<compile_context>
chip_gen: v7x
topology: tpu7x:2x2x1
jax: 0.10.0
libtpu: 0.0.40
codegen_flags: <defaults>
</compile_context>

<pallas_src>
import functools

import jax
import jax.numpy as jnp
from jax.experimental import pallas as pl
from jax.experimental.pallas import tpu as pltpu

# -----------------------------------------------------------------------------
# Config
# -----------------------------------------------------------------------------
B = 2            # batch
SEQ = 8          # question length
VOCAB = 50       # word-embedding vocab
EMB = 32         # word-embedding dim
HID = 32         # GRU hidden (q_emb)
MAML_CH = 16     # maml CNN channels
MAML_DIM = 64    # maml visual embedding dim
AE_CH = 64       # autoencoder channels (64 * 16 * 16 = 16384 -> convert Linear)
AE_DIM = 64      # output of convert Linear(16384, 64)
V_DIM = MAML_DIM + AE_DIM   # 128 after torch.cat(..., dim=2)
ATT_DIM = 64     # stacked-attention hidden size
NUM_STACKS = 2


# -----------------------------------------------------------------------------
# Wrapper-side layout helpers (pure XLA, tiny tensors)
# -----------------------------------------------------------------------------
def _im2col_3x3(x_nhwc):
    """3x3, pad=1 patches: [B,H,W,C] -> [B,H,W,9*C] (tap-major, channel-minor)."""
    Bsz, H, Wd, C = x_nhwc.shape
    xp = jnp.pad(x_nhwc, ((0, 0), (1, 1), (1, 1), (0, 0)))
    taps = [xp[:, dy:dy + H, dx:dx + Wd, :] for dy in range(3) for dx in range(3)]
    return jnp.stack(taps, axis=3).reshape(Bsz, H, Wd, 9 * C)


def _im2col3_pool_grouped(x_nhwc):
    """im2col patches regrouped by 2x2 max-pool position.

    [B,H,W,C] -> [4, B*(H//2)*(W//2), 9*C]; group k = 2*dy+dx holds the patch whose
    conv-output pixel is (2*pi+dy, 2*pj+dx); rows within a group are ordered (b,pi,pj).
    """
    Bsz, H, Wd, C = x_nhwc.shape
    p = _im2col_3x3(x_nhwc)
    p = p.reshape(Bsz, H // 2, 2, Wd // 2, 2, 9 * C)
    p = jnp.transpose(p, (2, 4, 0, 1, 3, 5))
    return p.reshape(4, Bsz * (H // 2) * (Wd // 2), 9 * C)


# -----------------------------------------------------------------------------
# Kernel 1: fused 3x3 conv (+bias) + ReLU + 2x2 max-pool
# -----------------------------------------------------------------------------
def _conv_pool_kernel(p_ref, w_ref, b_ref, o_ref):
    """p_ref: [4, R, 9*Cin] pool-grouped im2col patches.
    o_ref: [R, Cout] = relu(max_k(P_k @ W) + b) which equals maxpool2x2(relu(conv))
    exactly (ReLU is monotone and the bias is constant across the pool window), so the
    conv activation never round-trips through HBM."""
    w = w_ref[...]
    acc = jnp.dot(p_ref[0], w, preferred_element_type=jnp.float32)
    for k in range(1, 4):
        acc = jnp.maximum(acc, jnp.dot(p_ref[k], w,
                                       preferred_element_type=jnp.float32))
    o_ref[...] = jnp.maximum(acc + b_ref[...], 0.0)


def conv3x3_relu_pool(x_nhwc, w, b):
    """Returns [B*(H//2)*(W//2), Cout] with rows ordered (b, pooled_i, pooled_j)."""
    patches = _im2col3_pool_grouped(x_nhwc)             # [4, rows, 9*Cin]
    cout = w.shape[1]
    return pl.pallas_call(
        _conv_pool_kernel,
        out_shape=jax.ShapeDtypeStruct((patches.shape[1], cout), jnp.float32),
    )(patches, w, b.reshape(1, cout))


# -----------------------------------------------------------------------------
# Kernel 2: v_emb = concat(maml_fc(xm), convert(xa))  (both FCs fused, bf16 weights,
# single-shot matmuls -- no K tiling / accumulator scratch; output is 128 lanes wide)
# -----------------------------------------------------------------------------
def _vemb_kernel(xm_ref, wm_ref, bm_ref, xa_ref, wa_ref, ba_ref, o_ref):
    m = jnp.dot(xm_ref[...].astype(jnp.bfloat16), wm_ref[...],
                preferred_element_type=jnp.float32) + bm_ref[...]      # [B, 64]
    a = jnp.dot(xa_ref[...].astype(jnp.bfloat16), wa_ref[...],
                preferred_element_type=jnp.float32) + ba_ref[...]      # [B, 64]
    o_ref[...] = jnp.concatenate([m, a], axis=-1)                      # [B, 128]


# -----------------------------------------------------------------------------
# Kernel 3: AE decoder = nearest-upsample-2x + conv3x3(64->1, pad=1) + sigmoid, fused.
#
# An upsampled-output pixel (2i+a, 2j+b) only touches enc rows {i-1,i,i+1} and cols
# {j-1,j,j+1}, so the whole op is a 3x3 "valid" conv over zero-padded enc with 4
# parity output channels (parity-combined weights).  This removes the 9x im2col of the
# 32x32 upsampled image (was ~4.7 MiB through HBM feeding an N=1 matmul).
# -----------------------------------------------------------------------------
def _ae_decoder_kernel(encq_ref, w4_ref, b_ref, o_ref, *, w_pix):
    """Per-batch block.
    encq_ref: [3, (H+2)*W, C]   column-pre-shifted, (h,w)-row-flattened padded enc:
                                encq[q, h*W + w, c] = enc_pad[h, w+q, c]
    w4_ref:   [9, C, 4]         parity-combined taps (tap t=p*3+q, parity par=2a+b)
    o_ref:    [H*W, 4]          row = i*W + j, lane = sub-pixel parity 2a+b
    """
    acc = jnp.zeros(o_ref.shape, jnp.float32)
    n = o_ref.shape[0]
    for p in range(3):
        for q in range(3):
            # 8-aligned sublane slice: rows (i+p)*W + j for the current row tap p
            x = encq_ref[q, p * w_pix:p * w_pix + n, :]
            acc = acc + jnp.dot(x, w4_ref[p * 3 + q],
                                preferred_element_type=jnp.float32)
    o_ref[...] = jax.nn.sigmoid(acc + b_ref[...])


def ae_decoder(enc, dec_w, dec_b):
    """reconstruct_pass(enc): upsample2x -> conv3x3(C->1) -> sigmoid -> [B,1,2H,2W]."""
    Bsz, Hp, Wp, C = enc.shape                       # [B, 16, 16, 64]
    # Row-parity -> enc-row-tap combination matrix (same structure for columns):
    #   a=0: tap p=0 <- ky0, p=1 <- ky1+ky2 ; a=1: p=1 <- ky0+ky1, p=2 <- ky2
    A = jnp.array([[[1., 0., 0.], [0., 1., 1.], [0., 0., 0.]],
                   [[0., 0., 0.], [1., 1., 0.], [0., 0., 1.]]], jnp.float32)
    w33 = dec_w.reshape(3, 3, C)                      # [ky, kx, c]
    w4 = jnp.einsum('apk,bql,klc->pqcab', A, A, w33).reshape(9, C, 4)
    b4 = jnp.broadcast_to(dec_b.reshape(1, 1), (1, 4))

    encp = jnp.pad(enc, ((0, 0), (1, 1), (1, 1), (0, 0)))                  # [B,18,18,C]
    encq = jnp.stack([encp[:, :, s:s + Wp, :] for s in range(3)], axis=0)  # [3,B,18,16,C]
    encq = encq.reshape(3, Bsz, (Hp + 2) * Wp, C)                          # [3,B,288,C]

    out4 = pl.pallas_call(
        functools.partial(_ae_decoder_kernel, w_pix=Wp),
        out_shape=jax.ShapeDtypeStruct((Bsz, Hp * Wp, 4), jnp.float32),
        grid=(Bsz,),
        in_specs=[
            pl.BlockSpec((3, None, (Hp + 2) * Wp, C), lambda b: (0, b, 0, 0)),
            pl.BlockSpec((9, C, 4), lambda b: (0, 0, 0)),
            pl.BlockSpec((1, 4), lambda b: (0, 0)),
        ],
        out_specs=pl.BlockSpec((None, Hp * Wp, 4), lambda b: (b, 0, 0)),
        compiler_params=pltpu.CompilerParams(dimension_semantics=("parallel",)),
    )(encq, w4, b4)

    # Re-interleave the 4 parities into the 2x-upsampled spatial grid (tiny, XLA side).
    out4 = out4.reshape(Bsz, Hp, Wp, 2, 2)
    dec = jnp.transpose(out4, (0, 1, 3, 2, 4)).reshape(Bsz, 2 * Hp, 2 * Wp)
    return dec[:, None, :, :]                         # NCHW [B, 1, 32, 32]


# -----------------------------------------------------------------------------
# Kernel 4: fused question GRU + stacked attention
# -----------------------------------------------------------------------------
def _gru_san_kernel(x_ref, wih_ref, whh_ref, bih_ref, bhh_ref, v_ref, wproj_ref,
                    o_ref, *, seq_len, hid, num_stacks):
    """1-layer GRU (PyTorch gate order r,z,n) with packed gate weights -> 2 matmuls per
    timestep, fully unrolled at trace time (seq_len is small and static, live ranges are
    tiny), followed by the stacked attention.

    Stacked attention with num_objs == 1: softmax over a single object is exactly 1, so
    the attention weight p == 1, v_tilde == v, and the tanh/score branch never reaches
    the output -> only the per-stack projection u <- u + v @ Wproj[s] remains (exact)."""
    wih = wih_ref[...]        # [EMB, 3*HID]  (r | z | n)
    whh = whh_ref[...]        # [HID, 3*HID]
    bih = bih_ref[...]        # [1, 3*HID]
    bhh = bhh_ref[...]        # [1, 3*HID]

    h = jnp.zeros((x_ref.shape[1], hid), jnp.float32)
    for t in range(seq_len):                                              # unrolled
        x_t = x_ref[t]                                                    # [B, EMB]
        gi = jnp.dot(x_t, wih, preferred_element_type=jnp.float32) + bih  # [B, 3H]
        gh = jnp.dot(h, whh, preferred_element_type=jnp.float32) + bhh    # [B, 3H]
        r = jax.nn.sigmoid(gi[:, :hid] + gh[:, :hid])
        z = jax.nn.sigmoid(gi[:, hid:2 * hid] + gh[:, hid:2 * hid])
        n = jnp.tanh(gi[:, 2 * hid:] + r * gh[:, 2 * hid:])
        h = (1.0 - z) * n + z * h

    u = h                                                                 # [B, HID]
    v = v_ref[...]                                                        # [B, V_DIM]
    for s in range(num_stacks):
        u = u + jnp.dot(v, wproj_ref[s], preferred_element_type=jnp.float32)
    o_ref[...] = u


# -----------------------------------------------------------------------------
# Deterministic parameter init
# -----------------------------------------------------------------------------
def init_params(key):
    ks = iter(jax.random.split(key, 32))

    def w(shape, scale=0.05, dtype=jnp.float32):
        return (scale * jax.random.normal(next(ks), shape, jnp.float32)).astype(dtype)

    return dict(
        maml_conv_w=w((9 * 1, MAML_CH)),
        maml_conv_b=w((MAML_CH,)),
        # The two big FC weights are HBM-bandwidth bound at M=2 -> store bf16, acc f32.
        maml_fc_w=w((MAML_CH * 8 * 8, MAML_DIM), dtype=jnp.bfloat16),
        maml_fc_b=w((MAML_DIM,)),
        ae_enc_w=w((9 * 1, AE_CH)),
        ae_enc_b=w((AE_CH,)),
        ae_dec_w=w((9 * AE_CH, 1)),
        ae_dec_b=w((1,)),
        convert_w=w((AE_CH * 16 * 16, AE_DIM), scale=0.01, dtype=jnp.bfloat16),
        convert_b=w((AE_DIM,)),
        emb_table=w((VOCAB, EMB), scale=0.5),
        gru_wih=w((3, EMB, HID)),
        gru_whh=w((3, HID, HID)),
        gru_bih=w((3, 1, HID)),
        gru_bhh=w((3, 1, HID)),
        # Stacked-attention params; with num_objs == 1 only san_wproj reaches the output
        # (softmax over one object == 1), so wv/wu/ba/wp/bp are mathematically dead.
        san_wv=w((NUM_STACKS, V_DIM, ATT_DIM)),
        san_wu=w((NUM_STACKS, HID, ATT_DIM)),
        san_ba=w((NUM_STACKS, 1, ATT_DIM)),
        san_wp=w((NUM_STACKS, ATT_DIM, 1)),
        san_bp=w((NUM_STACKS, 1, 1)),
        san_wproj=w((NUM_STACKS, V_DIM, HID)),
    )


# -----------------------------------------------------------------------------
# Forward pass (mirrors SAN_Model.forward with maml=True, autoencoder=True)
# -----------------------------------------------------------------------------
@jax.jit
def san_forward(params, v, q):
    v0, v1 = v                       # v[0]: [B,1,16,16], v[1]: [B,1,32,32]  (NCHW)
    Bsz = v0.shape[0]

    # ---- maml_v_emb(v[0]): conv3x3(1->16)+ReLU+maxpool2 (one fused kernel) ----
    x0 = jnp.transpose(v0, (0, 2, 3, 1))                               # NHWC [B,16,16,1]
    maml_pooled = conv3x3_relu_pool(x0, params["maml_conv_w"],
                                    params["maml_conv_b"])             # [B*64, 16]
    xm = maml_pooled.reshape(Bsz, 8 * 8 * MAML_CH)                     # [B, 1024]

    # ---- ae_v_emb.forward_pass(v[1]): conv3x3(1->64)+ReLU+maxpool2 (fused) ----
    x1 = jnp.transpose(v1, (0, 2, 3, 1))                               # NHWC [B,32,32,1]
    enc_rows = conv3x3_relu_pool(x1, params["ae_enc_w"],
                                 params["ae_enc_b"])                   # [B*256, 64]
    enc = enc_rows.reshape(Bsz, 16, 16, AE_CH)                         # encoder
    xa = enc_rows.reshape(Bsz, 16 * 16 * AE_CH)                        # view(B, 16384)

    # ---- v_emb = cat(maml_fc(xm), convert(xa)) : one fused kernel, 128-lane out ----
    v_emb = pl.pallas_call(
        _vemb_kernel,
        out_shape=jax.ShapeDtypeStruct((Bsz, V_DIM), jnp.float32),
    )(xm, params["maml_fc_w"], params["maml_fc_b"].reshape(1, MAML_DIM),
      xa, params["convert_w"], params["convert_b"].reshape(1, AE_DIM))

    # ---- decoder = ae_v_emb.reconstruct_pass(enc) (fused upsample+conv+sigmoid) ----
    decoder = ae_decoder(enc, params["ae_dec_w"], params["ae_dec_b"])  # [B,1,32,32]

    # ---- w_emb(q): plain embedding gather (no one-hot matmul, no extra launch) ----
    x_tbe = jnp.transpose(jnp.take(params["emb_table"], q, axis=0), (1, 0, 2))  # [T,B,E]

    # ---- q_emb (GRU) + att = v_att(v_emb, q_emb), fused into one kernel ----
    wih_p = params["gru_wih"].transpose(1, 0, 2).reshape(EMB, 3 * HID)
    whh_p = params["gru_whh"].transpose(1, 0, 2).reshape(HID, 3 * HID)
    bih_p = params["gru_bih"].transpose(1, 0, 2).reshape(1, 3 * HID)
    bhh_p = params["gru_bhh"].transpose(1, 0, 2).reshape(1, 3 * HID)
    att = pl.pallas_call(
        functools.partial(_gru_san_kernel, seq_len=SEQ, hid=HID,
                          num_stacks=NUM_STACKS),
        out_shape=jax.ShapeDtypeStruct((Bsz, HID), jnp.float32),
    )(x_tbe, wih_p, whh_p, bih_p, bhh_p, v_emb, params["san_wproj"])

    return att, decoder              # args.autoencoder == True -> (att, decoder)


if __name__ == "__main__":
    key = jax.random.PRNGKey(0)
    kv0, kv1, kq, kp = jax.random.split(key, 4)
    v0 = jax.random.normal(kv0, (B, 1, 16, 16), jnp.float32)
    v1 = jax.random.normal(kv1, (B, 1, 32, 32), jnp.float32)
    q = jax.random.randint(kq, (B, SEQ), 0, VOCAB, dtype=jnp.int32)
    params = init_params(kp)

    att, decoder = san_forward(params, (v0, v1), q)
    jax.block_until_ready((att, decoder))

    assert att.shape == (B, HID)
    assert decoder.shape == (B, 1, 32, 32)
    assert bool(jnp.all(jnp.isfinite(att))) and bool(jnp.all(jnp.isfinite(decoder)))
    print("KERNEL_OK")
</pallas_src>

<mosaic_0001>
module attributes {stable_mosaic.version = 11 : i64} {
  func.func @_conv_pool_kernel(%arg0: memref<4x512x9xf32, #tpu.memory_space<vmem>>, %arg1: memref<9x64xf32, #tpu.memory_space<vmem>>, %arg2: memref<1x64xf32, #tpu.memory_space<vmem>>, %arg3: memref<512x64xf32, #tpu.memory_space<vmem>>) attributes {dimension_semantics = [], scalar_prefetch = 0 : i64, scratch_operands = 0 : i64, tpu.core_type = #tpu.core_type<tc>} {
    %c0 = arith.constant 0 : index
    %c0_0 = arith.constant 0 : index
    %0 = vector.load %arg1[%c0, %c0_0] : memref<9x64xf32, #tpu.memory_space<vmem>>, vector<9x64xf32>
    %c0_1 = arith.constant 0 : index
    %c0_2 = arith.constant 0 : index
    %c0_3 = arith.constant 0 : index
    %1 = vector.load %arg0[%c0_1, %c0_2, %c0_3] : memref<4x512x9xf32, #tpu.memory_space<vmem>>, vector<1x512x9xf32>
    %2 = vector.shape_cast %1 : vector<1x512x9xf32> to vector<512x9xf32>
    %cst = arith.constant dense<0.000000e+00> : vector<512x64xf32>
    %3 = tpu.matmul %2, %0, %cst {dimension_numbers = #tpu.dot_dimension_numbers<[1], [0], [0], [1], [0, 0, 1, 1], [], []>} : vector<512x9xf32>, vector<9x64xf32>, vector<512x64xf32> -> vector<512x64xf32>
    %c1 = arith.constant 1 : index
    %c0_4 = arith.constant 0 : index
    %c0_5 = arith.constant 0 : index
    %4 = vector.load %arg0[%c1, %c0_4, %c0_5] : memref<4x512x9xf32, #tpu.memory_space<vmem>>, vector<1x512x9xf32>
    %5 = vector.shape_cast %4 : vector<1x512x9xf32> to vector<512x9xf32>
    %cst_6 = arith.constant dense<0.000000e+00> : vector<512x64xf32>
    %6 = tpu.matmul %5, %0, %cst_6 {dimension_numbers = #tpu.dot_dimension_numbers<[1], [0], [0], [1], [0, 0, 1, 1], [], []>} : vector<512x9xf32>, vector<9x64xf32>, vector<512x64xf32> -> vector<512x64xf32>
    %7 = arith.maximumf %3, %6 : vector<512x64xf32>
    %c2 = arith.constant 2 : index
    %c0_7 = arith.constant 0 : index
    %c0_8 = arith.constant 0 : index
    %8 = vector.load %arg0[%c2, %c0_7, %c0_8] : memref<4x512x9xf32, #tpu.memory_space<vmem>>, vector<1x512x9xf32>
    %9 = vector.shape_cast %8 : vector<1x512x9xf32> to vector<512x9xf32>
    %cst_9 = arith.constant dense<0.000000e+00> : vector<512x64xf32>
    %10 = tpu.matmul %9, %0, %cst_9 {dimension_numbers = #tpu.dot_dimension_numbers<[1], [0], [0], [1], [0, 0, 1, 1], [], []>} : vector<512x9xf32>, vector<9x64xf32>, vector<512x64xf32> -> vector<512x64xf32>
    %11 = arith.maximumf %7, %10 : vector<512x64xf32>
    %c3 = arith.constant 3 : index
    %c0_10 = arith.constant 0 : index
    %c0_11 = arith.constant 0 : index
    %12 = vector.load %arg0[%c3, %c0_10, %c0_11] : memref<4x512x9xf32, #tpu.memory_space<vmem>>, vector<1x512x9xf32>
    %13 = vector.shape_cast %12 : vector<1x512x9xf32> to vector<512x9xf32>
    %cst_12 = arith.constant dense<0.000000e+00> : vector<512x64xf32>
    %14 = tpu.matmul %13, %0, %cst_12 {dimension_numbers = #tpu.dot_dimension_numbers<[1], [0], [0], [1], [0, 0, 1, 1], [], []>} : vector<512x9xf32>, vector<9x64xf32>, vector<512x64xf32> -> vector<512x64xf32>
    %15 = arith.maximumf %11, %14 : vector<512x64xf32>
    %c0_13 = arith.constant 0 : index
    %c0_14 = arith.constant 0 : index
    %16 = vector.load %arg2[%c0_13, %c0_14] : memref<1x64xf32, #tpu.memory_space<vmem>>, vector<1x64xf32>
    %17 = vector.broadcast %16 : vector<1x64xf32> to vector<512x64xf32>
    %18 = arith.addf %15, %17 : vector<512x64xf32>
    %cst_15 = arith.constant 0.000000e+00 : f32
    %19 = vector.broadcast %cst_15 : f32 to vector<512x64xf32>
    %20 = arith.maximumf %18, %19 : vector<512x64xf32>
    %c0_16 = arith.constant 0 : index
    %c0_17 = arith.constant 0 : index
    %21 = vector.load %arg3[%c0_16, %c0_17] : memref<512x64xf32, #tpu.memory_space<vmem>>, vector<512x64xf32>
    tpu.vector_store %arg3[%c0_16, %c0_17], %20 {strides = array<i32>} : memref<512x64xf32, #tpu.memory_space<vmem>>, vector<512x64xf32>,
    return
  }
}

module attributes {stable_mosaic.version = 11 : i64} {
  func.func @_ae_decoder_kernel(%arg0: i32, %arg1: memref<3x1x288x64xf32, #tpu.memory_space<vmem>>, %arg2: memref<9x64x4xf32, #tpu.memory_space<vmem>>, %arg3: memref<1x4xf32, #tpu.memory_space<vmem>>, %arg4: memref<1x256x4xf32, #tpu.memory_space<vmem>>) attributes {dimension_semantics = [#tpu.dimension_semantics<parallel>], iteration_bounds = array<i64: 2>, scalar_prefetch = 0 : i64, scratch_operands = 0 : i64, tpu.core_type = #tpu.core_type<tc>, window_params = [{transform_indices = @transform_0, window_bounds = array<i64: 3, 1, 288, 64>}, {pipeline_mode = #tpu.pipeline_mode<synchronous>, transform_indices = @transform_1, window_bounds = array<i64: 9, 64, 4>}, {pipeline_mode = #tpu.pipeline_mode<synchronous>, transform_indices = @transform_2, window_bounds = array<i64: 1, 4>}, {transform_indices = @transform_3, window_bounds = array<i64: 1, 256, 4>}]} {
    %cst = arith.constant 0.000000e+00 : f32
    %0 = vector.broadcast %cst : f32 to vector<256x4xf32>
    %c0 = arith.constant 0 : index
    %c0_0 = arith.constant 0 : index
    %c0_1 = arith.constant 0 : index
    %c0_2 = arith.constant 0 : index
    %1 = vector.load %arg1[%c0, %c0_0, %c0_1, %c0_2] : memref<3x1x288x64xf32, #tpu.memory_space<vmem>>, vector<1x1x256x64xf32>
    %2 = vector.shape_cast %1 : vector<1x1x256x64xf32> to vector<256x64xf32>
    %c0_3 = arith.constant 0 : index
    %c0_4 = arith.constant 0 : index
    %c0_5 = arith.constant 0 : index
    %3 = vector.load %arg2[%c0_3, %c0_4, %c0_5] : memref<9x64x4xf32, #tpu.memory_space<vmem>>, vector<1x64x4xf32>
    %4 = vector.shape_cast %3 : vector<1x64x4xf32> to vector<64x4xf32>
    %cst_6 = arith.constant dense<0.000000e+00> : vector<256x4xf32>
    %5 = tpu.matmul %2, %4, %cst_6 {dimension_numbers = #tpu.dot_dimension_numbers<[1], [0], [0], [1], [0, 0, 1, 1], [], []>} : vector<256x64xf32>, vector<64x4xf32>, vector<256x4xf32> -> vector<256x4xf32>
    %6 = arith.addf %0, %5 : vector<256x4xf32>
    %c1 = arith.constant 1 : index
    %c0_7 = arith.constant 0 : index
    %c0_8 = arith.constant 0 : index
    %c0_9 = arith.constant 0 : index
    %7 = vector.load %arg1[%c1, %c0_7, %c0_8, %c0_9] : memref<3x1x288x64xf32, #tpu.memory_space<vmem>>, vector<1x1x256x64xf32>
    %8 = vector.shape_cast %7 : vector<1x1x256x64xf32> to vector<256x64xf32>
    %c1_10 = arith.constant 1 : index
    %c0_11 = arith.constant 0 : index
    %c0_12 = arith.constant 0 : index
    %9 = vector.load %arg2[%c1_10, %c0_11, %c0_12] : memref<9x64x4xf32, #tpu.memory_space<vmem>>, vector<1x64x4xf32>
    %10 = vector.shape_cast %9 : vector<1x64x4xf32> to vector<64x4xf32>
    %cst_13 = arith.constant dense<0.000000e+00> : vector<256x4xf32>
    %11 = tpu.matmul %8, %10, %cst_13 {dimension_numbers = #tpu.dot_dimension_numbers<[1], [0], [0], [1], [0, 0, 1, 1], [], []>} : vector<256x64xf32>, vector<64x4xf32>, vector<256x4xf32> -> vector<256x4xf32>
    %12 = arith.addf %6, %11 : vector<256x4xf32>
    %c2 = arith.constant 2 : index
    %c0_14 = arith.constant 0 : index
    %c0_15 = arith.constant 0 : index
    %c0_16 = arith.constant 0 : index
    %13 = vector.load %arg1[%c2, %c0_14, %c0_15, %c0_16] : memref<3x1x288x64xf32, #tpu.memory_space<vmem>>, vector<1x1x256x64xf32>
    %14 = vector.shape_cast %13 : vector<1x1x256x64xf32> to vector<256x64xf32>
    %c2_17 = arith.constant 2 : index
    %c0_18 = arith.constant 0 : index
    %c0_19 = arith.constant 0 : index
    %15 = vector.load %arg2[%c2_17, %c0_18, %c0_19] : memref<9x64x4xf32, #tpu.memory_space<vmem>>, vector<1x64x4xf32>
    %16 = vector.shape_cast %15 : vector<1x64x4xf32> to vector<64x4xf32>
    %cst_20 = arith.constant dense<0.000000e+00> : vector<256x4xf32>
    %17 = tpu.matmul %14, %16, %cst_20 {dimension_numbers = #tpu.dot_dimension_numbers<[1], [0], [0], [1], [0, 0, 1, 1], [], []>} : vector<256x64xf32>, vector<64x4xf32>, vector<256x4xf32> -> vector<256x4xf32>
    %18 = arith.addf %12, %17 : vector<256x4xf32>
    %c0_21 = arith.constant 0 : index
    %c0_22 = arith.constant 0 : index
    %c16 = arith.constant 16 : index
    %c0_23 = arith.constant 0 : index
    %19 = vector.load %arg1[%c0_21, %c0_22, %c16, %c0_23] : memref<3x1x288x64xf32, #tpu.memory_space<vmem>>, vector<1x1x256x64xf32>
    %20 = vector.shape_cast %19 : vector<1x1x256x64xf32> to vector<256x64xf32>
    %c3 = arith.constant 3 : index
    %c0_24 = arith.constant 0 : index
    %c0_25 = arith.constant 0 : index
    %21 = vector.load %arg2[%c3, %c0_24, %c0_25] : memref<9x64x4xf32, #tpu.memory_space<vmem>>, vector<1x64x4xf32>
    %22 = vector.shape_cast %21 : vector<1x64x4xf32> to vector<64x4xf32>
    %cst_26 = arith.constant dense<0.000000e+00> : vector<256x4xf32>
    %23 = tpu.matmul %20, %22, %cst_26 {dimension_numbers = #tpu.dot_dimension_numbers<[1], [0], [0], [1], [0, 0, 1, 1], [], []>} : vector<256x64xf32>, vector<64x4xf32>, vector<256x4xf32> -> vector<256x4xf32>
    %24 = arith.addf %18, %23 : vector<256x4xf32>
    %c1_27 = arith.constant 1 : index
    %c0_28 = arith.constant 0 : index
    %c16_29 = arith.constant 16 : index
    %c0_30 = arith.constant 0 : index
    %25 = vector.load %arg1[%c1_27, %c0_28, %c16_29, %c0_30] : memref<3x1x288x64xf32, #tpu.memory_space<vmem>>, vector<1x1x256x64xf32>
    %26 = vector.shape_cast %25 : vector<1x1x256x64xf32> to vector<256x64xf32>
    %c4 = arith.constant 4 : index
    %c0_31 = arith.constant 0 : index
    %c0_32 = arith.constant 0 : index
    %27 = vector.load %arg2[%c4, %c0_31, %c0_32] : memref<9x64x4xf32, #tpu.memory_space<vmem>>, vector<1x64x4xf32>
    %28 = vector.shape_cast %27 : vector<1x64x4xf32> to vector<64x4xf32>
    %cst_33 = arith.constant dense<0.000000e+00> : vector<256x4xf32>
    %29 = tpu.matmul %26, %28, %cst_33 {dimension_numbers = #tpu.dot_dimension_numbers<[1], [0], [0], [1], [0, 0, 1, 1], [], []>} : vector<256x64xf32>, vector<64x4xf32>, vector<256x4xf32> -> vector<256x4xf32>
    %30 = arith.addf %24, %29 : vector<256x4xf32>
    %c2_34 = arith.constant 2 : index
    %c0_35 = arith.constant 0 : index
    %c16_36 = arith.constant 16 : index
    %c0_37 = arith.constant 0 : index
    %31 = vector.load %arg1[%c2_34, %c0_35, %c16_36, %c0_37] : memref<3x1x288x64xf32, #tpu.memory_space<vmem>>, vector<1x1x256x64xf32>
    %32 = vector.shape_cast %31 : vector<1x1x256x64xf32> to vector<256x64xf32>
    %c5 = arith.constant 5 : index
    %c0_38 = arith.constant 0 : index
    %c0_39 = arith.constant 0 : index
    %33 = vector.load %arg2[%c5, %c0_38, %c0_39] : memref<9x64x4xf32, #tpu.memory_space<vmem>>, vector<1x64x4xf32>
    %34 = vector.shape_cast %33 : vector<1x64x4xf32> to vector<64x4xf32>
    %cst_40 = arith.constant dense<0.000000e+00> : vector<256x4xf32>
    %35 = tpu.matmul %32, %34, %cst_40 {dimension_numbers = #tpu.dot_dimension_numbers<[1], [0], [0], [1], [0, 0, 1, 1], [], []>} : vector<256x64xf32>, vector<64x4xf32>, vector<256x4xf32> -> vector<256x4xf32>
    %36 = arith.addf %30, %35 : vector<256x4xf32>
    %c0_41 = arith.constant 0 : index
    %c0_42 = arith.constant 0 : index
    %c32 = arith.constant 32 : index
    %c0_43 = arith.constant 0 : index
    %37 = vector.load %arg1[%c0_41, %c0_42, %c32, %c0_43] : memref<3x1x288x64xf32, #tpu.memory_space<vmem>>, vector<1x1x256x64xf32>
    %38 = vector.shape_cast %37 : vector<1x1x256x64xf32> to vector<256x64xf32>
    %c6 = arith.constant 6 : index
    %c0_44 = arith.constant 0 : index
    %c0_45 = arith.constant 0 : index
    %39 = vector.load %arg2[%c6, %c0_44, %c0_45] : memref<9x64x4xf32, #tpu.memory_space<vmem>>, vector<1x64x4xf32>
    %40 = vector.shape_cast %39 : vector<1x64x4xf32> to vector<64x4xf32>
    %cst_46 = arith.constant dense<0.000000e+00> : vector<256x4xf32>
    %41 = tpu.matmul %38, %40, %cst_46 {dimension_numbers = #tpu.dot_dimension_numbers<[1], [0], [0], [1], [0, 0, 1, 1], [], []>} : vector<256x64xf32>, vector<64x4xf32>, vector<256x4xf32> -> vector<256x4xf32>
    %42 = arith.addf %36, %41 : vector<256x4xf32>
    %c1_47 = arith.constant 1 : index
    %c0_48 = arith.constant 0 : index
    %c32_49 = arith.constant 32 : index
    %c0_50 = arith.constant 0 : index
    %43 = vector.load %arg1[%c1_47, %c0_48, %c32_49, %c0_50] : memref<3x1x288x64xf32, #tpu.memory_space<vmem>>, vector<1x1x256x64xf32>
    %44 = vector.shape_cast %43 : vector<1x1x256x64xf32> to vector<256x64xf32>
    %c7 = arith.constant 7 : index
    %c0_51 = arith.constant 0 : index
    %c0_52 = arith.constant 0 : index
    %45 = vector.load %arg2[%c7, %c0_51, %c0_52] : memref<9x64x4xf32, #tpu.memory_space<vmem>>, vector<1x64x4xf32>
    %46 = vector.shape_cast %45 : vector<1x64x4xf32> to vector<64x4xf32>
    %cst_53 = arith.constant dense<0.000000e+00> : vector<256x4xf32>
    %47 = tpu.matmul %44, %46, %cst_53 {dimension_numbers = #tpu.dot_dimension_numbers<[1], [0], [0], [1], [0, 0, 1, 1], [], []>} : vector<256x64xf32>, vector<64x4xf32>, vector<256x4xf32> -> vector<256x4xf32>
    %48 = arith.addf %42, %47 : vector<256x4xf32>
    %c2_54 = arith.constant 2 : index
    %c0_55 = arith.constant 0 : index
    %c32_56 = arith.constant 32 : index
    %c0_57 = arith.constant 0 : index
    %49 = vector.load %arg1[%c2_54, %c0_55, %c32_56, %c0_57] : memref<3x1x288x64xf32, #tpu.memory_space<vmem>>, vector<1x1x256x64xf32>
    %50 = vector.shape_cast %49 : vector<1x1x256x64xf32> to vector<256x64xf32>
    %c8 = arith.constant 8 : index
    %c0_58 = arith.constant 0 : index
    %c0_59 = arith.constant 0 : index
    %51 = vector.load %arg2[%c8, %c0_58, %c0_59] : memref<9x64x4xf32, #tpu.memory_space<vmem>>, vector<1x64x4xf32>
    %52 = vector.shape_cast %51 : vector<1x64x4xf32> to vector<64x4xf32>
    %cst_60 = arith.constant dense<0.000000e+00> : vector<256x4xf32>
    %53 = tpu.matmul %50, %52, %cst_60 {dimension_numbers = #tpu.dot_dimension_numbers<[1], [0], [0], [1], [0, 0, 1, 1], [], []>} : vector<256x64xf32>, vector<64x4xf32>, vector<256x4xf32> -> vector<256x4xf32>
    %54 = arith.addf %48, %53 : vector<256x4xf32>
    %c0_61 = arith.constant 0 : index
    %c0_62 = arith.constant 0 : index
    %55 = vector.load %arg3[%c0_61, %c0_62] : memref<1x4xf32, #tpu.memory_space<vmem>>, vector<1x4xf32>
    %56 = vector.broadcast %55 : vector<1x4xf32> to vector<256x4xf32>
    %57 = arith.addf %54, %56 : vector<256x4xf32>
    %58 = arith.negf %57 : vector<256x4xf32>
    %59 = math.exp %58 : vector<256x4xf32>
    %cst_63 = arith.constant 1.000000e+00 : f32
    %60 = vector.broadcast %cst_63 : f32 to vector<256x4xf32>
    %61 = arith.addf %60, %59 : vector<256x4xf32>
    %62 = arith.divf %60, %61 : vector<256x4xf32>
    %c0_64 = arith.constant 0 : index
    %c0_65 = arith.constant 0 : index
    %c0_66 = arith.constant 0 : index
    %63 = vector.load %arg4[%c0_64, %c0_65, %c0_66] : memref<1x256x4xf32, #tpu.memory_space<vmem>>, vector<1x256x4xf32>
    %64 = vector.shape_cast %63 : vector<1x256x4xf32> to vector<256x4xf32>
    %65 = vector.shape_cast %62 : vector<256x4xf32> to vector<1x256x4xf32>
    tpu.vector_store %arg4[%c0_64, %c0_65, %c0_66], %65 {strides = array<i32>} : memref<1x256x4xf32, #tpu.memory_space<vmem>>, vector<1x256x4xf32>,
    return
  }
  func.func @transform_0(%arg0: i32) -> (i32, i32, i32, i32) {
    %c0_i32 = arith.constant 0 : i32
    %c0_i32_0 = arith.constant 0 : i32
    %c0_i32_1 = arith.constant 0 : i32
    %c0_i32_2 = arith.constant 0 : i32
    return %c0_i32, %arg0, %c0_i32_0, %c0_i32_1 : i32, i32, i32, i32
  }
  func.func @transform_1(%arg0: i32) -> (i32, i32, i32) {
    %c0_i32 = arith.constant 0 : i32
    %c0_i32_0 = arith.constant 0 : i32
    %c0_i32_1 = arith.constant 0 : i32
    %c0_i32_2 = arith.constant 0 : i32
    return %c0_i32, %c0_i32_0, %c0_i32_1 : i32, i32, i32
  }
  func.func @transform_2(%arg0: i32) -> (i32, i32) {
    %c0_i32 = arith.constant 0 : i32
    %c0_i32_0 = arith.constant 0 : i32
    %c0_i32_1 = arith.constant 0 : i32
    return %c0_i32, %c0_i32_0 : i32, i32
  }
  func.func @transform_3(%arg0: i32) -> (i32, i32, i32) {
    %c0_i32 = arith.constant 0 : i32
    %c0_i32_0 = arith.constant 0 : i32
    %c0_i32_1 = arith.constant 0 : i32
    return %arg0, %c0_i32, %c0_i32_0 : i32, i32, i32
  }
}

module attributes {stable_mosaic.version = 11 : i64} {
  func.func @_conv_pool_kernel(%arg0: memref<4x128x9xf32, #tpu.memory_space<vmem>>, %arg1: memref<9x16xf32, #tpu.memory_space<vmem>>, %arg2: memref<1x16xf32, #tpu.memory_space<vmem>>, %arg3: memref<128x16xf32, #tpu.memory_space<vmem>>) attributes {dimension_semantics = [], scalar_prefetch = 0 : i64, scratch_operands = 0 : i64, tpu.core_type = #tpu.core_type<tc>} {
    %c0 = arith.constant 0 : index
    %c0_0 = arith.constant 0 : index
    %0 = vector.load %arg1[%c0, %c0_0] : memref<9x16xf32, #tpu.memory_space<vmem>>, vector<9x16xf32>
    %c0_1 = arith.constant 0 : index
    %c0_2 = arith.constant 0 : index
    %c0_3 = arith.constant 0 : index
    %1 = vector.load %arg0[%c0_1, %c0_2, %c0_3] : memref<4x128x9xf32, #tpu.memory_space<vmem>>, vector<1x128x9xf32>
    %2 = vector.shape_cast %1 : vector<1x128x9xf32> to vector<128x9xf32>
    %cst = arith.constant dense<0.000000e+00> : vector<128x16xf32>
    %3 = tpu.matmul %2, %0, %cst {dimension_numbers = #tpu.dot_dimension_numbers<[1], [0], [0], [1], [0, 0, 1, 1], [], []>} : vector<128x9xf32>, vector<9x16xf32>, vector<128x16xf32> -> vector<128x16xf32>
    %c1 = arith.constant 1 : index
    %c0_4 = arith.constant 0 : index
    %c0_5 = arith.constant 0 : index
    %4 = vector.load %arg0[%c1, %c0_4, %c0_5] : memref<4x128x9xf32, #tpu.memory_space<vmem>>, vector<1x128x9xf32>
    %5 = vector.shape_cast %4 : vector<1x128x9xf32> to vector<128x9xf32>
    %cst_6 = arith.constant dense<0.000000e+00> : vector<128x16xf32>
    %6 = tpu.matmul %5, %0, %cst_6 {dimension_numbers = #tpu.dot_dimension_numbers<[1], [0], [0], [1], [0, 0, 1, 1], [], []>} : vector<128x9xf32>, vector<9x16xf32>, vector<128x16xf32> -> vector<128x16xf32>
    %7 = arith.maximumf %3, %6 : vector<128x16xf32>
    %c2 = arith.constant 2 : index
    %c0_7 = arith.constant 0 : index
    %c0_8 = arith.constant 0 : index
    %8 = vector.load %arg0[%c2, %c0_7, %c0_8] : memref<4x128x9xf32, #tpu.memory_space<vmem>>, vector<1x128x9xf32>
    %9 = vector.shape_cast %8 : vector<1x128x9xf32> to vector<128x9xf32>
    %cst_9 = arith.constant dense<0.000000e+00> : vector<128x16xf32>
    %10 = tpu.matmul %9, %0, %cst_9 {dimension_numbers = #tpu.dot_dimension_numbers<[1], [0], [0], [1], [0, 0, 1, 1], [], []>} : vector<128x9xf32>, vector<9x16xf32>, vector<128x16xf32> -> vector<128x16xf32>
    %11 = arith.maximumf %7, %10 : vector<128x16xf32>
    %c3 = arith.constant 3 : index
    %c0_10 = arith.constant 0 : index
    %c0_11 = arith.constant 0 : index
    %12 = vector.load %arg0[%c3, %c0_10, %c0_11] : memref<4x128x9xf32, #tpu.memory_space<vmem>>, vector<1x128x9xf32>
    %13 = vector.shape_cast %12 : vector<1x128x9xf32> to vector<128x9xf32>
    %cst_12 = arith.constant dense<0.000000e+00> : vector<128x16xf32>
    %14 = tpu.matmul %13, %0, %cst_12 {dimension_numbers = #tpu.dot_dimension_numbers<[1], [0], [0], [1], [0, 0, 1, 1], [], []>} : vector<128x9xf32>, vector<9x16xf32>, vector<128x16xf32> -> vector<128x16xf32>
    %15 = arith.maximumf %11, %14 : vector<128x16xf32>
    %c0_13 = arith.constant 0 : index
    %c0_14 = arith.constant 0 : index
    %16 = vector.load %arg2[%c0_13, %c0_14] : memref<1x16xf32, #tpu.memory_space<vmem>>, vector<1x16xf32>
    %17 = vector.broadcast %16 : vector<1x16xf32> to vector<128x16xf32>
    %18 = arith.addf %15, %17 : vector<128x16xf32>
    %cst_15 = arith.constant 0.000000e+00 : f32
    %19 = vector.broadcast %cst_15 : f32 to vector<128x16xf32>
    %20 = arith.maximumf %18, %19 : vector<128x16xf32>
    %c0_16 = arith.constant 0 : index
    %c0_17 = arith.constant 0 : index
    %21 = vector.load %arg3[%c0_16, %c0_17] : memref<128x16xf32, #tpu.memory_space<vmem>>, vector<128x16xf32>
    tpu.vector_store %arg3[%c0_16, %c0_17], %20 {strides = array<i32>} : memref<128x16xf32, #tpu.memory_space<vmem>>, vector<128x16xf32>,
    return
  }
}

module attributes {stable_mosaic.version = 11 : i64} {
  func.func @_vemb_kernel(%arg0: memref<2x1024xf32, #tpu.memory_space<vmem>>, %arg1: memref<1024x64xbf16, #tpu.memory_space<vmem>>, %arg2: memref<1x64xf32, #tpu.memory_space<vmem>>, %arg3: memref<2x16384xf32, #tpu.memory_space<vmem>>, %arg4: memref<16384x64xbf16, #tpu.memory_space<vmem>>, %arg5: memref<1x64xf32, #tpu.memory_space<vmem>>, %arg6: memref<2x128xf32, #tpu.memory_space<vmem>>) attributes {dimension_semantics = [], scalar_prefetch = 0 : i64, scratch_operands = 0 : i64, tpu.core_type = #tpu.core_type<tc>} {
    %c0 = arith.constant 0 : index
    %c0_0 = arith.constant 0 : index
    %0 = vector.load %arg0[%c0, %c0_0] : memref<2x1024xf32, #tpu.memory_space<vmem>>, vector<2x1024xf32>
    %1 = arith.truncf %0 : vector<2x1024xf32> to vector<2x1024xbf16>
    %c0_1 = arith.constant 0 : index
    %c0_2 = arith.constant 0 : index
    %2 = vector.load %arg1[%c0_1, %c0_2] : memref<1024x64xbf16, #tpu.memory_space<vmem>>, vector<1024x64xbf16>
    %cst = arith.constant dense<0.000000e+00> : vector<2x64xf32>
    %3 = tpu.matmul %1, %2, %cst {dimension_numbers = #tpu.dot_dimension_numbers<[1], [0], [0], [1], [0, 0, 1, 1], [], []>} : vector<2x1024xbf16>, vector<1024x64xbf16>, vector<2x64xf32> -> vector<2x64xf32>
    %c0_3 = arith.constant 0 : index
    %c0_4 = arith.constant 0 : index
    %4 = vector.load %arg2[%c0_3, %c0_4] : memref<1x64xf32, #tpu.memory_space<vmem>>, vector<1x64xf32>
    %5 = vector.broadcast %4 : vector<1x64xf32> to vector<2x64xf32>
    %6 = arith.addf %3, %5 : vector<2x64xf32>
    %c0_5 = arith.constant 0 : index
    %c0_6 = arith.constant 0 : index
    %7 = vector.load %arg3[%c0_5, %c0_6] : memref<2x16384xf32, #tpu.memory_space<vmem>>, vector<2x16384xf32>
    %8 = arith.truncf %7 : vector<2x16384xf32> to vector<2x16384xbf16>
    %c0_7 = arith.constant 0 : index
    %c0_8 = arith.constant 0 : index
    %9 = vector.load %arg4[%c0_7, %c0_8] : memref<16384x64xbf16, #tpu.memory_space<vmem>>, vector<16384x64xbf16>
    %cst_9 = arith.constant dense<0.000000e+00> : vector<2x64xf32>
    %10 = tpu.matmul %8, %9, %cst_9 {dimension_numbers = #tpu.dot_dimension_numbers<[1], [0], [0], [1], [0, 0, 1, 1], [], []>} : vector<2x16384xbf16>, vector<16384x64xbf16>, vector<2x64xf32> -> vector<2x64xf32>
    %c0_10 = arith.constant 0 : index
    %c0_11 = arith.constant 0 : index
    %11 = vector.load %arg5[%c0_10, %c0_11] : memref<1x64xf32, #tpu.memory_space<vmem>>, vector<1x64xf32>
    %12 = vector.broadcast %11 : vector<1x64xf32> to vector<2x64xf32>
    %13 = arith.addf %10, %12 : vector<2x64xf32>
    %14 = tpu.concatenate %6, %13 in 1 : vector<2x64xf32>, vector<2x64xf32> -> vector<2x128xf32>
    %c0_12 = arith.constant 0 : index
    %c0_13 = arith.constant 0 : index
    %15 = vector.load %arg6[%c0_12, %c0_13] : memref<2x128xf32, #tpu.memory_space<vmem>>, vector<2x128xf32>
    tpu.vector_store %arg6[%c0_12, %c0_13], %14 {strides = array<i32>} : memref<2x128xf32, #tpu.memory_space<vmem>>, vector<2x128xf32>,
    return
  }
}

module attributes {stable_mosaic.version = 11 : i64} {
  func.func @_gru_san_kernel(%arg0: memref<8x2x32xf32, #tpu.memory_space<vmem>>, %arg1: memref<32x96xf32, #tpu.memory_space<vmem>>, %arg2: memref<32x96xf32, #tpu.memory_space<vmem>>, %arg3: memref<1x96xf32, #tpu.memory_space<vmem>>, %arg4: memref<1x96xf32, #tpu.memory_space<vmem>>, %arg5: memref<2x128xf32, #tpu.memory_space<vmem>>, %arg6: memref<2x128x32xf32, #tpu.memory_space<vmem>>, %arg7: memref<2x32xf32, #tpu.memory_space<vmem>>) attributes {dimension_semantics = [], scalar_prefetch = 0 : i64, scratch_operands = 0 : i64, tpu.core_type = #tpu.core_type<tc>} {
    %c0 = arith.constant 0 : index
    %c0_0 = arith.constant 0 : index
    %0 = vector.load %arg1[%c0, %c0_0] : memref<32x96xf32, #tpu.memory_space<vmem>>, vector<32x96xf32>
    %c0_1 = arith.constant 0 : index
    %c0_2 = arith.constant 0 : index
    %1 = vector.load %arg2[%c0_1, %c0_2] : memref<32x96xf32, #tpu.memory_space<vmem>>, vector<32x96xf32>
    %c0_3 = arith.constant 0 : index
    %c0_4 = arith.constant 0 : index
    %2 = vector.load %arg3[%c0_3, %c0_4] : memref<1x96xf32, #tpu.memory_space<vmem>>, vector<1x96xf32>
    %c0_5 = arith.constant 0 : index
    %c0_6 = arith.constant 0 : index
    %3 = vector.load %arg4[%c0_5, %c0_6] : memref<1x96xf32, #tpu.memory_space<vmem>>, vector<1x96xf32>
    %cst = arith.constant 0.000000e+00 : f32
    %4 = vector.broadcast %cst : f32 to vector<2x32xf32>
    %c0_7 = arith.constant 0 : index
    %c0_8 = arith.constant 0 : index
    %c0_9 = arith.constant 0 : index
    %5 = vector.load %arg0[%c0_7, %c0_8, %c0_9] : memref<8x2x32xf32, #tpu.memory_space<vmem>>, vector<1x2x32xf32>
    %6 = vector.shape_cast %5 : vector<1x2x32xf32> to vector<2x32xf32>
    %cst_10 = arith.constant dense<0.000000e+00> : vector<2x96xf32>
    %7 = tpu.matmul %6, %0, %cst_10 {dimension_numbers = #tpu.dot_dimension_numbers<[1], [0], [0], [1], [0, 0, 1, 1], [], []>} : vector<2x32xf32>, vector<32x96xf32>, vector<2x96xf32> -> vector<2x96xf32>
    %8 = vector.broadcast %2 : vector<1x96xf32> to vector<2x96xf32>
    %9 = arith.addf %7, %8 : vector<2x96xf32>
    %cst_11 = arith.constant dense<0.000000e+00> : vector<2x96xf32>
    %10 = tpu.matmul %4, %1, %cst_11 {dimension_numbers = #tpu.dot_dimension_numbers<[1], [0], [0], [1], [0, 0, 1, 1], [], []>} : vector<2x32xf32>, vector<32x96xf32>, vector<2x96xf32> -> vector<2x96xf32>
    %11 = vector.broadcast %3 : vector<1x96xf32> to vector<2x96xf32>
    %12 = arith.addf %10, %11 : vector<2x96xf32>
    %13 = vector.extract_strided_slice %9 {offsets = [0, 0], sizes = [2, 32], strides = [1, 1]} : vector<2x96xf32> to vector<2x32xf32>
    %14 = vector.extract_strided_slice %12 {offsets = [0, 0], sizes = [2, 32], strides = [1, 1]} : vector<2x96xf32> to vector<2x32xf32>
    %15 = arith.addf %13, %14 : vector<2x32xf32>
    %16 = arith.negf %15 : vector<2x32xf32>
    %17 = math.exp %16 : vector<2x32xf32>
    %cst_12 = arith.constant 1.000000e+00 : f32
    %18 = vector.broadcast %cst_12 : f32 to vector<2x32xf32>
    %19 = arith.addf %18, %17 : vector<2x32xf32>
    %20 = arith.divf %18, %19 : vector<2x32xf32>
    %21 = vector.extract_strided_slice %9 {offsets = [0, 32], sizes = [2, 32], strides = [1, 1]} : vector<2x96xf32> to vector<2x32xf32>
    %22 = vector.extract_strided_slice %12 {offsets = [0, 32], sizes = [2, 32], strides = [1, 1]} : vector<2x96xf32> to vector<2x32xf32>
    %23 = arith.addf %21, %22 : vector<2x32xf32>
    %24 = arith.negf %23 : vector<2x32xf32>
    %25 = math.exp %24 : vector<2x32xf32>
    %cst_13 = arith.constant 1.000000e+00 : f32
    %26 = vector.broadcast %cst_13 : f32 to vector<2x32xf32>
    %27 = arith.addf %26, %25 : vector<2x32xf32>
    %28 = arith.divf %26, %27 : vector<2x32xf32>
    %29 = vector.extract_strided_slice %9 {offsets = [0, 64], sizes = [2, 32], strides = [1, 1]} : vector<2x96xf32> to vector<2x32xf32>
    %30 = vector.extract_strided_slice %12 {offsets = [0, 64], sizes = [2, 32], strides = [1, 1]} : vector<2x96xf32> to vector<2x32xf32>
    %31 = arith.mulf %20, %30 : vector<2x32xf32>
    %32 = arith.addf %29, %31 : vector<2x32xf32>
    %33 = math.tanh %32 : vector<2x32xf32>
    %cst_14 = arith.constant 1.000000e+00 : f32
    %34 = vector.broadcast %cst_14 : f32 to vector<2x32xf32>
    %35 = arith.subf %34, %28 : vector<2x32xf32>
    %36 = arith.mulf %35, %33 : vector<2x32xf32>
    %37 = arith.mulf %28, %4 : vector<2x32xf32>
    %38 = arith.addf %36, %37 : vector<2x32xf32>
    %c1 = arith.constant 1 : index
    %c0_15 = arith.constant 0 : index
    %c0_16 = arith.constant 0 : index
    %39 = vector.load %arg0[%c1, %c0_15, %c0_16] : memref<8x2x32xf32, #tpu.memory_space<vmem>>, vector<1x2x32xf32>
    %40 = vector.shape_cast %39 : vector<1x2x32xf32> to vector<2x32xf32>
    %cst_17 = arith.constant dense<0.000000e+00> : vector<2x96xf32>
    %41 = tpu.matmul %40, %0, %cst_17 {dimension_numbers = #tpu.dot_dimension_numbers<[1], [0], [0], [1], [0, 0, 1, 1], [], []>} : vector<2x32xf32>, vector<32x96xf32>, vector<2x96xf32> -> vector<2x96xf32>
    %42 = vector.broadcast %2 : vector<1x96xf32> to vector<2x96xf32>
    %43 = arith.addf %41, %42 : vector<2x96xf32>
    %cst_18 = arith.constant dense<0.000000e+00> : vector<2x96xf32>
    %44 = tpu.matmul %38, %1, %cst_18 {dimension_numbers = #tpu.dot_dimension_numbers<[1], [0], [0], [1], [0, 0, 1, 1], [], []>} : vector<2x32xf32>, vector<32x96xf32>, vector<2x96xf32> -> vector<2x96xf32>
    %45 = vector.broadcast %3 : vector<1x96xf32> to vector<2x96xf32>
    %46 = arith.addf %44, %45 : vector<2x96xf32>
    %47 = vector.extract_strided_slice %43 {offsets = [0, 0], sizes = [2, 32], strides = [1, 1]} : vector<2x96xf32> to vector<2x32xf32>
    %48 = vector.extract_strided_slice %46 {offsets = [0, 0], sizes = [2, 32], strides = [1, 1]} : vector<2x96xf32> to vector<2x32xf32>
    %49 = arith.addf %47, %48 : vector<2x32xf32>
    %50 = arith.negf %49 : vector<2x32xf32>
    %51 = math.exp %50 : vector<2x32xf32>
    %cst_19 = arith.constant 1.000000e+00 : f32
    %52 = vector.broadcast %cst_19 : f32 to vector<2x32xf32>
    %53 = arith.addf %52, %51 : vector<2x32xf32>
    %54 = arith.divf %52, %53 : vector<2x32xf32>
    %55 = vector.extract_strided_slice %43 {offsets = [0, 32], sizes = [2, 32], strides = [1, 1]} : vector<2x96xf32> to vector<2x32xf32>
    %56 = vector.extract_strided_slice %46 {offsets = [0, 32], sizes = [2, 32], strides = [1, 1]} : vector<2x96xf32> to vector<2x32xf32>
    %57 = arith.addf %55, %56 : vector<2x32xf32>
    %58 = arith.negf %57 : vector<2x32xf32>
    %59 = math.exp %58 : vector<2x32xf32>
    %cst_20 = arith.constant 1.000000e+00 : f32
    %60 = vector.broadcast %cst_20 : f32 to vector<2x32xf32>
    %61 = arith.addf %60, %59 : vector<2x32xf32>
    %62 = arith.divf %60, %61 : vector<2x32xf32>
    %63 = vector.extract_strided_slice %43 {offsets = [0, 64], sizes = [2, 32], strides = [1, 1]} : vector<2x96xf32> to vector<2x32xf32>
    %64 = vector.extract_strided_slice %46 {offsets = [0, 64], sizes = [2, 32], strides = [1, 1]} : vector<2x96xf32> to vector<2x32xf32>
    %65 = arith.mulf %54, %64 : vector<2x32xf32>
    %66 = arith.addf %63, %65 : vector<2x32xf32>
    %67 = math.tanh %66 : vector<2x32xf32>
    %cst_21 = arith.constant 1.000000e+00 : f32
    %68 = vector.broadcast %cst_21 : f32 to vector<2x32xf32>
    %69 = arith.subf %68, %62 : vector<2x32xf32>
    %70 = arith.mulf %69, %67 : vector<2x32xf32>
    %71 = arith.mulf %62, %38 : vector<2x32xf32>
    %72 = arith.addf %70, %71 : vector<2x32xf32>
    %c2 = arith.constant 2 : index
    %c0_22 = arith.constant 0 : index
    %c0_23 = arith.constant 0 : index
    %73 = vector.load %arg0[%c2, %c0_22, %c0_23] : memref<8x2x32xf32, #tpu.memory_space<vmem>>, vector<1x2x32xf32>
    %74 = vector.shape_cast %73 : vector<1x2x32xf32> to vector<2x32xf32>
    %cst_24 = arith.constant dense<0.000000e+00> : vector<2x96xf32>
    %75 = tpu.matmul %74, %0, %cst_24 {dimension_numbers = #tpu.dot_dimension_numbers<[1], [0], [0], [1], [0, 0, 1, 1], [], []>} : vector<2x32xf32>, vector<32x96xf32>, vector<2x96xf32> -> vector<2x96xf32>
    %76 = vector.broadcast %2 : vector<1x96xf32> to vector<2x96xf32>
    %77 = arith.addf %75, %76 : vector<2x96xf32>
    %cst_25 = arith.constant dense<0.000000e+00> : vector<2x96xf32>
    %78 = tpu.matmul %72, %1, %cst_25 {dimension_numbers = #tpu.dot_dimension_numbers<[1], [0], [0], [1], [0, 0, 1, 1], [], []>} : vector<2x32xf32>, vector<32x96xf32>, vector<2x96xf32> -> vector<2x96xf32>
    %79 = vector.broadcast %3 : vector<1x96xf32> to vector<2x96xf32>
    %80 = arith.addf %78, %79 : vector<2x96xf32>
    %81 = vector.extract_strided_slice %77 {offsets = [0, 0], sizes = [2, 32], strides = [1, 1]} : vector<2x96xf32> to vector<2x32xf32>
    %82 = vector.extract_strided_slice %80 {offsets = [0, 0], sizes = [2, 32], strides = [1, 1]} : vector<2x96xf32> to vector<2x32xf32>
    %83 = arith.addf %81, %82 : vector<2x32xf32>
    %84 = arith.negf %83 : vector<2x32xf32>
    %85 = math.exp %84 : vector<2x32xf32>
    %cst_26 = arith.constant 1.000000e+00 : f32
    %86 = vector.broadcast %cst_26 : f32 to vector<2x32xf32>
    %87 = arith.addf %86, %85 : vector<2x32xf32>
    %88 = arith.divf %86, %87 : vector<2x32xf32>
    %89 = vector.extract_strided_slice %77 {offsets = [0, 32], sizes = [2, 32], strides = [1, 1]} : vector<2x96xf32> to vector<2x32xf32>
    %90 = vector.extract_strided_slice %80 {offsets = [0, 32], sizes = [2, 32], strides = [1, 1]} : vector<2x96xf32> to vector<2x32xf32>
    %91 = arith.addf %89, %90 : vector<2x32xf32>
    %92 = arith.negf %91 : vector<2x32xf32>
    %93 = math.exp %92 : vector<2x32xf32>
    %cst_27 = arith.constant 1.000000e+00 : f32
    %94 = vector.broadcast %cst_27 : f32 to vector<2x32xf32>
    %95 = arith.addf %94, %93 : vector<2x32xf32>
    %96 = arith.divf %94, %95 : vector<2x32xf32>
    %97 = vector.extract_strided_slice %77 {offsets = [0, 64], sizes = [2, 32], strides = [1, 1]} : vector<2x96xf32> to vector<2x32xf32>
    %98 = vector.extract_strided_slice %80 {offsets = [0, 64], sizes = [2, 32], strides = [1, 1]} : vector<2x96xf32> to vector<2x32xf32>
    %99 = arith.mulf %88, %98 : vector<2x32xf32>
    %100 = arith.addf %97, %99 : vector<2x32xf32>
    %101 = math.tanh %100 : vector<2x32xf32>
    %cst_28 = arith.constant 1.000000e+00 : f32
    %102 = vector.broadcast %cst_28 : f32 to vector<2x32xf32>
    %103 = arith.subf %102, %96 : vector<2x32xf32>
    %104 = arith.mulf %103, %101 : vector<2x32xf32>
    %105 = arith.mulf %96, %72 : vector<2x32xf32>
    %106 = arith.addf %104, %105 : vector<2x32xf32>
    %c3 = arith.constant 3 : index
    %c0_29 = arith.constant 0 : index
    %c0_30 = arith.constant 0 : index
    %107 = vector.load %arg0[%c3, %c0_29, %c0_30] : memref<8x2x32xf32, #tpu.memory_space<vmem>>, vector<1x2x32xf32>
    %108 = vector.shape_cast %107 : vector<1x2x32xf32> to vector<2x32xf32>
    %cst_31 = arith.constant dense<0.000000e+00> : vector<2x96xf32>
    %109 = tpu.matmul %108, %0, %cst_31 {dimension_numbers = #tpu.dot_dimension_numbers<[1], [0], [0], [1], [0, 0, 1, 1], [], []>} : vector<2x32xf32>, vector<32x96xf32>, vector<2x96xf32> -> vector<2x96xf32>
    %110 = vector.broadcast %2 : vector<1x96xf32> to vector<2x96xf32>
    %111 = arith.addf %109, %110 : vector<2x96xf32>
    %cst_32 = arith.constant dense<0.000000e+00> : vector<2x96xf32>
    %112 = tpu.matmul %106, %1, %cst_32 {dimension_numbers = #tpu.dot_dimension_numbers<[1], [0], [0], [1], [0, 0, 1, 1], [], []>} : vector<2x32xf32>, vector<32x96xf32>, vector<2x96xf32> -> vector<2x96xf32>
    %113 = vector.broadcast %3 : vector<1x96xf32> to vector<2x96xf32>
    %114 = arith.addf %112, %113 : vector<2x96xf32>
    %115 = vector.extract_strided_slice %111 {offsets = [0, 0], sizes = [2, 32], strides = [1, 1]} : vector<2x96xf32> to vector<2x32xf32>
    %116 = vector.extract_strided_slice %114 {offsets = [0, 0], sizes = [2, 32], strides = [1, 1]} : vector<2x96xf32> to vector<2x32xf32>
    %117 = arith.addf %115, %116 : vector<2x32xf32>
    %118 = arith.negf %117 : vector<2x32xf32>
    %119 = math.exp %118 : vector<2x32xf32>
    %cst_33 = arith.constant 1.000000e+00 : f32
    %120 = vector.broadcast %cst_33 : f32 to vector<2x32xf32>
    %121 = arith.addf %120, %119 : vector<2x32xf32>
    %122 = arith.divf %120, %121 : vector<2x32xf32>
    %123 = vector.extract_strided_slice %111 {offsets = [0, 32], sizes = [2, 32], strides = [1, 1]} : vector<2x96xf32> to vector<2x32xf32>
    %124 = vector.extract_strided_slice %114 {offsets = [0, 32], sizes = [2, 32], strides = [1, 1]} : vector<2x96xf32> to vector<2x32xf32>
    %125 = arith.addf %123, %124 : vector<2x32xf32>
    %126 = arith.negf %125 : vector<2x32xf32>
    %127 = math.exp %126 : vector<2x32xf32>
    %cst_34 = arith.constant 1.000000e+00 : f32
    %128 = vector.broadcast %cst_34 : f32 to vector<2x32xf32>
    %129 = arith.addf %128, %127 : vector<2x32xf32>
    %130 = arith.divf %128, %129 : vector<2x32xf32>
    %131 = vector.extract_strided_slice %111 {offsets = [0, 64], sizes = [2, 32], strides = [1, 1]} : vector<2x96xf32> to vector<2x32xf32>
    %132 = vector.extract_strided_slice %114 {offsets = [0, 64], sizes = [2, 32], strides = [1, 1]} : vector<2x96xf32> to vector<2x32xf32>
    %133 = arith.mulf %122, %132 : vector<2x32xf32>
    %134 = arith.addf %131, %133 : vector<2x32xf32>
    %135 = math.tanh %134 : vector<2x32xf32>
    %cst_35 = arith.constant 1.000000e+00 : f32
    %136 = vector.broadcast %cst_35 : f32 to vector<2x32xf32>
    %137 = arith.subf %136, %130 : vector<2x32xf32>
    %138 = arith.mulf %137, %135 : vector<2x32xf32>
    %139 = arith.mulf %130, %106 : vector<2x32xf32>
    %140 = arith.addf %138, %139 : vector<2x32xf32>
    %c4 = arith.constant 4 : index
    %c0_36 = arith.constant 0 : index
    %c0_37 = arith.constant 0 : index
    %141 = vector.load %arg0[%c4, %c0_36, %c0_37] : memref<8x2x32xf32, #tpu.memory_space<vmem>>, vector<1x2x32xf32>
    %142 = vector.shape_cast %141 : vector<1x2x32xf32> to vector<2x32xf32>
    %cst_38 = arith.constant dense<0.000000e+00> : vector<2x96xf32>
    %143 = tpu.matmul %142, %0, %cst_38 {dimension_numbers = #tpu.dot_dimension_numbers<[1], [0], [0], [1], [0, 0, 1, 1], [], []>} : vector<2x32xf32>, vector<32x96xf32>, vector<2x96xf32> -> vector<2x96xf32>
    %144 = vector.broadcast %2 : vector<1x96xf32> to vector<2x96xf32>
    %145 = arith.addf %143, %144 : vector<2x96xf32>
    %cst_39 = arith.constant dense<0.000000e+00> : vector<2x96xf32>
    %146 = tpu.matmul %140, %1, %cst_39 {dimension_numbers = #tpu.dot_dimension_numbers<[1], [0], [0], [1], [0, 0, 1, 1], [], []>} : vector<2x32xf32>, vector<32x96xf32>, vector<2x96xf32> -> vector<2x96xf32>
    %147 = vector.broadcast %3 : vector<1x96xf32> to vector<2x96xf32>
    %148 = arith.addf %146, %147 : vector<2x96xf32>
    %149 = vector.extract_strided_slice %145 {offsets = [0, 0], sizes = [2, 32], strides = [1, 1]} : vector<2x96xf32> to vector<2x32xf32>
    %150 = vector.extract_strided_slice %148 {offsets = [0, 0], sizes = [2, 32], strides = [1, 1]} : vector<2x96xf32> to vector<2x32xf32>
    %151 = arith.addf %149, %150 : vector<2x32xf32>
    %152 = arith.negf %151 : vector<2x32xf32>
    %153 = math.exp %152 : vector<2x32xf32>
    %cst_40 = arith.constant 1.000000e+00 : f32
    %154 = vector.broadcast %cst_40 : f32 to vector<2x32xf32>
    %155 = arith.addf %154, %153 : vector<2x32xf32>
    %156 = arith.divf %154, %155 : vector<2x32xf32>
    %157 = vector.extract_strided_slice %145 {offsets = [0, 32], sizes = [2, 32], strides = [1, 1]} : vector<2x96xf32> to vector<2x32xf32>
    %158 = vector.extract_strided_slice %148 {offsets = [0, 32], sizes = [2, 32], strides = [1, 1]} : vector<2x96xf32> to vector<2x32xf32>
    %159 = arith.addf %157, %158 : vector<2x32xf32>
    %160 = arith.negf %159 : vector<2x32xf32>
    %161 = math.exp %160 : vector<2x32xf32>
    %cst_41 = arith.constant 1.000000e+00 : f32
    %162 = vector.broadcast %cst_41 : f32 to vector<2x32xf32>
    %163 = arith.addf %162, %161 : vector<2x32xf32>
    %164 = arith.divf %162, %163 : vector<2x32xf32>
    %165 = vector.extract_strided_slice %145 {offsets = [0, 64], sizes = [2, 32], strides = [1, 1]} : vector<2x96xf32> to vector<2x32xf32>
    %166 = vector.extract_strided_slice %148 {offsets = [0, 64], sizes = [2, 32], strides = [1, 1]} : vector<2x96xf32> to vector<2x32xf32>
    %167 = arith.mulf %156, %166 : vector<2x32xf32>
    %168 = arith.addf %165, %167 : vector<2x32xf32>
    %169 = math.tanh %168 : vector<2x32xf32>
    %cst_42 = arith.constant 1.000000e+00 : f32
    %170 = vector.broadcast %cst_42 : f32 to vector<2x32xf32>
    %171 = arith.subf %170, %164 : vector<2x32xf32>
    %172 = arith.mulf %171, %169 : vector<2x32xf32>
    %173 = arith.mulf %164, %140 : vector<2x32xf32>
    %174 = arith.addf %172, %173 : vector<2x32xf32>
    %c5 = arith.constant 5 : index
    %c0_43 = arith.constant 0 : index
    %c0_44 = arith.constant 0 : index
    %175 = vector.load %arg0[%c5, %c0_43, %c0_44] : memref<8x2x32xf32, #tpu.memory_space<vmem>>, vector<1x2x32xf32>
    %176 = vector.shape_cast %175 : vector<1x2x32xf32> to vector<2x32xf32>
    %cst_45 = arith.constant dense<0.000000e+00> : vector<2x96xf32>
    %177 = tpu.matmul %176, %0, %cst_45 {dimension_numbers = #tpu.dot_dimension_numbers<[1], [0], [0], [1], [0, 0, 1, 1], [], []>} : vector<2x32xf32>, vector<32x96xf32>, vector<2x96xf32> -> vector<2x96xf32>
    %178 = vector.broadcast %2 : vector<1x96xf32> to vector<2x96xf32>
    %179 = arith.addf %177, %178 : vector<2x96xf32>
    %cst_46 = arith.constant dense<0.000000e+00> : vector<2x96xf32>
    %180 = tpu.matmul %174, %1, %cst_46 {dimension_numbers = #tpu.dot_dimension_numbers<[1], [0], [0], [1], [0, 0, 1, 1], [], []>} : vector<2x32xf32>, vector<32x96xf32>, vector<2x96xf32> -> vector<2x96xf32>
    %181 = vector.broadcast %3 : vector<1x96xf32> to vector<2x96xf32>
    %182 = arith.addf %180, %181 : vector<2x96xf32>
    %183 = vector.extract_strided_slice %179 {offsets = [0, 0], sizes = [2, 32], strides = [1, 1]} : vector<2x96xf32> to vector<2x32xf32>
    %184 = vector.extract_strided_slice %182 {offsets = [0, 0], sizes = [2, 32], strides = [1, 1]} : vector<2x96xf32> to vector<2x32xf32>
    %185 = arith.addf %183, %184 : vector<2x32xf32>
    %186 = arith.negf %185 : vector<2x32xf32>
    %187 = math.exp %186 : vector<2x32xf32>
    %cst_47 = arith.constant 1.000000e+00 : f32
    %188 = vector.broadcast %cst_47 : f32 to vector<2x32xf32>
    %189 = arith.addf %188, %187 : vector<2x32xf32>
    %190 = arith.divf %188, %189 : vector<2x32xf32>
    %191 = vector.extract_strided_slice %179 {offsets = [0, 32], sizes = [2, 32], strides = [1, 1]} : vector<2x96xf32> to vector<2x32xf32>
    %192 = vector.extract_strided_slice %182 {offsets = [0, 32], sizes = [2, 32], strides = [1, 1]} : vector<2x96xf32> to vector<2x32xf32>
    %193 = arith.addf %191, %192 : vector<2x32xf32>
    %194 = arith.negf %193 : vector<2x32xf32>
    %195 = math.exp %194 : vector<2x32xf32>
    %cst_48 = arith.constant 1.000000e+00 : f32
    %196 = vector.broadcast %cst_48 : f32 to vector<2x32xf32>
    %197 = arith.addf %196, %195 : vector<2x32xf32>
    %198 = arith.divf %196, %197 : vector<2x32xf32>
    %199 = vector.extract_strided_slice %179 {offsets = [0, 64], sizes = [2, 32], strides = [1, 1]} : vector<2x96xf32> to vector<2x32xf32>
    %200 = vector.extract_strided_slice %182 {offsets = [0, 64], sizes = [2, 32], strides = [1, 1]} : vector<2x96xf32> to vector<2x32xf32>
    %201 = arith.mulf %190, %200 : vector<2x32xf32>
    %202 = arith.addf %199, %201 : vector<2x32xf32>
    %203 = math.tanh %202 : vector<2x32xf32>
    %cst_49 = arith.constant 1.000000e+00 : f32
    %204 = vector.broadcast %cst_49 : f32 to vector<2x32xf32>
    %205 = arith.subf %204, %198 : vector<2x32xf32>
    %206 = arith.mulf %205, %203 : vector<2x32xf32>
    %207 = arith.mulf %198, %174 : vector<2x32xf32>
    %208 = arith.addf %206, %207 : vector<2x32xf32>
    %c6 = arith.constant 6 : index
    %c0_50 = arith.constant 0 : index
    %c0_51 = arith.constant 0 : index
    %209 = vector.load %arg0[%c6, %c0_50, %c0_51] : memref<8x2x32xf32, #tpu.memory_space<vmem>>, vector<1x2x32xf32>
    %210 = vector.shape_cast %209 : vector<1x2x32xf32> to vector<2x32xf32>
    %cst_52 = arith.constant dense<0.000000e+00> : vector<2x96xf32>
    %211 = tpu.matmul %210, %0, %cst_52 {dimension_numbers = #tpu.dot_dimension_numbers<[1], [0], [0], [1], [0, 0, 1, 1], [], []>} : vector<2x32xf32>, vector<32x96xf32>, vector<2x96xf32> -> vector<2x96xf32>
    %212 = vector.broadcast %2 : vector<1x96xf32> to vector<2x96xf32>
    %213 = arith.addf %211, %212 : vector<2x96xf32>
    %cst_53 = arith.constant dense<0.000000e+00> : vector<2x96xf32>
    %214 = tpu.matmul %208, %1, %cst_53 {dimension_numbers = #tpu.dot_dimension_numbers<[1], [0], [0], [1], [0, 0, 1, 1], [], []>} : vector<2x32xf32>, vector<32x96xf32>, vector<2x96xf32> -> vector<2x96xf32>
    %215 = vector.broadcast %3 : vector<1x96xf32> to vector<2x96xf32>
    %216 = arith.addf %214, %215 : vector<2x96xf32>
    %217 = vector.extract_strided_slice %213 {offsets = [0, 0], sizes = [2, 32], strides = [1, 1]} : vector<2x96xf32> to vector<2x32xf32>
    %218 = vector.extract_strided_slice %216 {offsets = [0, 0], sizes = [2, 32], strides = [1, 1]} : vector<2x96xf32> to vector<2x32xf32>
    %219 = arith.addf %217, %218 : vector<2x32xf32>
    %220 = arith.negf %219 : vector<2x32xf32>
    %221 = math.exp %220 : vector<2x32xf32>
    %cst_54 = arith.constant 1.000000e+00 : f32
    %222 = vector.broadcast %cst_54 : f32 to vector<2x32xf32>
    %223 = arith.addf %222, %221 : vector<2x32xf32>
    %224 = arith.divf %222, %223 : vector<2x32xf32>
    %225 = vector.extract_strided_slice %213 {offsets = [0, 32], sizes = [2, 32], strides = [1, 1]} : vector<2x96xf32> to vector<2x32xf32>
    %226 = vector.extract_strided_slice %216 {offsets = [0, 32], sizes = [2, 32], strides = [1, 1]} : vector<2x96xf32> to vector<2x32xf32>
    %227 = arith.addf %225, %226 : vector<2x32xf32>
    %228 = arith.negf %227 : vector<2x32xf32>
    %229 = math.exp %228 : vector<2x32xf32>
    %cst_55 = arith.constant 1.000000e+00 : f32
    %230 = vector.broadcast %cst_55 : f32 to vector<2x32xf32>
    %231 = arith.addf %230, %229 : vector<2x32xf32>
    %232 = arith.divf %230, %231 : vector<2x32xf32>
    %233 = vector.extract_strided_slice %213 {offsets = [0, 64], sizes = [2, 32], strides = [1, 1]} : vector<2x96xf32> to vector<2x32xf32>
    %234 = vector.extract_strided_slice %216 {offsets = [0, 64], sizes = [2, 32], strides = [1, 1]} : vector<2x96xf32> to vector<2x32xf32>
    %235 = arith.mulf %224, %234 : vector<2x32xf32>
    %236 = arith.addf %233, %235 : vector<2x32xf32>
    %237 = math.tanh %236 : vector<2x32xf32>
    %cst_56 = arith.constant 1.000000e+00 : f32
    %238 = vector.broadcast %cst_56 : f32 to vector<2x32xf32>
    %239 = arith.subf %238, %232 : vector<2x32xf32>
    %240 = arith.mulf %239, %237 : vector<2x32xf32>
    %241 = arith.mulf %232, %208 : vector<2x32xf32>
    %242 = arith.addf %240, %241 : vector<2x32xf32>
    %c7 = arith.constant 7 : index
    %c0_57 = arith.constant 0 : index
    %c0_58 = arith.constant 0 : index
    %243 = vector.load %arg0[%c7, %c0_57, %c0_58] : memref<8x2x32xf32, #tpu.memory_space<vmem>>, vector<1x2x32xf32>
    %244 = vector.shape_cast %243 : vector<1x2x32xf32> to vector<2x32xf32>
    %cst_59 = arith.constant dense<0.000000e+00> : vector<2x96xf32>
    %245 = tpu.matmul %244, %0, %cst_59 {dimension_numbers = #tpu.dot_dimension_numbers<[1], [0], [0], [1], [0, 0, 1, 1], [], []>} : vector<2x32xf32>, vector<32x96xf32>, vector<2x96xf32> -> vector<2x96xf32>
    %246 = vector.broadcast %2 : vector<1x96xf32> to vector<2x96xf32>
    %247 = arith.addf %245, %246 : vector<2x96xf32>
    %cst_60 = arith.constant dense<0.000000e+00> : vector<2x96xf32>
    %248 = tpu.matmul %242, %1, %cst_60 {dimension_numbers = #tpu.dot_dimension_numbers<[1], [0], [0], [1], [0, 0, 1, 1], [], []>} : vector<2x32xf32>, vector<32x96xf32>, vector<2x96xf32> -> vector<2x96xf32>
    %249 = vector.broadcast %3 : vector<1x96xf32> to vector<2x96xf32>
    %250 = arith.addf %248, %249 : vector<2x96xf32>
    %251 = vector.extract_strided_slice %247 {offsets = [0, 0], sizes = [2, 32], strides = [1, 1]} : vector<2x96xf32> to vector<2x32xf32>
    %252 = vector.extract_strided_slice %250 {offsets = [0, 0], sizes = [2, 32], strides = [1, 1]} : vector<2x96xf32> to vector<2x32xf32>
    %253 = arith.addf %251, %252 : vector<2x32xf32>
    %254 = arith.negf %253 : vector<2x32xf32>
    %255 = math.exp %254 : vector<2x32xf32>
    %cst_61 = arith.constant 1.000000e+00 : f32
    %256 = vector.broadcast %cst_61 : f32 to vector<2x32xf32>
    %257 = arith.addf %256, %255 : vector<2x32xf32>
    %258 = arith.divf %256, %257 : vector<2x32xf32>
    %259 = vector.extract_strided_slice %247 {offsets = [0, 32], sizes = [2, 32], strides = [1, 1]} : vector<2x96xf32> to vector<2x32xf32>
    %260 = vector.extract_strided_slice %250 {offsets = [0, 32], sizes = [2, 32], strides = [1, 1]} : vector<2x96xf32> to vector<2x32xf32>
    %261 = arith.addf %259, %260 : vector<2x32xf32>
    %262 = arith.negf %261 : vector<2x32xf32>
    %263 = math.exp %262 : vector<2x32xf32>
    %cst_62 = arith.constant 1.000000e+00 : f32
    %264 = vector.broadcast %cst_62 : f32 to vector<2x32xf32>
    %265 = arith.addf %264, %263 : vector<2x32xf32>
    %266 = arith.divf %264, %265 : vector<2x32xf32>
    %267 = vector.extract_strided_slice %247 {offsets = [0, 64], sizes = [2, 32], strides = [1, 1]} : vector<2x96xf32> to vector<2x32xf32>
    %268 = vector.extract_strided_slice %250 {offsets = [0, 64], sizes = [2, 32], strides = [1, 1]} : vector<2x96xf32> to vector<2x32xf32>
    %269 = arith.mulf %258, %268 : vector<2x32xf32>
    %270 = arith.addf %267, %269 : vector<2x32xf32>
    %271 = math.tanh %270 : vector<2x32xf32>
    %cst_63 = arith.constant 1.000000e+00 : f32
    %272 = vector.broadcast %cst_63 : f32 to vector<2x32xf32>
    %273 = arith.subf %272, %266 : vector<2x32xf32>
    %274 = arith.mulf %273, %271 : vector<2x32xf32>
    %275 = arith.mulf %266, %242 : vector<2x32xf32>
    %276 = arith.addf %274, %275 : vector<2x32xf32>
    %c0_64 = arith.constant 0 : index
    %c0_65 = arith.constant 0 : index
    %277 = vector.load %arg5[%c0_64, %c0_65] : memref<2x128xf32, #tpu.memory_space<vmem>>, vector<2x128xf32>
    %c0_66 = arith.constant 0 : index
    %c0_67 = arith.constant 0 : index
    %c0_68 = arith.constant 0 : index
    %278 = vector.load %arg6[%c0_66, %c0_67, %c0_68] : memref<2x128x32xf32, #tpu.memory_space<vmem>>, vector<1x128x32xf32>
    %279 = vector.shape_cast %278 : vector<1x128x32xf32> to vector<128x32xf32>
    %cst_69 = arith.constant dense<0.000000e+00> : vector<2x32xf32>
    %280 = tpu.matmul %277, %279, %cst_69 {dimension_numbers = #tpu.dot_dimension_numbers<[1], [0], [0], [1], [0, 0, 1, 1], [], []>} : vector<2x128xf32>, vector<128x32xf32>, vector<2x32xf32> -> vector<2x32xf32>
    %281 = arith.addf %276, %280 : vector<2x32xf32>
    %c1_70 = arith.constant 1 : index
    %c0_71 = arith.constant 0 : index
    %c0_72 = arith.constant 0 : index
    %282 = vector.load %arg6[%c1_70, %c0_71, %c0_72] : memref<2x128x32xf32, #tpu.memory_space<vmem>>, vector<1x128x32xf32>
    %283 = vector.shape_cast %282 : vector<1x128x32xf32> to vector<128x32xf32>
    %cst_73 = arith.constant dense<0.000000e+00> : vector<2x32xf32>
    %284 = tpu.matmul %277, %283, %cst_73 {dimension_numbers = #tpu.dot_dimension_numbers<[1], [0], [0], [1], [0, 0, 1, 1], [], []>} : vector<2x128xf32>, vector<128x32xf32>, vector<2x32xf32> -> vector<2x32xf32>
    %285 = arith.addf %281, %284 : vector<2x32xf32>
    %c0_74 = arith.constant 0 : index
    %c0_75 = arith.constant 0 : index
    %286 = vector.load %arg7[%c0_74, %c0_75] : memref<2x32xf32, #tpu.memory_space<vmem>>, vector<2x32xf32>
    tpu.vector_store %arg7[%c0_74, %c0_75], %285 {strides = array<i32>} : memref<2x32xf32, #tpu.memory_space<vmem>>, vector<2x32xf32>,
    return
  }
}

</mosaic_0001>

<bundles_post_ra>
// kernel: san_forward.6
= control target key start
LH: loop header
LB: loop body
LE: loop exit
PB: predicated region body
PF: predicated region fallthrough
CT: control target
= control target key end

     0   :  { %vm273_vm0 = vcmask 1040384   ;;  %vm80_vm1 = vcmask 72704   ;;  %vm4126_vm2 = vmmov 1   ;;  %vm2915_vm4 = vcmask 523264   ;;  %s6098_s1 = inlined_call_operand.vmem [shape: f32[9,64], index: 1, kind: input, shape index: {}]   ;;  %s6099_s0 = inlined_call_operand.vmem [shape: f32[4,512,9], index: 0, kind: input, shape index: {}]   ;;  %s6100_s2 = inlined_call_operand.vmem [shape: f32[1,64], index: 2, kind: input, shape index: {}]   ;;  %s6101_s3 = inlined_call_operand.vmem [shape: f32[512,64], index: 3, kind: output, shape index: {}]  }
   0x1   :  { %v14_v0 = vld [vmem:[%s6098_s1] sm:$0xff]  ;;  %v15_v1 = vld [vmem:[%s6098_s1 + $0x8] sm:$0x1]  ;;  %vm4153_vm3 = vmpackc.low %vm273_vm0, %vm4126_vm2 }
   0x2   :  { %v4101_v3 = vpack.c.bf16 %v15_v1, %v14_v0  ;;  %v16_v4 = vld [vmem:[%s6099_s0] sm:$0xff]  ;;  %v17_v6 = vld [vmem:[%s6099_s0 + $0x8] sm:$0xff]  ;;  %v18_v8 = vld [vmem:[%s6099_s0 + $0x10] sm:$0xff] }
   0x3   :  { %v3049_v5 = vld [vmem:[%s6099_s0 + $0x200] sm:$0xff]  ;;  %3705 = vmatprep.mubr.msk.f32.mxu0 %vm80_vm1, %v16_v4  ;;  %v3050_v7 = vld [vmem:[%s6099_s0 + $0x208] sm:$0xff]  ;;  %v3051_v9 = vld [vmem:[%s6099_s0 + $0x210] sm:$0xff] }
   0x4   :  { %3805 = vmatprep.mubr.msk.f32.mxu1 %vm80_vm1, %v3049_v5  ;;  %4103 = vmatprep.subr.msk.bf16.mxu0 %vm4153_vm3, %v4101_v3  ;;  %v19_v10 = vld [vmem:[%s6099_s0 + $0x18] sm:$0xff]  ;;  %v20_v12 = vld [vmem:[%s6099_s0 + $0x20] sm:$0xff]  ;;  %v21_v14 = vld [vmem:[%s6099_s0 + $0x28] sm:$0xff] }
   0x5   :  { %4109 = vmatprep.subr.msk.bf16.mxu1 %vm4153_vm3, %v4101_v3  ;;  %4106 = vmatpush3.bf16.msk.msra.mxu0 %vm4153_vm3, %v4101_v3  ;;  %v3052_v11 = vld [vmem:[%s6099_s0 + $0x218] sm:$0xff]  ;;  %v3053_v13 = vld [vmem:[%s6099_s0 + $0x220] sm:$0xff]  ;;  %v3054_v15 = vld [vmem:[%s6099_s0 + $0x228] sm:$0xff] }
   0x6   :  { %4112 = vmatpush3.bf16.msk.msra.mxu1 %vm4153_vm3, %v4101_v3  ;;  %4115 = vmatprep.subr.msk.bf16.mxu0 %vm4153_vm3, %v4101_v3  ;;  %v22_v16 = vld [vmem:[%s6099_s0 + $0x30] sm:$0xff]  ;;  %v23_v18 = vld [vmem:[%s6099_s0 + $0x38] sm:$0xff]  ;;  %v24_v20 = vld [vmem:[%s6099_s0 + $0x40] sm:$0xff] }
   0x7   :  { %4121 = vmatprep.subr.msk.bf16.mxu1 %vm4153_vm3, %v4101_v3  ;;  %v3055_v17 = vld [vmem:[%s6099_s0 + $0x230] sm:$0xff]  ;;  %v3056_v19 = vld [vmem:[%s6099_s0 + $0x238] sm:$0xff]  ;;  %v3057_v21 = vld [vmem:[%s6099_s0 + $0x240] sm:$0xff] }
   0x8   :  { %3706 = vmatmul.mubr.msk.f32.vlgmr.msra.gmra.mrb[0].mxu0 %vm80_vm1, %v17_v6  ;;  %v25_v22 = vld [vmem:[%s6099_s0 + $0x48] sm:$0xff]  ;;  %v26_v24 = vld [vmem:[%s6099_s0 + $0x50] sm:$0xff]  ;;  %v27_v26 = vld [vmem:[%s6099_s0 + $0x58] sm:$0xff] }
   0x9   :  { %3806 = vmatmul.mubr.msk.f32.vlgmr.msra.gmra.mrb[0].mxu1 %vm80_vm1, %v3050_v7  ;;  %4118 = vmatpush3.bf16.msk.msra.mxu0 %vm4153_vm3, %v4101_v3  ;;  %v3058_v23 = vld [vmem:[%s6099_s0 + $0x248] sm:$0xff]  ;;  %v3059_v25 = vld [vmem:[%s6099_s0 + $0x250] sm:$0xff]  ;;  %v3060_v27 = vld [vmem:[%s6099_s0 + $0x258] sm:$0xff] }
   0xa   :  { %3708 = vmatprep.mubr.msk.f32.mxu0 %vm80_vm1, %v18_v8  ;;  %3808 = vmatprep.mubr.msk.f32.mxu1 %vm80_vm1, %v3051_v9  ;;  %v28_v28 = vld [vmem:[%s6099_s0 + $0x60] sm:$0xff]  ;;  %v29_v30 = vld [vmem:[%s6099_s0 + $0x68] sm:$0xff]  ;;  %v30_v32 = vld [vmem:[%s6099_s0 + $0x70] sm:$0xff] }
   0xb   :  { %4124 = vmatpush3.bf16.msk.msra.mxu1 %vm4153_vm3, %v4101_v3  ;;  %v3061_v29 = vld [vmem:[%s6099_s0 + $0x260] sm:$0xff]  ;;  %v3062_v31 = vld [vmem:[%s6099_s0 + $0x268] sm:$0xff]  ;;  %v3063_v33 = vld [vmem:[%s6099_s0 + $0x270] sm:$0xff] }
   0xc   :  { %3709 = vmatmul.mubr.msk.f32.gmra.mrb[2].mxu0 %vm80_vm1, %v19_v10  ;;  %v31_v34 = vld [vmem:[%s6099_s0 + $0x78] sm:$0xff]  ;;  %v32_v36 = vld [vmem:[%s6099_s0 + $0x80] sm:$0xff]  ;;  %v33_v38 = vld [vmem:[%s6099_s0 + $0x88] sm:$0xff] }
   0xd   :  { %3809 = vmatmul.mubr.msk.f32.gmra.mrb[2].mxu1 %vm80_vm1, %v3052_v11  ;;  %3711 = vmatprep.mubr.msk.f32.mxu0 %vm80_vm1, %v20_v12  ;;  %v3064_v35 = vld [vmem:[%s6099_s0 + $0x278] sm:$0xff]  ;;  %v3065_v37 = vld [vmem:[%s6099_s0 + $0x280] sm:$0xff]  ;;  %v3066_v39 = vld [vmem:[%s6099_s0 + $0x288] sm:$0xff] }
   0xe   :  { %3811 = vmatprep.mubr.msk.f32.mxu1 %vm80_vm1, %v3053_v13  ;;  %v34_v40 = vld [vmem:[%s6099_s0 + $0x90] sm:$0xff]  ;;  %v35_v42 = vld [vmem:[%s6099_s0 + $0x98] sm:$0xff]  ;;  %v36_v44 = vld [vmem:[%s6099_s0 + $0xa0] sm:$0xff] }
   0xf   :  { %v3067_v41 = vld [vmem:[%s6099_s0 + $0x290] sm:$0xff]  ;;  %v3068_v43 = vld [vmem:[%s6099_s0 + $0x298] sm:$0xff]  ;;  %v3069_v45 = vld [vmem:[%s6099_s0 + $0x2a0] sm:$0xff] }
  0x10   :  { %3712 = vmatmul.mubr.msk.f32.gmra.mrb[4].mxu0 %vm80_vm1, %v21_v14  ;;  %v37_v46 = vld [vmem:[%s6099_s0 + $0xa8] sm:$0xff]  ;;  %v38_v48 = vld [vmem:[%s6099_s0 + $0xb0] sm:$0xff]  ;;  %v39_v50 = vld [vmem:[%s6099_s0 + $0xb8] sm:$0xff] }
  0x11   :  { %3812 = vmatmul.mubr.msk.f32.gmra.mrb[4].mxu1 %vm80_vm1, %v3054_v15  ;;  %3714 = vmatprep.mubr.msk.f32.mxu0 %vm80_vm1, %v22_v16  ;;  %v3070_v47 = vld [vmem:[%s6099_s0 + $0x2a8] sm:$0xff]  ;;  %v3071_v49 = vld [vmem:[%s6099_s0 + $0x2b0] sm:$0xff]  ;;  %v3072_v51 = vld [vmem:[%s6099_s0 + $0x2b8] sm:$0xff] }
  0x12   :  { %3814 = vmatprep.mubr.msk.f32.mxu1 %vm80_vm1, %v3055_v17  ;;  %v40_v52 = vld [vmem:[%s6099_s0 + $0xc0] sm:$0xff]  ;;  %v41_v54 = vld [vmem:[%s6099_s0 + $0xc8] sm:$0xff]  ;;  %v42_v56 = vld [vmem:[%s6099_s0 + $0xd0] sm:$0xff] }
  0x13   :  { %v3073_v53 = vld [vmem:[%s6099_s0 + $0x2c0] sm:$0xff]  ;;  %v3074_v55 = vld [vmem:[%s6099_s0 + $0x2c8] sm:$0xff]  ;;  %v3075_v57 = vld [vmem:[%s6099_s0 + $0x2d0] sm:$0xff] }
  0x14   :  { %3715 = vmatmul.mubr.msk.f32.gmra.mrb[6].mxu0 %vm80_vm1, %v23_v18  ;;  %v43_v58 = vld [vmem:[%s6099_s0 + $0xd8] sm:$0xff]  ;;  %v44_v60 = vld [vmem:[%s6099_s0 + $0xe0] sm:$0xff]  ;;  %v45_v62 = vld [vmem:[%s6099_s0 + $0xe8] sm:$0xff] }
  0x15   :  { %3815 = vmatmul.mubr.msk.f32.gmra.mrb[6].mxu1 %vm80_vm1, %v3056_v19  ;;  %3717 = vmatprep.mubr.msk.f32.mxu0 %vm80_vm1, %v24_v20  ;;  %v3076_v59 = vld [vmem:[%s6099_s0 + $0x2d8] sm:$0xff]  ;;  %v3077_v61 = vld [vmem:[%s6099_s0 + $0x2e0] sm:$0xff]  ;;  %v3078_v63 = vld [vmem:[%s6099_s0 + $0x2e8] sm:$0xff] }
  0x16   :  { %3817 = vmatprep.mubr.msk.f32.mxu1 %vm80_vm1, %v3057_v21  ;;  %v46_v0 = vld [vmem:[%s6099_s0 + $0xf0] sm:$0xff]  ;;  %v47_v2 = vld [vmem:[%s6099_s0 + $0xf8] sm:$0xff]  ;;  %v48_v4 = vld [vmem:[%s6099_s0 + $0x100] sm:$0xff] }
  0x17   :  { %v3079_v1 = vld [vmem:[%s6099_s0 + $0x2f0] sm:$0xff]  ;;  %v3080_v3 = vld [vmem:[%s6099_s0 + $0x2f8] sm:$0xff]  ;;  %v3081_v5 = vld [vmem:[%s6099_s0 + $0x300] sm:$0xff] }
  0x18   :  { %3718 = vmatmul.mubr.msk.f32.gmra.mrb[8].mxu0 %vm80_vm1, %v25_v22  ;;  %v49_v6 = vld [vmem:[%s6099_s0 + $0x108] sm:$0xff]  ;;  %v50_v8 = vld [vmem:[%s6099_s0 + $0x110] sm:$0xff]  ;;  %v51_v10 = vld [vmem:[%s6099_s0 + $0x118] sm:$0xff] }
  0x19   :  { %3818 = vmatmul.mubr.msk.f32.gmra.mrb[8].mxu1 %vm80_vm1, %v3058_v23  ;;  %3720 = vmatprep.mubr.msk.f32.mxu0 %vm80_vm1, %v26_v24  ;;  %v3082_v7 = vld [vmem:[%s6099_s0 + $0x308] sm:$0xff]  ;;  %v3083_v9 = vld [vmem:[%s6099_s0 + $0x310] sm:$0xff]  ;;  %v3084_v11 = vld [vmem:[%s6099_s0 + $0x318] sm:$0xff] }
  0x1a   :  { %3820 = vmatprep.mubr.msk.f32.mxu1 %vm80_vm1, %v3059_v25  ;;  %v52_v12 = vld [vmem:[%s6099_s0 + $0x120] sm:$0xff]  ;;  %v53_v14 = vld [vmem:[%s6099_s0 + $0x128] sm:$0xff]  ;;  %v54_v16 = vld [vmem:[%s6099_s0 + $0x130] sm:$0xff] }
  0x1b   :  { %v3085_v13 = vld [vmem:[%s6099_s0 + $0x320] sm:$0xff]  ;;  %v3086_v15 = vld [vmem:[%s6099_s0 + $0x328] sm:$0xff]  ;;  %v3087_v17 = vld [vmem:[%s6099_s0 + $0x330] sm:$0xff] }
  0x1c   :  { %3721 = vmatmul.mubr.msk.f32.gmra.mrb[10].mxu0 %vm80_vm1, %v27_v26  ;;  %v55_v18 = vld [vmem:[%s6099_s0 + $0x138] sm:$0xff]  ;;  %v56_v20 = vld [vmem:[%s6099_s0 + $0x140] sm:$0xff]  ;;  %v57_v22 = vld [vmem:[%s6099_s0 + $0x148] sm:$0xff] }
  0x1d   :  { %3821 = vmatmul.mubr.msk.f32.gmra.mrb[10].mxu1 %vm80_vm1, %v3060_v27  ;;  %3723 = vmatprep.mubr.msk.f32.mxu0 %vm80_vm1, %v28_v28  ;;  %v3088_v19 = vld [vmem:[%s6099_s0 + $0x338] sm:$0xff]  ;;  %v3089_v21 = vld [vmem:[%s6099_s0 + $0x340] sm:$0xff]  ;;  %v3090_v23 = vld [vmem:[%s6099_s0 + $0x348] sm:$0xff] }
  0x1e   :  { %3823 = vmatprep.mubr.msk.f32.mxu1 %vm80_vm1, %v3061_v29  ;;  %v58_v24 = vld [vmem:[%s6099_s0 + $0x150] sm:$0xff]  ;;  %v59_v26 = vld [vmem:[%s6099_s0 + $0x158] sm:$0xff]  ;;  %v60_v28 = vld [vmem:[%s6099_s0 + $0x160] sm:$0xff] }
  0x1f   :  { %v3091_v25 = vld [vmem:[%s6099_s0 + $0x350] sm:$0xff]  ;;  %v3092_v27 = vld [vmem:[%s6099_s0 + $0x358] sm:$0xff]  ;;  %v3093_v29 = vld [vmem:[%s6099_s0 + $0x360] sm:$0xff] }
  0x20   :  { %3724 = vmatmul.mubr.msk.f32.gmra.mrb[12].mxu0 %vm80_vm1, %v29_v30  ;;  %v61_v30 = vld [vmem:[%s6099_s0 + $0x168] sm:$0xff] }
  0x21   :  { %3824 = vmatmul.mubr.msk.f32.gmra.mrb[12].mxu1 %vm80_vm1, %v3062_v31  ;;  %3726 = vmatprep.mubr.msk.f32.mxu0 %vm80_vm1, %v30_v32  ;;  %v3094_v31 = vld [vmem:[%s6099_s0 + $0x368] sm:$0xff]  ;;  %v62_v32 = vld [vmem:[%s6099_s0 + $0x170] sm:$0xff] }
  0x22   :  { %3826 = vmatprep.mubr.msk.f32.mxu1 %vm80_vm1, %v3063_v33  ;;  %v3095_v33 = vld [vmem:[%s6099_s0 + $0x370] sm:$0xff] }
  0x24   :  { %3727 = vmatmul.mubr.msk.f32.gmra.mrb[14].mxu0 %vm80_vm1, %v31_v34  ;;  %v63_v34 = vld [vmem:[%s6099_s0 + $0x178] sm:$0xff] }
  0x25   :  { %3827 = vmatmul.mubr.msk.f32.gmra.mrb[14].mxu1 %vm80_vm1, %v3064_v35  ;;  %3729 = vmatprep.mubr.msk.f32.mxu0 %vm80_vm1, %v32_v36  ;;  %v3096_v35 = vld [vmem:[%s6099_s0 + $0x378] sm:$0xff]  ;;  %v64_v36 = vld [vmem:[%s6099_s0 + $0x180] sm:$0xff] }
  0x26   :  { %3829 = vmatprep.mubr.msk.f32.mxu1 %vm80_vm1, %v3065_v37  ;;  %v3097_v37 = vld [vmem:[%s6099_s0 + $0x380] sm:$0xff] }
  0x28   :  { %3730 = vmatmul.mubr.msk.f32.gmra.mrb[16].mxu0 %vm80_vm1, %v33_v38  ;;  %v65_v38 = vld [vmem:[%s6099_s0 + $0x188] sm:$0xff] }
  0x29   :  { %3830 = vmatmul.mubr.msk.f32.gmra.mrb[16].mxu1 %vm80_vm1, %v3066_v39  ;;  %3732 = vmatprep.mubr.msk.f32.mxu0 %vm80_vm1, %v34_v40  ;;  %v3098_v39 = vld [vmem:[%s6099_s0 + $0x388] sm:$0xff]  ;;  %v66_v40 = vld [vmem:[%s6099_s0 + $0x190] sm:$0xff] }
  0x2a   :  { %3832 = vmatprep.mubr.msk.f32.mxu1 %vm80_vm1, %v3067_v41  ;;  %v3099_v41 = vld [vmem:[%s6099_s0 + $0x390] sm:$0xff] }
  0x2c   :  { %3733 = vmatmul.mubr.msk.f32.gmra.mrb[18].mxu0 %vm80_vm1, %v35_v42  ;;  %v67_v42 = vld [vmem:[%s6099_s0 + $0x198] sm:$0xff] }
  0x2d   :  { %3833 = vmatmul.mubr.msk.f32.gmra.mrb[18].mxu1 %vm80_vm1, %v3068_v43  ;;  %3735 = vmatprep.mubr.msk.f32.mxu0 %vm80_vm1, %v36_v44  ;;  %v3100_v43 = vld [vmem:[%s6099_s0 + $0x398] sm:$0xff]  ;;  %v68_v44 = vld [vmem:[%s6099_s0 + $0x1a0] sm:$0xff] }
  0x2e   :  { %3835 = vmatprep.mubr.msk.f32.mxu1 %vm80_vm1, %v3069_v45  ;;  %v3101_v45 = vld [vmem:[%s6099_s0 + $0x3a0] sm:$0xff] }
  0x30   :  { %3736 = vmatmul.mubr.msk.f32.gmra.mrb[20].mxu0 %vm80_vm1, %v37_v46  ;;  %v69_v46 = vld [vmem:[%s6099_s0 + $0x1a8] sm:$0xff] }
  0x31   :  { %3836 = vmatmul.mubr.msk.f32.gmra.mrb[20].mxu1 %vm80_vm1, %v3070_v47  ;;  %3738 = vmatprep.mubr.msk.f32.mxu0 %vm80_vm1, %v38_v48  ;;  %v3102_v47 = vld [vmem:[%s6099_s0 + $0x3a8] sm:$0xff]  ;;  %v70_v48 = vld [vmem:[%s6099_s0 + $0x1b0] sm:$0xff] }
  0x32   :  { %3838 = vmatprep.mubr.msk.f32.mxu1 %vm80_vm1, %v3071_v49  ;;  %v3103_v49 = vld [vmem:[%s6099_s0 + $0x3b0] sm:$0xff] }
  0x34   :  { %3739 = vmatmul.mubr.msk.f32.gmra.mrb[22].mxu0 %vm80_vm1, %v39_v50  ;;  %v71_v50 = vld [vmem:[%s6099_s0 + $0x1b8] sm:$0xff] }
  0x35   :  { %3839 = vmatmul.mubr.msk.f32.gmra.mrb[22].mxu1 %vm80_vm1, %v3072_v51  ;;  %3741 = vmatprep.mubr.msk.f32.mxu0 %vm80_vm1, %v40_v52  ;;  %v3104_v51 = vld [vmem:[%s6099_s0 + $0x3b8] sm:$0xff]  ;;  %v72_v52 = vld [vmem:[%s6099_s0 + $0x1c0] sm:$0xff] }
  0x36   :  { %3841 = vmatprep.mubr.msk.f32.mxu1 %vm80_vm1, %v3073_v53  ;;  %v3105_v53 = vld [vmem:[%s6099_s0 + $0x3c0] sm:$0xff] }
  0x38   :  { %3742 = vmatmul.mubr.msk.f32.gmra.mrb[24].mxu0 %vm80_vm1, %v41_v54  ;;  %v73_v54 = vld [vmem:[%s6099_s0 + $0x1c8] sm:$0xff] }
  0x39   :  { %3842 = vmatmul.mubr.msk.f32.gmra.mrb[24].mxu1 %vm80_vm1, %v3074_v55  ;;  %3744 = vmatprep.mubr.msk.f32.mxu0 %vm80_vm1, %v42_v56  ;;  %v3106_v55 = vld [vmem:[%s6099_s0 + $0x3c8] sm:$0xff]  ;;  %v74_v56 = vld [vmem:[%s6099_s0 + $0x1d0] sm:$0xff] }
  0x3a   :  { %3844 = vmatprep.mubr.msk.f32.mxu1 %vm80_vm1, %v3075_v57  ;;  %v3107_v57 = vld [vmem:[%s6099_s0 + $0x3d0] sm:$0xff] }
  0x3c   :  { %3745 = vmatmul.mubr.msk.f32.gmra.mrb[26].mxu0 %vm80_vm1, %v43_v58  ;;  %v75_v58 = vld [vmem:[%s6099_s0 + $0x1d8] sm:$0xff] }
  0x3d   :  { %3845 = vmatmul.mubr.msk.f32.gmra.mrb[26].mxu1 %vm80_vm1, %v3076_v59  ;;  %3747 = vmatprep.mubr.msk.f32.mxu0 %vm80_vm1, %v44_v60  ;;  %v3108_v59 = vld [vmem:[%s6099_s0 + $0x3d8] sm:$0xff]  ;;  %v76_v60 = vld [vmem:[%s6099_s0 + $0x1e0] sm:$0xff] }
  0x3e   :  { %3847 = vmatprep.mubr.msk.f32.mxu1 %vm80_vm1, %v3077_v61  ;;  %v3109_v61 = vld [vmem:[%s6099_s0 + $0x3e0] sm:$0xff] }
  0x40   :  { %3748 = vmatmul.mubr.msk.f32.gmra.mrb[28].mxu0 %vm80_vm1, %v45_v62  ;;  %v77_v62 = vld [vmem:[%s6099_s0 + $0x1e8] sm:$0xff] }
  0x41   :  { %3848 = vmatmul.mubr.msk.f32.gmra.mrb[28].mxu1 %vm80_vm1, %v3078_v63  ;;  %3750 = vmatprep.mubr.msk.f32.mxu0 %vm80_vm1, %v46_v0  ;;  %v3110_v63 = vld [vmem:[%s6099_s0 + $0x3e8] sm:$0xff]  ;;  %v78_v0 = vld [vmem:[%s6099_s0 + $0x1f0] sm:$0xff] }
  0x42   :  { %3850 = vmatprep.mubr.msk.f32.mxu1 %vm80_vm1, %v3079_v1  ;;  %v3111_v1 = vld [vmem:[%s6099_s0 + $0x3f0] sm:$0xff] }
  0x44   :  { %3751 = vmatmul.mubr.msk.f32.gmra.mrb[30].mxu0 %vm80_vm1, %v47_v2  ;;  %v79_v2 = vld [vmem:[%s6099_s0 + $0x1f8] sm:$0xff] }
  0x45   :  { %3851 = vmatmul.mubr.msk.f32.gmra.mrb[30].mxu1 %vm80_vm1, %v3080_v3  ;;  %3753 = vmatprep.mubr.msk.f32.mxu0 %vm80_vm1, %v48_v4  ;;  %v3112_v3 = vld [vmem:[%s6099_s0 + $0x3f8] sm:$0xff]  ;;  %v3178_v4 = vld [vmem:[%s6099_s0 + $0x400] sm:$0xff] }
  0x46   :  { %3853 = vmatprep.mubr.msk.f32.mxu1 %vm80_vm1, %v3081_v5  ;;  %v3307_v5 = vld [vmem:[%s6099_s0 + $0x600] sm:$0xff] }
  0x48   :  { %3754 = vmatmul.mubr.msk.f32.gmra.mrb[32].mxu0 %vm80_vm1, %v49_v6  ;;  %v3179_v6 = vld [vmem:[%s6099_s0 + $0x408] sm:$0xff] }
  0x49   :  { %3854 = vmatmul.mubr.msk.f32.gmra.mrb[32].mxu1 %vm80_vm1, %v3082_v7  ;;  %3756 = vmatprep.mubr.msk.f32.mxu0 %vm80_vm1, %v50_v8  ;;  %v3308_v7 = vld [vmem:[%s6099_s0 + $0x608] sm:$0xff]  ;;  %v3180_v8 = vld [vmem:[%s6099_s0 + $0x410] sm:$0xff] }
  0x4a   :  { %3856 = vmatprep.mubr.msk.f32.mxu1 %vm80_vm1, %v3083_v9  ;;  %v3309_v9 = vld [vmem:[%s6099_s0 + $0x610] sm:$0xff] }
  0x4c   :  { %3757 = vmatmul.mubr.msk.f32.gmra.mrb[34].mxu0 %vm80_vm1, %v51_v10  ;;  %v3181_v10 = vld [vmem:[%s6099_s0 + $0x418] sm:$0xff] }
  0x4d   :  { %3857 = vmatmul.mubr.msk.f32.gmra.mrb[34].mxu1 %vm80_vm1, %v3084_v11  ;;  %3759 = vmatprep.mubr.msk.f32.mxu0 %vm80_vm1, %v52_v12  ;;  %v3310_v11 = vld [vmem:[%s6099_s0 + $0x618] sm:$0xff]  ;;  %v3182_v12 = vld [vmem:[%s6099_s0 + $0x420] sm:$0xff] }
  0x4e   :  { %3859 = vmatprep.mubr.msk.f32.mxu1 %vm80_vm1, %v3085_v13  ;;  %v3311_v13 = vld [vmem:[%s6099_s0 + $0x620] sm:$0xff] }
  0x50   :  { %3760 = vmatmul.mubr.msk.f32.gmra.mrb[36].mxu0 %vm80_vm1, %v53_v14  ;;  %v3183_v14 = vld [vmem:[%s6099_s0 + $0x428] sm:$0xff] }
  0x51   :  { %3860 = vmatmul.mubr.msk.f32.gmra.mrb[36].mxu1 %vm80_vm1, %v3086_v15  ;;  %3762 = vmatprep.mubr.msk.f32.mxu0 %vm80_vm1, %v54_v16  ;;  %v3312_v15 = vld [vmem:[%s6099_s0 + $0x628] sm:$0xff]  ;;  %v3184_v16 = vld [vmem:[%s6099_s0 + $0x430] sm:$0xff] }
  0x52   :  { %3862 = vmatprep.mubr.msk.f32.mxu1 %vm80_vm1, %v3087_v17  ;;  %v3313_v17 = vld [vmem:[%s6099_s0 + $0x630] sm:$0xff] }
  0x54   :  { %3763 = vmatmul.mubr.msk.f32.gmra.mrb[38].mxu0 %vm80_vm1, %v55_v18  ;;  %v3185_v18 = vld [vmem:[%s6099_s0 + $0x438] sm:$0xff] }
  0x55   :  { %3863 = vmatmul.mubr.msk.f32.gmra.mrb[38].mxu1 %vm80_vm1, %v3088_v19  ;;  %3765 = vmatprep.mubr.msk.f32.mxu0 %vm80_vm1, %v56_v20  ;;  %v3314_v19 = vld [vmem:[%s6099_s0 + $0x638] sm:$0xff]  ;;  %v3186_v20 = vld [vmem:[%s6099_s0 + $0x440] sm:$0xff] }
  0x56   :  { %3865 = vmatprep.mubr.msk.f32.mxu1 %vm80_vm1, %v3089_v21  ;;  %v3315_v21 = vld [vmem:[%s6099_s0 + $0x640] sm:$0xff] }
  0x58   :  { %3766 = vmatmul.mubr.msk.f32.gmra.mrb[40].mxu0 %vm80_vm1, %v57_v22  ;;  %v3187_v22 = vld [vmem:[%s6099_s0 + $0x448] sm:$0xff] }
  0x59   :  { %3866 = vmatmul.mubr.msk.f32.gmra.mrb[40].mxu1 %vm80_vm1, %v3090_v23  ;;  %3768 = vmatprep.mubr.msk.f32.mxu0 %vm80_vm1, %v58_v24  ;;  %v3316_v23 = vld [vmem:[%s6099_s0 + $0x648] sm:$0xff]  ;;  %v3188_v24 = vld [vmem:[%s6099_s0 + $0x450] sm:$0xff] }
  0x5a   :  { %3868 = vmatprep.mubr.msk.f32.mxu1 %vm80_vm1, %v3091_v25  ;;  %v3317_v25 = vld [vmem:[%s6099_s0 + $0x650] sm:$0xff] }
  0x5c   :  { %3769 = vmatmul.mubr.msk.f32.gmra.mrb[42].mxu0 %vm80_vm1, %v59_v26  ;;  %v3189_v26 = vld [vmem:[%s6099_s0 + $0x458] sm:$0xff] }
  0x5d   :  { %3869 = vmatmul.mubr.msk.f32.gmra.mrb[42].mxu1 %vm80_vm1, %v3092_v27  ;;  %3771 = vmatprep.mubr.msk.f32.mxu0 %vm80_vm1, %v60_v28  ;;  %v3318_v27 = vld [vmem:[%s6099_s0 + $0x658] sm:$0xff]  ;;  %v3190_v28 = vld [vmem:[%s6099_s0 + $0x460] sm:$0xff] }
  0x5e   :  { %3871 = vmatprep.mubr.msk.f32.mxu1 %vm80_vm1, %v3093_v29  ;;  %v3319_v29 = vld [vmem:[%s6099_s0 + $0x660] sm:$0xff] }
  0x60   :  { %3772 = vmatmul.mubr.msk.f32.gmra.mrb[44].mxu0 %vm80_vm1, %v61_v30  ;;  %v3191_v30 = vld [vmem:[%s6099_s0 + $0x468] sm:$0xff] }
  0x61   :  { %3872 = vmatmul.mubr.msk.f32.gmra.mrb[44].mxu1 %vm80_vm1, %v3094_v31  ;;  %3774 = vmatprep.mubr.msk.f32.mxu0 %vm80_vm1, %v62_v32  ;;  %v3320_v31 = vld [vmem:[%s6099_s0 + $0x668] sm:$0xff]  ;;  %v3192_v32 = vld [vmem:[%s6099_s0 + $0x470] sm:$0xff] }
  0x62   :  { %3874 = vmatprep.mubr.msk.f32.mxu1 %vm80_vm1, %v3095_v33  ;;  %v3321_v33 = vld [vmem:[%s6099_s0 + $0x670] sm:$0xff] }
  0x64   :  { %3775 = vmatmul.mubr.msk.f32.gmra.mrb[46].mxu0 %vm80_vm1, %v63_v34  ;;  %v3193_v34 = vld [vmem:[%s6099_s0 + $0x478] sm:$0xff] }
  0x65   :  { %3875 = vmatmul.mubr.msk.f32.gmra.mrb[46].mxu1 %vm80_vm1, %v3096_v35  ;;  %3777 = vmatprep.mubr.msk.f32.mxu0 %vm80_vm1, %v64_v36  ;;  %v3322_v35 = vld [vmem:[%s6099_s0 + $0x678] sm:$0xff]  ;;  %v3194_v36 = vld [vmem:[%s6099_s0 + $0x480] sm:$0xff] }
  0x66   :  { %3877 = vmatprep.mubr.msk.f32.mxu1 %vm80_vm1, %v3097_v37  ;;  %v3323_v37 = vld [vmem:[%s6099_s0 + $0x680] sm:$0xff] }
  0x68   :  { %3778 = vmatmul.mubr.msk.f32.gmra.mrb[48].mxu0 %vm80_vm1, %v65_v38  ;;  %v3195_v38 = vld [vmem:[%s6099_s0 + $0x488] sm:$0xff] }
  0x69   :  { %3878 = vmatmul.mubr.msk.f32.gmra.mrb[48].mxu1 %vm80_vm1, %v3098_v39  ;;  %3780 = vmatprep.mubr.msk.f32.mxu0 %vm80_vm1, %v66_v40  ;;  %v3324_v39 = vld [vmem:[%s6099_s0 + $0x688] sm:$0xff]  ;;  %v3196_v40 = vld [vmem:[%s6099_s0 + $0x490] sm:$0xff] }
  0x6a   :  { %3880 = vmatprep.mubr.msk.f32.mxu1 %vm80_vm1, %v3099_v41  ;;  %v3325_v41 = vld [vmem:[%s6099_s0 + $0x690] sm:$0xff] }
  0x6c   :  { %3781 = vmatmul.mubr.msk.f32.gmra.mrb[50].mxu0 %vm80_vm1, %v67_v42  ;;  %v3197_v42 = vld [vmem:[%s6099_s0 + $0x498] sm:$0xff] }
  0x6d   :  { %3881 = vmatmul.mubr.msk.f32.gmra.mrb[50].mxu1 %vm80_vm1, %v3100_v43  ;;  %3783 = vmatprep.mubr.msk.f32.mxu0 %vm80_vm1, %v68_v44  ;;  %v3326_v43 = vld [vmem:[%s6099_s0 + $0x698] sm:$0xff]  ;;  %v3198_v44 = vld [vmem:[%s6099_s0 + $0x4a0] sm:$0xff] }
  0x6e   :  { %3883 = vmatprep.mubr.msk.f32.mxu1 %vm80_vm1, %v3101_v45  ;;  %v3327_v45 = vld [vmem:[%s6099_s0 + $0x6a0] sm:$0xff] }
  0x70   :  { %3784 = vmatmul.mubr.msk.f32.gmra.mrb[52].mxu0 %vm80_vm1, %v69_v46  ;;  %v3199_v46 = vld [vmem:[%s6099_s0 + $0x4a8] sm:$0xff] }
  0x71   :  { %3884 = vmatmul.mubr.msk.f32.gmra.mrb[52].mxu1 %vm80_vm1, %v3102_v47  ;;  %3786 = vmatprep.mubr.msk.f32.mxu0 %vm80_vm1, %v70_v48  ;;  %v3328_v47 = vld [vmem:[%s6099_s0 + $0x6a8] sm:$0xff]  ;;  %v3200_v48 = vld [vmem:[%s6099_s0 + $0x4b0] sm:$0xff] }
  0x72   :  { %3886 = vmatprep.mubr.msk.f32.mxu1 %vm80_vm1, %v3103_v49  ;;  %v3329_v49 = vld [vmem:[%s6099_s0 + $0x6b0] sm:$0xff] }
  0x74   :  { %3787 = vmatmul.mubr.msk.f32.gmra.mrb[54].mxu0 %vm80_vm1, %v71_v50  ;;  %v3201_v50 = vld [vmem:[%s6099_s0 + $0x4b8] sm:$0xff] }
  0x75   :  { %3887 = vmatmul.mubr.msk.f32.gmra.mrb[54].mxu1 %vm80_vm1, %v3104_v51  ;;  %3789 = vmatprep.mubr.msk.f32.mxu0 %vm80_vm1, %v72_v52  ;;  %v3330_v51 = vld [vmem:[%s6099_s0 + $0x6b8] sm:$0xff]  ;;  %v3202_v52 = vld [vmem:[%s6099_s0 + $0x4c0] sm:$0xff] }
  0x76   :  { %3889 = vmatprep.mubr.msk.f32.mxu1 %vm80_vm1, %v3105_v53  ;;  %v3331_v53 = vld [vmem:[%s6099_s0 + $0x6c0] sm:$0xff] }
  0x78   :  { %3790 = vmatmul.mubr.msk.f32.gmra.mrb[56].mxu0 %vm80_vm1, %v73_v54  ;;  %v3203_v54 = vld [vmem:[%s6099_s0 + $0x4c8] sm:$0xff] }
  0x79   :  { %3890 = vmatmul.mubr.msk.f32.gmra.mrb[56].mxu1 %vm80_vm1, %v3106_v55  ;;  %3792 = vmatprep.mubr.msk.f32.mxu0 %vm80_vm1, %v74_v56  ;;  %v3332_v55 = vld [vmem:[%s6099_s0 + $0x6c8] sm:$0xff]  ;;  %v3204_v56 = vld [vmem:[%s6099_s0 + $0x4d0] sm:$0xff] }
  0x7a   :  { %3892 = vmatprep.mubr.msk.f32.mxu1 %vm80_vm1, %v3107_v57  ;;  %v3333_v57 = vld [vmem:[%s6099_s0 + $0x6d0] sm:$0xff] }
  0x7c   :  { %3793 = vmatmul.mubr.msk.f32.gmra.mrb[58].mxu0 %vm80_vm1, %v75_v58  ;;  %v3205_v58 = vld [vmem:[%s6099_s0 + $0x4d8] sm:$0xff] }
  0x7d   :  { %3893 = vmatmul.mubr.msk.f32.gmra.mrb[58].mxu1 %vm80_vm1, %v3108_v59  ;;  %3795 = vmatprep.mubr.msk.f32.mxu0 %vm80_vm1, %v76_v60  ;;  %v3334_v59 = vld [vmem:[%s6099_s0 + $0x6d8] sm:$0xff]  ;;  %v3206_v60 = vld [vmem:[%s6099_s0 + $0x4e0] sm:$0xff] }
  0x7e   :  { %3895 = vmatprep.mubr.msk.f32.mxu1 %vm80_vm1, %v3109_v61  ;;  %v3335_v61 = vld [vmem:[%s6099_s0 + $0x6e0] sm:$0xff] }
  0x80   :  { %3796 = vmatmul.mubr.msk.f32.gmra.mrb[60].mxu0 %vm80_vm1, %v77_v62  ;;  %v3207_v62 = vld [vmem:[%s6099_s0 + $0x4e8] sm:$0xff] }
  0x81   :  { %3896 = vmatmul.mubr.msk.f32.gmra.mrb[60].mxu1 %vm80_vm1, %v3110_v63  ;;  %3798 = vmatprep.mubr.msk.f32.mxu0 %vm80_vm1, %v78_v0  ;;  %v3336_v63 = vld [vmem:[%s6099_s0 + $0x6e8] sm:$0xff]  ;;  %v3208_v0 = vld [vmem:[%s6099_s0 + $0x4f0] sm:$0xff] }
  0x82   :  { %3898 = vmatprep.mubr.msk.f32.mxu1 %vm80_vm1, %v3111_v1  ;;  %v3337_v1 = vld [vmem:[%s6099_s0 + $0x6f0] sm:$0xff] }
  0x84   :  { %3799 = vmatmul.mubr.msk.f32.gmra.mrb[62].mxu0 %vm80_vm1, %v79_v2  ;;  %v3209_v2 = vld [vmem:[%s6099_s0 + $0x4f8] sm:$0xff] }
  0x85   :  { %3899 = vmatmul.mubr.msk.f32.gmra.mrb[62].mxu1 %vm80_vm1, %v3112_v3  ;;  %3905 = vmatprep.mubr.msk.f32.mxu0 %vm80_vm1, %v3178_v4  ;;  %v3338_v3 = vld [vmem:[%s6099_s0 + $0x6f8] sm:$0xff]  ;;  %v3210_v4 = vld [vmem:[%s6099_s0 + $0x500] sm:$0xff] }
  0x86   :  { %4005 = vmatprep.mubr.msk.f32.mxu1 %vm80_vm1, %v3307_v5  ;;  %v3339_v5 = vld [vmem:[%s6099_s0 + $0x700] sm:$0xff] }
  0x88   :  { %3906 = vmatmul.mubr.msk.f32.vlgmr.msra.gmra.mrb[64].mxu0 %vm80_vm1, %v3179_v6  ;;  %v3211_v6 = vld [vmem:[%s6099_s0 + $0x508] sm:$0xff] }
  0x89   :  { %4006 = vmatmul.mubr.msk.f32.vlgmr.msra.gmra.mrb[64].mxu1 %vm80_vm1, %v3308_v7  ;;  %3908 = vmatprep.mubr.msk.f32.mxu0 %vm80_vm1, %v3180_v8  ;;  %v3340_v7 = vld [vmem:[%s6099_s0 + $0x708] sm:$0xff]  ;;  %v3212_v8 = vld [vmem:[%s6099_s0 + $0x510] sm:$0xff] }
  0x8a   :  { %4008 = vmatprep.mubr.msk.f32.mxu1 %vm80_vm1, %v3309_v9  ;;  %v3341_v9 = vld [vmem:[%s6099_s0 + $0x710] sm:$0xff] }
  0x8c   :  { %3909 = vmatmul.mubr.msk.f32.gmra.mrb[66].mxu0 %vm80_vm1, %v3181_v10  ;;  %v3213_v10 = vld [vmem:[%s6099_s0 + $0x518] sm:$0xff] }
  0x8d   :  { %4009 = vmatmul.mubr.msk.f32.gmra.mrb[66].mxu1 %vm80_vm1, %v3310_v11  ;;  %3911 = vmatprep.mubr.msk.f32.mxu0 %vm80_vm1, %v3182_v12  ;;  %v3342_v11 = vld [vmem:[%s6099_s0 + $0x718] sm:$0xff]  ;;  %v3214_v12 = vld [vmem:[%s6099_s0 + $0x520] sm:$0xff] }
  0x8e   :  { %4011 = vmatprep.mubr.msk.f32.mxu1 %vm80_vm1, %v3311_v13  ;;  %v3343_v13 = vld [vmem:[%s6099_s0 + $0x720] sm:$0xff] }
  0x90   :  { %3912 = vmatmul.mubr.msk.f32.gmra.mrb[68].mxu0 %vm80_vm1, %v3183_v14  ;;  %v3215_v14 = vld [vmem:[%s6099_s0 + $0x528] sm:$0xff] }
  0x91   :  { %4012 = vmatmul.mubr.msk.f32.gmra.mrb[68].mxu1 %vm80_vm1, %v3312_v15  ;;  %3914 = vmatprep.mubr.msk.f32.mxu0 %vm80_vm1, %v3184_v16  ;;  %v3344_v15 = vld [vmem:[%s6099_s0 + $0x728] sm:$0xff]  ;;  %v3216_v16 = vld [vmem:[%s6099_s0 + $0x530] sm:$0xff] }
  0x92   :  { %4014 = vmatprep.mubr.msk.f32.mxu1 %vm80_vm1, %v3313_v17  ;;  %v3345_v17 = vld [vmem:[%s6099_s0 + $0x730] sm:$0xff] }
  0x94   :  { %3915 = vmatmul.mubr.msk.f32.gmra.mrb[70].mxu0 %vm80_vm1, %v3185_v18  ;;  %v3217_v18 = vld [vmem:[%s6099_s0 + $0x538] sm:$0xff] }
  0x95   :  { %4015 = vmatmul.mubr.msk.f32.gmra.mrb[70].mxu1 %vm80_vm1, %v3314_v19  ;;  %3917 = vmatprep.mubr.msk.f32.mxu0 %vm80_vm1, %v3186_v20  ;;  %v3346_v19 = vld [vmem:[%s6099_s0 + $0x738] sm:$0xff]  ;;  %v3218_v20 = vld [vmem:[%s6099_s0 + $0x540] sm:$0xff] }
  0x96   :  { %4017 = vmatprep.mubr.msk.f32.mxu1 %vm80_vm1, %v3315_v21  ;;  %v3347_v21 = vld [vmem:[%s6099_s0 + $0x740] sm:$0xff] }
  0x98   :  { %3918 = vmatmul.mubr.msk.f32.gmra.mrb[72].mxu0 %vm80_vm1, %v3187_v22  ;;  %v3219_v22 = vld [vmem:[%s6099_s0 + $0x548] sm:$0xff] }
  0x99   :  { %4018 = vmatmul.mubr.msk.f32.gmra.mrb[72].mxu1 %vm80_vm1, %v3316_v23  ;;  %3920 = vmatprep.mubr.msk.f32.mxu0 %vm80_vm1, %v3188_v24  ;;  %v3348_v23 = vld [vmem:[%s6099_s0 + $0x748] sm:$0xff]  ;;  %v3220_v24 = vld [vmem:[%s6099_s0 + $0x550] sm:$0xff] }
  0x9a   :  { %4020 = vmatprep.mubr.msk.f32.mxu1 %vm80_vm1, %v3317_v25  ;;  %v3349_v25 = vld [vmem:[%s6099_s0 + $0x750] sm:$0xff] }
  0x9c   :  { %3921 = vmatmul.mubr.msk.f32.gmra.mrb[74].mxu0 %vm80_vm1, %v3189_v26  ;;  %v3221_v26 = vld [vmem:[%s6099_s0 + $0x558] sm:$0xff] }
  0x9d   :  { %4021 = vmatmul.mubr.msk.f32.gmra.mrb[74].mxu1 %vm80_vm1, %v3318_v27  ;;  %3923 = vmatprep.mubr.msk.f32.mxu0 %vm80_vm1, %v3190_v28  ;;  %v3350_v27 = vld [vmem:[%s6099_s0 + $0x758] sm:$0xff]  ;;  %v3222_v28 = vld [vmem:[%s6099_s0 + $0x560] sm:$0xff] }
  0x9e   :  { %4023 = vmatprep.mubr.msk.f32.mxu1 %vm80_vm1, %v3319_v29  ;;  %v3351_v29 = vld [vmem:[%s6099_s0 + $0x760] sm:$0xff] }
  0xa0   :  { %3924 = vmatmul.mubr.msk.f32.gmra.mrb[76].mxu0 %vm80_vm1, %v3191_v30 }
  0xa1   :  { %4024 = vmatmul.mubr.msk.f32.gmra.mrb[76].mxu1 %vm80_vm1, %v3320_v31  ;;  %3926 = vmatprep.mubr.msk.f32.mxu0 %vm80_vm1, %v3192_v32 }
  0xa2   :  { %4026 = vmatprep.mubr.msk.f32.mxu1 %vm80_vm1, %v3321_v33 }
  0xa4   :  { %3927 = vmatmul.mubr.msk.f32.gmra.mrb[78].mxu0 %vm80_vm1, %v3193_v34 }
  0xa5   :  { %4027 = vmatmul.mubr.msk.f32.gmra.mrb[78].mxu1 %vm80_vm1, %v3322_v35  ;;  %3929 = vmatprep.mubr.msk.f32.mxu0 %vm80_vm1, %v3194_v36  ;;  %v3223_v36 = vld [vmem:[%s6099_s0 + $0x568] sm:$0xff] }
  0xa6   :  { %4029 = vmatprep.mubr.msk.f32.mxu1 %vm80_vm1, %v3323_v37  ;;  %v3352_v37 = vld [vmem:[%s6099_s0 + $0x768] sm:$0xff] }
  0xa8   :  { %3930 = vmatmul.mubr.msk.f32.gmra.mrb[80].mxu0 %vm80_vm1, %v3195_v38  ;;  %v3224_v38 = vld [vmem:[%s6099_s0 + $0x570] sm:$0xff] }
  0xa9   :  { %4030 = vmatmul.mubr.msk.f32.gmra.mrb[80].mxu1 %vm80_vm1, %v3324_v39  ;;  %3932 = vmatprep.mubr.msk.f32.mxu0 %vm80_vm1, %v3196_v40  ;;  %v3353_v39 = vld [vmem:[%s6099_s0 + $0x770] sm:$0xff] }
  0xaa   :  { %4032 = vmatprep.mubr.msk.f32.mxu1 %vm80_vm1, %v3325_v41 }
  0xac   :  { %3933 = vmatmul.mubr.msk.f32.gmra.mrb[82].mxu0 %vm80_vm1, %v3197_v42 }
  0xad   :  { %4033 = vmatmul.mubr.msk.f32.gmra.mrb[82].mxu1 %vm80_vm1, %v3326_v43  ;;  %3935 = vmatprep.mubr.msk.f32.mxu0 %vm80_vm1, %v3198_v44 }
  0xae   :  { %4035 = vmatprep.mubr.msk.f32.mxu1 %vm80_vm1, %v3327_v45 }
  0xb0   :  { %3936 = vmatmul.mubr.msk.f32.gmra.mrb[84].mxu0 %vm80_vm1, %v3199_v46  ;;  %v3225_v46 = vld [vmem:[%s6099_s0 + $0x578] sm:$0xff] }
  0xb1   :  { %4036 = vmatmul.mubr.msk.f32.gmra.mrb[84].mxu1 %vm80_vm1, %v3328_v47  ;;  %3938 = vmatprep.mubr.msk.f32.mxu0 %vm80_vm1, %v3200_v48  ;;  %v3354_v47 = vld [vmem:[%s6099_s0 + $0x778] sm:$0xff]  ;;  %v3226_v48 = vld [vmem:[%s6099_s0 + $0x580] sm:$0xff] }
  0xb2   :  { %4038 = vmatprep.mubr.msk.f32.mxu1 %vm80_vm1, %v3329_v49  ;;  %v3355_v49 = vld [vmem:[%s6099_s0 + $0x780] sm:$0xff] }
  0xb4   :  { %3939 = vmatmul.mubr.msk.f32.gmra.mrb[86].mxu0 %vm80_vm1, %v3201_v50 }
  0xb5   :  { %4039 = vmatmul.mubr.msk.f32.gmra.mrb[86].mxu1 %vm80_vm1, %v3330_v51  ;;  %3941 = vmatprep.mubr.msk.f32.mxu0 %vm80_vm1, %v3202_v52 }
  0xb6   :  { %4041 = vmatprep.mubr.msk.f32.mxu1 %vm80_vm1, %v3331_v53 }
  0xb8   :  { %3942 = vmatmul.mubr.msk.f32.gmra.mrb[88].mxu0 %vm80_vm1, %v3203_v54 }
  0xb9   :  { %4042 = vmatmul.mubr.msk.f32.gmra.mrb[88].mxu1 %vm80_vm1, %v3332_v55  ;;  %3944 = vmatprep.mubr.msk.f32.mxu0 %vm80_vm1, %v3204_v56  ;;  %v3227_v56 = vld [vmem:[%s6099_s0 + $0x588] sm:$0xff] }
  0xba   :  { %4044 = vmatprep.mubr.msk.f32.mxu1 %vm80_vm1, %v3333_v57  ;;  %v3356_v57 = vld [vmem:[%s6099_s0 + $0x788] sm:$0xff] }
  0xbc   :  { %3945 = vmatmul.mubr.msk.f32.gmra.mrb[90].mxu0 %vm80_vm1, %v3205_v58  ;;  %v3228_v58 = vld [vmem:[%s6099_s0 + $0x590] sm:$0xff] }
  0xbd   :  { %4045 = vmatmul.mubr.msk.f32.gmra.mrb[90].mxu1 %vm80_vm1, %v3334_v59  ;;  %3947 = vmatprep.mubr.msk.f32.mxu0 %vm80_vm1, %v3206_v60  ;;  %v3357_v59 = vld [vmem:[%s6099_s0 + $0x790] sm:$0xff] }
  0xbe   :  { %4047 = vmatprep.mubr.msk.f32.mxu1 %vm80_vm1, %v3335_v61 }
  0xc0   :  { %3948 = vmatmul.mubr.msk.f32.gmra.mrb[92].mxu0 %vm80_vm1, %v3207_v62 }
  0xc1   :  { %4048 = vmatmul.mubr.msk.f32.gmra.mrb[92].mxu1 %vm80_vm1, %v3336_v63  ;;  %3950 = vmatprep.mubr.msk.f32.mxu0 %vm80_vm1, %v3208_v0 }
  0xc2   :  { %4050 = vmatprep.mubr.msk.f32.mxu1 %vm80_vm1, %v3337_v1 }
  0xc4   :  { %3951 = vmatmul.mubr.msk.f32.gmra.mrb[94].mxu0 %vm80_vm1, %v3209_v2  ;;  %v3229_v2 = vld [vmem:[%s6099_s0 + $0x598] sm:$0xff] }
  0xc5   :  { %4051 = vmatmul.mubr.msk.f32.gmra.mrb[94].mxu1 %vm80_vm1, %v3338_v3  ;;  %3953 = vmatprep.mubr.msk.f32.mxu0 %vm80_vm1, %v3210_v4  ;;  %v3358_v3 = vld [vmem:[%s6099_s0 + $0x798] sm:$0xff]  ;;  %v3230_v4 = vld [vmem:[%s6099_s0 + $0x5a0] sm:$0xff] }
  0xc6   :  { %4053 = vmatprep.mubr.msk.f32.mxu1 %vm80_vm1, %v3339_v5  ;;  %v3359_v5 = vld [vmem:[%s6099_s0 + $0x7a0] sm:$0xff] }
  0xc8   :  { %3954 = vmatmul.mubr.msk.f32.gmra.mrb[96].mxu0 %vm80_vm1, %v3211_v6 }
  0xc9   :  { %4054 = vmatmul.mubr.msk.f32.gmra.mrb[96].mxu1 %vm80_vm1, %v3340_v7  ;;  %3956 = vmatprep.mubr.msk.f32.mxu0 %vm80_vm1, %v3212_v8 }
  0xca   :  { %4056 = vmatprep.mubr.msk.f32.mxu1 %vm80_vm1, %v3341_v9 }
  0xcc   :  { %3957 = vmatmul.mubr.msk.f32.gmra.mrb[98].mxu0 %vm80_vm1, %v3213_v10 }
  0xcd   :  { %4057 = vmatmul.mubr.msk.f32.gmra.mrb[98].mxu1 %vm80_vm1, %v3342_v11  ;;  %3959 = vmatprep.mubr.msk.f32.mxu0 %vm80_vm1, %v3214_v12  ;;  %v3231_v12 = vld [vmem:[%s6099_s0 + $0x5a8] sm:$0xff] }
  0xce   :  { %4059 = vmatprep.mubr.msk.f32.mxu1 %vm80_vm1, %v3343_v13  ;;  %v3360_v13 = vld [vmem:[%s6099_s0 + $0x7a8] sm:$0xff] }
  0xd0   :  { %3960 = vmatmul.mubr.msk.f32.gmra.mrb[100].mxu0 %vm80_vm1, %v3215_v14  ;;  %v3232_v14 = vld [vmem:[%s6099_s0 + $0x5b0] sm:$0xff] }
  0xd1   :  { %4060 = vmatmul.mubr.msk.f32.gmra.mrb[100].mxu1 %vm80_vm1, %v3344_v15  ;;  %3962 = vmatprep.mubr.msk.f32.mxu0 %vm80_vm1, %v3216_v16  ;;  %v3361_v15 = vld [vmem:[%s6099_s0 + $0x7b0] sm:$0xff] }
  0xd2   :  { %4062 = vmatprep.mubr.msk.f32.mxu1 %vm80_vm1, %v3345_v17 }
  0xd4   :  { %3963 = vmatmul.mubr.msk.f32.gmra.mrb[102].mxu0 %vm80_vm1, %v3217_v18 }
  0xd5   :  { %4063 = vmatmul.mubr.msk.f32.gmra.mrb[102].mxu1 %vm80_vm1, %v3346_v19  ;;  %3965 = vmatprep.mubr.msk.f32.mxu0 %vm80_vm1, %v3218_v20 }
  0xd6   :  { %4065 = vmatprep.mubr.msk.f32.mxu1 %vm80_vm1, %v3347_v21  ;;  %v5590_v21 = vld [vmem:[%s6100_s2] ss:$0 sm:$0xff] }
  0xd8   :  { %3966 = vmatmul.mubr.msk.f32.gmra.mrb[104].mxu0 %vm80_vm1, %v3219_v22  ;;  %v3233_v22 = vld [vmem:[%s6099_s0 + $0x5b8] sm:$0xff] }
  0xd9   :  { %4066 = vmatmul.mubr.msk.f32.gmra.mrb[104].mxu1 %vm80_vm1, %v3348_v23  ;;  %3968 = vmatprep.mubr.msk.f32.mxu0 %vm80_vm1, %v3220_v24  ;;  %v3362_v23 = vld [vmem:[%s6099_s0 + $0x7b8] sm:$0xff]  ;;  %v3234_v24 = vld [vmem:[%s6099_s0 + $0x5c0] sm:$0xff] }
  0xda   :  { %4068 = vmatprep.mubr.msk.f32.mxu1 %vm80_vm1, %v3349_v25  ;;  %v3363_v25 = vld [vmem:[%s6099_s0 + $0x7c0] sm:$0xff] }
  0xdb   :  { %v5041_v30 = vpop.f32.mrb[0].mxu0 }
  0xdc   :  { %v5043_v31 = vpop.f32.mrb[0].mxu1  ;;  %v5047_v33 = vpop.f32.mrb[1].mxu0  ;;  %3969 = vmatmul.mubr.msk.f32.gmra.mrb[106].mxu0 %vm80_vm1, %v3221_v26 }
  0xdd   :  { %v5049_v34 = vpop.f32.mrb[1].mxu1  ;;  %4069 = vmatmul.mubr.msk.f32.gmra.mrb[106].mxu1 %vm80_vm1, %v3350_v27  ;;  %3971 = vmatprep.mubr.msk.f32.mxu0 %vm80_vm1, %v3222_v28 }
  0xde   :  { %4071 = vmatprep.mubr.msk.f32.mxu1 %vm80_vm1, %v3351_v29 }
  0xdf   :  { %v5069_v40 = vpop.f32.mrb[2].mxu0 }
  0xe0   :  { %v5071_v41 = vpop.f32.mrb[2].mxu1  ;;  %v5075_v43 = vpop.f32.mrb[3].mxu0  ;;  %3972 = vmatmul.mubr.msk.f32.gmra.mrb[108].mxu0 %vm80_vm1, %v3223_v36 }
  0xe1   :  { %v5077_v44 = vpop.f32.mrb[3].mxu1  ;;  %4072 = vmatmul.mubr.msk.f32.gmra.mrb[108].mxu1 %vm80_vm1, %v3352_v37  ;;  %3974 = vmatprep.mubr.msk.f32.mxu0 %vm80_vm1, %v3224_v38  ;;  %v3235_v38 = vld [vmem:[%s6099_s0 + $0x5c8] sm:$0xff] }
  0xe2   :  { %4074 = vmatprep.mubr.msk.f32.mxu1 %vm80_vm1, %v3353_v39  ;;  %v3364_v39 = vld [vmem:[%s6099_s0 + $0x7c8] sm:$0xff] }
  0xe3   :  { %v5097_v50 = vpop.f32.mrb[4].mxu0 }
  0xe4   :  { %v5099_v51 = vpop.f32.mrb[4].mxu1  ;;  %v5103_v53 = vpop.f32.mrb[5].mxu0  ;;  %3975 = vmatmul.mubr.msk.f32.gmra.mrb[110].mxu0 %vm80_vm1, %v3225_v46  ;;  %v3236_v46 = vld [vmem:[%s6099_s0 + $0x5d0] sm:$0xff] }
  0xe5   :  { %v5105_v54 = vpop.f32.mrb[5].mxu1  ;;  %4075 = vmatmul.mubr.msk.f32.gmra.mrb[110].mxu1 %vm80_vm1, %v3354_v47  ;;  %3977 = vmatprep.mubr.msk.f32.mxu0 %vm80_vm1, %v3226_v48  ;;  %v3365_v47 = vld [vmem:[%s6099_s0 + $0x7d0] sm:$0xff] }
  0xe6   :  { %4077 = vmatprep.mubr.msk.f32.mxu1 %vm80_vm1, %v3355_v49 }
  0xe7   :  { %v5125_v60 = vpop.f32.mrb[6].mxu0 }
  0xe8   :  { %v5127_v61 = vpop.f32.mrb[6].mxu1  ;;  %v5131_v63 = vpop.f32.mrb[7].mxu0  ;;  %3978 = vmatmul.mubr.msk.f32.gmra.mrb[112].mxu0 %vm80_vm1, %v3227_v56 }
  0xe9   :  { %v5133_v0 = vpop.f32.mrb[7].mxu1  ;;  %4078 = vmatmul.mubr.msk.f32.gmra.mrb[112].mxu1 %vm80_vm1, %v3356_v57  ;;  %3980 = vmatprep.mubr.msk.f32.mxu0 %vm80_vm1, %v3228_v58 }
  0xea   :  { %4080 = vmatprep.mubr.msk.f32.mxu1 %vm80_vm1, %v3357_v59 }
  0xeb   :  { %v5153_v6 = vpop.f32.mrb[8].mxu0 }
  0xec   :  { %v5155_v7 = vpop.f32.mrb[8].mxu1  ;;  %v5159_v9 = vpop.f32.mrb[9].mxu0  ;;  %3981 = vmatmul.mubr.msk.f32.gmra.mrb[114].mxu0 %vm80_vm1, %v3229_v2  ;;  %v3237_v2 = vld [vmem:[%s6099_s0 + $0x5d8] sm:$0xff] }
  0xed   :  { %v5161_v10 = vpop.f32.mrb[9].mxu1  ;;  %4081 = vmatmul.mubr.msk.f32.gmra.mrb[114].mxu1 %vm80_vm1, %v3358_v3  ;;  %3983 = vmatprep.mubr.msk.f32.mxu0 %vm80_vm1, %v3230_v4  ;;  %v3366_v3 = vld [vmem:[%s6099_s0 + $0x7d8] sm:$0xff]  ;;  %v3238_v4 = vld [vmem:[%s6099_s0 + $0x5e0] sm:$0xff] }
  0xee   :  { %4083 = vmatprep.mubr.msk.f32.mxu1 %vm80_vm1, %v3359_v5  ;;  %v3367_v5 = vld [vmem:[%s6099_s0 + $0x7e0] sm:$0xff] }
  0xef   :  { %v5181_v16 = vpop.f32.mrb[10].mxu0 }
  0xf0   :  { %v5183_v17 = vpop.f32.mrb[10].mxu1  ;;  %v5187_v19 = vpop.f32.mrb[11].mxu0  ;;  %3984 = vmatmul.mubr.msk.f32.gmra.mrb[116].mxu0 %vm80_vm1, %v3231_v12 }
  0xf1   :  { %v5189_v20 = vpop.f32.mrb[11].mxu1  ;;  %4084 = vmatmul.mubr.msk.f32.gmra.mrb[116].mxu1 %vm80_vm1, %v3360_v13  ;;  %3986 = vmatprep.mubr.msk.f32.mxu0 %vm80_vm1, %v3232_v14 }
  0xf2   :  { %4086 = vmatprep.mubr.msk.f32.mxu1 %vm80_vm1, %v3361_v15 }
  0xf3   :  { %v5209_v26 = vpop.f32.mrb[12].mxu0 }
  0xf4   :  { %v5211_v27 = vpop.f32.mrb[12].mxu1  ;;  %v5215_v29 = vpop.f32.mrb[13].mxu0  ;;  %3987 = vmatmul.mubr.msk.f32.gmra.mrb[118].mxu0 %vm80_vm1, %v3233_v22 }
  0xf5   :  { %v5217_v36 = vpop.f32.mrb[13].mxu1  ;;  %4087 = vmatmul.mubr.msk.f32.gmra.mrb[118].mxu1 %vm80_vm1, %v3362_v23  ;;  %3989 = vmatprep.mubr.msk.f32.mxu0 %vm80_vm1, %v3234_v24  ;;  %v3239_v24 = vld [vmem:[%s6099_s0 + $0x5e8] sm:$0xff]  ;;  %v3241_v23 = vld [vmem:[%s6099_s0 + $0x5f8] sm:$0xff] }
  0xf6   :  { %4089 = vmatprep.mubr.msk.f32.mxu1 %vm80_vm1, %v3363_v25  ;;  %v3368_v25 = vld [vmem:[%s6099_s0 + $0x7e8] sm:$0xff] }
  0xf7   :  { %v5237_v48 = vpop.f32.mrb[14].mxu0 }
  0xf8   :  { %v5239_v49 = vpop.f32.mrb[14].mxu1  ;;  %v5243_v57 = vpop.f32.mrb[15].mxu0  ;;  %3990 = vmatmul.mubr.msk.f32.gmra.mrb[120].mxu0 %vm80_vm1, %v3235_v38  ;;  %v3240_v38 = vld [vmem:[%s6099_s0 + $0x5f0] sm:$0xff] }
  0xf9   :  { %v5245_v58 = vpop.f32.mrb[15].mxu1  ;;  %4090 = vmatmul.mubr.msk.f32.gmra.mrb[120].mxu1 %vm80_vm1, %v3364_v39  ;;  %3992 = vmatprep.mubr.msk.f32.mxu0 %vm80_vm1, %v3236_v46  ;;  %v3369_v39 = vld [vmem:[%s6099_s0 + $0x7f0] sm:$0xff] }
  0xfa   :  { %4092 = vmatprep.mubr.msk.f32.mxu1 %vm80_vm1, %v3365_v47 }
  0xfb   :  { %v5265_v12 = vpop.f32.mrb[16].mxu0 }
  0xfc   :  { %v5267_v13 = vpop.f32.mrb[16].mxu1  ;;  %v5271_v15 = vpop.f32.mrb[17].mxu0  ;;  %3993 = vmatmul.mubr.msk.f32.gmra.mrb[122].mxu0 %vm80_vm1, %v3237_v2  ;;  %v3370_v2 = vld [vmem:[%s6099_s0 + $0x7f8] sm:$0xff] }
  0xfd   :  { %v5273_v22 = vpop.f32.mrb[17].mxu1  ;;  %4093 = vmatmul.mubr.msk.f32.gmra.mrb[122].mxu1 %vm80_vm1, %v3366_v3  ;;  %3995 = vmatprep.mubr.msk.f32.mxu0 %vm80_vm1, %v3238_v4 }
  0xfe   :  { %4095 = vmatprep.mubr.msk.f32.mxu1 %vm80_vm1, %v3367_v5 }
  0xff   :  { %v5293_v46 = vpop.f32.mrb[18].mxu0 }
 0x100   :  { %v5295_v47 = vpop.f32.mrb[18].mxu1  ;;  %v5299_v3 = vpop.f32.mrb[19].mxu0  ;;  %3996 = vmatmul.mubr.msk.f32.gmra.mrb[124].mxu0 %vm80_vm1, %v3239_v24 }
 0x101   :  { %v5301_v4 = vpop.f32.mrb[19].mxu1  ;;  %4096 = vmatmul.mubr.msk.f32.gmra.mrb[124].mxu1 %vm80_vm1, %v3368_v25  ;;  %3998 = vmatprep.mubr.msk.f32.mxu0 %vm80_vm1, %v3240_v38 }
 0x102   :  { %4098 = vmatprep.mubr.msk.f32.mxu1 %vm80_vm1, %v3369_v39 }
 0x103   :  { %v5315_v14 = vpop.f32.mrb[20].mxu0 }
 0x104   :  { %v5317_v24 = vpop.f32.mrb[20].mxu1  ;;  %v5321_v5 = vpop.f32.mrb[21].mxu0  ;;  %3999 = vmatmul.mubr.msk.f32.gmra.mrb[126].mxu0 %vm80_vm1, %v3241_v23 }
 0x105   :  { %v5323_v38 = vpop.f32.mrb[21].mxu1  ;;  %4099 = vmatmul.mubr.msk.f32.gmra.mrb[126].mxu1 %vm80_vm1, %v3370_v2 }
 0x107   :  { %v5329_v59 = vpop.f32.mrb[22].mxu0 }
 0x108   :  { %v5331_v56 = vpop.f32.mrb[22].mxu1  ;;  %v5335_v28 = vpop.f32.mrb[23].mxu0 }
 0x109   :  { %v5337_v25 = vpop.f32.mrb[23].mxu1 }
 0x10b   :  { %v5341_v23 = vpop.f32.mrb[24].mxu0 }
 0x10c   :  { %v5343_v2 = vpop.f32.mrb[24].mxu1  ;;  %v5347_v18 = vpop.f32.mrb[25].mxu0 }
 0x10d   :  { %6183 = vst [vmem:[#allocation2_spill] sm:$0xff] %v5343_v2  ;;  %6184 = vst [vmem:[#allocation3_spill] sm:$0xff] %v5347_v18  ;;  %v5349_v11 = vpop.f32.mrb[25].mxu1 }
 0x10e   :  { %6185 = vst [vmem:[#allocation4_spill] sm:$0xff] %v5349_v11  ;;  %v6263_v11 = vmax.f32 %v5047_v33, %v5049_v34  ;;  %v6265_v34 = vmax.f32 %v5075_v43, %v5077_v44 }
 0x10f   :  { %v5353_v8 = vpop.f32.mrb[26].mxu0 }
 0x110   :  { %6186 = vst [vmem:[#allocation5_spill] sm:$0xff] %v5353_v8  ;;  %v5355_v1 = vpop.f32.mrb[26].mxu1  ;;  %v5359_v62 = vpop.f32.mrb[27].mxu0  ;;  %v6262_v8 = vmax.f32 %v5041_v30, %v5043_v31  ;;  %v6264_v30 = vmax.f32 %v5069_v40, %v5071_v41 }
 0x111   :  { %6187 = vst [vmem:[#allocation6_spill] sm:$0xff] %v5355_v1  ;;  %6188 = vst [vmem:[#allocation7_spill] sm:$0xff] %v5359_v62  ;;  %v5361_v55 = vpop.f32.mrb[27].mxu1 }
 0x112   :  { %6189 = vst [vmem:[#allocation8_spill] sm:$0xff] %v5361_v55 }
 0x113   :  { %v5365_v52 = vpop.f32.mrb[28].mxu0 }
 0x114   :  { %6190 = vst [vmem:[#allocation9_spill] sm:$0xff] %v5365_v52  ;;  %v5367_v45 = vpop.f32.mrb[28].mxu1  ;;  %v5371_v42 = vpop.f32.mrb[29].mxu0 }
 0x115   :  { %6191 = vst [vmem:[#allocation10_spill] sm:$0xff] %v5367_v45  ;;  %6192 = vst [vmem:[#allocation11_spill] sm:$0xff] %v5371_v42  ;;  %v5373_v35 = vpop.f32.mrb[29].mxu1 }
 0x116   :  { %6193 = vst [vmem:[#allocation12_spill] sm:$0xff] %v5373_v35 }
 0x117   :  { %v5377_v32 = vpop.f32.mrb[30].mxu0 }
 0x118   :  { %6194 = vst [vmem:[#allocation13_spill] sm:$0xff] %v5377_v32  ;;  %v5379_v1 = vpop.f32.mrb[30].mxu1  ;;  %v5383_v55 = vpop.f32.mrb[31].mxu0 }
 0x119   :  { %6195 = vst [vmem:[#allocation14_spill] sm:$0xff] %v5379_v1  ;;  %6196 = vst [vmem:[#allocation15_spill] sm:$0xff] %v5383_v55  ;;  %v5385_v62 = vpop.f32.mrb[31].mxu1 }
 0x11a   :  { %6197 = vst [vmem:[#allocation16_spill] sm:$0xff] %v5385_v62 }
 0x11b   :  { %v5389_v45 = vpop.f32.mrb[32].mxu0 }
 0x11c   :  { %6198 = vst [vmem:[#allocation17_spill] sm:$0xff] %v5389_v45  ;;  %v5391_v52 = vpop.f32.mrb[32].mxu1  ;;  %v5395_v35 = vpop.f32.mrb[33].mxu0 }
 0x11d   :  { %6199 = vst [vmem:[#allocation18_spill] sm:$0xff] %v5391_v52  ;;  %6200 = vst [vmem:[#allocation19_spill] sm:$0xff] %v5395_v35  ;;  %v5397_v42 = vpop.f32.mrb[33].mxu1 }
 0x11e   :  { %6201 = vst [vmem:[#allocation20_spill] sm:$0xff] %v5397_v42 }
 0x11f   :  { %v5401_v1 = vpop.f32.mrb[34].mxu0 }
 0x120   :  { %6202 = vst [vmem:[#allocation21_spill] sm:$0xff] %v5401_v1  ;;  %v5403_v32 = vpop.f32.mrb[34].mxu1  ;;  %v5407_v62 = vpop.f32.mrb[35].mxu0 }
 0x121   :  { %6203 = vst [vmem:[#allocation22_spill] sm:$0xff] %v5403_v32  ;;  %6204 = vst [vmem:[#allocation23_spill] sm:$0xff] %v5407_v62  ;;  %v5409_v55 = vpop.f32.mrb[35].mxu1 }
 0x122   :  { %6205 = vst [vmem:[#allocation24_spill] sm:$0xff] %v5409_v55 }
 0x123   :  { %v5413_v52 = vpop.f32.mrb[36].mxu0 }
 0x124   :  { %6206 = vst [vmem:[#allocation25_spill] sm:$0xff] %v5413_v52  ;;  %v5415_v45 = vpop.f32.mrb[36].mxu1  ;;  %v5419_v42 = vpop.f32.mrb[37].mxu0 }
 0x125   :  { %6207 = vst [vmem:[#allocation26_spill] sm:$0xff] %v5415_v45  ;;  %6208 = vst [vmem:[#allocation27_spill] sm:$0xff] %v5419_v42  ;;  %v5421_v35 = vpop.f32.mrb[37].mxu1 }
 0x126   :  { %6209 = vst [vmem:[#allocation28_spill] sm:$0xff] %v5421_v35 }
 0x127   :  { %v5425_v32 = vpop.f32.mrb[38].mxu0 }
 0x128   :  { %6210 = vst [vmem:[#allocation29_spill] sm:$0xff] %v5425_v32  ;;  %v5427_v1 = vpop.f32.mrb[38].mxu1  ;;  %v5431_v55 = vpop.f32.mrb[39].mxu0 }
 0x129   :  { %6211 = vst [vmem:[#allocation30_spill] sm:$0xff] %v5427_v1  ;;  %6212 = vst [vmem:[#allocation31_spill] sm:$0xff] %v5431_v55  ;;  %v5433_v62 = vpop.f32.mrb[39].mxu1 }
 0x12a   :  { %6213 = vst [vmem:[#allocation32_spill] sm:$0xff] %v5433_v62 }
 0x12b   :  { %v5437_v45 = vpop.f32.mrb[40].mxu0 }
 0x12c   :  { %6214 = vst [vmem:[#allocation33_spill] sm:$0xff] %v5437_v45  ;;  %v5439_v52 = vpop.f32.mrb[40].mxu1  ;;  %v5443_v35 = vpop.f32.mrb[41].mxu0 }
 0x12d   :  { %6215 = vst [vmem:[#allocation34_spill] sm:$0xff] %v5439_v52  ;;  %6216 = vst [vmem:[#allocation35_spill] sm:$0xff] %v5443_v35  ;;  %v5445_v42 = vpop.f32.mrb[41].mxu1 }
 0x12e   :  { %6217 = vst [vmem:[#allocation36_spill] sm:$0xff] %v5445_v42 }
 0x12f   :  { %v5449_v1 = vpop.f32.mrb[42].mxu0 }
 0x130   :  { %6218 = vst [vmem:[#allocation37_spill] sm:$0xff] %v5449_v1  ;;  %v5451_v32 = vpop.f32.mrb[42].mxu1  ;;  %v5455_v62 = vpop.f32.mrb[43].mxu0 }
 0x131   :  { %6219 = vst [vmem:[#allocation38_spill] sm:$0xff] %v5451_v32  ;;  %6220 = vst [vmem:[#allocation39_spill] sm:$0xff] %v5455_v62  ;;  %v5457_v55 = vpop.f32.mrb[43].mxu1 }
 0x132   :  { %6221 = vst [vmem:[#allocation40_spill] sm:$0xff] %v5457_v55 }
 0x133   :  { %v5461_v52 = vpop.f32.mrb[44].mxu0 }
 0x134   :  { %6222 = vst [vmem:[#allocation41_spill] sm:$0xff] %v5461_v52  ;;  %v5463_v45 = vpop.f32.mrb[44].mxu1  ;;  %v5467_v42 = vpop.f32.mrb[45].mxu0 }
 0x135   :  { %6223 = vst [vmem:[#allocation42_spill] sm:$0xff] %v5463_v45  ;;  %6224 = vst [vmem:[#allocation43_spill] sm:$0xff] %v5467_v42  ;;  %v5469_v35 = vpop.f32.mrb[45].mxu1 }
 0x136   :  { %6225 = vst [vmem:[#allocation44_spill] sm:$0xff] %v5469_v35 }
 0x137   :  { %v5473_v32 = vpop.f32.mrb[46].mxu0 }
 0x138   :  { %6226 = vst [vmem:[#allocation45_spill] sm:$0xff] %v5473_v32  ;;  %v5475_v1 = vpop.f32.mrb[46].mxu1  ;;  %v5479_v55 = vpop.f32.mrb[47].mxu0 }
 0x139   :  { %6227 = vst [vmem:[#allocation46_spill] sm:$0xff] %v5475_v1  ;;  %6228 = vst [vmem:[#allocation47_spill] sm:$0xff] %v5479_v55  ;;  %v5481_v62 = vpop.f32.mrb[47].mxu1 }
 0x13a   :  { %6229 = vst [vmem:[#allocation48_spill] sm:$0xff] %v5481_v62 }
 0x13b   :  { %v5485_v45 = vpop.f32.mrb[48].mxu0 }
 0x13c   :  { %6230 = vst [vmem:[#allocation49_spill] sm:$0xff] %v5485_v45  ;;  %v5487_v52 = vpop.f32.mrb[48].mxu1  ;;  %v5491_v35 = vpop.f32.mrb[49].mxu0 }
 0x13d   :  { %6231 = vst [vmem:[#allocation50_spill] sm:$0xff] %v5487_v52  ;;  %6232 = vst [vmem:[#allocation51_spill] sm:$0xff] %v5491_v35  ;;  %v5493_v42 = vpop.f32.mrb[49].mxu1 }
 0x13e   :  { %6233 = vst [vmem:[#allocation52_spill] sm:$0xff] %v5493_v42 }
 0x13f   :  { %v5497_v1 = vpop.f32.mrb[50].mxu0 }
 0x140   :  { %6234 = vst [vmem:[#allocation53_spill] sm:$0xff] %v5497_v1  ;;  %v5499_v32 = vpop.f32.mrb[50].mxu1  ;;  %v5503_v62 = vpop.f32.mrb[51].mxu0 }
 0x141   :  { %6235 = vst [vmem:[#allocation54_spill] sm:$0xff] %v5499_v32  ;;  %6236 = vst [vmem:[#allocation55_spill] sm:$0xff] %v5503_v62  ;;  %v5505_v55 = vpop.f32.mrb[51].mxu1 }
 0x142   :  { %6237 = vst [vmem:[#allocation56_spill] sm:$0xff] %v5505_v55 }
 0x143   :  { %v5509_v52 = vpop.f32.mrb[52].mxu0 }
 0x144   :  { %6238 = vst [vmem:[#allocation57_spill] sm:$0xff] %v5509_v52  ;;  %v5511_v45 = vpop.f32.mrb[52].mxu1  ;;  %v5515_v42 = vpop.f32.mrb[53].mxu0 }
 0x145   :  { %6239 = vst [vmem:[#allocation58_spill] sm:$0xff] %v5511_v45  ;;  %6240 = vst [vmem:[#allocation59_spill] sm:$0xff] %v5515_v42  ;;  %v5517_v35 = vpop.f32.mrb[53].mxu1 }
 0x146   :  { %6241 = vst [vmem:[#allocation60_spill] sm:$0xff] %v5517_v35 }
 0x147   :  { %v5521_v32 = vpop.f32.mrb[54].mxu0 }
 0x148   :  { %6242 = vst [vmem:[#allocation61_spill] sm:$0xff] %v5521_v32  ;;  %v5523_v1 = vpop.f32.mrb[54].mxu1  ;;  %v5527_v55 = vpop.f32.mrb[55].mxu0 }
 0x149   :  { %6243 = vst [vmem:[#allocation62_spill] sm:$0xff] %v5523_v1  ;;  %6244 = vst [vmem:[#allocation63_spill] sm:$0xff] %v5527_v55  ;;  %v5529_v62 = vpop.f32.mrb[55].mxu1 }
 0x14a   :  { %6245 = vst [vmem:[#allocation64_spill] sm:$0xff] %v5529_v62 }
 0x14b   :  { %v5533_v45 = vpop.f32.mrb[56].mxu0 }
 0x14c   :  { %6246 = vst [vmem:[#allocation65_spill] sm:$0xff] %v5533_v45  ;;  %v5535_v52 = vpop.f32.mrb[56].mxu1  ;;  %v5539_v35 = vpop.f32.mrb[57].mxu0 }
 0x14d   :  { %6247 = vst [vmem:[#allocation66_spill] sm:$0xff] %v5535_v52  ;;  %6248 = vst [vmem:[#allocation67_spill] sm:$0xff] %v5539_v35  ;;  %v5541_v42 = vpop.f32.mrb[57].mxu1 }
 0x14e   :  { %6249 = vst [vmem:[#allocation68_spill] sm:$0xff] %v5541_v42 }
 0x14f   :  { %v5545_v1 = vpop.f32.mrb[58].mxu0 }
 0x150   :  { %6250 = vst [vmem:[#allocation69_spill] sm:$0xff] %v5545_v1  ;;  %v5547_v32 = vpop.f32.mrb[58].mxu1  ;;  %v5551_v62 = vpop.f32.mrb[59].mxu0 }
 0x151   :  { %6251 = vst [vmem:[#allocation70_spill] sm:$0xff] %v5547_v32  ;;  %6252 = vst [vmem:[#allocation71_spill] sm:$0xff] %v5551_v62  ;;  %v5553_v55 = vpop.f32.mrb[59].mxu1 }
 0x152   :  { %6253 = vst [vmem:[#allocation72_spill] sm:$0xff] %v5553_v55 }
 0x153   :  { %v5557_v52 = vpop.f32.mrb[60].mxu0 }
 0x154   :  { %6254 = vst [vmem:[#allocation73_spill] sm:$0xff] %v5557_v52  ;;  %v5559_v45 = vpop.f32.mrb[60].mxu1  ;;  %v5563_v42 = vpop.f32.mrb[61].mxu0 }
 0x155   :  { %6255 = vst [vmem:[#allocation74_spill] sm:$0xff] %v5559_v45  ;;  %6256 = vst [vmem:[#allocation75_spill] sm:$0xff] %v5563_v42  ;;  %v5565_v35 = vpop.f32.mrb[61].mxu1 }
 0x156   :  { %6257 = vst [vmem:[#allocation76_spill] sm:$0xff] %v5565_v35 }
 0x157   :  { %v5569_v32 = vpop.f32.mrb[62].mxu0 }
 0x158   :  { %6258 = vst [vmem:[#allocation77_spill] sm:$0xff] %v5569_v32  ;;  %v5571_v1 = vpop.f32.mrb[62].mxu1  ;;  %v5575_v55 = vpop.f32.mrb[63].mxu0 }
 0x159   :  { %6259 = vst [vmem:[#allocation78_spill] sm:$0xff] %v5571_v1  ;;  %6260 = vst [vmem:[#allocation79_spill] sm:$0xff] %v5575_v55  ;;  %v5577_v62 = vpop.f32.mrb[63].mxu1 }
 0x15a   :  { %6261 = vst [vmem:[#allocation80_spill] sm:$0xff] %v5577_v62 }
 0x15b   :  { %v3907_v45 = vpop.f32.mrb[64].mxu0 }
 0x15c   :  { %v4007_v52 = vpop.f32.mrb[64].mxu1  ;;  %v2011_v37 = vmax.f32 %v6262_v8, %v3907_v45  ;;  %v1691_v35 = vpop.f32.mrb[65].mxu0 }
 0x15d   :  { %v2397_v42 = vpop.f32.mrb[65].mxu1  ;;  %v2010_v18 = vmax.f32 %v6263_v11, %v1691_v35 }
 0x15e   :  { %v2717_v1 = vmax.f32 %v2011_v37, %v4007_v52 }
 0x15f   :  { %v2716_v32 = vmax.f32 %v2010_v18, %v2397_v42  ;;  %v3910_v39 = vpop.f32.mrb[66].mxu0 }
 0x160   :  { %v4010_v62 = vpop.f32.mrb[66].mxu1  ;;  %v2788_v55 = vadd.f32 %v5590_v21, %v2717_v1  ;;  %v2013_v31 = vmax.f32 %v6264_v30, %v3910_v39  ;;  %v1701_v45 = vpop.f32.mrb[67].mxu0 }
 0x161   :  { %v2407_v8 = vpop.f32.mrb[67].mxu1  ;;  %v2787_v33 = vadd.f32 %v5590_v21, %v2716_v32  ;;  %v2012_v35 = vmax.f32 %v6265_v34, %v1701_v45  ;;  %v6266_v32 = vmax.f32 %v5097_v50, %v5099_v51 }
 0x162   :  { %v2852_v11 = vmax.f32 %v2788_v55, 0.0  ;;  %v2719_v52 = vmax.f32 %v2013_v31, %v4010_v62  ;;  %v6267_v55 = vmax.f32 %v5103_v53, %v5105_v54 }
 0x163   :  { %v2851_v42 = vmax.f32 %v2787_v33, 0.0  ;;  %v2718_v18 = vmax.f32 %v2012_v35, %v2407_v8  ;;  %v3913_v37 = vpop.f32.mrb[68].mxu0  ;;  %v6268_v33 = vmax.f32 %v5125_v60, %v5127_v61 }
 0x164   :  { %v4013_v2 = vpop.f32.mrb[68].mxu1  ;;  %2917 = vst.msk [vmem:[%s6101_s3 + $0x8] sm:$0xff] %vm2915_vm4, %v2852_v11  ;;  %v2790_v40 = vadd.f32 %v5590_v21, %v2719_v52  ;;  %v2015_v41 = vmax.f32 %v6266_v32, %v3913_v37  ;;  %v1711_v1 = vpop.f32.mrb[69].mxu0  ;;  %v6270_v32 = vmax.f32 %v5153_v6, %v5155_v7 }
 0x165   :  { %v2417_v43 = vpop.f32.mrb[69].mxu1  ;;  %2916 = vst.msk [vmem:[%s6101_s3] sm:$0xff] %vm2915_vm4, %v2851_v42  ;;  %v2789_v44 = vadd.f32 %v5590_v21, %v2718_v18  ;;  %v2014_v62 = vmax.f32 %v6267_v55, %v1711_v1 }
 0x166   :  { %v2854_v39 = vmax.f32 %v2790_v40, 0.0  ;;  %v2721_v30 = vmax.f32 %v2015_v41, %v4013_v2  ;;  %v6269_v2 = vmax.f32 %v5131_v63, %v5133_v0 }
 0x167   :  { %v2853_v31 = vmax.f32 %v2789_v44, 0.0  ;;  %v2720_v45 = vmax.f32 %v2014_v62, %v2417_v43  ;;  %v3916_v8 = vpop.f32.mrb[70].mxu0  ;;  %v6271_v43 = vmax.f32 %v5159_v9, %v5161_v10 }
 0x168   :  { %v4016_v50 = vpop.f32.mrb[70].mxu1  ;;  %2919 = vst.msk [vmem:[%s6101_s3 + $0x18] sm:$0xff] %vm2915_vm4, %v2854_v39  ;;  %v2792_v51 = vadd.f32 %v5590_v21, %v2721_v30  ;;  %v2017_v34 = vmax.f32 %v6268_v33, %v3916_v8  ;;  %v1721_v35 = vpop.f32.mrb[71].mxu0 }
 0x169   :  { %v2427_v53 = vpop.f32.mrb[71].mxu1  ;;  %2918 = vst.msk [vmem:[%s6101_s3 + $0x10] sm:$0xff] %vm2915_vm4, %v2853_v31  ;;  %v2791_v54 = vadd.f32 %v5590_v21, %v2720_v45  ;;  %v2016_v11 = vmax.f32 %v6269_v2, %v1721_v35  ;;  %v6272_v45 = vmax.f32 %v5181_v16, %v5183_v17 }
 0x16a   :  { %v2856_v52 = vmax.f32 %v2792_v51, 0.0  ;;  %v2723_v42 = vmax.f32 %v2017_v34, %v4016_v50  ;;  %v6273_v51 = vmax.f32 %v5187_v19, %v5189_v20 }
 0x16b   :  { %v2855_v18 = vmax.f32 %v2791_v54, 0.0  ;;  %v2722_v37 = vmax.f32 %v2016_v11, %v2427_v53  ;;  %v3919_v40 = vpop.f32.mrb[72].mxu0  ;;  %v6274_v11 = vmax.f32 %v5209_v26, %v5211_v27 }
 0x16c   :  { %v4019_v60 = vpop.f32.mrb[72].mxu1  ;;  %2921 = vst.msk [vmem:[%s6101_s3 + $0x28] sm:$0xff] %vm2915_vm4, %v2856_v52  ;;  %v2794_v61 = vadd.f32 %v5590_v21, %v2723_v42  ;;  %v2019_v41 = vmax.f32 %v6270_v32, %v3919_v40  ;;  %v1731_v1 = vpop.f32.mrb[73].mxu0 }
 0x16d   :  { %v2437_v63 = vpop.f32.mrb[73].mxu1  ;;  %2920 = vst.msk [vmem:[%s6101_s3 + $0x20] sm:$0xff] %vm2915_vm4, %v2855_v18  ;;  %v2793_v0 = vadd.f32 %v5590_v21, %v2722_v37  ;;  %v2018_v44 = vmax.f32 %v6271_v43, %v1731_v1  ;;  %v6275_v18 = vmax.f32 %v5215_v29, %v5217_v36  ;;  %v6276_v1 = vmax.f32 %v5237_v48, %v5239_v49 }
 0x16e   :  { %v2858_v55 = vmax.f32 %v2794_v61, 0.0  ;;  %v2725_v62 = vmax.f32 %v2019_v41, %v4019_v60  ;;  %v6277_v43 = vmax.f32 %v5243_v57, %v5245_v58 }
 0x16f   :  { %v2857_v39 = vmax.f32 %v2793_v0, 0.0  ;;  %v2724_v30 = vmax.f32 %v2018_v44, %v2437_v63  ;;  %v3922_v31 = vpop.f32.mrb[74].mxu0 }
 0x170   :  { %v4022_v6 = vpop.f32.mrb[74].mxu1  ;;  %2923 = vst.msk [vmem:[%s6101_s3 + $0x38] sm:$0xff] %vm2915_vm4, %v2858_v55  ;;  %v2796_v7 = vadd.f32 %v5590_v21, %v2725_v62  ;;  %v2021_v8 = vmax.f32 %v6272_v45, %v3922_v31  ;;  %v1741_v50 = vpop.f32.mrb[75].mxu0 }
 0x171   :  { %v2447_v9 = vpop.f32.mrb[75].mxu1  ;;  %2922 = vst.msk [vmem:[%s6101_s3 + $0x30] sm:$0xff] %vm2915_vm4, %v2857_v39  ;;  %v2795_v10 = vadd.f32 %v5590_v21, %v2724_v30  ;;  %v2020_v33 = vmax.f32 %v6273_v51, %v1741_v50 }
 0x172   :  { %v2860_v34 = vmax.f32 %v2796_v7, 0.0  ;;  %v2727_v35 = vmax.f32 %v2021_v8, %v4022_v6  ;;  %v6278_v6 = vmax.f32 %v5265_v12, %v5267_v13  ;;  %v6279_v8 = vmax.f32 %v5271_v15, %v5273_v22 }
 0x173   :  { %v2859_v53 = vmax.f32 %v2795_v10, 0.0  ;;  %v2726_v54 = vmax.f32 %v2020_v33, %v2447_v9  ;;  %v3925_v2 = vpop.f32.mrb[76].mxu0 }
 0x174   :  { %v4025_v16 = vpop.f32.mrb[76].mxu1  ;;  %2925 = vst.msk [vmem:[%s6101_s3 + $0x48] sm:$0xff] %vm2915_vm4, %v2860_v34  ;;  %v2798_v17 = vadd.f32 %v5590_v21, %v2727_v35  ;;  %v2023_v52 = vmax.f32 %v6274_v11, %v3925_v2  ;;  %v1751_v42 = vpop.f32.mrb[77].mxu0  ;;  %v6280_v35 = vmax.f32 %v5293_v46, %v5295_v47  ;;  %v6281_v2 = vmax.f32 %v5299_v3, %v5301_v4 }
 0x175   :  { %v2457_v19 = vpop.f32.mrb[77].mxu1  ;;  %2924 = vst.msk [vmem:[%s6101_s3 + $0x40] sm:$0xff] %vm2915_vm4, %v2859_v53  ;;  %v2797_v20 = vadd.f32 %v5590_v21, %v2726_v54  ;;  %v2022_v37 = vmax.f32 %v6275_v18, %v1751_v42 }
 0x176   :  { %v2862_v40 = vmax.f32 %v2798_v17, 0.0  ;;  %v2729_v60 = vmax.f32 %v2023_v52, %v4025_v16 }
 0x177   :  { %v2861_v61 = vmax.f32 %v2797_v20, 0.0  ;;  %v2728_v32 = vmax.f32 %v2022_v37, %v2457_v19  ;;  %v3928_v41 = vpop.f32.mrb[78].mxu0  ;;  %v6282_v20 = vmax.f32 %v5315_v14, %v5317_v24 }
 0x178   :  { %v4028_v26 = vpop.f32.mrb[78].mxu1  ;;  %2927 = vst.msk [vmem:[%s6101_s3 + $0x58] sm:$0xff] %vm2915_vm4, %v2862_v40  ;;  %v2800_v27 = vadd.f32 %v5590_v21, %v2729_v60  ;;  %v2025_v63 = vmax.f32 %v6276_v1, %v3928_v41  ;;  %v1761_v0 = vpop.f32.mrb[79].mxu0  ;;  %v6283_v40 = vmax.f32 %v5321_v5, %v5323_v38  ;;  %v6284_v1 = vmax.f32 %v5329_v59, %v5331_v56 }
 0x179   :  { %v2467_v29 = vpop.f32.mrb[79].mxu1  ;;  %2926 = vst.msk [vmem:[%s6101_s3 + $0x50] sm:$0xff] %vm2915_vm4, %v2861_v61  ;;  %v2799_v36 = vadd.f32 %v5590_v21, %v2728_v32  ;;  %v2024_v44 = vmax.f32 %v6277_v43, %v1761_v0 }
 0x17a   :  { %v2864_v55 = vmax.f32 %v2800_v27, 0.0  ;;  %v2731_v62 = vmax.f32 %v2025_v63, %v4028_v26 }
 0x17b   :  { %v2863_v39 = vmax.f32 %v2799_v36, 0.0  ;;  %v2730_v30 = vmax.f32 %v2024_v44, %v2467_v29  ;;  %v3931_v31 = vpop.f32.mrb[80].mxu0  ;;  %v6285_v29 = vmax.f32 %v5335_v28, %v5337_v25 }
 0x17c   :  { %v4031_v48 = vpop.f32.mrb[80].mxu1  ;;  %2929 = vst.msk [vmem:[%s6101_s3 + $0x68] sm:$0xff] %vm2915_vm4, %v2864_v55  ;;  %v2802_v49 = vadd.f32 %v5590_v21, %v2731_v62  ;;  %v2027_v7 = vmax.f32 %v6278_v6, %v3931_v31  ;;  %v1771_v45 = vpop.f32.mrb[81].mxu0  ;;  %v6288_v6 = vld [vmem:[#allocation3_spill] sm:$0xff] }
 0x17d   :  { %v2477_v57 = vpop.f32.mrb[81].mxu1  ;;  %2928 = vst.msk [vmem:[%s6101_s3 + $0x60] sm:$0xff] %vm2915_vm4, %v2863_v39  ;;  %v2801_v58 = vadd.f32 %v5590_v21, %v2730_v30  ;;  %v2026_v50 = vmax.f32 %v6279_v8, %v1771_v45  ;;  %v6286_v30 = vld [vmem:[#allocation2_spill] sm:$0xff] }
 0x17e   :  { %v2866_v9 = vmax.f32 %v2802_v49, 0.0  ;;  %v2733_v10 = vmax.f32 %v2027_v7, %v4031_v48  ;;  %v6287_v31 = vmax.f32 %v5341_v23, %v6286_v30  ;;  %v6289_v7 = vld [vmem:[#allocation4_spill] sm:$0xff] }
 0x17f   :  { %v2865_v51 = vmax.f32 %v2801_v58, 0.0  ;;  %v2732_v33 = vmax.f32 %v2026_v50, %v2477_v57  ;;  %v3934_v34 = vpop.f32.mrb[82].mxu0  ;;  %v6290_v45 = vmax.f32 %v6288_v6, %v6289_v7 }
 0x180   :  { %v4034_v12 = vpop.f32.mrb[82].mxu1  ;;  %2931 = vst.msk [vmem:[%s6101_s3 + $0x78] sm:$0xff] %vm2915_vm4, %v2866_v9  ;;  %v2804_v13 = vadd.f32 %v5590_v21, %v2733_v10  ;;  %v2029_v53 = vmax.f32 %v6280_v35, %v3934_v34  ;;  %v1781_v54 = vpop.f32.mrb[83].mxu0  ;;  %v6292_v34 = vld [vmem:[#allocation6_spill] sm:$0xff] }
 0x181   :  { %v2487_v15 = vpop.f32.mrb[83].mxu1  ;;  %2930 = vst.msk [vmem:[%s6101_s3 + $0x70] sm:$0xff] %vm2915_vm4, %v2865_v51  ;;  %v2803_v22 = vadd.f32 %v5590_v21, %v2732_v33  ;;  %v2028_v16 = vmax.f32 %v6281_v2, %v1781_v54  ;;  %v6291_v33 = vld [vmem:[#allocation5_spill] sm:$0xff] }
 0x182   :  { %v2868_v17 = vmax.f32 %v2804_v13, 0.0  ;;  %v2735_v11 = vmax.f32 %v2029_v53, %v4034_v12  ;;  %v6293_v12 = vmax.f32 %v6291_v33, %v6292_v34 }
 0x183   :  { %v2867_v52 = vmax.f32 %v2803_v22, 0.0  ;;  %v2734_v42 = vmax.f32 %v2028_v16, %v2487_v15  ;;  %v3937_v19 = vpop.f32.mrb[84].mxu0  ;;  %v6294_v15 = vld [vmem:[#allocation7_spill] sm:$0xff]  ;;  %v6295_v22 = vld [vmem:[#allocation8_spill] sm:$0xff] }
 0x184   :  { %v4037_v46 = vpop.f32.mrb[84].mxu1  ;;  %2933 = vst.msk [vmem:[%s6101_s3 + $0x88] sm:$0xff] %vm2915_vm4, %v2868_v17  ;;  %v2806_v47 = vadd.f32 %v5590_v21, %v2735_v11  ;;  %v2031_v18 = vmax.f32 %v6282_v20, %v3937_v19  ;;  %v1791_v37 = vpop.f32.mrb[85].mxu0  ;;  %v6296_v2 = vmax.f32 %v6294_v15, %v6295_v22  ;;  %v6297_v20 = vld [vmem:[#allocation9_spill] sm:$0xff] }
 0x185   :  { %v2497_v3 = vpop.f32.mrb[85].mxu1  ;;  %2932 = vst.msk [vmem:[%s6101_s3 + $0x80] sm:$0xff] %vm2915_vm4, %v2867_v52  ;;  %v2805_v4 = vadd.f32 %v5590_v21, %v2734_v42  ;;  %v2030_v60 = vmax.f32 %v6283_v40, %v1791_v37 }
 0x186   :  { %v2870_v61 = vmax.f32 %v2806_v47, 0.0  ;;  %v2737_v32 = vmax.f32 %v2031_v18, %v4037_v46  ;;  %v6298_v18 = vld [vmem:[#allocation10_spill] sm:$0xff] }
 0x187   :  { %v2869_v41 = vmax.f32 %v2805_v4, 0.0  ;;  %v2736_v26 = vmax.f32 %v2030_v60, %v2497_v3  ;;  %v3940_v27 = vpop.f32.mrb[86].mxu0  ;;  %v6299_v37 = vmax.f32 %v6297_v20, %v6298_v18 }
 0x188   :  { %v4040_v14 = vpop.f32.mrb[86].mxu1  ;;  %2935 = vst.msk [vmem:[%s6101_s3 + $0x98] sm:$0xff] %vm2915_vm4, %v2870_v61  ;;  %v2808_v24 = vadd.f32 %v5590_v21, %v2737_v32  ;;  %v2033_v63 = vmax.f32 %v6284_v1, %v3940_v27  ;;  %v1801_v0 = vpop.f32.mrb[87].mxu0  ;;  %v6300_v61 = vld [vmem:[#allocation11_spill] sm:$0xff]  ;;  %v6301_v32 = vld [vmem:[#allocation12_spill] sm:$0xff] }
 0x189   :  { %v2507_v5 = vpop.f32.mrb[87].mxu1  ;;  %2934 = vst.msk [vmem:[%s6101_s3 + $0x90] sm:$0xff] %vm2915_vm4, %v2869_v41  ;;  %v2807_v38 = vadd.f32 %v5590_v21, %v2736_v26  ;;  %v2032_v36 = vmax.f32 %v6285_v29, %v1801_v0  ;;  %v6302_v41 = vmax.f32 %v6300_v61, %v6301_v32  ;;  %v6304_v29 = vld [vmem:[#allocation14_spill] sm:$0xff] }
 0x18a   :  { %v2872_v43 = vmax.f32 %v2808_v24, 0.0  ;;  %v2739_v44 = vmax.f32 %v2033_v63, %v4040_v14 }
 0x18b   :  { %v2871_v55 = vmax.f32 %v2807_v38, 0.0  ;;  %v2738_v62 = vmax.f32 %v2032_v36, %v2507_v5  ;;  %v3943_v39 = vpop.f32.mrb[88].mxu0  ;;  %v6303_v38 = vld [vmem:[#allocation13_spill] sm:$0xff] }
 0x18c   :  { %v4043_v56 = vpop.f32.mrb[88].mxu1  ;;  %2937 = vst.msk [vmem:[%s6101_s3 + $0xa8] sm:$0xff] %vm2915_vm4, %v2872_v43  ;;  %v2810_v59 = vadd.f32 %v5590_v21, %v2739_v44  ;;  %v2035_v48 = vmax.f32 %v6287_v31, %v3943_v39  ;;  %v1811_v49 = vpop.f32.mrb[89].mxu0  ;;  %v6305_v36 = vmax.f32 %v6303_v38, %v6304_v29  ;;  %v6306_v39 = vld [vmem:[#allocation15_spill] sm:$0xff] }
 0x18d   :  { %v2517_v28 = vpop.f32.mrb[89].mxu1  ;;  %2936 = vst.msk [vmem:[%s6101_s3 + $0xa0] sm:$0xff] %vm2915_vm4, %v2871_v55  ;;  %v2809_v25 = vadd.f32 %v5590_v21, %v2738_v62  ;;  %v2034_v57 = vmax.f32 %v6290_v45, %v1811_v49  ;;  %v6309_v45 = vld [vmem:[#allocation17_spill] sm:$0xff] }
 0x18e   :  { %v2874_v58 = vmax.f32 %v2810_v59, 0.0  ;;  %v2741_v8 = vmax.f32 %v2035_v48, %v4043_v56  ;;  %v6307_v56 = vld [vmem:[#allocation16_spill] sm:$0xff] }
 0x18f   :  { %v2873_v50 = vmax.f32 %v2809_v25, 0.0  ;;  %v2740_v9 = vmax.f32 %v2034_v57, %v2517_v28  ;;  %v3946_v10 = vpop.f32.mrb[90].mxu0  ;;  %v6308_v59 = vmax.f32 %v6306_v39, %v6307_v56  ;;  %v6310_v57 = vld [vmem:[#allocation18_spill] sm:$0xff] }
 0x190   :  { %v4046_v23 = vpop.f32.mrb[90].mxu1  ;;  %2939 = vst.msk [vmem:[%s6101_s3 + $0xb8] sm:$0xff] %vm2915_vm4, %v2874_v58  ;;  %v2812_v51 = vadd.f32 %v5590_v21, %v2741_v8  ;;  %v2037_v13 = vmax.f32 %v6293_v12, %v3946_v10  ;;  %v1821_v35 = vpop.f32.mrb[91].mxu0  ;;  %v6311_v58 = vmax.f32 %v6309_v45, %v6310_v57 }
 0x191   :  { %v2527_v53 = vpop.f32.mrb[91].mxu1  ;;  %2938 = vst.msk [vmem:[%s6101_s3 + $0xb0] sm:$0xff] %vm2915_vm4, %v2873_v50  ;;  %v2811_v54 = vadd.f32 %v5590_v21, %v2740_v9  ;;  %v2036_v16 = vmax.f32 %v6296_v2, %v1821_v35  ;;  %v6315_v2 = vld [vmem:[#allocation21_spill] sm:$0xff] }
 0x192   :  { %v2876_v17 = vmax.f32 %v2812_v51, 0.0  ;;  %v2743_v11 = vmax.f32 %v2037_v13, %v4046_v23  ;;  %v6312_v23 = vld [vmem:[#allocation19_spill] sm:$0xff]  ;;  %v6313_v51 = vld [vmem:[#allocation20_spill] sm:$0xff] }
 0x193   :  { %v2875_v52 = vmax.f32 %v2811_v54, 0.0  ;;  %v2742_v42 = vmax.f32 %v2036_v16, %v2527_v53  ;;  %v3949_v19 = vpop.f32.mrb[92].mxu0  ;;  %v6314_v33 = vmax.f32 %v6312_v23, %v6313_v51  ;;  %v6316_v16 = vld [vmem:[#allocation22_spill] sm:$0xff] }
 0x194   :  { %v4049_v46 = vpop.f32.mrb[92].mxu1  ;;  %2941 = vst.msk [vmem:[%s6101_s3 + $0xc8] sm:$0xff] %vm2915_vm4, %v2876_v17  ;;  %v2814_v47 = vadd.f32 %v5590_v21, %v2743_v11  ;;  %v2039_v3 = vmax.f32 %v6299_v37, %v3949_v19  ;;  %v1831_v4 = vpop.f32.mrb[93].mxu0  ;;  %v6317_v17 = vmax.f32 %v6315_v2, %v6316_v16 }
 0x195   :  { %v2537_v40 = vpop.f32.mrb[93].mxu1  ;;  %2940 = vst.msk [vmem:[%s6101_s3 + $0xc0] sm:$0xff] %vm2915_vm4, %v2875_v52  ;;  %v2813_v60 = vadd.f32 %v5590_v21, %v2742_v42  ;;  %v2038_v26 = vmax.f32 %v6302_v41, %v1831_v4  ;;  %v6321_v41 = vld [vmem:[#allocation25_spill] sm:$0xff] }
 0x196   :  { %v2878_v27 = vmax.f32 %v2814_v47, 0.0  ;;  %v2745_v14 = vmax.f32 %v2039_v3, %v4049_v46  ;;  %v6318_v46 = vld [vmem:[#allocation23_spill] sm:$0xff]  ;;  %v6319_v47 = vld [vmem:[#allocation24_spill] sm:$0xff] }
 0x197   :  { %v2877_v24 = vmax.f32 %v2813_v60, 0.0  ;;  %v2744_v1 = vmax.f32 %v2038_v26, %v2537_v40  ;;  %v3952_v63 = vpop.f32.mrb[94].mxu0  ;;  %v6320_v20 = vmax.f32 %v6318_v46, %v6319_v47  ;;  %v6322_v26 = vld [vmem:[#allocation26_spill] sm:$0xff] }
 0x198   :  { %v4052_v0 = vpop.f32.mrb[94].mxu1  ;;  %2943 = vst.msk [vmem:[%s6101_s3 + $0xd8] sm:$0xff] %vm2915_vm4, %v2878_v27  ;;  %v2816_v5 = vadd.f32 %v5590_v21, %v2745_v14  ;;  %v2041_v43 = vmax.f32 %v6305_v36, %v3952_v63  ;;  %v1841_v44 = vpop.f32.mrb[95].mxu0  ;;  %v6323_v27 = vmax.f32 %v6321_v41, %v6322_v26 }
 0x199   :  { %v2547_v55 = vpop.f32.mrb[95].mxu1  ;;  %2942 = vst.msk [vmem:[%s6101_s3 + $0xd0] sm:$0xff] %vm2915_vm4, %v2877_v24  ;;  %v2815_v62 = vadd.f32 %v5590_v21, %v2744_v1  ;;  %v2040_v30 = vmax.f32 %v6308_v59, %v1841_v44  ;;  %v6327_v59 = vld [vmem:[#allocation29_spill] sm:$0xff] }
 0x19a   :  { %v2880_v31 = vmax.f32 %v2816_v5, 0.0  ;;  %v2747_v48 = vmax.f32 %v2041_v43, %v4052_v0  ;;  %v6324_v0 = vld [vmem:[#allocation27_spill] sm:$0xff]  ;;  %v6325_v5 = vld [vmem:[#allocation28_spill] sm:$0xff] }
 0x19b   :  { %v2879_v49 = vmax.f32 %v2815_v62, 0.0  ;;  %v2746_v28 = vmax.f32 %v2040_v30, %v2547_v55  ;;  %v3955_v25 = vpop.f32.mrb[96].mxu0  ;;  %v6326_v38 = vmax.f32 %v6324_v0, %v6325_v5  ;;  %v6328_v30 = vld [vmem:[#allocation30_spill] sm:$0xff] }
 0x19c   :  { %v4055_v6 = vpop.f32.mrb[96].mxu1  ;;  %2945 = vst.msk [vmem:[%s6101_s3 + $0xe8] sm:$0xff] %vm2915_vm4, %v2880_v31  ;;  %v2818_v7 = vadd.f32 %v5590_v21, %v2747_v48  ;;  %v2043_v8 = vmax.f32 %v6311_v58, %v3955_v25  ;;  %v1851_v50 = vpop.f32.mrb[97].mxu0  ;;  %v6329_v31 = vmax.f32 %v6327_v59, %v6328_v30 }
 0x19d   :  { %v2557_v9 = vpop.f32.mrb[97].mxu1  ;;  %2944 = vst.msk [vmem:[%s6101_s3 + $0xe0] sm:$0xff] %vm2915_vm4, %v2879_v49  ;;  %v2817_v10 = vadd.f32 %v5590_v21, %v2746_v28  ;;  %v2042_v34 = vmax.f32 %v6314_v33, %v1851_v50  ;;  %v6333_v33 = vld [vmem:[#allocation33_spill] sm:$0xff] }
 0x19e   :  { %v2882_v12 = vmax.f32 %v2818_v7, 0.0  ;;  %v2749_v13 = vmax.f32 %v2043_v8, %v4055_v6  ;;  %v6330_v6 = vld [vmem:[#allocation31_spill] sm:$0xff]  ;;  %v6331_v7 = vld [vmem:[#allocation32_spill] sm:$0xff] }
 0x19f   :  { %v2881_v35 = vmax.f32 %v2817_v10, 0.0  ;;  %v2748_v53 = vmax.f32 %v2042_v34, %v2557_v9  ;;  %v3958_v54 = vpop.f32.mrb[98].mxu0  ;;  %v6332_v45 = vmax.f32 %v6330_v6, %v6331_v7  ;;  %v6334_v34 = vld [vmem:[#allocation34_spill] sm:$0xff] }
 0x1a0   :  { %v4058_v15 = vpop.f32.mrb[98].mxu1  ;;  %2947 = vst.msk [vmem:[%s6101_s3 + $0xf8] sm:$0xff] %vm2915_vm4, %v2882_v12  ;;  %v2820_v22 = vadd.f32 %v5590_v21, %v2749_v13  ;;  %v2045_v11 = vmax.f32 %v6317_v17, %v3958_v54  ;;  %v1861_v52 = vpop.f32.mrb[99].mxu0  ;;  %v6335_v12 = vmax.f32 %v6333_v33, %v6334_v34 }
 0x1a1   :  { %v2567_v42 = vpop.f32.mrb[99].mxu1  ;;  %2946 = vst.msk [vmem:[%s6101_s3 + $0xf0] sm:$0xff] %vm2915_vm4, %v2881_v35  ;;  %v2819_v19 = vadd.f32 %v5590_v21, %v2748_v53  ;;  %v2044_v18 = vmax.f32 %v6320_v20, %v1861_v52  ;;  %v6339_v20 = vld [vmem:[#allocation37_spill] sm:$0xff] }
 0x1a2   :  { %v2884_v37 = vmax.f32 %v2820_v22, 0.0  ;;  %v2751_v3 = vmax.f32 %v2045_v11, %v4058_v15  ;;  %v6336_v15 = vld [vmem:[#allocation35_spill] sm:$0xff]  ;;  %v6337_v22 = vld [vmem:[#allocation36_spill] sm:$0xff] }
 0x1a3   :  { %v2883_v4 = vmax.f32 %v2819_v19, 0.0  ;;  %v2750_v40 = vmax.f32 %v2044_v18, %v2567_v42  ;;  %v3961_v60 = vpop.f32.mrb[100].mxu0  ;;  %v6338_v2 = vmax.f32 %v6336_v15, %v6337_v22  ;;  %v6340_v18 = vld [vmem:[#allocation38_spill] sm:$0xff] }
 0x1a4   :  { %v4061_v61 = vpop.f32.mrb[100].mxu1  ;;  %2949 = vst.msk [vmem:[%s6101_s3 + $0x108] sm:$0xff] %vm2915_vm4, %v2884_v37  ;;  %v2822_v32 = vadd.f32 %v5590_v21, %v2751_v3  ;;  %v2047_v14 = vmax.f32 %v6323_v27, %v3961_v60  ;;  %v1871_v24 = vpop.f32.mrb[101].mxu0  ;;  %v6341_v37 = vmax.f32 %v6339_v20, %v6340_v18 }
 0x1a5   :  { %v2577_v1 = vpop.f32.mrb[101].mxu1  ;;  %2948 = vst.msk [vmem:[%s6101_s3 + $0x100] sm:$0xff] %vm2915_vm4, %v2883_v4  ;;  %v2821_v63 = vadd.f32 %v5590_v21, %v2750_v40  ;;  %v2046_v29 = vmax.f32 %v6326_v38, %v1871_v24  ;;  %v6345_v38 = vld [vmem:[#allocation41_spill] sm:$0xff] }
 0x1a6   :  { %v2886_v36 = vmax.f32 %v2822_v32, 0.0  ;;  %v2753_v43 = vmax.f32 %v2047_v14, %v4061_v61  ;;  %v6342_v61 = vld [vmem:[#allocation39_spill] sm:$0xff]  ;;  %v6343_v32 = vld [vmem:[#allocation40_spill] sm:$0xff] }
 0x1a7   :  { %v2885_v44 = vmax.f32 %v2821_v63, 0.0  ;;  %v2752_v55 = vmax.f32 %v2046_v29, %v2577_v1  ;;  %v3964_v62 = vpop.f32.mrb[102].mxu0  ;;  %v6344_v41 = vmax.f32 %v6342_v61, %v6343_v32  ;;  %v6346_v29 = vld [vmem:[#allocation42_spill] sm:$0xff] }
 0x1a8   :  { %v4064_v39 = vpop.f32.mrb[102].mxu1  ;;  %2951 = vst.msk [vmem:[%s6101_s3 + $0x118] sm:$0xff] %vm2915_vm4, %v2886_v36  ;;  %v2824_v56 = vadd.f32 %v5590_v21, %v2753_v43  ;;  %v2049_v48 = vmax.f32 %v6329_v31, %v3964_v62  ;;  %v1881_v49 = vpop.f32.mrb[103].mxu0  ;;  %v6347_v36 = vmax.f32 %v6345_v38, %v6346_v29 }
 0x1a9   :  { %v2587_v28 = vpop.f32.mrb[103].mxu1  ;;  %2950 = vst.msk [vmem:[%s6101_s3 + $0x110] sm:$0xff] %vm2915_vm4, %v2885_v44  ;;  %v2823_v25 = vadd.f32 %v5590_v21, %v2752_v55  ;;  %v2048_v57 = vmax.f32 %v6332_v45, %v1881_v49  ;;  %v6351_v45 = vld [vmem:[#allocation45_spill] sm:$0xff] }
 0x1aa   :  { %v2888_v58 = vmax.f32 %v2824_v56, 0.0  ;;  %v2755_v8 = vmax.f32 %v2049_v48, %v4064_v39  ;;  %v6348_v39 = vld [vmem:[#allocation43_spill] sm:$0xff]  ;;  %v6349_v56 = vld [vmem:[#allocation44_spill] sm:$0xff] }
 0x1ab   :  { %v2887_v50 = vmax.f32 %v2823_v25, 0.0  ;;  %v2754_v9 = vmax.f32 %v2048_v57, %v2587_v28  ;;  %v3967_v10 = vpop.f32.mrb[104].mxu0  ;;  %v6350_v59 = vmax.f32 %v6348_v39, %v6349_v56  ;;  %v6352_v57 = vld [vmem:[#allocation46_spill] sm:$0xff] }
 0x1ac   :  { %v4067_v23 = vpop.f32.mrb[104].mxu1  ;;  %2953 = vst.msk [vmem:[%s6101_s3 + $0x128] sm:$0xff] %vm2915_vm4, %v2888_v58  ;;  %v2826_v51 = vadd.f32 %v5590_v21, %v2755_v8  ;;  %v2051_v13 = vmax.f32 %v6335_v12, %v3967_v10  ;;  %v1891_v35 = vpop.f32.mrb[105].mxu0  ;;  %v6353_v58 = vmax.f32 %v6351_v45, %v6352_v57 }
 0x1ad   :  { %v2597_v53 = vpop.f32.mrb[105].mxu1  ;;  %2952 = vst.msk [vmem:[%s6101_s3 + $0x120] sm:$0xff] %vm2915_vm4, %v2887_v50  ;;  %v2825_v54 = vadd.f32 %v5590_v21, %v2754_v9  ;;  %v2050_v16 = vmax.f32 %v6338_v2, %v1891_v35  ;;  %v6357_v2 = vld [vmem:[#allocation49_spill] sm:$0xff] }
 0x1ae   :  { %v2890_v17 = vmax.f32 %v2826_v51, 0.0  ;;  %v2757_v11 = vmax.f32 %v2051_v13, %v4067_v23  ;;  %v6354_v23 = vld [vmem:[#allocation47_spill] sm:$0xff]  ;;  %v6355_v51 = vld [vmem:[#allocation48_spill] sm:$0xff] }
 0x1af   :  { %v2889_v52 = vmax.f32 %v2825_v54, 0.0  ;;  %v2756_v42 = vmax.f32 %v2050_v16, %v2597_v53  ;;  %v3970_v19 = vpop.f32.mrb[106].mxu0  ;;  %v6356_v33 = vmax.f32 %v6354_v23, %v6355_v51  ;;  %v6358_v16 = vld [vmem:[#allocation50_spill] sm:$0xff] }
 0x1b0   :  { %v4070_v46 = vpop.f32.mrb[106].mxu1  ;;  %2955 = vst.msk [vmem:[%s6101_s3 + $0x138] sm:$0xff] %vm2915_vm4, %v2890_v17  ;;  %v2828_v47 = vadd.f32 %v5590_v21, %v2757_v11  ;;  %v2053_v3 = vmax.f32 %v6341_v37, %v3970_v19  ;;  %v1901_v4 = vpop.f32.mrb[107].mxu0  ;;  %v6359_v17 = vmax.f32 %v6357_v2, %v6358_v16 }
 0x1b1   :  { %v2607_v40 = vpop.f32.mrb[107].mxu1  ;;  %2954 = vst.msk [vmem:[%s6101_s3 + $0x130] sm:$0xff] %vm2915_vm4, %v2889_v52  ;;  %v2827_v60 = vadd.f32 %v5590_v21, %v2756_v42  ;;  %v2052_v26 = vmax.f32 %v6344_v41, %v1901_v4  ;;  %v6363_v41 = vld [vmem:[#allocation53_spill] sm:$0xff] }
 0x1b2   :  { %v2892_v27 = vmax.f32 %v2828_v47, 0.0  ;;  %v2759_v14 = vmax.f32 %v2053_v3, %v4070_v46  ;;  %v6360_v46 = vld [vmem:[#allocation51_spill] sm:$0xff]  ;;  %v6361_v47 = vld [vmem:[#allocation52_spill] sm:$0xff] }
 0x1b3   :  { %v2891_v24 = vmax.f32 %v2827_v60, 0.0  ;;  %v2758_v1 = vmax.f32 %v2052_v26, %v2607_v40  ;;  %v3973_v63 = vpop.f32.mrb[108].mxu0  ;;  %v6362_v20 = vmax.f32 %v6360_v46, %v6361_v47  ;;  %v6364_v26 = vld [vmem:[#allocation54_spill] sm:$0xff] }
 0x1b4   :  { %v4073_v0 = vpop.f32.mrb[108].mxu1  ;;  %2957 = vst.msk [vmem:[%s6101_s3 + $0x148] sm:$0xff] %vm2915_vm4, %v2892_v27  ;;  %v2830_v5 = vadd.f32 %v5590_v21, %v2759_v14  ;;  %v2055_v43 = vmax.f32 %v6347_v36, %v3973_v63  ;;  %v1911_v44 = vpop.f32.mrb[109].mxu0  ;;  %v6365_v27 = vmax.f32 %v6363_v41, %v6364_v26 }
 0x1b5   :  { %v2617_v55 = vpop.f32.mrb[109].mxu1  ;;  %2956 = vst.msk [vmem:[%s6101_s3 + $0x140] sm:$0xff] %vm2915_vm4, %v2891_v24  ;;  %v2829_v62 = vadd.f32 %v5590_v21, %v2758_v1  ;;  %v2054_v30 = vmax.f32 %v6350_v59, %v1911_v44  ;;  %v6369_v59 = vld [vmem:[#allocation57_spill] sm:$0xff] }
 0x1b6   :  { %v2894_v31 = vmax.f32 %v2830_v5, 0.0  ;;  %v2761_v48 = vmax.f32 %v2055_v43, %v4073_v0  ;;  %v6366_v0 = vld [vmem:[#allocation55_spill] sm:$0xff]  ;;  %v6367_v5 = vld [vmem:[#allocation56_spill] sm:$0xff] }
 0x1b7   :  { %v2893_v49 = vmax.f32 %v2829_v62, 0.0  ;;  %v2760_v28 = vmax.f32 %v2054_v30, %v2617_v55  ;;  %v3976_v25 = vpop.f32.mrb[110].mxu0  ;;  %v6368_v38 = vmax.f32 %v6366_v0, %v6367_v5  ;;  %v6370_v30 = vld [vmem:[#allocation58_spill] sm:$0xff] }
 0x1b8   :  { %v4076_v6 = vpop.f32.mrb[110].mxu1  ;;  %2959 = vst.msk [vmem:[%s6101_s3 + $0x158] sm:$0xff] %vm2915_vm4, %v2894_v31  ;;  %v2832_v7 = vadd.f32 %v5590_v21, %v2761_v48  ;;  %v2057_v8 = vmax.f32 %v6353_v58, %v3976_v25  ;;  %v1921_v50 = vpop.f32.mrb[111].mxu0  ;;  %v6371_v31 = vmax.f32 %v6369_v59, %v6370_v30 }
 0x1b9   :  { %v2627_v9 = vpop.f32.mrb[111].mxu1  ;;  %2958 = vst.msk [vmem:[%s6101_s3 + $0x150] sm:$0xff] %vm2915_vm4, %v2893_v49  ;;  %v2831_v10 = vadd.f32 %v5590_v21, %v2760_v28  ;;  %v2056_v34 = vmax.f32 %v6356_v33, %v1921_v50  ;;  %v6375_v33 = vld [vmem:[#allocation61_spill] sm:$0xff] }
 0x1ba   :  { %v2896_v12 = vmax.f32 %v2832_v7, 0.0  ;;  %v2763_v13 = vmax.f32 %v2057_v8, %v4076_v6  ;;  %v6372_v6 = vld [vmem:[#allocation59_spill] sm:$0xff]  ;;  %v6373_v7 = vld [vmem:[#allocation60_spill] sm:$0xff] }
 0x1bb   :  { %v2895_v35 = vmax.f32 %v2831_v10, 0.0  ;;  %v2762_v53 = vmax.f32 %v2056_v34, %v2627_v9  ;;  %v3979_v54 = vpop.f32.mrb[112].mxu0  ;;  %v6374_v45 = vmax.f32 %v6372_v6, %v6373_v7  ;;  %v6376_v34 = vld [vmem:[#allocation62_spill] sm:$0xff] }
 0x1bc   :  { %v4079_v15 = vpop.f32.mrb[112].mxu1  ;;  %2961 = vst.msk [vmem:[%s6101_s3 + $0x168] sm:$0xff] %vm2915_vm4, %v2896_v12  ;;  %v2834_v22 = vadd.f32 %v5590_v21, %v2763_v13  ;;  %v2059_v11 = vmax.f32 %v6359_v17, %v3979_v54  ;;  %v1931_v52 = vpop.f32.mrb[113].mxu0  ;;  %v6377_v12 = vmax.f32 %v6375_v33, %v6376_v34 }
 0x1bd   :  { %v2637_v42 = vpop.f32.mrb[113].mxu1  ;;  %2960 = vst.msk [vmem:[%s6101_s3 + $0x160] sm:$0xff] %vm2915_vm4, %v2895_v35  ;;  %v2833_v19 = vadd.f32 %v5590_v21, %v2762_v53  ;;  %v2058_v18 = vmax.f32 %v6362_v20, %v1931_v52  ;;  %v6381_v20 = vld [vmem:[#allocation65_spill] sm:$0xff] }
 0x1be   :  { %v2898_v37 = vmax.f32 %v2834_v22, 0.0  ;;  %v2765_v3 = vmax.f32 %v2059_v11, %v4079_v15  ;;  %v6378_v15 = vld [vmem:[#allocation63_spill] sm:$0xff]  ;;  %v6379_v22 = vld [vmem:[#allocation64_spill] sm:$0xff] }
 0x1bf   :  { %v2897_v4 = vmax.f32 %v2833_v19, 0.0  ;;  %v2764_v40 = vmax.f32 %v2058_v18, %v2637_v42  ;;  %v3982_v60 = vpop.f32.mrb[114].mxu0  ;;  %v6380_v2 = vmax.f32 %v6378_v15, %v6379_v22  ;;  %v6382_v18 = vld [vmem:[#allocation66_spill] sm:$0xff] }
 0x1c0   :  { %v4082_v61 = vpop.f32.mrb[114].mxu1  ;;  %2963 = vst.msk [vmem:[%s6101_s3 + $0x178] sm:$0xff] %vm2915_vm4, %v2898_v37  ;;  %v2836_v32 = vadd.f32 %v5590_v21, %v2765_v3  ;;  %v2061_v14 = vmax.f32 %v6365_v27, %v3982_v60  ;;  %v1941_v24 = vpop.f32.mrb[115].mxu0  ;;  %v6383_v37 = vmax.f32 %v6381_v20, %v6382_v18 }
 0x1c1   :  { %v2647_v1 = vpop.f32.mrb[115].mxu1  ;;  %2962 = vst.msk [vmem:[%s6101_s3 + $0x170] sm:$0xff] %vm2915_vm4, %v2897_v4  ;;  %v2835_v63 = vadd.f32 %v5590_v21, %v2764_v40  ;;  %v2060_v29 = vmax.f32 %v6368_v38, %v1941_v24  ;;  %v6387_v38 = vld [vmem:[#allocation69_spill] sm:$0xff] }
 0x1c2   :  { %v2900_v36 = vmax.f32 %v2836_v32, 0.0  ;;  %v2767_v43 = vmax.f32 %v2061_v14, %v4082_v61  ;;  %v6384_v61 = vld [vmem:[#allocation67_spill] sm:$0xff]  ;;  %v6385_v32 = vld [vmem:[#allocation68_spill] sm:$0xff] }
 0x1c3   :  { %v2899_v44 = vmax.f32 %v2835_v63, 0.0  ;;  %v2766_v55 = vmax.f32 %v2060_v29, %v2647_v1  ;;  %v3985_v62 = vpop.f32.mrb[116].mxu0  ;;  %v6386_v41 = vmax.f32 %v6384_v61, %v6385_v32  ;;  %v6388_v29 = vld [vmem:[#allocation70_spill] sm:$0xff] }
 0x1c4   :  { %v4085_v39 = vpop.f32.mrb[116].mxu1  ;;  %2965 = vst.msk [vmem:[%s6101_s3 + $0x188] sm:$0xff] %vm2915_vm4, %v2900_v36  ;;  %v2838_v56 = vadd.f32 %v5590_v21, %v2767_v43  ;;  %v2063_v48 = vmax.f32 %v6371_v31, %v3985_v62  ;;  %v1951_v49 = vpop.f32.mrb[117].mxu0  ;;  %v6389_v36 = vmax.f32 %v6387_v38, %v6388_v29 }
 0x1c5   :  { %v2657_v28 = vpop.f32.mrb[117].mxu1  ;;  %2964 = vst.msk [vmem:[%s6101_s3 + $0x180] sm:$0xff] %vm2915_vm4, %v2899_v44  ;;  %v2837_v25 = vadd.f32 %v5590_v21, %v2766_v55  ;;  %v2062_v57 = vmax.f32 %v6374_v45, %v1951_v49  ;;  %v6393_v45 = vld [vmem:[#allocation73_spill] sm:$0xff] }
 0x1c6   :  { %v2902_v58 = vmax.f32 %v2838_v56, 0.0  ;;  %v2769_v8 = vmax.f32 %v2063_v48, %v4085_v39  ;;  %v6390_v39 = vld [vmem:[#allocation71_spill] sm:$0xff]  ;;  %v6391_v56 = vld [vmem:[#allocation72_spill] sm:$0xff] }
 0x1c7   :  { %v2901_v50 = vmax.f32 %v2837_v25, 0.0  ;;  %v2768_v9 = vmax.f32 %v2062_v57, %v2657_v28  ;;  %v3988_v10 = vpop.f32.mrb[118].mxu0  ;;  %v6392_v59 = vmax.f32 %v6390_v39, %v6391_v56  ;;  %v6394_v57 = vld [vmem:[#allocation74_spill] sm:$0xff] }
 0x1c8   :  { %v4088_v23 = vpop.f32.mrb[118].mxu1  ;;  %2967 = vst.msk [vmem:[%s6101_s3 + $0x198] sm:$0xff] %vm2915_vm4, %v2902_v58  ;;  %v2840_v51 = vadd.f32 %v5590_v21, %v2769_v8  ;;  %v2065_v13 = vmax.f32 %v6377_v12, %v3988_v10  ;;  %v1961_v35 = vpop.f32.mrb[119].mxu0  ;;  %v6395_v58 = vmax.f32 %v6393_v45, %v6394_v57 }
 0x1c9   :  { %v2667_v53 = vpop.f32.mrb[119].mxu1  ;;  %2966 = vst.msk [vmem:[%s6101_s3 + $0x190] sm:$0xff] %vm2915_vm4, %v2901_v50  ;;  %v2839_v54 = vadd.f32 %v5590_v21, %v2768_v9  ;;  %v2064_v16 = vmax.f32 %v6380_v2, %v1961_v35  ;;  %v6399_v2 = vld [vmem:[#allocation77_spill] sm:$0xff] }
 0x1ca   :  { %v2904_v17 = vmax.f32 %v2840_v51, 0.0  ;;  %v2771_v11 = vmax.f32 %v2065_v13, %v4088_v23  ;;  %v6396_v23 = vld [vmem:[#allocation75_spill] sm:$0xff]  ;;  %v6397_v51 = vld [vmem:[#allocation76_spill] sm:$0xff] }
 0x1cb   :  { %v2903_v52 = vmax.f32 %v2839_v54, 0.0  ;;  %v2770_v42 = vmax.f32 %v2064_v16, %v2667_v53  ;;  %v3991_v19 = vpop.f32.mrb[120].mxu0  ;;  %v6398_v33 = vmax.f32 %v6396_v23, %v6397_v51  ;;  %v6400_v16 = vld [vmem:[#allocation78_spill] sm:$0xff] }
 0x1cc   :  { %v4091_v46 = vpop.f32.mrb[120].mxu1  ;;  %2969 = vst.msk [vmem:[%s6101_s3 + $0x1a8] sm:$0xff] %vm2915_vm4, %v2904_v17  ;;  %v2842_v47 = vadd.f32 %v5590_v21, %v2771_v11  ;;  %v2067_v3 = vmax.f32 %v6383_v37, %v3991_v19  ;;  %v1971_v4 = vpop.f32.mrb[121].mxu0  ;;  %v6401_v17 = vmax.f32 %v6399_v2, %v6400_v16 }
 0x1cd   :  { %v2677_v40 = vpop.f32.mrb[121].mxu1  ;;  %2968 = vst.msk [vmem:[%s6101_s3 + $0x1a0] sm:$0xff] %vm2915_vm4, %v2903_v52  ;;  %v2841_v60 = vadd.f32 %v5590_v21, %v2770_v42  ;;  %v2066_v26 = vmax.f32 %v6386_v41, %v1971_v4 }
 0x1ce   :  { %v2906_v27 = vmax.f32 %v2842_v47, 0.0  ;;  %v2773_v14 = vmax.f32 %v2067_v3, %v4091_v46  ;;  %v6402_v46 = vld [vmem:[#allocation79_spill] sm:$0xff]  ;;  %v6403_v47 = vld [vmem:[#allocation80_spill] sm:$0xff] }
 0x1cf   :  { %v2905_v24 = vmax.f32 %v2841_v60, 0.0  ;;  %v2772_v1 = vmax.f32 %v2066_v26, %v2677_v40  ;;  %v3994_v63 = vpop.f32.mrb[122].mxu0  ;;  %v6404_v20 = vmax.f32 %v6402_v46, %v6403_v47 }
 0x1d0   :  { %v4094_v0 = vpop.f32.mrb[122].mxu1  ;;  %2971 = vst.msk [vmem:[%s6101_s3 + $0x1b8] sm:$0xff] %vm2915_vm4, %v2906_v27  ;;  %v2844_v5 = vadd.f32 %v5590_v21, %v2773_v14  ;;  %v2069_v43 = vmax.f32 %v6389_v36, %v3994_v63  ;;  %v1981_v44 = vpop.f32.mrb[123].mxu0 }
 0x1d1   :  { %v2687_v55 = vpop.f32.mrb[123].mxu1  ;;  %2970 = vst.msk [vmem:[%s6101_s3 + $0x1b0] sm:$0xff] %vm2915_vm4, %v2905_v24  ;;  %v2843_v62 = vadd.f32 %v5590_v21, %v2772_v1  ;;  %v2068_v30 = vmax.f32 %v6392_v59, %v1981_v44 }
 0x1d2   :  { %v2908_v31 = vmax.f32 %v2844_v5, 0.0  ;;  %v2775_v48 = vmax.f32 %v2069_v43, %v4094_v0 }
 0x1d3   :  { %v2907_v49 = vmax.f32 %v2843_v62, 0.0  ;;  %v2774_v28 = vmax.f32 %v2068_v30, %v2687_v55  ;;  %v3997_v25 = vpop.f32.mrb[124].mxu0 }
 0x1d4   :  { %v4097_v6 = vpop.f32.mrb[124].mxu1  ;;  %2973 = vst.msk [vmem:[%s6101_s3 + $0x1c8] sm:$0xff] %vm2915_vm4, %v2908_v31  ;;  %v2846_v7 = vadd.f32 %v5590_v21, %v2775_v48  ;;  %v2071_v8 = vmax.f32 %v6395_v58, %v3997_v25  ;;  %v1991_v50 = vpop.f32.mrb[125].mxu0 }
 0x1d5   :  { %v2697_v9 = vpop.f32.mrb[125].mxu1  ;;  %2972 = vst.msk [vmem:[%s6101_s3 + $0x1c0] sm:$0xff] %vm2915_vm4, %v2907_v49  ;;  %v2845_v10 = vadd.f32 %v5590_v21, %v2774_v28  ;;  %v2070_v34 = vmax.f32 %v6398_v33, %v1991_v50 }
 0x1d6   :  { %v2910_v12 = vmax.f32 %v2846_v7, 0.0  ;;  %v2777_v13 = vmax.f32 %v2071_v8, %v4097_v6 }
 0x1d7   :  { %v2909_v35 = vmax.f32 %v2845_v10, 0.0  ;;  %v2776_v53 = vmax.f32 %v2070_v34, %v2697_v9  ;;  %v4000_v54 = vpop.f32.mrb[126].mxu0 }
 0x1d8   :  { %v4100_v15 = vpop.f32.mrb[126].mxu1  ;;  %2975 = vst.msk [vmem:[%s6101_s3 + $0x1d8] sm:$0xff] %vm2915_vm4, %v2910_v12  ;;  %v2848_v22 = vadd.f32 %v5590_v21, %v2777_v13  ;;  %v2073_v11 = vmax.f32 %v6401_v17, %v4000_v54  ;;  %v2001_v52 = vpop.f32.mrb[127].mxu0 }
 0x1d9   :  { %v2707_v42 = vpop.f32.mrb[127].mxu1  ;;  %2974 = vst.msk [vmem:[%s6101_s3 + $0x1d0] sm:$0xff] %vm2915_vm4, %v2909_v35  ;;  %v2847_v19 = vadd.f32 %v5590_v21, %v2776_v53  ;;  %v2072_v18 = vmax.f32 %v6404_v20, %v2001_v52 }
 0x1da   :  { %v2912_v37 = vmax.f32 %v2848_v22, 0.0  ;;  %v2779_v3 = vmax.f32 %v2073_v11, %v4100_v15 }
 0x1db   :  { %v2911_v4 = vmax.f32 %v2847_v19, 0.0  ;;  %v2778_v40 = vmax.f32 %v2072_v18, %v2707_v42 }
 0x1dc   :  { %2977 = vst.msk [vmem:[%s6101_s3 + $0x1e8] sm:$0xff] %vm2915_vm4, %v2912_v37  ;;  %v2850_v60 = vadd.f32 %v5590_v21, %v2779_v3 }
 0x1dd   :  { %2976 = vst.msk [vmem:[%s6101_s3 + $0x1e0] sm:$0xff] %vm2915_vm4, %v2911_v4  ;;  %v2849_v61 = vadd.f32 %v5590_v21, %v2778_v40 }
 0x1de   :  { %v2914_v32 = vmax.f32 %v2850_v60, 0.0 }
 0x1df   :  { %v2913_v41 = vmax.f32 %v2849_v61, 0.0 }
 0x1e0   :  { %2979 = vst.msk [vmem:[%s6101_s3 + $0x1f8] sm:$0xff] %vm2915_vm4, %v2914_v32 }
 0x1e1   :  { %2978 = vst.msk [vmem:[%s6101_s3 + $0x1f0] sm:$0xff] %vm2915_vm4, %v2913_v41 }

// kernel: san_forward.8
= control target key start
LH: loop header
LB: loop body
LE: loop exit
PB: predicated region body
PF: predicated region fallthrough
CT: control target
= control target key end

     0   :  { %s6574_s12 = smov 0   ;;  %s6576_s13 = smov 0   ;;  %s8092_s0 = inlined_call_operand.vmem [shape: f32[3,2,288,64], index: 0, kind: input, shape index: {}]   ;;  %s8093_s1 = inlined_call_operand.vmem [shape: f32[9,64,4], index: 1, kind: input, shape index: {}]   ;;  %s8094_s2 = inlined_call_operand.vmem [shape: f32[1,4], index: 2, kind: input, shape index: {}]   ;;  %s8095_s3 = inlined_call_operand.vmem [shape: f32[2,256,4], index: 3, kind: output, shape index: {}]  }
   0x1   :  { %s6578_s14 = smov 0  }
   0x2 LB: > { %s4443_s15 = sadd.s32 4294967295, %s6552_s14   ;;  %s6591_s16 = sadd.s32 1, %s6552_s14   ;;  %s6552_s14 = sphi %s6578_s14, %s8222_s14   ;;  %s6548_s13 = sphi %s6576_s13, %s8221_s13   ;;  %s6544_s12 = sphi %s6574_s12, %s8220_s12  }
   0x3   : > { %s17_s17 = ssub.s32 %s6552_s14, %s6591_s16  ;;  %s20_s18 = sadd.s32 1, %s6548_s13 }
   0x4   : > { %p18_p0 = scmp.eq.s32.totalorder %s17_s17, 0  ;;  %p27_p1 = scmp.ne.s32.totalorder %s6548_s13, %s6544_s12 }
   0x5   : > { %p28_p2 = scmp.eq.s32.totalorder %s6552_s14, 0  ;;  %p4446_p4 = scmp.ge.s32.totalorder %s6552_s14, 2 }
   0x6   : > { %s6600_s19 = scalar_select %p18_p0, %s6548_s13, %s20_s18  }
   0x7   : > { %p29_p3 = por %p28_p2, %p27_p1  ;;  %127 = sbr.rel (%p4446_p4) target bundleno = 73 (0x49), region = 24 }
   0xe   : > { %130 = sbr.rel (!%p29_p3) target bundleno = 73 (0x49), region = 28  ;;  %s132_s20 = sand.u32 (%p29_p3), 1, %s6548_s13  }
   0xf   : > { %s6376_s21 = smul.u32 (%p29_p3), 288, %s6552_s14 }
  0x10   : > { %s6375_s22 = smul.u32 (%p29_p3), 864, %s132_s20 }
  0x11   : > { %s6608_s25 = scalar_lea.vmem (%p29_p3), %s8092_s0, %s6376_s21 }
  0x12   : > { %v379_v0 = vld [vmem:[%s6608_s25] sm:$0xff] (%p29_p3)  ;;  %v381_v1 = vld [vmem:[%s6608_s25 + $0x8] sm:$0xff] (%p29_p3)  ;;  %v383_v2 = vld [vmem:[%s6608_s25 + $0x10] sm:$0xff] (%p29_p3)  ;;  %s6613_s26 = scalar_lea.vmem (%p29_p3), [#allocation2], %s6375_s22 }
  0x13   : > { %380 = vst [vmem:[%s6613_s26] sm:$0xff] (%p29_p3), %v379_v0  ;;  %382 = vst [vmem:[%s6613_s26 + $0x8] sm:$0xff] (%p29_p3), %v381_v1  ;;  %v385_v3 = vld [vmem:[%s6608_s25 + $0x18] sm:$0xff] (%p29_p3)  ;;  %v387_v4 = vld [vmem:[%s6608_s25 + $0x20] sm:$0xff] (%p29_p3) }
  0x14   : > { %384 = vst [vmem:[%s6613_s26 + $0x10] sm:$0xff] (%p29_p3), %v383_v2  ;;  %v389_v5 = vld [vmem:[%s6608_s25 + $0x28] sm:$0xff] (%p29_p3)  ;;  %386 = vst [vmem:[%s6613_s26 + $0x18] sm:$0xff] (%p29_p3), %v385_v3  ;;  %v391_v6 = vld [vmem:[%s6608_s25 + $0x30] sm:$0xff] (%p29_p3) }
  0x15   : > { %388 = vst [vmem:[%s6613_s26 + $0x20] sm:$0xff] %v387_v4  ;;  %390 = vst [vmem:[%s6613_s26 + $0x28] sm:$0xff] %v389_v5  ;;  %v393_v7 = vld [vmem:[%s6608_s25 + $0x38] sm:$0xff]  ;;  %v395_v8 = vld [vmem:[%s6608_s25 + $0x40] sm:$0xff] }
  0x16   : > { %392 = vst [vmem:[%s6613_s26 + $0x30] sm:$0xff] %v391_v6  ;;  %394 = vst [vmem:[%s6613_s26 + $0x38] sm:$0xff] %v393_v7  ;;  %v397_v9 = vld [vmem:[%s6608_s25 + $0x48] sm:$0xff]  ;;  %v399_v10 = vld [vmem:[%s6608_s25 + $0x50] sm:$0xff] }
  0x17   : > { %396 = vst [vmem:[%s6613_s26 + $0x40] sm:$0xff] %v395_v8  ;;  %v401_v11 = vld [vmem:[%s6608_s25 + $0x58] sm:$0xff]  ;;  %398 = vst [vmem:[%s6613_s26 + $0x48] sm:$0xff] %v397_v9  ;;  %v403_v12 = vld [vmem:[%s6608_s25 + $0x60] sm:$0xff] }
  0x18   : > { %400 = vst [vmem:[%s6613_s26 + $0x50] sm:$0xff] %v399_v10  ;;  %402 = vst [vmem:[%s6613_s26 + $0x58] sm:$0xff] %v401_v11  ;;  %v405_v13 = vld [vmem:[%s6608_s25 + $0x68] sm:$0xff]  ;;  %v407_v14 = vld [vmem:[%s6608_s25 + $0x70] sm:$0xff] }
  0x19   : > { %404 = vst [vmem:[%s6613_s26 + $0x60] sm:$0xff] %v403_v12  ;;  %406 = vst [vmem:[%s6613_s26 + $0x68] sm:$0xff] %v405_v13  ;;  %v409_v15 = vld [vmem:[%s6608_s25 + $0x78] sm:$0xff]  ;;  %v411_v16 = vld [vmem:[%s6608_s25 + $0x80] sm:$0xff] }
  0x1a   : > { %408 = vst [vmem:[%s6613_s26 + $0x70] sm:$0xff] %v407_v14  ;;  %v413_v17 = vld [vmem:[%s6608_s25 + $0x88] sm:$0xff]  ;;  %410 = vst [vmem:[%s6613_s26 + $0x78] sm:$0xff] %v409_v15  ;;  %v415_v18 = vld [vmem:[%s6608_s25 + $0x90] sm:$0xff] }
  0x1b   : > { %412 = vst [vmem:[%s6613_s26 + $0x80] sm:$0xff] %v411_v16  ;;  %414 = vst [vmem:[%s6613_s26 + $0x88] sm:$0xff] %v413_v17  ;;  %v417_v19 = vld [vmem:[%s6608_s25 + $0x98] sm:$0xff]  ;;  %v419_v20 = vld [vmem:[%s6608_s25 + $0xa0] sm:$0xff] }
  0x1c   : > { %416 = vst [vmem:[%s6613_s26 + $0x90] sm:$0xff] %v415_v18  ;;  %418 = vst [vmem:[%s6613_s26 + $0x98] sm:$0xff] %v417_v19  ;;  %v421_v21 = vld [vmem:[%s6608_s25 + $0xa8] sm:$0xff]  ;;  %v423_v22 = vld [vmem:[%s6608_s25 + $0xb0] sm:$0xff] }
  0x1d   : > { %420 = vst [vmem:[%s6613_s26 + $0xa0] sm:$0xff] %v419_v20  ;;  %v425_v23 = vld [vmem:[%s6608_s25 + $0xb8] sm:$0xff]  ;;  %422 = vst [vmem:[%s6613_s26 + $0xa8] sm:$0xff] %v421_v21  ;;  %v427_v24 = vld [vmem:[%s6608_s25 + $0xc0] sm:$0xff] }
  0x1e   : > { %424 = vst [vmem:[%s6613_s26 + $0xb0] sm:$0xff] %v423_v22  ;;  %426 = vst [vmem:[%s6613_s26 + $0xb8] sm:$0xff] %v425_v23  ;;  %v429_v25 = vld [vmem:[%s6608_s25 + $0xc8] sm:$0xff]  ;;  %v431_v26 = vld [vmem:[%s6608_s25 + $0xd0] sm:$0xff] }
  0x1f   : > { %428 = vst [vmem:[%s6613_s26 + $0xc0] sm:$0xff] %v427_v24  ;;  %430 = vst [vmem:[%s6613_s26 + $0xc8] sm:$0xff] %v429_v25  ;;  %v433_v27 = vld [vmem:[%s6608_s25 + $0xd8] sm:$0xff]  ;;  %v435_v28 = vld [vmem:[%s6608_s25 + $0xe0] sm:$0xff] }
  0x20   : > { %432 = vst [vmem:[%s6613_s26 + $0xd0] sm:$0xff] %v431_v26  ;;  %v437_v29 = vld [vmem:[%s6608_s25 + $0xe8] sm:$0xff]  ;;  %434 = vst [vmem:[%s6613_s26 + $0xd8] sm:$0xff] %v433_v27  ;;  %v439_v30 = vld [vmem:[%s6608_s25 + $0xf0] sm:$0xff] }
  0x21   : > { %436 = vst [vmem:[%s6613_s26 + $0xe0] sm:$0xff] %v435_v28  ;;  %438 = vst [vmem:[%s6613_s26 + $0xe8] sm:$0xff] %v437_v29  ;;  %v441_v31 = vld [vmem:[%s6608_s25 + $0xf8] sm:$0xff]  ;;  %v443_v32 = vld [vmem:[%s6608_s25 + $0x100] sm:$0xff] }
  0x22   : > { %440 = vst [vmem:[%s6613_s26 + $0xf0] sm:$0xff] %v439_v30  ;;  %442 = vst [vmem:[%s6613_s26 + $0xf8] sm:$0xff] %v441_v31  ;;  %v445_v33 = vld [vmem:[%s6608_s25 + $0x108] sm:$0xff]  ;;  %v447_v34 = vld [vmem:[%s6608_s25 + $0x110] sm:$0xff] }
  0x23   : > { %444 = vst [vmem:[%s6613_s26 + $0x100] sm:$0xff] %v443_v32  ;;  %v449_v35 = vld [vmem:[%s6608_s25 + $0x118] sm:$0xff]  ;;  %446 = vst [vmem:[%s6613_s26 + $0x108] sm:$0xff] %v445_v33  ;;  %v451_v36 = vld [vmem:[%s6608_s25 + $0x240] sm:$0xff] }
  0x24   : > { %448 = vst [vmem:[%s6613_s26 + $0x110] sm:$0xff] %v447_v34  ;;  %450 = vst [vmem:[%s6613_s26 + $0x118] sm:$0xff] %v449_v35  ;;  %v453_v37 = vld [vmem:[%s6608_s25 + $0x248] sm:$0xff]  ;;  %v455_v38 = vld [vmem:[%s6608_s25 + $0x250] sm:$0xff] }
  0x25   : > { %452 = vst [vmem:[%s6613_s26 + $0x120] sm:$0xff] %v451_v36  ;;  %454 = vst [vmem:[%s6613_s26 + $0x128] sm:$0xff] %v453_v37  ;;  %v457_v39 = vld [vmem:[%s6608_s25 + $0x258] sm:$0xff]  ;;  %v459_v40 = vld [vmem:[%s6608_s25 + $0x260] sm:$0xff] }
  0x26   : > { %456 = vst [vmem:[%s6613_s26 + $0x130] sm:$0xff] %v455_v38  ;;  %v461_v41 = vld [vmem:[%s6608_s25 + $0x268] sm:$0xff]  ;;  %458 = vst [vmem:[%s6613_s26 + $0x138] sm:$0xff] %v457_v39  ;;  %v463_v42 = vld [vmem:[%s6608_s25 + $0x270] sm:$0xff] }
  0x27   : > { %460 = vst [vmem:[%s6613_s26 + $0x140] sm:$0xff] %v459_v40  ;;  %462 = vst [vmem:[%s6613_s26 + $0x148] sm:$0xff] %v461_v41  ;;  %v465_v43 = vld [vmem:[%s6608_s25 + $0x278] sm:$0xff]  ;;  %v467_v44 = vld [vmem:[%s6608_s25 + $0x280] sm:$0xff] }
  0x28   : > { %464 = vst [vmem:[%s6613_s26 + $0x150] sm:$0xff] %v463_v42  ;;  %466 = vst [vmem:[%s6613_s26 + $0x158] sm:$0xff] %v465_v43  ;;  %v469_v45 = vld [vmem:[%s6608_s25 + $0x288] sm:$0xff]  ;;  %v471_v46 = vld [vmem:[%s6608_s25 + $0x290] sm:$0xff] }
  0x29   : > { %468 = vst [vmem:[%s6613_s26 + $0x160] sm:$0xff] %v467_v44  ;;  %v473_v47 = vld [vmem:[%s6608_s25 + $0x298] sm:$0xff]  ;;  %470 = vst [vmem:[%s6613_s26 + $0x168] sm:$0xff] %v469_v45  ;;  %v475_v48 = vld [vmem:[%s6608_s25 + $0x2a0] sm:$0xff] }
  0x2a   : > { %472 = vst [vmem:[%s6613_s26 + $0x170] sm:$0xff] %v471_v46  ;;  %474 = vst [vmem:[%s6613_s26 + $0x178] sm:$0xff] %v473_v47  ;;  %v477_v49 = vld [vmem:[%s6608_s25 + $0x2a8] sm:$0xff]  ;;  %v479_v50 = vld [vmem:[%s6608_s25 + $0x2b0] sm:$0xff] }
  0x2b   : > { %476 = vst [vmem:[%s6613_s26 + $0x180] sm:$0xff] %v475_v48  ;;  %478 = vst [vmem:[%s6613_s26 + $0x188] sm:$0xff] %v477_v49  ;;  %v481_v51 = vld [vmem:[%s6608_s25 + $0x2b8] sm:$0xff]  ;;  %v483_v52 = vld [vmem:[%s6608_s25 + $0x2c0] sm:$0xff] }
  0x2c   : > { %480 = vst [vmem:[%s6613_s26 + $0x190] sm:$0xff] %v479_v50  ;;  %v485_v53 = vld [vmem:[%s6608_s25 + $0x2c8] sm:$0xff]  ;;  %482 = vst [vmem:[%s6613_s26 + $0x198] sm:$0xff] %v481_v51  ;;  %v487_v54 = vld [vmem:[%s6608_s25 + $0x2d0] sm:$0xff] }
  0x2d   : > { %484 = vst [vmem:[%s6613_s26 + $0x1a0] sm:$0xff] %v483_v52  ;;  %486 = vst [vmem:[%s6613_s26 + $0x1a8] sm:$0xff] %v485_v53  ;;  %v489_v55 = vld [vmem:[%s6608_s25 + $0x2d8] sm:$0xff]  ;;  %v491_v56 = vld [vmem:[%s6608_s25 + $0x2e0] sm:$0xff] }
  0x2e   : > { %488 = vst [vmem:[%s6613_s26 + $0x1b0] sm:$0xff] %v487_v54  ;;  %490 = vst [vmem:[%s6613_s26 + $0x1b8] sm:$0xff] %v489_v55  ;;  %v493_v57 = vld [vmem:[%s6608_s25 + $0x2e8] sm:$0xff]  ;;  %v495_v58 = vld [vmem:[%s6608_s25 + $0x2f0] sm:$0xff] }
  0x2f   : > { %492 = vst [vmem:[%s6613_s26 + $0x1c0] sm:$0xff] %v491_v56  ;;  %v497_v59 = vld [vmem:[%s6608_s25 + $0x2f8] sm:$0xff]  ;;  %494 = vst [vmem:[%s6613_s26 + $0x1c8] sm:$0xff] %v493_v57  ;;  %v499_v60 = vld [vmem:[%s6608_s25 + $0x300] sm:$0xff] }
  0x30   : > { %496 = vst [vmem:[%s6613_s26 + $0x1d0] sm:$0xff] %v495_v58  ;;  %498 = vst [vmem:[%s6613_s26 + $0x1d8] sm:$0xff] %v497_v59  ;;  %v501_v61 = vld [vmem:[%s6608_s25 + $0x308] sm:$0xff]  ;;  %v503_v62 = vld [vmem:[%s6608_s25 + $0x310] sm:$0xff] }
  0x31   : > { %500 = vst [vmem:[%s6613_s26 + $0x1e0] sm:$0xff] %v499_v60  ;;  %502 = vst [vmem:[%s6613_s26 + $0x1e8] sm:$0xff] %v501_v61  ;;  %v505_v63 = vld [vmem:[%s6608_s25 + $0x318] sm:$0xff]  ;;  %v507_v0 = vld [vmem:[%s6608_s25 + $0x320] sm:$0xff] }
  0x32   : > { %504 = vst [vmem:[%s6613_s26 + $0x1f0] sm:$0xff] %v503_v62  ;;  %v509_v1 = vld [vmem:[%s6608_s25 + $0x328] sm:$0xff]  ;;  %506 = vst [vmem:[%s6613_s26 + $0x1f8] sm:$0xff] %v505_v63  ;;  %v511_v2 = vld [vmem:[%s6608_s25 + $0x330] sm:$0xff] }
  0x33   : > { %508 = vst [vmem:[%s6613_s26 + $0x200] sm:$0xff] %v507_v0  ;;  %510 = vst [vmem:[%s6613_s26 + $0x208] sm:$0xff] %v509_v1  ;;  %v513_v3 = vld [vmem:[%s6608_s25 + $0x338] sm:$0xff]  ;;  %v515_v4 = vld [vmem:[%s6608_s25 + $0x340] sm:$0xff] }
  0x34   : > { %512 = vst [vmem:[%s6613_s26 + $0x210] sm:$0xff] %v511_v2  ;;  %514 = vst [vmem:[%s6613_s26 + $0x218] sm:$0xff] %v513_v3  ;;  %v517_v5 = vld [vmem:[%s6608_s25 + $0x348] sm:$0xff]  ;;  %v519_v6 = vld [vmem:[%s6608_s25 + $0x350] sm:$0xff] }
  0x35   : > { %516 = vst [vmem:[%s6613_s26 + $0x220] sm:$0xff] %v515_v4  ;;  %v521_v7 = vld [vmem:[%s6608_s25 + $0x358] sm:$0xff]  ;;  %518 = vst [vmem:[%s6613_s26 + $0x228] sm:$0xff] %v517_v5  ;;  %v523_v8 = vld [vmem:[%s6608_s25 + $0x480] sm:$0xff] }
  0x36   : > { %520 = vst [vmem:[%s6613_s26 + $0x230] sm:$0xff] %v519_v6  ;;  %522 = vst [vmem:[%s6613_s26 + $0x238] sm:$0xff] %v521_v7  ;;  %v525_v9 = vld [vmem:[%s6608_s25 + $0x488] sm:$0xff]  ;;  %v527_v10 = vld [vmem:[%s6608_s25 + $0x490] sm:$0xff] }
  0x37   : > { %524 = vst [vmem:[%s6613_s26 + $0x240] sm:$0xff] %v523_v8  ;;  %526 = vst [vmem:[%s6613_s26 + $0x248] sm:$0xff] %v525_v9  ;;  %v529_v11 = vld [vmem:[%s6608_s25 + $0x498] sm:$0xff]  ;;  %v531_v12 = vld [vmem:[%s6608_s25 + $0x4a0] sm:$0xff] }
  0x38   : > { %528 = vst [vmem:[%s6613_s26 + $0x250] sm:$0xff] %v527_v10  ;;  %v533_v13 = vld [vmem:[%s6608_s25 + $0x4a8] sm:$0xff]  ;;  %530 = vst [vmem:[%s6613_s26 + $0x258] sm:$0xff] %v529_v11  ;;  %v535_v14 = vld [vmem:[%s6608_s25 + $0x4b0] sm:$0xff] }
  0x39   : > { %532 = vst [vmem:[%s6613_s26 + $0x260] sm:$0xff] %v531_v12  ;;  %534 = vst [vmem:[%s6613_s26 + $0x268] sm:$0xff] %v533_v13  ;;  %v537_v15 = vld [vmem:[%s6608_s25 + $0x4b8] sm:$0xff]  ;;  %v539_v16 = vld [vmem:[%s6608_s25 + $0x4c0] sm:$0xff] }
  0x3a   : > { %536 = vst [vmem:[%s6613_s26 + $0x270] sm:$0xff] %v535_v14  ;;  %538 = vst [vmem:[%s6613_s26 + $0x278] sm:$0xff] %v537_v15  ;;  %v541_v17 = vld [vmem:[%s6608_s25 + $0x4c8] sm:$0xff]  ;;  %v543_v18 = vld [vmem:[%s6608_s25 + $0x4d0] sm:$0xff] }
  0x3b   : > { %540 = vst [vmem:[%s6613_s26 + $0x280] sm:$0xff] %v539_v16  ;;  %v545_v19 = vld [vmem:[%s6608_s25 + $0x4d8] sm:$0xff]  ;;  %542 = vst [vmem:[%s6613_s26 + $0x288] sm:$0xff] %v541_v17  ;;  %v547_v20 = vld [vmem:[%s6608_s25 + $0x4e0] sm:$0xff] }
  0x3c   : > { %544 = vst [vmem:[%s6613_s26 + $0x290] sm:$0xff] %v543_v18  ;;  %546 = vst [vmem:[%s6613_s26 + $0x298] sm:$0xff] %v545_v19  ;;  %v549_v21 = vld [vmem:[%s6608_s25 + $0x4e8] sm:$0xff]  ;;  %v551_v22 = vld [vmem:[%s6608_s25 + $0x4f0] sm:$0xff] }
  0x3d   : > { %548 = vst [vmem:[%s6613_s26 + $0x2a0] sm:$0xff] %v547_v20  ;;  %550 = vst [vmem:[%s6613_s26 + $0x2a8] sm:$0xff] %v549_v21  ;;  %v553_v23 = vld [vmem:[%s6608_s25 + $0x4f8] sm:$0xff]  ;;  %v555_v24 = vld [vmem:[%s6608_s25 + $0x500] sm:$0xff] }
  0x3e   : > { %552 = vst [vmem:[%s6613_s26 + $0x2b0] sm:$0xff] %v551_v22  ;;  %v557_v25 = vld [vmem:[%s6608_s25 + $0x508] sm:$0xff]  ;;  %554 = vst [vmem:[%s6613_s26 + $0x2b8] sm:$0xff] %v553_v23  ;;  %v559_v26 = vld [vmem:[%s6608_s25 + $0x510] sm:$0xff] }
  0x3f   : > { %556 = vst [vmem:[%s6613_s26 + $0x2c0] sm:$0xff] %v555_v24  ;;  %558 = vst [vmem:[%s6613_s26 + $0x2c8] sm:$0xff] %v557_v25  ;;  %v561_v27 = vld [vmem:[%s6608_s25 + $0x518] sm:$0xff]  ;;  %v563_v28 = vld [vmem:[%s6608_s25 + $0x520] sm:$0xff] }
  0x40   : > { %560 = vst [vmem:[%s6613_s26 + $0x2d0] sm:$0xff] %v559_v26  ;;  %562 = vst [vmem:[%s6613_s26 + $0x2d8] sm:$0xff] %v561_v27  ;;  %v565_v29 = vld [vmem:[%s6608_s25 + $0x528] sm:$0xff]  ;;  %v567_v30 = vld [vmem:[%s6608_s25 + $0x530] sm:$0xff] }
  0x41   : > { %564 = vst [vmem:[%s6613_s26 + $0x2e0] sm:$0xff] %v563_v28  ;;  %v569_v31 = vld [vmem:[%s6608_s25 + $0x538] sm:$0xff]  ;;  %566 = vst [vmem:[%s6613_s26 + $0x2e8] sm:$0xff] %v565_v29  ;;  %v571_v32 = vld [vmem:[%s6608_s25 + $0x540] sm:$0xff] }
  0x42   : > { %568 = vst [vmem:[%s6613_s26 + $0x2f0] sm:$0xff] %v567_v30  ;;  %570 = vst [vmem:[%s6613_s26 + $0x2f8] sm:$0xff] %v569_v31  ;;  %v573_v33 = vld [vmem:[%s6608_s25 + $0x548] sm:$0xff]  ;;  %v575_v34 = vld [vmem:[%s6608_s25 + $0x550] sm:$0xff] }
  0x43   : > { %572 = vst [vmem:[%s6613_s26 + $0x300] sm:$0xff] %v571_v32  ;;  %574 = vst [vmem:[%s6613_s26 + $0x308] sm:$0xff] %v573_v33  ;;  %v577_v35 = vld [vmem:[%s6608_s25 + $0x558] sm:$0xff]  ;;  %v579_v36 = vld [vmem:[%s6608_s25 + $0x560] sm:$0xff] }
  0x44   : > { %576 = vst [vmem:[%s6613_s26 + $0x310] sm:$0xff] %v575_v34  ;;  %v581_v37 = vld [vmem:[%s6608_s25 + $0x568] sm:$0xff]  ;;  %578 = vst [vmem:[%s6613_s26 + $0x318] sm:$0xff] %v577_v35  ;;  %v583_v38 = vld [vmem:[%s6608_s25 + $0x570] sm:$0xff] }
  0x45   : > { %580 = vst [vmem:[%s6613_s26 + $0x320] sm:$0xff] %v579_v36  ;;  %582 = vst [vmem:[%s6613_s26 + $0x328] sm:$0xff] %v581_v37  ;;  %v585_v39 = vld [vmem:[%s6608_s25 + $0x578] sm:$0xff]  ;;  %v587_v40 = vld [vmem:[%s6608_s25 + $0x580] sm:$0xff] }
  0x46   : > { %584 = vst [vmem:[%s6613_s26 + $0x330] sm:$0xff] %v583_v38  ;;  %586 = vst [vmem:[%s6613_s26 + $0x338] sm:$0xff] %v585_v39  ;;  %v589_v41 = vld [vmem:[%s6608_s25 + $0x588] sm:$0xff]  ;;  %v591_v42 = vld [vmem:[%s6608_s25 + $0x590] sm:$0xff] }
  0x47   : > { %588 = vst [vmem:[%s6613_s26 + $0x340] sm:$0xff] %v587_v40  ;;  %v593_v43 = vld [vmem:[%s6608_s25 + $0x598] sm:$0xff]  ;;  %590 = vst [vmem:[%s6613_s26 + $0x348] sm:$0xff] %v589_v41 }
  0x48   : > { %592 = vst [vmem:[%s6613_s26 + $0x350] sm:$0xff] %v591_v42  ;;  %594 = vst [vmem:[%s6613_s26 + $0x358] sm:$0xff] %v593_v43 }
  0x49 PF: > { %p4448_p5 = scmp.ge.s32.totalorder %s6552_s14, 1  ;;  %p599_p6 = scmp.lt.s32.totalorder %s6552_s14, 3 }
  0x4b   : > { %p600_p7 = pnand %p4448_p5, %p599_p6 }
  0x4d   : > { %603 = sbr.rel (%p600_p7) target bundleno = 636 (0x27c), region = 66 }
  0x54   : > { %v4483_v44 = vld [vmem:[%s8093_s1 + $0x40] sm:$0xff]  ;;  %v4484_v45 = vld [vmem:[%s8093_s1 + $0x48] sm:$0xff]  ;;  %s606_s6 = sand.u32 1, %s6544_s12   ;;  %v4485_v49 = vld [vmem:[%s8093_s1 + $0x50] sm:$0xff]  ;;  %vm716_vm0 = vcmask 523264   ;;  %p7972_p8 = scmp.lt.s32.totalorder %s4443_s15, 1 }
  0x55   : > { %v4699_v46 = vld [vmem:[%s8093_s1 + $0x100] sm:$0xff]  ;;  %v5967_v47 = vpack.c.bf16 %v4484_v45, %v4483_v44  ;;  %v4700_v48 = vld [vmem:[%s8093_s1 + $0x108] sm:$0xff]  ;;  %v4486_v50 = vld [vmem:[%s8093_s1 + $0x58] sm:$0xff]  ;;  %s6377_s18 = smul.u32 864, %s606_s6  ;;  %vm4349_vm1 = vcmask 31744  }
  0x56   : > { %v6849_v51 = vpack.c.bf16 %v4700_v48, %v4699_v46  ;;  %v5971_v52 = vpack.c.bf16 %v4486_v50, %v4485_v49  ;;  %v4701_v53 = vld [vmem:[%s8093_s1 + $0x110] sm:$0xff]  ;;  %v4702_v54 = vld [vmem:[%s8093_s1 + $0x118] sm:$0xff]  ;;  %v4487_v55 = vld [vmem:[%s8093_s1 + $0x60] sm:$0xff]  ;;  %s8224_s15 = smov (!%p7972_p8, %s4443_s15), 1 }
  0x57   : > { %5968 = vmatprep.subr.bf16.mxu1 %v5967_v47  ;;  %v6860_v56 = vpack.c.bf16 %v4702_v54, %v4701_v53  ;;  %v4488_v57 = vld [vmem:[%s8093_s1 + $0x68] sm:$0xff]  ;;  %v4703_v58 = vld [vmem:[%s8093_s1 + $0x120] sm:$0xff]  ;;  %s6873_s4 = scalar_lea.vmem [#allocation2], %s6377_s18  ;;  %v4489_v0 = vld [vmem:[%s8093_s1 + $0x70] sm:$0xff]  ;;  %s5030_s14 = sshll.u32 %s8224_s15, 8 }
  0x58   : > { %v4704_v59 = vld [vmem:[%s8093_s1 + $0x128] sm:$0xff]  ;;  %6032 = vmatprep.subr.bf16.mxu0 %v6849_v51  ;;  %5970 = vmatpush3.bf16.msra.mxu1 %v5967_v47  ;;  %v5975_v60 = vpack.c.bf16 %v4488_v57, %v4487_v55  ;;  %v4451_v61 = vld [vmem:[%s6873_s4 + $0x120] sm:$0xff]  ;;  %v4667_v62 = vld [vmem:[%s6873_s4 + $0x130] sm:$0xff]  ;;  %s7995_s29 = scalar_lea.vmem %s8095_s3, %s5030_s14 }
  0x59   : > { %8141 = vst [vmem:[#allocation3_spill] sm:$0xff] %v6860_v56  ;;  %6034 = vmatpush3.bf16.msra.mxu0 %v6849_v51  ;;  %5972 = vmatprep.subr.bf16.mxu1 %v5971_v52  ;;  %v6878_v63 = vpack.c.bf16 %v4704_v59, %v4703_v58  ;;  %v4490_v1 = vld [vmem:[%s8093_s1 + $0x78] sm:$0xff]  ;;  %v4705_v2 = vld [vmem:[%s8093_s1 + $0x130] sm:$0xff]  ;;  %v666_v6 = vld [vmem:[%s8093_s1] sm:$0xff] }
  0x5a   : > { %6036 = vmatprep.subr.bf16.mxu0 %v6860_v56  ;;  %5407 = vmatprep.mubr.msk.f32.mxu1 %vm716_vm0, %v4451_v61  ;;  %v4706_v3 = vld [vmem:[%s8093_s1 + $0x138] sm:$0xff]  ;;  %v5979_v4 = vpack.c.bf16 %v4490_v1, %v4489_v0  ;;  %v667_v7 = vld [vmem:[%s8093_s1 + $0x8] sm:$0xff]  ;;  %v4771_v8 = vld [vmem:[%s8093_s1 + $0x140] sm:$0xff] }
  0x5b   : > { %8142 = vst [vmem:[#allocation4_spill] sm:$0xff] %v6878_v63  ;;  %5663 = vmatprep.mubr.msk.f32.mxu0 %vm716_vm0, %v4667_v62  ;;  %v6896_v5 = vpack.c.bf16 %v4706_v3, %v4705_v2  ;;  %v4772_v9 = vld [vmem:[%s8093_s1 + $0x148] sm:$0xff]  ;;  %v5983_v10 = vpack.c.bf16 %v667_v7, %v666_v6  ;;  %v4773_v12 = vld [vmem:[%s8093_s1 + $0x150] sm:$0xff]  ;;  %v4774_v13 = vld [vmem:[%s8093_s1 + $0x158] sm:$0xff] }
  0x5c   : > { %5974 = vmatpush3.bf16.msra.mxu1 %v5971_v52  ;;  %v6047_v11 = vpack.c.bf16 %v4772_v9, %v4771_v8  ;;  %v4452_v14 = vld [vmem:[%s6873_s4 + $0x128] sm:$0xff]  ;;  %v668_v15 = vld [vmem:[%s8093_s1 + $0x10] sm:$0xff]  ;;  %v669_v16 = vld [vmem:[%s8093_s1 + $0x18] sm:$0xff]  ;;  %v6051_v18 = vpack.c.bf16 %v4774_v13, %v4773_v12 }
  0x5d   : > { %6038 = vmatpush3.bf16.msra.mxu0 %v6860_v56  ;;  %5976 = vmatprep.subr.bf16.mxu1 %v5975_v60  ;;  %8143 = vst [vmem:[#allocation5_spill] sm:$0xff] %v6896_v5  ;;  %v4668_v17 = vld [vmem:[%s6873_s4 + $0x138] sm:$0xff]  ;;  %v6929_v19 = vld [vmem:[%s6873_s4 + $0x140] sm:$0xff]  ;;  %v5987_v20 = vpack.c.bf16 %v669_v16, %v668_v15  ;;  %v4776_v22 = vld [vmem:[%s8093_s1 + $0x168] sm:$0xff] }
  0x5e   : > { %6040 = vmatprep.subr.bf16.mxu0 %v6878_v63  ;;  %v4775_v21 = vld [vmem:[%s8093_s1 + $0x160] sm:$0xff]  ;;  %v671_v24 = vld [vmem:[%s8093_s1 + $0x28] sm:$0xff]  ;;  %v6951_v26 = vld [vmem:[%s6873_s4 + $0x150] sm:$0xff] }
  0x5f   : > { %v670_v23 = vld [vmem:[%s8093_s1 + $0x20] sm:$0xff]  ;;  %v6946_v25 = vld [vmem:[%s6873_s4 + $0x148] sm:$0xff]  ;;  %v6055_v27 = vpack.c.bf16 %v4776_v22, %v4775_v21  ;;  %v4777_v28 = vld [vmem:[%s8093_s1 + $0x170] sm:$0xff] }
  0x60   : > { %5978 = vmatpush3.bf16.msra.mxu1 %v5975_v60  ;;  %v4778_v29 = vld [vmem:[%s8093_s1 + $0x178] sm:$0xff]  ;;  %v5991_v30 = vpack.c.bf16 %v671_v24, %v670_v23  ;;  %v672_v31 = vld [vmem:[%s8093_s1 + $0x30] sm:$0xff]  ;;  %v6976_v34 = vld [vmem:[%s6873_s4 + $0x160] sm:$0xff] }
  0x61   : > { %6042 = vmatpush3.bf16.msra.mxu0 %v6878_v63  ;;  %5980 = vmatprep.subr.bf16.mxu1 %v5979_v4  ;;  %v673_v32 = vld [vmem:[%s8093_s1 + $0x38] sm:$0xff]  ;;  %v6059_v35 = vpack.c.bf16 %v4778_v29, %v4777_v28  ;;  %v4811_v36 = vld [vmem:[%s8093_s1 + $0x180] sm:$0xff]  ;;  %v4812_v37 = vld [vmem:[%s8093_s1 + $0x188] sm:$0xff] }
  0x62   : > { %6044 = vmatprep.subr.bf16.mxu0 %v6896_v5  ;;  %v6973_v33 = vld [vmem:[%s6873_s4 + $0x158] sm:$0xff]  ;;  %v5995_v38 = vpack.c.bf16 %v673_v32, %v672_v31  ;;  %v6993_v39 = vld [vmem:[%s6873_s4 + $0x168] sm:$0xff]  ;;  %v4587_v40 = vld [vmem:[%s8093_s1 + $0x80] sm:$0xff]  ;;  %v6063_v43 = vpack.c.bf16 %v4812_v37, %v4811_v36 }
  0x63   : > { %v4588_v41 = vld [vmem:[%s8093_s1 + $0x88] sm:$0xff]  ;;  %v7002_v42 = vld [vmem:[%s6873_s4 + $0x170] sm:$0xff]  ;;  %v7015_v45 = vld [vmem:[%s6873_s4 + $0x178] sm:$0xff] }
  0x64   : > { %5982 = vmatpush3.bf16.msra.mxu1 %v5979_v4  ;;  %v7006_v44 = vpack.c.bf16 %v4588_v41, %v4587_v40  ;;  %v7018_v46 = vld [vmem:[%s6873_s4 + $0x180] sm:$0xff]  ;;  %v7030_v47 = vld [vmem:[%s6873_s4 + $0x188] sm:$0xff]  ;;  %v7033_v48 = vld [vmem:[%s6873_s4 + $0x190] sm:$0xff] }
  0x65   : > { %6046 = vmatpush3.bf16.msra.mxu0 %v6896_v5  ;;  %5984 = vmatprep.subr.bf16.mxu1 %v5983_v10  ;;  %v7044_v49 = vld [vmem:[%s6873_s4 + $0x198] sm:$0xff]  ;;  %v7047_v50 = vld [vmem:[%s6873_s4 + $0x1a0] sm:$0xff]  ;;  %v7058_v52 = vld [vmem:[%s6873_s4 + $0x1a8] sm:$0xff] }
  0x66   : > { %6048 = vmatprep.subr.bf16.mxu0 %v6047_v11  ;;  %8144 = vst [vmem:[#allocation6_spill] sm:$0xff] %v7058_v52  ;;  %v7061_v53 = vld [vmem:[%s6873_s4 + $0x250] sm:$0xff]  ;;  %v4814_v55 = vld [vmem:[%s8093_s1 + $0x198] sm:$0xff]  ;;  %v7084_v59 = vld [vmem:[%s6873_s4 + $0x260] sm:$0xff] }
  0x67   : > { %5408 = vmatmul.mubr.msk.f32.vlgmr.msra.gmra.mrb[0].mxu1 %vm716_vm0, %v4452_v14  ;;  %v4813_v54 = vld [vmem:[%s8093_s1 + $0x190] sm:$0xff]  ;;  %v7078_v57 = vld [vmem:[%s6873_s4 + $0x258] sm:$0xff]  ;;  %v4815_v61 = vld [vmem:[%s8093_s1 + $0x1a0] sm:$0xff] }
  0x68   : > { %5664 = vmatmul.mubr.msk.f32.vlgmr.msra.gmra.mrb[0].mxu0 %vm716_vm0, %v4668_v17  ;;  %5986 = vmatpush3.bf16.msra.mxu1 %v5983_v10  ;;  %v7081_v58 = vld [vmem:[%s6873_s4 + $0x1b0] sm:$0xff]  ;;  %v6067_v60 = vpack.c.bf16 %v4814_v55, %v4813_v54  ;;  %v7099_v0 = vld [vmem:[%s6873_s4 + $0x1b8] sm:$0xff]  ;;  %v7104_v1 = vld [vmem:[%s6873_s4 + $0x268] sm:$0xff] }
  0x69   : > { %6050 = vmatpush3.bf16.msra.mxu0 %v6047_v11  ;;  %5410 = vmatprep.mubr.msk.f32.mxu1 %vm716_vm0, %v4667_v62  ;;  %8145 = vst [vmem:[#allocation7_spill] sm:$0xff] %v7081_v58  ;;  %v4816_v62 = vld [vmem:[%s8093_s1 + $0x1a8] sm:$0xff]  ;;  %8146 = vst [vmem:[#allocation8_spill] sm:$0xff] %v7099_v0  ;;  %v7107_v2 = vld [vmem:[%s6873_s4 + $0x1c0] sm:$0xff] }
  0x6a   : > { %5666 = vmatprep.mubr.msk.f32.mxu0 %vm716_vm0, %v6929_v19  ;;  %6052 = vmatprep.subr.bf16.mxu0 %v6051_v18  ;;  %8147 = vst [vmem:[#allocation9_spill] sm:$0xff] %v7107_v2  ;;  %v7110_v3 = vld [vmem:[%s6873_s4 + $0x270] sm:$0xff]  ;;  %v6071_v4 = vpack.c.bf16 %v4816_v62, %v4815_v61  ;;  %v4818_v7 = vld [vmem:[%s8093_s1 + $0x1b8] sm:$0xff]  ;;  %v7125_v8 = vld [vmem:[%s6873_s4 + $0x1c8] sm:$0xff] }
  0x6b   : > { %5411 = vmatmul.mubr.msk.f32.gmra.mrb[2].mxu1 %vm716_vm0, %v4668_v17  ;;  %5988 = vmatprep.subr.bf16.mxu1 %v5987_v20  ;;  %v4817_v6 = vld [vmem:[%s8093_s1 + $0x1b0] sm:$0xff]  ;;  %8148 = vst [vmem:[#allocation10_spill] sm:$0xff] %v7125_v8  ;;  %v7130_v9 = vld [vmem:[%s6873_s4 + $0x278] sm:$0xff]  ;;  %v7136_v11 = vld [vmem:[%s6873_s4 + $0x280] sm:$0xff] }
  0x6c   : > { %5667 = vmatmul.mubr.msk.f32.gmra.mrb[2].mxu0 %vm716_vm0, %v6946_v25  ;;  %5413 = vmatprep.mubr.msk.f32.mxu1 %vm716_vm0, %v6929_v19  ;;  %v7133_v10 = vld [vmem:[%s6873_s4 + $0x1d0] sm:$0xff]  ;;  %v6075_v12 = vpack.c.bf16 %v4818_v7, %v4817_v6  ;;  %v4883_v13 = vld [vmem:[%s8093_s1 + $0x1c0] sm:$0xff]  ;;  %v4884_v14 = vld [vmem:[%s8093_s1 + $0x1c8] sm:$0xff] }
  0x6d   : > { %5669 = vmatprep.mubr.msk.f32.mxu0 %vm716_vm0, %v6951_v26  ;;  %6054 = vmatpush3.bf16.msra.mxu0 %v6051_v18  ;;  %8149 = vst [vmem:[#allocation11_spill] sm:$0xff] %v7133_v10  ;;  %v7151_v15 = vld [vmem:[%s6873_s4 + $0x1d8] sm:$0xff]  ;;  %v7156_v16 = vld [vmem:[%s6873_s4 + $0x288] sm:$0xff]  ;;  %v7159_v17 = vld [vmem:[%s6873_s4 + $0x1e0] sm:$0xff] }
  0x6e   : > { %6056 = vmatprep.subr.bf16.mxu0 %v6055_v27  ;;  %5990 = vmatpush3.bf16.msra.mxu1 %v5987_v20  ;;  %8150 = vst [vmem:[#allocation12_spill] sm:$0xff] %v7151_v15  ;;  %8151 = vst [vmem:[#allocation13_spill] sm:$0xff] %v7159_v17  ;;  %v7162_v18 = vld [vmem:[%s6873_s4 + $0x290] sm:$0xff]  ;;  %v7164_v20 = vpack.c.bf16 %v4884_v14, %v4883_v13  ;;  %v7173_v21 = vld [vmem:[%s6873_s4 + $0x1e8] sm:$0xff] }
  0x6f   : > { %5414 = vmatmul.mubr.msk.f32.gmra.mrb[4].mxu1 %vm716_vm0, %v6946_v25  ;;  %5992 = vmatprep.subr.bf16.mxu1 %v5991_v30  ;;  %8152 = vst [vmem:[#allocation14_spill] sm:$0xff] %v7173_v21  ;;  %v7178_v22 = vld [vmem:[%s6873_s4 + $0x298] sm:$0xff]  ;;  %v7181_v23 = vld [vmem:[%s6873_s4 + $0x1f0] sm:$0xff]  ;;  %v7184_v24 = vld [vmem:[%s6873_s4 + $0x2a0] sm:$0xff] }
  0x70   : > { %5670 = vmatmul.mubr.msk.f32.gmra.mrb[4].mxu0 %vm716_vm0, %v6973_v33  ;;  %5416 = vmatprep.mubr.msk.f32.mxu1 %vm716_vm0, %v6951_v26  ;;  %8153 = vst [vmem:[#allocation15_spill] sm:$0xff] %v7181_v23  ;;  %v7199_v28 = vld [vmem:[%s6873_s4 + $0x2a8] sm:$0xff]  ;;  %v7202_v29 = vld [vmem:[%s6873_s4 + $0x200] sm:$0xff]  ;;  %v7219_v32 = vld [vmem:[%s6873_s4 + $0x2b8] sm:$0xff] }
  0x71   : > { %5672 = vmatprep.mubr.msk.f32.mxu0 %vm716_vm0, %v6976_v34  ;;  %6058 = vmatpush3.bf16.msra.mxu0 %v6055_v27  ;;  %v7194_v27 = vld [vmem:[%s6873_s4 + $0x1f8] sm:$0xff]  ;;  %8155 = vst [vmem:[#allocation17_spill] sm:$0xff] %v7202_v29  ;;  %v7214_v31 = vld [vmem:[%s6873_s4 + $0x208] sm:$0xff]  ;;  %v7225_v36 = vld [vmem:[%s6873_s4 + $0x2c0] sm:$0xff] }
  0x72   : > { %6060 = vmatprep.subr.bf16.mxu0 %v6059_v35  ;;  %5994 = vmatpush3.bf16.msra.mxu1 %v5991_v30  ;;  %8154 = vst [vmem:[#allocation16_spill] sm:$0xff] %v7194_v27  ;;  %v7205_v30 = vld [vmem:[%s6873_s4 + $0x2b0] sm:$0xff]  ;;  %8156 = vst [vmem:[#allocation18_spill] sm:$0xff] %v7214_v31  ;;  %v7234_v37 = vld [vmem:[%s6873_s4 + $0x218] sm:$0xff] }
  0x73   : > { %5417 = vmatmul.mubr.msk.f32.gmra.mrb[6].mxu1 %vm716_vm0, %v6973_v33  ;;  %5996 = vmatprep.subr.bf16.mxu1 %v5995_v38  ;;  %8158 = vst [vmem:[#allocation20_spill] sm:$0xff] %v7234_v37  ;;  %v634_v40 = vld [vmem:[%s6873_s4] sm:$0xff]  ;;  %v7243_v41 = vld [vmem:[%s6873_s4 + $0x2d0] sm:$0xff]  ;;  %v4590_v54 = vld [vmem:[%s8093_s1 + $0x98] sm:$0xff] }
  0x74   : > { %5673 = vmatmul.mubr.msk.f32.gmra.mrb[6].mxu0 %vm716_vm0, %v6993_v39  ;;  %5419 = vmatprep.mubr.msk.f32.mxu1 %vm716_vm0, %v6976_v34  ;;  %v635_v55 = vld [vmem:[%s6873_s4 + $0x8] sm:$0xff]  ;;  %v7263_v61 = vld [vmem:[%s6873_s4 + $0x10] sm:$0xff]  ;;  %v7266_v62 = vld [vmem:[%s6873_s4 + $0x2e0] sm:$0xff] }
  0x75   : > { %5675 = vmatprep.mubr.msk.f32.mxu0 %vm716_vm0, %v7002_v42  ;;  %6062 = vmatpush3.bf16.msra.mxu0 %v6059_v35  ;;  %v7222_v35 = vld [vmem:[%s6873_s4 + $0x210] sm:$0xff]  ;;  %8159 = vst [vmem:[#allocation21_spill] sm:$0xff] %v7263_v61  ;;  %v4591_v6 = vld [vmem:[%s8093_s1 + $0xa0] sm:$0xff]  ;;  %v4592_v7 = vld [vmem:[%s8093_s1 + $0xa8] sm:$0xff] }
  0x76   : > { %6064 = vmatprep.subr.bf16.mxu0 %v6063_v43  ;;  %5998 = vmatpush3.bf16.msra.mxu1 %v5995_v38  ;;  %8157 = vst [vmem:[#allocation19_spill] sm:$0xff] %v7222_v35  ;;  %v7239_v38 = vld [vmem:[%s6873_s4 + $0x2c8] sm:$0xff]  ;;  %v7289_v14 = vld [vmem:[%s6873_s4 + $0x20] sm:$0xff]  ;;  %v7401_v56 = vld [vmem:[%s6873_s4 + $0x338] sm:$0xff] }
  0x77   : > { %5420 = vmatmul.mubr.msk.f32.gmra.mrb[8].mxu1 %vm716_vm0, %v6993_v39  ;;  %6000 = vmatprep.subr.bf16.mxu1 %v7006_v44  ;;  %v7286_v13 = vld [vmem:[%s6873_s4 + $0x2e8] sm:$0xff]  ;;  %8161 = vst [vmem:[#allocation23_spill] sm:$0xff] %v7289_v14  ;;  %v7384_v63 = vld [vmem:[%s6873_s4 + $0x60] sm:$0xff]  ;;  %8172 = vst [vmem:[#allocation34_spill] sm:$0xff] %v7401_v56 }
  0x78   : > { %5676 = vmatmul.mubr.msk.f32.gmra.mrb[8].mxu0 %vm716_vm0, %v7015_v45  ;;  %5422 = vmatprep.mubr.msk.f32.mxu1 %vm716_vm0, %v7002_v42  ;;  %8169 = vst [vmem:[#allocation31_spill] sm:$0xff] %v7384_v63 }
  0x79   : > { %5678 = vmatprep.mubr.msk.f32.mxu0 %vm716_vm0, %v7018_v46 }
  0x7b   : > { %5423 = vmatmul.mubr.msk.f32.gmra.mrb[10].mxu1 %vm716_vm0, %v7015_v45 }
  0x7c   : > { %5679 = vmatmul.mubr.msk.f32.gmra.mrb[10].mxu0 %vm716_vm0, %v7030_v47  ;;  %5425 = vmatprep.mubr.msk.f32.mxu1 %vm716_vm0, %v7018_v46 }
  0x7d   : > { %5681 = vmatprep.mubr.msk.f32.mxu0 %vm716_vm0, %v7033_v48 }
  0x7f   : > { %5426 = vmatmul.mubr.msk.f32.gmra.mrb[12].mxu1 %vm716_vm0, %v7030_v47 }
  0x80   : > { %5682 = vmatmul.mubr.msk.f32.gmra.mrb[12].mxu0 %vm716_vm0, %v7044_v49  ;;  %5428 = vmatprep.mubr.msk.f32.mxu1 %vm716_vm0, %v7033_v48 }
  0x81   : > { %5684 = vmatprep.mubr.msk.f32.mxu0 %vm716_vm0, %v7047_v50 }
  0x83   : > { %5429 = vmatmul.mubr.msk.f32.gmra.mrb[14].mxu1 %vm716_vm0, %v7044_v49 }
  0x84   : > { %5685 = vmatmul.mubr.msk.f32.gmra.mrb[14].mxu0 %vm716_vm0, %v7058_v52  ;;  %5431 = vmatprep.mubr.msk.f32.mxu1 %vm716_vm0, %v7047_v50 }
  0x85   : > { %5727 = vmatprep.mubr.msk.f32.mxu0 %vm716_vm0, %v7061_v53 }
  0x87   : > { %5432 = vmatmul.mubr.msk.f32.gmra.mrb[16].mxu1 %vm716_vm0, %v7058_v52  ;;  %v4887_v52 = vld [vmem:[%s8093_s1 + $0x1e0] sm:$0xff] }
  0x88   : > { %5728 = vmatmul.mubr.msk.f32.vlgmr.msra.gmra.mrb[0].mxu0 %vm716_vm0, %v7078_v57  ;;  %5434 = vmatprep.mubr.msk.f32.mxu1 %vm716_vm0, %v7081_v58  ;;  %v7444_v58 = vld [vmem:[%s6873_s4 + $0x90] sm:$0xff] }
  0x89   : > { %6066 = vmatpush3.bf16.msra.mxu0 %v6063_v43  ;;  %5730 = vmatprep.mubr.msk.f32.mxu0 %vm716_vm0, %v7084_v59  ;;  %v4589_v43 = vld [vmem:[%s8093_s1 + $0x90] sm:$0xff]  ;;  %8179 = vst [vmem:[#allocation41_spill] sm:$0xff] %v7444_v58 }
  0x8a   : > { %6068 = vmatprep.subr.bf16.mxu0 %v6067_v60 }
  0x8b   : > { %5435 = vmatmul.mubr.msk.f32.gmra.mrb[18].mxu1 %vm716_vm0, %v7099_v0  ;;  %v4885_v0 = vld [vmem:[%s8093_s1 + $0x1d0] sm:$0xff] }
  0x8c   : > { %5731 = vmatmul.mubr.msk.f32.gmra.mrb[2].mxu0 %vm716_vm0, %v7104_v1  ;;  %5437 = vmatprep.mubr.msk.f32.mxu1 %vm716_vm0, %v7107_v2  ;;  %v7421_v2 = vld [vmem:[%s6873_s4 + $0x348] sm:$0xff] }
  0x8d   : > { %5733 = vmatprep.mubr.msk.f32.mxu0 %vm716_vm0, %v7110_v3  ;;  %6070 = vmatpush3.bf16.msra.mxu0 %v6067_v60  ;;  %v7260_v60 = vld [vmem:[%s6873_s4 + $0x2d8] sm:$0xff]  ;;  %8176 = vst [vmem:[#allocation38_spill] sm:$0xff] %v7421_v2 }
  0x8e   : > { %6072 = vmatprep.subr.bf16.mxu0 %v6071_v4 }
  0x8f   : > { %5438 = vmatmul.mubr.msk.f32.gmra.mrb[20].mxu1 %vm716_vm0, %v7125_v8  ;;  %v7407_v8 = vld [vmem:[%s6873_s4 + $0x340] sm:$0xff] }
  0x90   : > { %5734 = vmatmul.mubr.msk.f32.gmra.mrb[4].mxu0 %vm716_vm0, %v7130_v9  ;;  %5440 = vmatprep.mubr.msk.f32.mxu1 %vm716_vm0, %v7133_v10  ;;  %v7404_v10 = vld [vmem:[%s6873_s4 + $0x70] sm:$0xff]  ;;  %8174 = vst [vmem:[#allocation36_spill] sm:$0xff] %v7407_v8 }
  0x91   : > { %5736 = vmatprep.mubr.msk.f32.mxu0 %vm716_vm0, %v7136_v11  ;;  %6074 = vmatpush3.bf16.msra.mxu0 %v6071_v4  ;;  %v6003_v4 = vpack.c.bf16 %v4590_v54, %v4589_v43  ;;  %v6007_v43 = vpack.c.bf16 %v4592_v7, %v4591_v6  ;;  %v4594_v54 = vld [vmem:[%s8093_s1 + $0xb8] sm:$0xff]  ;;  %v7315_v7 = vld [vmem:[%s6873_s4 + $0x30] sm:$0xff]  ;;  %8173 = vst [vmem:[#allocation35_spill] sm:$0xff] %v7404_v10 }
  0x92   : > { %6076 = vmatprep.subr.bf16.mxu0 %v6075_v12  ;;  %v7312_v6 = vld [vmem:[%s6873_s4 + $0x2f8] sm:$0xff]  ;;  %8163 = vst [vmem:[#allocation25_spill] sm:$0xff] %v7315_v7 }
  0x93   : > { %5441 = vmatmul.mubr.msk.f32.gmra.mrb[22].mxu1 %vm716_vm0, %v7151_v15  ;;  %v7396_v15 = vld [vmem:[%s6873_s4 + $0x68] sm:$0xff] }
  0x94   : > { %5737 = vmatmul.mubr.msk.f32.gmra.mrb[6].mxu0 %vm716_vm0, %v7156_v16  ;;  %5443 = vmatprep.mubr.msk.f32.mxu1 %vm716_vm0, %v7159_v17  ;;  %v7387_v17 = vld [vmem:[%s6873_s4 + $0x330] sm:$0xff]  ;;  %8171 = vst [vmem:[#allocation33_spill] sm:$0xff] %v7396_v15 }
  0x95   : > { %5739 = vmatprep.mubr.msk.f32.mxu0 %vm716_vm0, %v7162_v18  ;;  %6078 = vmatpush3.bf16.msra.mxu0 %v6075_v12  ;;  %v7279_v12 = vld [vmem:[%s6873_s4 + $0x18] sm:$0xff]  ;;  %8170 = vst [vmem:[#allocation32_spill] sm:$0xff] %v7387_v17 }
  0x96   : > { %6080 = vmatprep.subr.bf16.mxu0 %v7164_v20  ;;  %8160 = vst [vmem:[#allocation22_spill] sm:$0xff] %v7279_v12 }
  0x97   : > { %5444 = vmatmul.mubr.msk.f32.gmra.mrb[24].mxu1 %vm716_vm0, %v7173_v21  ;;  %v7376_v21 = vld [vmem:[%s6873_s4 + $0x58] sm:$0xff] }
  0x98   : > { %5740 = vmatmul.mubr.msk.f32.gmra.mrb[8].mxu0 %vm716_vm0, %v7178_v22  ;;  %5446 = vmatprep.mubr.msk.f32.mxu1 %vm716_vm0, %v7181_v23  ;;  %v7355_v23 = vld [vmem:[%s6873_s4 + $0x48] sm:$0xff]  ;;  %8167 = vst [vmem:[#allocation29_spill] sm:$0xff] %v7376_v21 }
  0x99   : > { %5742 = vmatprep.mubr.msk.f32.mxu0 %vm716_vm0, %v7184_v24  ;;  %8165 = vst [vmem:[#allocation27_spill] sm:$0xff] %v7355_v23 }
  0x9b   : > { %5447 = vmatmul.mubr.msk.f32.gmra.mrb[26].mxu1 %vm716_vm0, %v7194_v27  ;;  %v7344_v27 = vld [vmem:[%s6873_s4 + $0x310] sm:$0xff] }
  0x9c   : > { %5743 = vmatmul.mubr.msk.f32.gmra.mrb[10].mxu0 %vm716_vm0, %v7199_v28  ;;  %5449 = vmatprep.mubr.msk.f32.mxu1 %vm716_vm0, %v7202_v29  ;;  %v4628_v29 = vld [vmem:[%s8093_s1 + $0xc8] sm:$0xff] }
  0x9d   : > { %5745 = vmatprep.mubr.msk.f32.mxu0 %vm716_vm0, %v7205_v30 }
  0x9f   : > { %5450 = vmatmul.mubr.msk.f32.gmra.mrb[28].mxu1 %vm716_vm0, %v7214_v31  ;;  %v4627_v31 = vld [vmem:[%s8093_s1 + $0xc0] sm:$0xff] }
  0xa0   : > { %5746 = vmatmul.mubr.msk.f32.gmra.mrb[12].mxu0 %vm716_vm0, %v7219_v32  ;;  %5452 = vmatprep.mubr.msk.f32.mxu1 %vm716_vm0, %v7222_v35  ;;  %v7346_v5 = vpack.c.bf16 %v4628_v29, %v4627_v31  ;;  %v7363_v29 = vld [vmem:[%s6873_s4 + $0x50] sm:$0xff]  ;;  %v7366_v31 = vld [vmem:[%s6873_s4 + $0x320] sm:$0xff] }
  0xa1   : > { %5748 = vmatprep.mubr.msk.f32.mxu0 %vm716_vm0, %v7225_v36  ;;  %8166 = vst [vmem:[#allocation28_spill] sm:$0xff] %v7363_v29 }
  0xa3   : > { %5453 = vmatmul.mubr.msk.f32.gmra.mrb[30].mxu1 %vm716_vm0, %v7234_v37  ;;  %v7318_v37 = vld [vmem:[%s6873_s4 + $0x300] sm:$0xff] }
  0xa4   : > { %5749 = vmatmul.mubr.msk.f32.gmra.mrb[14].mxu0 %vm716_vm0, %v7239_v38  ;;  %5471 = vmatprep.mubr.msk.f32.mxu1 %vm716_vm0, %v634_v40  ;;  %v7292_v40 = vld [vmem:[%s6873_s4 + $0x2f0] sm:$0xff] }
  0xa5   : > { %5751 = vmatprep.mubr.msk.f32.mxu0 %vm716_vm0, %v7243_v41 }
  0xa7   : > { %5472 = vmatmul.mubr.msk.f32.vlgmr.msra.gmra.mrb[0].mxu1 %vm716_vm0, %v635_v55  ;;  %v7307_v55 = vld [vmem:[%s6873_s4 + $0x28] sm:$0xff] }
  0xa8   : > { %5752 = vmatmul.mubr.msk.f32.gmra.mrb[16].mxu0 %vm716_vm0, %v7260_v60  ;;  %6002 = vmatpush3.bf16.msra.mxu1 %v7006_v44  ;;  %v4593_v44 = vld [vmem:[%s8093_s1 + $0xb0] sm:$0xff]  ;;  %8162 = vst [vmem:[#allocation24_spill] sm:$0xff] %v7307_v55 }
  0xa9   : > { %5474 = vmatprep.mubr.msk.f32.mxu1 %vm716_vm0, %v7263_v61  ;;  %5754 = vmatprep.mubr.msk.f32.mxu0 %vm716_vm0, %v7266_v62  ;;  %v6011_v35 = vpack.c.bf16 %v4594_v54, %v4593_v44  ;;  %v7338_v44 = vld [vmem:[%s6873_s4 + $0x308] sm:$0xff]  ;;  %v7341_v54 = vld [vmem:[%s6873_s4 + $0x40] sm:$0xff] }
  0xaa   : > { %6004 = vmatprep.subr.bf16.mxu1 %v6003_v4  ;;  %v7424_v61 = vld [vmem:[%s6873_s4 + $0x80] sm:$0xff] }
  0xab   : > { %5475 = vmatmul.mubr.msk.f32.gmra.mrb[2].mxu1 %vm716_vm0, %v7279_v12  ;;  %v7416_v12 = vld [vmem:[%s6873_s4 + $0x78] sm:$0xff]  ;;  %8177 = vst [vmem:[#allocation39_spill] sm:$0xff] %v7424_v61 }
  0xac   : > { %5755 = vmatmul.mubr.msk.f32.gmra.mrb[18].mxu0 %vm716_vm0, %v7286_v13  ;;  %5477 = vmatprep.mubr.msk.f32.mxu1 %vm716_vm0, %v7289_v14  ;;  %8175 = vst [vmem:[#allocation37_spill] sm:$0xff] %v7416_v12 }
  0xad   : > { %5757 = vmatprep.mubr.msk.f32.mxu0 %vm716_vm0, %v7292_v40  ;;  %6006 = vmatpush3.bf16.msra.mxu1 %v6003_v4  ;;  %v7333_v4 = vld [vmem:[%s6873_s4 + $0x38] sm:$0xff] }
  0xae   : > { %6008 = vmatprep.subr.bf16.mxu1 %v6007_v43  ;;  %8164 = vst [vmem:[#allocation26_spill] sm:$0xff] %v7333_v4 }
  0xaf   : > { %5478 = vmatmul.mubr.msk.f32.gmra.mrb[4].mxu1 %vm716_vm0, %v7307_v55 }
  0xb0   : > { %5758 = vmatmul.mubr.msk.f32.gmra.mrb[20].mxu0 %vm716_vm0, %v7312_v6  ;;  %5480 = vmatprep.mubr.msk.f32.mxu1 %vm716_vm0, %v7315_v7 }
  0xb1   : > { %5760 = vmatprep.mubr.msk.f32.mxu0 %vm716_vm0, %v7318_v37  ;;  %6010 = vmatpush3.bf16.msra.mxu1 %v6007_v43  ;;  %v7360_v43 = vld [vmem:[%s6873_s4 + $0x318] sm:$0xff] }
  0xb2   : > { %6012 = vmatprep.subr.bf16.mxu1 %v6011_v35 }
  0xb3   : > { %5481 = vmatmul.mubr.msk.f32.gmra.mrb[6].mxu1 %vm716_vm0, %v7333_v4 }
  0xb4   : > { %5761 = vmatmul.mubr.msk.f32.gmra.mrb[22].mxu0 %vm716_vm0, %v7338_v44  ;;  %5483 = vmatprep.mubr.msk.f32.mxu1 %vm716_vm0, %v7341_v54 }
  0xb5   : > { %5763 = vmatprep.mubr.msk.f32.mxu0 %vm716_vm0, %v7344_v27  ;;  %6014 = vmatpush3.bf16.msra.mxu1 %v6011_v35  ;;  %v7381_v35 = vld [vmem:[%s6873_s4 + $0x328] sm:$0xff] }
  0xb6   : > { %6016 = vmatprep.subr.bf16.mxu1 %v7346_v5  ;;  %8168 = vst [vmem:[#allocation30_spill] sm:$0xff] %v7381_v35 }
  0xb7   : > { %5484 = vmatmul.mubr.msk.f32.gmra.mrb[8].mxu1 %vm716_vm0, %v7355_v23 }
  0xb8   : > { %5764 = vmatmul.mubr.msk.f32.gmra.mrb[24].mxu0 %vm716_vm0, %v7360_v43  ;;  %5486 = vmatprep.mubr.msk.f32.mxu1 %vm716_vm0, %v7363_v29 }
  0xb9   : > { %5766 = vmatprep.mubr.msk.f32.mxu0 %vm716_vm0, %v7366_v31 }
  0xbb   : > { %5487 = vmatmul.mubr.msk.f32.gmra.mrb[10].mxu1 %vm716_vm0, %v7376_v21 }
  0xbc   : > { %5767 = vmatmul.mubr.msk.f32.gmra.mrb[26].mxu0 %vm716_vm0, %v7381_v35  ;;  %5489 = vmatprep.mubr.msk.f32.mxu1 %vm716_vm0, %v7384_v63  ;;  %v4890_v35 = vld [vmem:[%s8093_s1 + $0x1f8] sm:$0xff] }
  0xbd   : > { %5769 = vmatprep.mubr.msk.f32.mxu0 %vm716_vm0, %v7387_v17 }
  0xbf   : > { %5490 = vmatmul.mubr.msk.f32.gmra.mrb[12].mxu1 %vm716_vm0, %v7396_v15 }
  0xc0   : > { %5770 = vmatmul.mubr.msk.f32.gmra.mrb[28].mxu0 %vm716_vm0, %v7401_v56  ;;  %5492 = vmatprep.mubr.msk.f32.mxu1 %vm716_vm0, %v7404_v10  ;;  %v4886_v56 = vld [vmem:[%s8093_s1 + $0x1d8] sm:$0xff] }
  0xc1   : > { %5772 = vmatprep.mubr.msk.f32.mxu0 %vm716_vm0, %v7407_v8  ;;  %v7439_v8 = vld [vmem:[%s6873_s4 + $0x88] sm:$0xff]  ;;  %v6083_v17 = vpack.c.bf16 %v4886_v56, %v4885_v0  ;;  %v7459_v56 = vld [vmem:[%s6873_s4 + $0x98] sm:$0xff]  ;;  %v7465_v0 = vld [vmem:[%s6873_s4 + $0xa0] sm:$0xff] }
  0xc2   : > { %8178 = vst [vmem:[#allocation40_spill] sm:$0xff] %v7439_v8 }
  0xc3   : > { %5493 = vmatmul.mubr.msk.f32.gmra.mrb[14].mxu1 %vm716_vm0, %v7416_v12 }
  0xc4   : > { %5773 = vmatmul.mubr.msk.f32.gmra.mrb[30].mxu0 %vm716_vm0, %v7421_v2  ;;  %5495 = vmatprep.mubr.msk.f32.mxu1 %vm716_vm0, %v7424_v61  ;;  %v4888_v2 = vld [vmem:[%s8093_s1 + $0x1e8] sm:$0xff] }
  0xc5   : > { %5791 = vmatprep.mubr.msk.f32.mxu0 %vm716_vm0, %v7289_v14  ;;  %v6087_v14 = vpack.c.bf16 %v4888_v2, %v4887_v52  ;;  %v7480_v52 = vld [vmem:[%s6873_s4 + $0xa8] sm:$0xff]  ;;  %v7485_v2 = vld [vmem:[%s6873_s4 + $0xb0] sm:$0xff] }
  0xc7   : > { %5496 = vmatmul.mubr.msk.f32.gmra.mrb[16].mxu1 %vm716_vm0, %v7439_v8 }
  0xc8   : > { %5792 = vmatmul.mubr.msk.f32.vlgmr.msra.gmra.mrb[0].mxu0 %vm716_vm0, %v7307_v55  ;;  %5498 = vmatprep.mubr.msk.f32.mxu1 %vm716_vm0, %v7444_v58  ;;  %v4889_v55 = vld [vmem:[%s8093_s1 + $0x1f0] sm:$0xff] }
  0xc9   : > { %6082 = vmatpush3.bf16.msra.mxu0 %v7164_v20  ;;  %5794 = vmatprep.mubr.msk.f32.mxu0 %vm716_vm0, %v7315_v7  ;;  %v6091_v20 = vpack.c.bf16 %v4890_v35, %v4889_v55  ;;  %v4956_v7 = vld [vmem:[%s8093_s1 + $0x208] sm:$0xff]  ;;  %v7505_v55 = vld [vmem:[%s6873_s4 + $0xc0] sm:$0xff] }
  0xca   : > { %6084 = vmatprep.subr.bf16.mxu0 %v6083_v17 }
  0xcb   : > { %5499 = vmatmul.mubr.msk.f32.gmra.mrb[18].mxu1 %vm716_vm0, %v7459_v56 }
  0xcc   : > { %5795 = vmatmul.mubr.msk.f32.gmra.mrb[2].mxu0 %vm716_vm0, %v7333_v4  ;;  %5501 = vmatprep.mubr.msk.f32.mxu1 %vm716_vm0, %v7465_v0  ;;  %v4955_v4 = vld [vmem:[%s8093_s1 + $0x200] sm:$0xff] }
  0xcd   : > { %5797 = vmatprep.mubr.msk.f32.mxu0 %vm716_vm0, %v7341_v54  ;;  %6086 = vmatpush3.bf16.msra.mxu0 %v6083_v17  ;;  %v7500_v17 = vld [vmem:[%s6873_s4 + $0xb8] sm:$0xff]  ;;  %v7507_v35 = vpack.c.bf16 %v4956_v7, %v4955_v4  ;;  %v7536_v4 = vld [vmem:[%s6873_s4 + $0xe0] sm:$0xff] }
  0xce   : > { %6088 = vmatprep.subr.bf16.mxu0 %v6087_v14  ;;  %v7531_v7 = vld [vmem:[%s6873_s4 + $0xd8] sm:$0xff] }
  0xcf   : > { %5502 = vmatmul.mubr.msk.f32.gmra.mrb[20].mxu1 %vm716_vm0, %v7480_v52 }
  0xd0   : > { %5798 = vmatmul.mubr.msk.f32.gmra.mrb[4].mxu0 %vm716_vm0, %v7355_v23  ;;  %5504 = vmatprep.mubr.msk.f32.mxu1 %vm716_vm0, %v7485_v2  ;;  %v7516_v23 = vld [vmem:[%s6873_s4 + $0xc8] sm:$0xff] }
  0xd1   : > { %5800 = vmatprep.mubr.msk.f32.mxu0 %vm716_vm0, %v7363_v29  ;;  %6090 = vmatpush3.bf16.msra.mxu0 %v6087_v14  ;;  %v7521_v14 = vld [vmem:[%s6873_s4 + $0xd0] sm:$0xff]  ;;  %v4632_v29 = vld [vmem:[%s8093_s1 + $0xe8] sm:$0xff] }
  0xd2   : > { %6092 = vmatprep.subr.bf16.mxu0 %v6091_v20 }
  0xd3   : > { %5505 = vmatmul.mubr.msk.f32.gmra.mrb[22].mxu1 %vm716_vm0, %v7500_v17 }
  0xd4   : > { %5801 = vmatmul.mubr.msk.f32.gmra.mrb[6].mxu0 %vm716_vm0, %v7376_v21  ;;  %5507 = vmatprep.mubr.msk.f32.mxu1 %vm716_vm0, %v7505_v55  ;;  %v4631_v21 = vld [vmem:[%s8093_s1 + $0xe0] sm:$0xff] }
  0xd5   : > { %5803 = vmatprep.mubr.msk.f32.mxu0 %vm716_vm0, %v7384_v63  ;;  %6094 = vmatpush3.bf16.msra.mxu0 %v6091_v20  ;;  %v7545_v20 = vld [vmem:[%s6873_s4 + $0xe8] sm:$0xff] }
  0xd6   : > { %6096 = vmatprep.subr.bf16.mxu0 %v7507_v35  ;;  %v4556_v63 = vld [vmem:[%s6873_s4 + $0x248] sm:$0xff] }
  0xd7   : > { %5508 = vmatmul.mubr.msk.f32.gmra.mrb[24].mxu1 %vm716_vm0, %v7516_v23 }
  0xd8   : > { %5804 = vmatmul.mubr.msk.f32.gmra.mrb[8].mxu0 %vm716_vm0, %v7396_v15  ;;  %5510 = vmatprep.mubr.msk.f32.mxu1 %vm716_vm0, %v7521_v14  ;;  %v7550_v15 = vld [vmem:[%s6873_s4 + $0xf0] sm:$0xff] }
  0xd9   : > { %5806 = vmatprep.mubr.msk.f32.mxu0 %vm716_vm0, %v7404_v10  ;;  %v4555_v10 = vld [vmem:[%s6873_s4 + $0x240] sm:$0xff] }
  0xdb   : > { %5511 = vmatmul.mubr.msk.f32.gmra.mrb[26].mxu1 %vm716_vm0, %v7531_v7 }
  0xdc   : > { %5807 = vmatmul.mubr.msk.f32.gmra.mrb[10].mxu0 %vm716_vm0, %v7416_v12  ;;  %5513 = vmatprep.mubr.msk.f32.mxu1 %vm716_vm0, %v7536_v4  ;;  %v7559_v12 = vld [vmem:[%s6873_s4 + $0xf8] sm:$0xff] }
  0xdd   : > { %5809 = vmatprep.mubr.msk.f32.mxu0 %vm716_vm0, %v7424_v61  ;;  %v4629_v61 = vld [vmem:[%s8093_s1 + $0xd0] sm:$0xff] }
  0xdf   : > { %5514 = vmatmul.mubr.msk.f32.gmra.mrb[28].mxu1 %vm716_vm0, %v7545_v20 }
  0xe0   : > { %5810 = vmatmul.mubr.msk.f32.gmra.mrb[12].mxu0 %vm716_vm0, %v7439_v8  ;;  %5516 = vmatprep.mubr.msk.f32.mxu1 %vm716_vm0, %v7550_v15  ;;  %v4630_v8 = vld [vmem:[%s8093_s1 + $0xd8] sm:$0xff] }
  0xe1   : > { %5812 = vmatprep.mubr.msk.f32.mxu0 %vm716_vm0, %v7444_v58  ;;  %v6019_v58 = vpack.c.bf16 %v4630_v8, %v4629_v61  ;;  %v4633_v8 = vld [vmem:[%s8093_s1 + $0xf0] sm:$0xff] }
  0xe2   : > { %v4957_v61 = vld [vmem:[%s8093_s1 + $0x210] sm:$0xff] }
  0xe3   : > { %5517 = vmatmul.mubr.msk.f32.gmra.mrb[30].mxu1 %vm716_vm0, %v7559_v12 }
  0xe4   : > { %5813 = vmatmul.mubr.msk.f32.gmra.mrb[14].mxu0 %vm716_vm0, %v7459_v56  ;;  %5535 = vmatprep.mubr.msk.f32.mxu1 %vm716_vm0, %v4555_v10  ;;  %v4634_v10 = vld [vmem:[%s8093_s1 + $0xf8] sm:$0xff] }
  0xe5   : > { %5815 = vmatprep.mubr.msk.f32.mxu0 %vm716_vm0, %v7465_v0 }
  0xe7   : > { %5536 = vmatmul.mubr.msk.f32.vlgmr.msra.gmra.mrb[0].mxu1 %vm716_vm0, %v4556_v63  ;;  %v6023_v63 = vpack.c.bf16 %v4632_v29, %v4631_v21  ;;  %v2967_v21 = vld [vmem:[%s6873_s4 + $0x118] sm:$0xff] }
  0xe8   : > { %5816 = vmatmul.mubr.msk.f32.gmra.mrb[16].mxu0 %vm716_vm0, %v7480_v52  ;;  %6018 = vmatpush3.bf16.msra.mxu1 %v7346_v5  ;;  %v6027_v5 = vpack.c.bf16 %v4634_v10, %v4633_v8  ;;  %v4958_v29 = vld [vmem:[%s8093_s1 + $0x218] sm:$0xff]  ;;  %v4959_v8 = vld [vmem:[%s8093_s1 + $0x220] sm:$0xff]  ;;  %v4960_v10 = vld [vmem:[%s8093_s1 + $0x228] sm:$0xff] }
  0xe9   : > { %5538 = vmatprep.mubr.msk.f32.mxu1 %vm716_vm0, %v7061_v53  ;;  %5818 = vmatprep.mubr.msk.f32.mxu0 %vm716_vm0, %v7485_v2  ;;  %v7632_v53 = vld [vmem:[%s6873_s4 + $0x100] sm:$0xff] }
  0xea   : > { %6020 = vmatprep.subr.bf16.mxu1 %v6019_v58 }
  0xeb   : > { %5539 = vmatmul.mubr.msk.f32.gmra.mrb[2].mxu1 %vm716_vm0, %v7078_v57  ;;  %v7643_v57 = vld [vmem:[%s6873_s4 + $0x108] sm:$0xff] }
  0xec   : > { %5819 = vmatmul.mubr.msk.f32.gmra.mrb[18].mxu0 %vm716_vm0, %v7500_v17  ;;  %5541 = vmatprep.mubr.msk.f32.mxu1 %vm716_vm0, %v7084_v59 }
  0xed   : > { %5821 = vmatprep.mubr.msk.f32.mxu0 %vm716_vm0, %v7505_v55  ;;  %6022 = vmatpush3.bf16.msra.mxu1 %v6019_v58  ;;  %v2966_v58 = vld [vmem:[%s6873_s4 + $0x110] sm:$0xff] }
  0xee   : > { %6024 = vmatprep.subr.bf16.mxu1 %v6023_v63 }
  0xef   : > { %5542 = vmatmul.mubr.msk.f32.gmra.mrb[4].mxu1 %vm716_vm0, %v7104_v1 }
  0xf0   : > { %5822 = vmatmul.mubr.msk.f32.gmra.mrb[20].mxu0 %vm716_vm0, %v7516_v23  ;;  %5544 = vmatprep.mubr.msk.f32.mxu1 %vm716_vm0, %v7110_v3 }
  0xf1   : > { %5824 = vmatprep.mubr.msk.f32.mxu0 %vm716_vm0, %v7521_v14  ;;  %6026 = vmatpush3.bf16.msra.mxu1 %v6023_v63  ;;  %v6099_v63 = vpack.c.bf16 %v4958_v29, %v4957_v61  ;;  %v8193_v61 = vld [vmem:[#allocation24_spill] sm:$0xff] }
  0xf2   : > { %6028 = vmatprep.subr.bf16.mxu1 %v6027_v5  ;;  %v8194_v29 = vld [vmem:[#allocation12_spill] sm:$0xff] }
  0xf3   : > { %5545 = vmatmul.mubr.msk.f32.gmra.mrb[6].mxu1 %vm716_vm0, %v7130_v9 }
  0xf4   : > { %5825 = vmatmul.mubr.msk.f32.gmra.mrb[22].mxu0 %vm716_vm0, %v7531_v7  ;;  %5547 = vmatprep.mubr.msk.f32.mxu1 %vm716_vm0, %v7136_v11 }
  0xf5   : > { %5827 = vmatprep.mubr.msk.f32.mxu0 %vm716_vm0, %v7536_v4  ;;  %6030 = vmatpush3.bf16.msra.mxu1 %v6027_v5  ;;  %v4961_v5 = vld [vmem:[%s8093_s1 + $0x230] sm:$0xff] }
  0xf6   : > { %6111 = vmatprep.subr.bf16.mxu1 %v6849_v51 }
  0xf7   : > { %5548 = vmatmul.mubr.msk.f32.gmra.mrb[8].mxu1 %vm716_vm0, %v7156_v16 }
  0xf8   : > { %5828 = vmatmul.mubr.msk.f32.gmra.mrb[24].mxu0 %vm716_vm0, %v7545_v20  ;;  %5550 = vmatprep.mubr.msk.f32.mxu1 %vm716_vm0, %v7162_v18 }
  0xf9   : > { %5830 = vmatprep.mubr.msk.f32.mxu0 %vm716_vm0, %v7550_v15 }
  0xfb   : > { %5551 = vmatmul.mubr.msk.f32.gmra.mrb[10].mxu1 %vm716_vm0, %v7178_v22 }
  0xfc   : > { %5831 = vmatmul.mubr.msk.f32.gmra.mrb[26].mxu0 %vm716_vm0, %v7559_v12  ;;  %5553 = vmatprep.mubr.msk.f32.mxu1 %vm716_vm0, %v7184_v24 }
  0xfd   : > { %5833 = vmatprep.mubr.msk.f32.mxu0 %vm716_vm0, %v7632_v53 }
  0xff   : > { %5554 = vmatmul.mubr.msk.f32.gmra.mrb[12].mxu1 %vm716_vm0, %v7199_v28 }
 0x100   : > { %5834 = vmatmul.mubr.msk.f32.gmra.mrb[28].mxu0 %vm716_vm0, %v7643_v57  ;;  %5556 = vmatprep.mubr.msk.f32.mxu1 %vm716_vm0, %v7205_v30 }
 0x101   : > { %5836 = vmatprep.mubr.msk.f32.mxu0 %vm716_vm0, %v2966_v58  ;;  %v8191_v58 = vld [vmem:[#allocation11_spill] sm:$0xff] }
 0x103   : > { %5557 = vmatmul.mubr.msk.f32.gmra.mrb[14].mxu1 %vm716_vm0, %v7219_v32 }
 0x104   : > { %5837 = vmatmul.mubr.msk.f32.gmra.mrb[30].mxu0 %vm716_vm0, %v2967_v21  ;;  %5559 = vmatprep.mubr.msk.f32.mxu1 %vm716_vm0, %v7225_v36  ;;  %v8192_v21 = vld [vmem:[#allocation3_spill] sm:$0xff] }
 0x105   : > { %5855 = vmatprep.mubr.msk.f32.mxu0 %vm716_vm0, %v6929_v19  ;;  %v6103_v19 = vpack.c.bf16 %v4960_v10, %v4959_v8  ;;  %v8196_v8 = vld [vmem:[#allocation13_spill] sm:$0xff]  ;;  %v8198_v10 = vld [vmem:[#allocation26_spill] sm:$0xff] }
 0x107   : > { %5560 = vmatmul.mubr.msk.f32.gmra.mrb[16].mxu1 %vm716_vm0, %v7239_v38 }
 0x108   : > { %5856 = vmatmul.mubr.msk.f32.vlgmr.msra.gmra.mrb[0].mxu0 %vm716_vm0, %v6946_v25  ;;  %5562 = vmatprep.mubr.msk.f32.mxu1 %vm716_vm0, %v7243_v41  ;;  %v4962_v25 = vld [vmem:[%s8093_s1 + $0x238] sm:$0xff] }
 0x109   : > { %6098 = vmatpush3.bf16.msra.mxu0 %v7507_v35  ;;  %5858 = vmatprep.mubr.msk.f32.mxu0 %vm716_vm0, %v6951_v26  ;;  %v6107_v26 = vpack.c.bf16 %v4962_v25, %v4961_v5  ;;  %v8190_v35 = vld [vmem:[#allocation23_spill] sm:$0xff]  ;;  %v8201_v25 = vld [vmem:[#allocation5_spill] sm:$0xff] }
 0x10a   : > { %6100 = vmatprep.subr.bf16.mxu0 %v6099_v63  ;;  %v8200_v5 = vld [vmem:[#allocation15_spill] sm:$0xff] }
 0x10b   : > { %5563 = vmatmul.mubr.msk.f32.gmra.mrb[18].mxu1 %vm716_vm0, %v7260_v60 }
 0x10c   : > { %5859 = vmatmul.mubr.msk.f32.gmra.mrb[2].mxu0 %vm716_vm0, %v6973_v33  ;;  %5565 = vmatprep.mubr.msk.f32.mxu1 %vm716_vm0, %v7266_v62  ;;  %v8180_v33 = vld [vmem:[#allocation30_spill] sm:$0xff] }
 0x10d   : > { %5861 = vmatprep.mubr.msk.f32.mxu0 %vm716_vm0, %v6976_v34  ;;  %6102 = vmatpush3.bf16.msra.mxu0 %v6099_v63  ;;  %v8181_v34 = vld [vmem:[#allocation6_spill] sm:$0xff]  ;;  %v8195_v63 = vld [vmem:[#allocation25_spill] sm:$0xff] }
 0x10e   : > { %6104 = vmatprep.subr.bf16.mxu0 %v6103_v19 }
 0x10f   : > { %5566 = vmatmul.mubr.msk.f32.gmra.mrb[20].mxu1 %vm716_vm0, %v7286_v13 }
 0x110   : > { %5862 = vmatmul.mubr.msk.f32.gmra.mrb[4].mxu0 %vm716_vm0, %v6993_v39  ;;  %5568 = vmatprep.mubr.msk.f32.mxu1 %vm716_vm0, %v7292_v40  ;;  %v8182_v39 = vld [vmem:[#allocation32_spill] sm:$0xff] }
 0x111   : > { %5864 = vmatprep.mubr.msk.f32.mxu0 %vm716_vm0, %v7002_v42  ;;  %6106 = vmatpush3.bf16.msra.mxu0 %v6103_v19  ;;  %v8183_v42 = vld [vmem:[#allocation7_spill] sm:$0xff]  ;;  %v8199_v19 = vld [vmem:[#allocation14_spill] sm:$0xff] }
 0x112   : > { %6108 = vmatprep.subr.bf16.mxu0 %v6107_v26 }
 0x113   : > { %5569 = vmatmul.mubr.msk.f32.gmra.mrb[22].mxu1 %vm716_vm0, %v7312_v6 }
 0x114   : > { %5865 = vmatmul.mubr.msk.f32.gmra.mrb[6].mxu0 %vm716_vm0, %v7015_v45  ;;  %5571 = vmatprep.mubr.msk.f32.mxu1 %vm716_vm0, %v7318_v37  ;;  %v8184_v45 = vld [vmem:[#allocation34_spill] sm:$0xff] }
 0x115   : > { %5867 = vmatprep.mubr.msk.f32.mxu0 %vm716_vm0, %v7018_v46  ;;  %6110 = vmatpush3.bf16.msra.mxu0 %v6107_v26  ;;  %v8185_v46 = vld [vmem:[#allocation8_spill] sm:$0xff]  ;;  %v8202_v26 = vld [vmem:[#allocation27_spill] sm:$0xff] }
 0x117   : > { %5572 = vmatmul.mubr.msk.f32.gmra.mrb[24].mxu1 %vm716_vm0, %v7338_v44 }
 0x118   : > { %5868 = vmatmul.mubr.msk.f32.gmra.mrb[8].mxu0 %vm716_vm0, %v7030_v47  ;;  %5574 = vmatprep.mubr.msk.f32.mxu1 %vm716_vm0, %v7344_v27  ;;  %v8186_v47 = vld [vmem:[#allocation21_spill] sm:$0xff] }
 0x119   : > { %5870 = vmatprep.mubr.msk.f32.mxu0 %vm716_vm0, %v7033_v48  ;;  %v8187_v48 = vld [vmem:[#allocation9_spill] sm:$0xff] }
 0x11b   : > { %5575 = vmatmul.mubr.msk.f32.gmra.mrb[26].mxu1 %vm716_vm0, %v7360_v43 }
 0x11c   : > { %5871 = vmatmul.mubr.msk.f32.gmra.mrb[10].mxu0 %vm716_vm0, %v7044_v49  ;;  %5577 = vmatprep.mubr.msk.f32.mxu1 %vm716_vm0, %v7366_v31  ;;  %v8188_v49 = vld [vmem:[#allocation22_spill] sm:$0xff] }
 0x11d   : > { %5873 = vmatprep.mubr.msk.f32.mxu0 %vm716_vm0, %v7047_v50  ;;  %v8189_v50 = vld [vmem:[#allocation10_spill] sm:$0xff] }
 0x11f   : > { %5578 = vmatmul.mubr.msk.f32.gmra.mrb[28].mxu1 %vm716_vm0, %v8180_v33 }
 0x120   : > { %5874 = vmatmul.mubr.msk.f32.gmra.mrb[12].mxu0 %vm716_vm0, %v8181_v34  ;;  %5580 = vmatprep.mubr.msk.f32.mxu1 %vm716_vm0, %v8182_v39  ;;  %v8203_v34 = vld [vmem:[#allocation16_spill] sm:$0xff] }
 0x121   : > { %5876 = vmatprep.mubr.msk.f32.mxu0 %vm716_vm0, %v8183_v42  ;;  %v8204_v42 = vld [vmem:[#allocation28_spill] sm:$0xff] }
 0x123   : > { %5581 = vmatmul.mubr.msk.f32.gmra.mrb[30].mxu1 %vm716_vm0, %v8184_v45 }
 0x124   : > { %5877 = vmatmul.mubr.msk.f32.gmra.mrb[14].mxu0 %vm716_vm0, %v8185_v46  ;;  %5599 = vmatprep.mubr.msk.f32.mxu1 %vm716_vm0, %v8186_v47  ;;  %v8205_v46 = vld [vmem:[#allocation17_spill] sm:$0xff]  ;;  %v8207_v47 = vld [vmem:[#allocation18_spill] sm:$0xff] }
 0x125   : > { %5879 = vmatprep.mubr.msk.f32.mxu0 %vm716_vm0, %v8187_v48  ;;  %v8208_v48 = vld [vmem:[#allocation31_spill] sm:$0xff] }
 0x127   : > { %5600 = vmatmul.mubr.msk.f32.vlgmr.msra.gmra.mrb[0].mxu1 %vm716_vm0, %v8188_v49  ;;  %v8209_v49 = vld [vmem:[#allocation19_spill] sm:$0xff] }
 0x128   : > { %5880 = vmatmul.mubr.msk.f32.gmra.mrb[16].mxu0 %vm716_vm0, %v8189_v50  ;;  %6115 = vmatpush3.bf16.msra.mxu1 %v6849_v51  ;;  %v8197_v51 = vld [vmem:[#allocation4_spill] sm:$0xff]  ;;  %v7792_v50 = vld [vmem:[%s6873_s4 + $0x220] sm:$0xff] }
 0x129   : > { %5602 = vmatprep.mubr.msk.f32.mxu1 %vm716_vm0, %v8190_v35  ;;  %5882 = vmatprep.mubr.msk.f32.mxu0 %vm716_vm0, %v8191_v58  ;;  %v8210_v35 = vld [vmem:[#allocation33_spill] sm:$0xff]  ;;  %v8211_v58 = vld [vmem:[#allocation20_spill] sm:$0xff] }
 0x12a   : > { %6112 = vmatprep.subr.bf16.mxu1 %v8192_v21 }
 0x12b   : > { %5603 = vmatmul.mubr.msk.f32.gmra.mrb[2].mxu1 %vm716_vm0, %v8193_v61  ;;  %v7803_v61 = vld [vmem:[%s6873_s4 + $0x228] sm:$0xff] }
 0x12c   : > { %5883 = vmatmul.mubr.msk.f32.gmra.mrb[18].mxu0 %vm716_vm0, %v8194_v29  ;;  %5605 = vmatprep.mubr.msk.f32.mxu1 %vm716_vm0, %v8195_v63  ;;  %v4881_v29 = vld [vmem:[%s6873_s4 + $0x230] sm:$0xff] }
 0x12d   : > { %5885 = vmatprep.mubr.msk.f32.mxu0 %vm716_vm0, %v8196_v8  ;;  %6116 = vmatpush3.bf16.msra.mxu1 %v8192_v21  ;;  %v8212_v21 = vld [vmem:[#allocation35_spill] sm:$0xff]  ;;  %v8213_v63 = vld [vmem:[#allocation37_spill] sm:$0xff] }
 0x12e   : > { %6113 = vmatprep.subr.bf16.mxu1 %v8197_v51  ;;  %v8214_v8 = vld [vmem:[#allocation39_spill] sm:$0xff] }
 0x12f   : > { %5606 = vmatmul.mubr.msk.f32.gmra.mrb[4].mxu1 %vm716_vm0, %v8198_v10  ;;  %v8215_v10 = vld [vmem:[#allocation40_spill] sm:$0xff] }
 0x130   : > { %5886 = vmatmul.mubr.msk.f32.gmra.mrb[20].mxu0 %vm716_vm0, %v8199_v19  ;;  %5608 = vmatprep.mubr.msk.f32.mxu1 %vm716_vm0, %v7341_v54  ;;  %v8206_v54 = vld [vmem:[#allocation29_spill] sm:$0xff] }
 0x131   : > { %5888 = vmatprep.mubr.msk.f32.mxu0 %vm716_vm0, %v8200_v5  ;;  %6117 = vmatpush3.bf16.msra.mxu1 %v8197_v51  ;;  %v4882_v51 = vld [vmem:[%s6873_s4 + $0x238] sm:$0xff]  ;;  %v8216_v19 = vld [vmem:[#allocation41_spill] sm:$0xff] }
 0x132   : > { %6114 = vmatprep.subr.bf16.mxu1 %v8201_v25 }
 0x133   : > { %5609 = vmatmul.mubr.msk.f32.gmra.mrb[6].mxu1 %vm716_vm0, %v8202_v26 }
 0x134   : > { %5889 = vmatmul.mubr.msk.f32.gmra.mrb[22].mxu0 %vm716_vm0, %v8203_v34  ;;  %5611 = vmatprep.mubr.msk.f32.mxu1 %vm716_vm0, %v8204_v42 }
 0x135   : > { %5891 = vmatprep.mubr.msk.f32.mxu0 %vm716_vm0, %v8205_v46  ;;  %6118 = vmatpush3.bf16.msra.mxu1 %v8201_v25 }
 0x137   : > { %5612 = vmatmul.mubr.msk.f32.gmra.mrb[8].mxu1 %vm716_vm0, %v8206_v54 }
 0x138   : > { %5892 = vmatmul.mubr.msk.f32.gmra.mrb[24].mxu0 %vm716_vm0, %v8207_v47  ;;  %5614 = vmatprep.mubr.msk.f32.mxu1 %vm716_vm0, %v8208_v48 }
 0x139   : > { %5894 = vmatprep.mubr.msk.f32.mxu0 %vm716_vm0, %v8209_v49 }
 0x13b   : > { %5615 = vmatmul.mubr.msk.f32.gmra.mrb[10].mxu1 %vm716_vm0, %v8210_v35 }
 0x13c   : > { %5895 = vmatmul.mubr.msk.f32.gmra.mrb[26].mxu0 %vm716_vm0, %v8211_v58  ;;  %5617 = vmatprep.mubr.msk.f32.mxu1 %vm716_vm0, %v8212_v21 }
 0x13d   : > { %5897 = vmatprep.mubr.msk.f32.mxu0 %vm716_vm0, %v7792_v50 }
 0x13f   : > { %5618 = vmatmul.mubr.msk.f32.gmra.mrb[12].mxu1 %vm716_vm0, %v8213_v63 }
 0x140   : > { %5898 = vmatmul.mubr.msk.f32.gmra.mrb[28].mxu0 %vm716_vm0, %v7803_v61  ;;  %5620 = vmatprep.mubr.msk.f32.mxu1 %vm716_vm0, %v8214_v8 }
 0x141   : > { %5900 = vmatprep.mubr.msk.f32.mxu0 %vm716_vm0, %v4881_v29 }
 0x143   : > { %5621 = vmatmul.mubr.msk.f32.gmra.mrb[14].mxu1 %vm716_vm0, %v8215_v10 }
 0x144   : > { %5901 = vmatmul.mubr.msk.f32.gmra.mrb[30].mxu0 %vm716_vm0, %v4882_v51  ;;  %5623 = vmatprep.mubr.msk.f32.mxu1 %vm716_vm0, %v8216_v19 }
 0x145   : > { %5919 = vmatprep.mubr.msk.f32.mxu0 %vm716_vm0, %v7084_v59  ;;  %v4683_v59 = vld [vmem:[%s6873_s4 + $0x1b0] sm:$0xff] }
 0x147   : > { %5624 = vmatmul.mubr.msk.f32.gmra.mrb[16].mxu1 %vm716_vm0, %v7459_v56 }
 0x148   : > { %5920 = vmatmul.mubr.msk.f32.vlgmr.msra.gmra.mrb[0].mxu0 %vm716_vm0, %v7104_v1  ;;  %5626 = vmatprep.mubr.msk.f32.mxu1 %vm716_vm0, %v7465_v0  ;;  %v4684_v1 = vld [vmem:[%s6873_s4 + $0x1b8] sm:$0xff] }
 0x149   : > { %5922 = vmatprep.mubr.msk.f32.mxu0 %vm716_vm0, %v7110_v3  ;;  %v4685_v3 = vld [vmem:[%s6873_s4 + $0x1c0] sm:$0xff] }
 0x14b   : > { %5627 = vmatmul.mubr.msk.f32.gmra.mrb[18].mxu1 %vm716_vm0, %v7480_v52 }
 0x14c   : > { %5923 = vmatmul.mubr.msk.f32.gmra.mrb[2].mxu0 %vm716_vm0, %v7130_v9  ;;  %5629 = vmatprep.mubr.msk.f32.mxu1 %vm716_vm0, %v7485_v2  ;;  %v4686_v9 = vld [vmem:[%s6873_s4 + $0x1c8] sm:$0xff] }
 0x14d   : > { %5925 = vmatprep.mubr.msk.f32.mxu0 %vm716_vm0, %v7136_v11  ;;  %v4687_v11 = vld [vmem:[%s6873_s4 + $0x1d0] sm:$0xff] }
 0x14f   : > { %5630 = vmatmul.mubr.msk.f32.gmra.mrb[20].mxu1 %vm716_vm0, %v7500_v17 }
 0x150   : > { %5926 = vmatmul.mubr.msk.f32.gmra.mrb[4].mxu0 %vm716_vm0, %v7156_v16  ;;  %5632 = vmatprep.mubr.msk.f32.mxu1 %vm716_vm0, %v7505_v55  ;;  %v4689_v16 = vld [vmem:[%s6873_s4 + $0x1e0] sm:$0xff] }
 0x151   : > { %5928 = vmatprep.mubr.msk.f32.mxu0 %vm716_vm0, %v7162_v18  ;;  %v4690_v18 = vld [vmem:[%s6873_s4 + $0x1e8] sm:$0xff] }
 0x153   : > { %5633 = vmatmul.mubr.msk.f32.gmra.mrb[22].mxu1 %vm716_vm0, %v7516_v23  ;;  %v4692_v23 = vld [vmem:[%s6873_s4 + $0x1f8] sm:$0xff] }
 0x154   : > { %5929 = vmatmul.mubr.msk.f32.gmra.mrb[6].mxu0 %vm716_vm0, %v7178_v22  ;;  %5635 = vmatprep.mubr.msk.f32.mxu1 %vm716_vm0, %v7521_v14  ;;  %v4691_v22 = vld [vmem:[%s6873_s4 + $0x1f0] sm:$0xff] }
 0x155   : > { %5931 = vmatprep.mubr.msk.f32.mxu0 %vm716_vm0, %v7184_v24  ;;  %v4693_v24 = vld [vmem:[%s6873_s4 + $0x200] sm:$0xff] }
 0x157   : > { %5636 = vmatmul.mubr.msk.f32.gmra.mrb[24].mxu1 %vm716_vm0, %v7531_v7  ;;  %v7960_v7 = vld [vmem:[%s8094_s2] ss:$0 sm:$0xff] }
 0x158   : > { %5932 = vmatmul.mubr.msk.f32.gmra.mrb[8].mxu0 %vm716_vm0, %v7199_v28  ;;  %5638 = vmatprep.mubr.msk.f32.mxu1 %vm716_vm0, %v7536_v4  ;;  %v4695_v28 = vld [vmem:[%s6873_s4 + $0x210] sm:$0xff] }
 0x159   : > { %5934 = vmatprep.mubr.msk.f32.mxu0 %vm716_vm0, %v7205_v30  ;;  %v4696_v30 = vld [vmem:[%s6873_s4 + $0x218] sm:$0xff] }
 0x15b   : > { %5639 = vmatmul.mubr.msk.f32.gmra.mrb[26].mxu1 %vm716_vm0, %v7545_v20 }
 0x15c   : > { %5935 = vmatmul.mubr.msk.f32.gmra.mrb[10].mxu0 %vm716_vm0, %v7219_v32  ;;  %5641 = vmatprep.mubr.msk.f32.mxu1 %vm716_vm0, %v7550_v15  ;;  %v4688_v15 = vld [vmem:[%s6873_s4 + $0x1d8] sm:$0xff]  ;;  %v8217_v32 = vld [vmem:[#allocation36_spill] sm:$0xff] }
 0x15d   : > { %5937 = vmatprep.mubr.msk.f32.mxu0 %vm716_vm0, %v7225_v36  ;;  %v4953_v36 = vld [vmem:[%s6873_s4 + $0x350] sm:$0xff] }
 0x15f   : > { %5642 = vmatmul.mubr.msk.f32.gmra.mrb[28].mxu1 %vm716_vm0, %v7559_v12 }
 0x160   : > { %5938 = vmatmul.mubr.msk.f32.gmra.mrb[12].mxu0 %vm716_vm0, %v7239_v38  ;;  %5644 = vmatprep.mubr.msk.f32.mxu1 %vm716_vm0, %v7632_v53  ;;  %v4954_v38 = vld [vmem:[%s6873_s4 + $0x358] sm:$0xff] }
 0x161   : > { %5940 = vmatprep.mubr.msk.f32.mxu0 %vm716_vm0, %v7243_v41 }
 0x163   : > { %5645 = vmatmul.mubr.msk.f32.gmra.mrb[30].mxu1 %vm716_vm0, %v7643_v57 }
 0x164   : > { %5941 = vmatmul.mubr.msk.f32.gmra.mrb[14].mxu0 %vm716_vm0, %v7260_v60  ;;  %5687 = vmatprep.mubr.msk.f32.mxu1 %vm716_vm0, %v4683_v59 }
 0x165   : > { %5943 = vmatprep.mubr.msk.f32.mxu0 %vm716_vm0, %v7266_v62 }
 0x167   : > { %5688 = vmatmul.mubr.msk.f32.vlgmr.msra.gmra.mrb[16].mxu1 %vm716_vm0, %v4684_v1 }
 0x168   : > { %5944 = vmatmul.mubr.msk.f32.gmra.mrb[16].mxu0 %vm716_vm0, %v7286_v13  ;;  %5690 = vmatprep.mubr.msk.f32.mxu1 %vm716_vm0, %v4685_v3 }
 0x169   : > { %5946 = vmatprep.mubr.msk.f32.mxu0 %vm716_vm0, %v7292_v40 }
 0x16b   : > { %5691 = vmatmul.mubr.msk.f32.gmra.mrb[18].mxu1 %vm716_vm0, %v4686_v9 }
 0x16c   : > { %5947 = vmatmul.mubr.msk.f32.gmra.mrb[18].mxu0 %vm716_vm0, %v7312_v6  ;;  %5693 = vmatprep.mubr.msk.f32.mxu1 %vm716_vm0, %v4687_v11 }
 0x16d   : > { %5949 = vmatprep.mubr.msk.f32.mxu0 %vm716_vm0, %v7318_v37  ;;  %v8218_v37 = vld [vmem:[#allocation38_spill] sm:$0xff] }
 0x16f   : > { %5694 = vmatmul.mubr.msk.f32.gmra.mrb[20].mxu1 %vm716_vm0, %v4688_v15 }
 0x170   : > { %5950 = vmatmul.mubr.msk.f32.gmra.mrb[20].mxu0 %vm716_vm0, %v7338_v44  ;;  %5696 = vmatprep.mubr.msk.f32.mxu1 %vm716_vm0, %v4689_v16 }
 0x171   : > { %5952 = vmatprep.mubr.msk.f32.mxu0 %vm716_vm0, %v7344_v27  ;;  %v4694_v27 = vld [vmem:[%s6873_s4 + $0x208] sm:$0xff] }
 0x173   : > { %5697 = vmatmul.mubr.msk.f32.gmra.mrb[22].mxu1 %vm716_vm0, %v4690_v18 }
 0x174   : > { %5953 = vmatmul.mubr.msk.f32.gmra.mrb[22].mxu0 %vm716_vm0, %v7360_v43  ;;  %5699 = vmatprep.mubr.msk.f32.mxu1 %vm716_vm0, %v4691_v22 }
 0x175   : > { %5955 = vmatprep.mubr.msk.f32.mxu0 %vm716_vm0, %v7366_v31 }
 0x177   : > { %5700 = vmatmul.mubr.msk.f32.gmra.mrb[24].mxu1 %vm716_vm0, %v4692_v23 }
 0x178   : > { %5956 = vmatmul.mubr.msk.f32.gmra.mrb[24].mxu0 %vm716_vm0, %v8180_v33  ;;  %5702 = vmatprep.mubr.msk.f32.mxu1 %vm716_vm0, %v4693_v24 }
 0x179   : > { %5958 = vmatprep.mubr.msk.f32.mxu0 %vm716_vm0, %v8182_v39 }
 0x17b   : > { %5703 = vmatmul.mubr.msk.f32.gmra.mrb[26].mxu1 %vm716_vm0, %v4694_v27 }
 0x17c   : > { %5959 = vmatmul.mubr.msk.f32.gmra.mrb[26].mxu0 %vm716_vm0, %v8184_v45  ;;  %5705 = vmatprep.mubr.msk.f32.mxu1 %vm716_vm0, %v4695_v28 }
 0x17d   : > { %5961 = vmatprep.mubr.msk.f32.mxu0 %vm716_vm0, %v8217_v32 }
 0x17f   : > { %5706 = vmatmul.mubr.msk.f32.gmra.mrb[28].mxu1 %vm716_vm0, %v4696_v30 }
 0x180   : > { %5962 = vmatmul.mubr.msk.f32.gmra.mrb[28].mxu0 %vm716_vm0, %v8218_v37  ;;  %5708 = vmatprep.mubr.msk.f32.mxu1 %vm716_vm0, %v7792_v50 }
 0x181   : > { %5964 = vmatprep.mubr.msk.f32.mxu0 %vm716_vm0, %v4953_v36 }
 0x183   : > { %5709 = vmatmul.mubr.msk.f32.gmra.mrb[30].mxu1 %vm716_vm0, %v7803_v61 }
 0x184   : > { %5965 = vmatmul.mubr.msk.f32.gmra.mrb[30].mxu0 %vm716_vm0, %v4954_v38 }
 0x1fa   : > { %v5601_v41 = vpop.f32.mrb[0].mxu1 }
 0x1fb   : > { %v1957_v60 = vpop.f32.mrb[1].mxu1 }
 0x1fe   : > { %v5604_v62 = vpop.f32.mrb[2].mxu1 }
 0x1ff   : > { %v1967_v12 = vpop.f32.mrb[3].mxu1 }
 0x202   : > { %v5607_v13 = vpop.f32.mrb[4].mxu1 }
 0x203   : > { %v1977_v40 = vpop.f32.mrb[5].mxu1 }
 0x206   : > { %v5610_v6 = vpop.f32.mrb[6].mxu1 }
 0x207   : > { %v1987_v44 = vpop.f32.mrb[7].mxu1 }
 0x20a   : > { %v5613_v43 = vpop.f32.mrb[8].mxu1 }
 0x20b   : > { %v1997_v31 = vpop.f32.mrb[9].mxu1 }
 0x20e   : > { %v7945_v56 = vpop.f32.mrb[10].mxu1 }
 0x20f   : > { %v7947_v0 = vpop.f32.mrb[11].mxu1 }
 0x212   : > { %v7949_v52 = vpop.f32.mrb[12].mxu1 }
 0x213   : > { %v7951_v2 = vpop.f32.mrb[13].mxu1 }
 0x216   : > { %v7953_v17 = vpop.f32.mrb[14].mxu1 }
 0x217   : > { %v7955_v55 = vpop.f32.mrb[15].mxu1 }
 0x21b   : > { %v5921_v14 = vpop.f32.mrb[0].mxu0 }
 0x21c   : > { %v6119_v4 = vadd.f32 %v5921_v14, %v5601_v41  ;;  %v3927_v20 = vpop.f32.mrb[1].mxu0 }
 0x21d   : > { %v6120_v53 = vadd.f32 %v3927_v20, %v1957_v60 }
 0x21e   : > { %v4126_v57 = vadd.f32 %v6119_v4, %v7960_v7 }
 0x21f   : > { %v4125_v33 = vadd.f32 %v6120_v53, %v7960_v7  ;;  %v5924_v39 = vpop.f32.mrb[2].mxu0 }
 0x220   : > { %v4997_v45 = vmul.f32 -1.442695, %v4126_v57  ;;  %v6121_v5 = vadd.f32 %v5924_v39, %v5604_v62  ;;  %v3937_v25 = vpop.f32.mrb[3].mxu0 }
 0x221   : > { %v4996_v26 = vmul.f32 -1.442695, %v4125_v33  ;;  %v6122_v34 = vadd.f32 %v3937_v25, %v1967_v12 }
 0x222   : > { %6402 = vpow2.f32 %v4997_v45  ;;  %v4128_v42 = vadd.f32 %v6121_v5, %v7960_v7 }
 0x223   : > { %6404 = vpow2.f32 %v4996_v26  ;;  %v4127_v46 = vadd.f32 %v6122_v34, %v7960_v7  ;;  %v5927_v54 = vpop.f32.mrb[4].mxu0 }
 0x224   : > { %v4999_v47 = vmul.f32 -1.442695, %v4128_v42  ;;  %v6123_v48 = vadd.f32 %v5927_v54, %v5607_v13  ;;  %v3947_v49 = vpop.f32.mrb[5].mxu0 }
 0x225   : > { %v4998_v50 = vmul.f32 -1.442695, %v4127_v46  ;;  %v6124_v35 = vadd.f32 %v3947_v49, %v1977_v40 }
 0x226   : > { %6406 = vpow2.f32 %v4999_v47  ;;  %v4130_v58 = vadd.f32 %v6123_v48, %v7960_v7 }
 0x227   : > { %6408 = vpow2.f32 %v4998_v50  ;;  %v4129_v21 = vadd.f32 %v6124_v35, %v7960_v7  ;;  %v5930_v61 = vpop.f32.mrb[6].mxu0 }
 0x228   : > { %v5001_v29 = vmul.f32 -1.442695, %v4130_v58  ;;  %v6125_v63 = vadd.f32 %v5930_v61, %v5610_v6  ;;  %v3957_v8 = vpop.f32.mrb[7].mxu0 }
 0x229   : > { %v5000_v51 = vmul.f32 -1.442695, %v4129_v21  ;;  %v6126_v10 = vadd.f32 %v3957_v8, %v1987_v44 }
 0x22a   : > { %6410 = vpow2.f32 %v5001_v29  ;;  %v4132_v19 = vadd.f32 %v6125_v63, %v7960_v7 }
 0x22b   : > { %6412 = vpow2.f32 %v5000_v51  ;;  %v4131_v59 = vadd.f32 %v6126_v10, %v7960_v7  ;;  %v5933_v1 = vpop.f32.mrb[8].mxu0 }
 0x22c   : > { %v6403_v3 = vpop.eup %6402  ;;  %v5003_v9 = vmul.f32 -1.442695, %v4132_v19  ;;  %v6127_v11 = vadd.f32 %v5933_v1, %v5613_v43  ;;  %v3967_v15 = vpop.f32.mrb[9].mxu0 }
 0x22d   : > { %v6405_v16 = vpop.eup %6404  ;;  %v4254_v18 = vadd.f32 1.0, %v6403_v3  ;;  %v5002_v22 = vmul.f32 -1.442695, %v4131_v59  ;;  %v6128_v23 = vadd.f32 %v3967_v15, %v1997_v31 }
 0x22e   : > { %v4253_v24 = vadd.f32 1.0, %v6405_v16  ;;  %6414 = vpow2.f32 %v5003_v9  ;;  %v4134_v27 = vadd.f32 %v6127_v11, %v7960_v7 }
 0x22f   : > { %6416 = vrcp.f32 %v4254_v18  ;;  %v4133_v28 = vadd.f32 %v6128_v23, %v7960_v7  ;;  %v5936_v30 = vpop.f32.mrb[10].mxu0 }
 0x230   : > { %v6407_v32 = vpop.eup %6406  ;;  %6418 = vrcp.f32 %v4253_v24  ;;  %v5005_v36 = vmul.f32 -1.442695, %v4134_v27  ;;  %v6129_v37 = vadd.f32 %v5936_v30, %v7945_v56  ;;  %v3977_v38 = vpop.f32.mrb[11].mxu0 }
 0x231   : > { %v6409_v41 = vpop.eup %6408  ;;  %v4256_v60 = vadd.f32 1.0, %v6407_v32  ;;  %6420 = vpow2.f32 %v5002_v22  ;;  %v5004_v62 = vmul.f32 -1.442695, %v4133_v28  ;;  %v6130_v12 = vadd.f32 %v3977_v38, %v7947_v0 }
 0x232   : > { %v4255_v13 = vadd.f32 1.0, %v6409_v41  ;;  %6422 = vpow2.f32 %v5005_v36  ;;  %v4136_v40 = vadd.f32 %v6129_v37, %v7960_v7 }
 0x233   : > { %6424 = vrcp.f32 %v4256_v60  ;;  %v4135_v6 = vadd.f32 %v6130_v12, %v7960_v7  ;;  %v5939_v44 = vpop.f32.mrb[12].mxu0 }
 0x234   : > { %v6411_v43 = vpop.eup %6410  ;;  %6426 = vrcp.f32 %v4255_v13  ;;  %v5007_v31 = vmul.f32 -1.442695, %v4136_v40  ;;  %v6131_v56 = vadd.f32 %v5939_v44, %v7949_v52  ;;  %v3987_v14 = vpop.f32.mrb[13].mxu0 }
 0x235   : > { %v6413_v4 = vpop.eup %6412  ;;  %v4258_v20 = vadd.f32 1.0, %v6411_v43  ;;  %6428 = vpow2.f32 %v5004_v62  ;;  %v5006_v53 = vmul.f32 -1.442695, %v4135_v6  ;;  %v6132_v0 = vadd.f32 %v3987_v14, %v7951_v2 }
 0x236   : > { %v4257_v57 = vadd.f32 1.0, %v6413_v4  ;;  %6430 = vpow2.f32 %v5007_v31  ;;  %v4138_v33 = vadd.f32 %v6131_v56, %v7960_v7 }
 0x237   : > { %6432 = vrcp.f32 %v4258_v20  ;;  %v4137_v52 = vadd.f32 %v6132_v0, %v7960_v7  ;;  %v5942_v39 = vpop.f32.mrb[14].mxu0 }
 0x238   : > { %v6415_v45 = vpop.eup %6414  ;;  %6434 = vrcp.f32 %v4257_v57  ;;  %v5009_v5 = vmul.f32 -1.442695, %v4138_v33  ;;  %v6133_v2 = vadd.f32 %v5942_v39, %v7953_v17  ;;  %v3997_v25 = vpop.f32.mrb[15].mxu0 }
 0x239   : > { %v6417_v26 = vpop.eup %6416  ;;  %v4260_v34 = vadd.f32 1.0, %v6415_v45  ;;  %6436 = vpow2.f32 %v5006_v53  ;;  %v5008_v42 = vmul.f32 -1.442695, %v4137_v52  ;;  %v6134_v46 = vadd.f32 %v3997_v25, %v7955_v55 }
 0x23a   : > { %v6419_v54 = vpop.eup %6418  ;;  %4351 = vst.msk [vmem:[%s7995_s29 + $0x8] sm:$0xff] %vm4349_vm1, %v6417_v26  ;;  %6438 = vpow2.f32 %v5009_v5  ;;  %v4140_v47 = vadd.f32 %v6133_v2, %v7960_v7  ;;  %v5689_v48 = vpop.f32.mrb[16].mxu1 }
 0x23b   : > { %v6421_v49 = vpop.eup %6420  ;;  %4350 = vst.msk [vmem:[%s7995_s29] sm:$0xff] %vm4349_vm1, %v6419_v54  ;;  %6440 = vrcp.f32 %v4260_v34  ;;  %v4139_v17 = vadd.f32 %v6134_v46, %v7960_v7  ;;  %v5945_v50 = vpop.f32.mrb[16].mxu0 }
 0x23c   : > { %v2431_v35 = vpop.f32.mrb[17].mxu1  ;;  %v6423_v58 = vpop.eup %6422  ;;  %v4259_v21 = vadd.f32 1.0, %v6421_v49  ;;  %6442 = vpow2.f32 %v5008_v42  ;;  %v5011_v55 = vmul.f32 -1.442695, %v4140_v47  ;;  %v6135_v61 = vadd.f32 %v5945_v50, %v5689_v48 }
 0x23d   : > { %v4007_v29 = vpop.f32.mrb[17].mxu0  ;;  %v6425_v63 = vpop.eup %6424  ;;  %v4262_v8 = vadd.f32 1.0, %v6423_v58  ;;  %v5010_v51 = vmul.f32 -1.442695, %v4139_v17 }
 0x23e   : > { %v6136_v10 = vadd.f32 %v4007_v29, %v2431_v35  ;;  %v6427_v19 = vpop.eup %6426  ;;  %4353 = vst.msk [vmem:[%s7995_s29 + $0x18] sm:$0xff] %vm4349_vm1, %v6425_v63  ;;  %6444 = vrcp.f32 %v4259_v21  ;;  %v4142_v59 = vadd.f32 %v6135_v61, %v7960_v7  ;;  %v5692_v1 = vpop.f32.mrb[18].mxu1 }
 0x23f   : > { %v6429_v3 = vpop.eup %6428  ;;  %4352 = vst.msk [vmem:[%s7995_s29 + $0x10] sm:$0xff] %vm4349_vm1, %v6427_v19  ;;  %6446 = vrcp.f32 %v4262_v8  ;;  %v5948_v11 = vpop.f32.mrb[18].mxu0 }
 0x240   : > { %v4141_v9 = vadd.f32 %v6136_v10, %v7960_v7  ;;  %v2441_v15 = vpop.f32.mrb[19].mxu1  ;;  %v6431_v16 = vpop.eup %6430  ;;  %v4261_v18 = vadd.f32 1.0, %v6429_v3  ;;  %6448 = vpow2.f32 %v5011_v55  ;;  %v5013_v22 = vmul.f32 -1.442695, %v4142_v59 }
 0x241   : > { %v6137_v23 = vadd.f32 %v5948_v11, %v5692_v1  ;;  %v4017_v24 = vpop.f32.mrb[19].mxu0  ;;  %v6433_v27 = vpop.eup %6432  ;;  %v4264_v28 = vadd.f32 1.0, %v6431_v16  ;;  %6450 = vpow2.f32 %v5010_v51 }
 0x242   : > { %v5012_v30 = vmul.f32 -1.442695, %v4141_v9  ;;  %v6138_v32 = vadd.f32 %v4017_v24, %v2441_v15  ;;  %v6435_v36 = vpop.eup %6434  ;;  %4355 = vst.msk [vmem:[%s7995_s29 + $0x28] sm:$0xff] %vm4349_vm1, %v6433_v27  ;;  %6452 = vrcp.f32 %v4261_v18  ;;  %v5695_v38 = vpop.f32.mrb[20].mxu1 }
 0x243   : > { %v4144_v37 = vadd.f32 %v6137_v23, %v7960_v7  ;;  %v6437_v41 = vpop.eup %6436  ;;  %4354 = vst.msk [vmem:[%s7995_s29 + $0x20] sm:$0xff] %vm4349_vm1, %v6435_v36  ;;  %6454 = vrcp.f32 %v4264_v28  ;;  %v5951_v62 = vpop.f32.mrb[20].mxu0 }
 0x244   : > { %v4143_v60 = vadd.f32 %v6138_v32, %v7960_v7  ;;  %v2451_v12 = vpop.f32.mrb[21].mxu1  ;;  %v6439_v13 = vpop.eup %6438  ;;  %v4263_v40 = vadd.f32 1.0, %v6437_v41  ;;  %6456 = vpow2.f32 %v5013_v22  ;;  %v6139_v44 = vadd.f32 %v5951_v62, %v5695_v38 }
 0x245   : > { %v5015_v6 = vmul.f32 -1.442695, %v4144_v37  ;;  %v4027_v43 = vpop.f32.mrb[21].mxu0  ;;  %v6441_v31 = vpop.eup %6440  ;;  %v4266_v56 = vadd.f32 1.0, %v6439_v13  ;;  %6458 = vpow2.f32 %v5012_v30 }
 0x246   : > { %v6140_v14 = vadd.f32 %v4027_v43, %v2451_v12  ;;  %v6443_v4 = vpop.eup %6442  ;;  %4357 = vst.msk [vmem:[%s7995_s29 + $0x38] sm:$0xff] %vm4349_vm1, %v6441_v31  ;;  %6460 = vrcp.f32 %v4263_v40  ;;  %v5014_v20 = vmul.f32 -1.442695, %v4143_v60  ;;  %v4146_v53 = vadd.f32 %v6139_v44, %v7960_v7  ;;  %v5698_v0 = vpop.f32.mrb[22].mxu1 }
 0x247   : > { %6462 = vrcp.f32 %v4266_v56  ;;  %v4265_v57 = vadd.f32 1.0, %v6443_v4  ;;  %v5954_v52 = vpop.f32.mrb[22].mxu0  ;;  %v2461_v39 = vpop.f32.mrb[23].mxu1 }
 0x248   : > { %v4145_v33 = vadd.f32 %v6140_v14, %v7960_v7  ;;  %v6445_v45 = vpop.eup %6444  ;;  %6464 = vpow2.f32 %v5015_v6  ;;  %v5017_v5 = vmul.f32 -1.442695, %v4146_v53  ;;  %v6141_v2 = vadd.f32 %v5954_v52, %v5698_v0  ;;  %v4037_v25 = vpop.f32.mrb[23].mxu0 }
 0x249   : > { %v6447_v26 = vpop.eup %6446  ;;  %4356 = vst.msk [vmem:[%s7995_s29 + $0x30] sm:$0xff] %vm4349_vm1, %v6445_v45  ;;  %6466 = vrcp.f32 %v4265_v57  ;;  %v6142_v42 = vadd.f32 %v4037_v25, %v2461_v39 }
 0x24a   : > { %v5016_v34 = vmul.f32 -1.442695, %v4145_v33  ;;  %v6449_v46 = vpop.eup %6448  ;;  %4359 = vst.msk [vmem:[%s7995_s29 + $0x48] sm:$0xff] %vm4349_vm1, %v6447_v26  ;;  %6468 = vpow2.f32 %v5014_v20  ;;  %v4148_v54 = vadd.f32 %v6141_v2, %v7960_v7  ;;  %v5701_v47 = vpop.f32.mrb[24].mxu1 }
 0x24b   : > { %v6451_v48 = vpop.eup %6450  ;;  %v4268_v49 = vadd.f32 1.0, %v6449_v46  ;;  %6470 = vpow2.f32 %v5017_v5  ;;  %v4147_v17 = vadd.f32 %v6142_v42, %v7960_v7  ;;  %v5957_v50 = vpop.f32.mrb[24].mxu0 }
 0x24c   : > { %v2471_v35 = vpop.f32.mrb[25].mxu1  ;;  %v6453_v58 = vpop.eup %6452  ;;  %v4267_v21 = vadd.f32 1.0, %v6451_v48  ;;  %6472 = vpow2.f32 %v5016_v34  ;;  %v5019_v55 = vmul.f32 -1.442695, %v4148_v54  ;;  %v6143_v61 = vadd.f32 %v5957_v50, %v5701_v47 }
 0x24d   : > { %v4047_v29 = vpop.f32.mrb[25].mxu0  ;;  %v6455_v63 = vpop.eup %6454  ;;  %4358 = vst.msk [vmem:[%s7995_s29 + $0x40] sm:$0xff] %vm4349_vm1, %v6453_v58  ;;  %6474 = vrcp.f32 %v4268_v49  ;;  %v5018_v8 = vmul.f32 -1.442695, %v4147_v17 }
 0x24e   : > { %v6144_v51 = vadd.f32 %v4047_v29, %v2471_v35  ;;  %v6457_v10 = vpop.eup %6456  ;;  %4361 = vst.msk [vmem:[%s7995_s29 + $0x58] sm:$0xff] %vm4349_vm1, %v6455_v63  ;;  %6476 = vrcp.f32 %v4267_v21  ;;  %v4150_v19 = vadd.f32 %v6143_v61, %v7960_v7  ;;  %v5704_v59 = vpop.f32.mrb[26].mxu1 }
 0x24f   : > { %v6459_v1 = vpop.eup %6458  ;;  %v4270_v3 = vadd.f32 1.0, %v6457_v10  ;;  %6478 = vpow2.f32 %v5019_v55  ;;  %v5960_v11 = vpop.f32.mrb[26].mxu0 }
 0x250   : > { %v4149_v9 = vadd.f32 %v6144_v51, %v7960_v7  ;;  %v2481_v15 = vpop.f32.mrb[27].mxu1  ;;  %v6461_v16 = vpop.eup %6460  ;;  %v4269_v18 = vadd.f32 1.0, %v6459_v1  ;;  %6480 = vpow2.f32 %v5018_v8  ;;  %v5021_v22 = vmul.f32 -1.442695, %v4150_v19 }
 0x251   : > { %v6145_v23 = vadd.f32 %v5960_v11, %v5704_v59  ;;  %v4057_v24 = vpop.f32.mrb[27].mxu0  ;;  %v6463_v27 = vpop.eup %6462  ;;  %4360 = vst.msk [vmem:[%s7995_s29 + $0x50] sm:$0xff] %vm4349_vm1, %v6461_v16  ;;  %6482 = vrcp.f32 %v4270_v3 }
 0x252   : > { %v5020_v28 = vmul.f32 -1.442695, %v4149_v9  ;;  %v6146_v30 = vadd.f32 %v4057_v24, %v2481_v15  ;;  %v6465_v32 = vpop.eup %6464  ;;  %4363 = vst.msk [vmem:[%s7995_s29 + $0x68] sm:$0xff] %vm4349_vm1, %v6463_v27  ;;  %6484 = vrcp.f32 %v4269_v18  ;;  %v5707_v37 = vpop.f32.mrb[28].mxu1 }
 0x253   : > { %v4152_v36 = vadd.f32 %v6145_v23, %v7960_v7  ;;  %v6467_v38 = vpop.eup %6466  ;;  %v4272_v41 = vadd.f32 1.0, %v6465_v32  ;;  %6486 = vpow2.f32 %v5021_v22  ;;  %v5963_v62 = vpop.f32.mrb[28].mxu0 }
 0x254   : > { %v4151_v60 = vadd.f32 %v6146_v30, %v7960_v7  ;;  %v2491_v12 = vpop.f32.mrb[29].mxu1  ;;  %v6469_v13 = vpop.eup %6468  ;;  %4362 = vst.msk [vmem:[%s7995_s29 + $0x60] sm:$0xff] %vm4349_vm1, %v6467_v38  ;;  %6488 = vpow2.f32 %v5020_v28  ;;  %v6147_v6 = vadd.f32 %v5963_v62, %v5707_v37 }
 0x255   : > { %v5023_v40 = vmul.f32 -1.442695, %v4152_v36  ;;  %v4067_v44 = vpop.f32.mrb[29].mxu0  ;;  %v6471_v43 = vpop.eup %6470  ;;  %6490 = vrcp.f32 %v4272_v41  ;;  %v4271_v31 = vadd.f32 1.0, %v6469_v13 }
 0x256   : > { %v6148_v56 = vadd.f32 %v4067_v44, %v2491_v12  ;;  %v6473_v14 = vpop.eup %6472  ;;  %v4274_v4 = vadd.f32 1.0, %v6471_v43  ;;  %v5022_v20 = vmul.f32 -1.442695, %v4151_v60  ;;  %v4154_v53 = vadd.f32 %v6147_v6, %v7960_v7  ;;  %v5710_v0 = vpop.f32.mrb[30].mxu1 }
 0x257   : > { %6492 = vpow2.f32 %v5023_v40  ;;  %v6475_v57 = vpop.eup %6474  ;;  %v4273_v33 = vadd.f32 1.0, %v6473_v14  ;;  %v5966_v39 = vpop.f32.mrb[30].mxu0 }
 0x258   : > { %6494 = vrcp.f32 %v4271_v31  ;;  %v4153_v52 = vadd.f32 %v6148_v56, %v7960_v7  ;;  %v2501_v45 = vpop.f32.mrb[31].mxu1  ;;  %v6477_v5 = vpop.eup %6476  ;;  %4365 = vst.msk [vmem:[%s7995_s29 + $0x78] sm:$0xff] %vm4349_vm1, %v6475_v57  ;;  %v5025_v2 = vmul.f32 -1.442695, %v4154_v53  ;;  %v6149_v25 = vadd.f32 %v5966_v39, %v5710_v0 }
 0x259   : > { %6496 = vrcp.f32 %v4274_v4  ;;  %v4077_v26 = vpop.f32.mrb[31].mxu0  ;;  %v6479_v34 = vpop.eup %6478  ;;  %4364 = vst.msk [vmem:[%s7995_s29 + $0x70] sm:$0xff] %vm4349_vm1, %v6477_v5 }
 0x25a   : > { %6498 = vrcp.f32 %v4273_v33  ;;  %v6150_v42 = vadd.f32 %v4077_v26, %v2501_v45  ;;  %v6481_v46 = vpop.eup %6480  ;;  %v4276_v54 = vadd.f32 1.0, %v6479_v34  ;;  %v5024_v47 = vmul.f32 -1.442695, %v4153_v52 }
 0x25b   : > { %6500 = vpow2.f32 %v5022_v20  ;;  %v4156_v48 = vadd.f32 %v6149_v25, %v7960_v7  ;;  %v6483_v49 = vpop.eup %6482  ;;  %v4275_v17 = vadd.f32 1.0, %v6481_v46 }
 0x25c   : > { %6502 = vpow2.f32 %v5025_v2  ;;  %v4155_v50 = vadd.f32 %v6150_v42, %v7960_v7  ;;  %v6485_v35 = vpop.eup %6484  ;;  %4367 = vst.msk [vmem:[%s7995_s29 + $0x88] sm:$0xff] %vm4349_vm1, %v6483_v49 }
 0x25d   : > { %6504 = vrcp.f32 %v4276_v54  ;;  %v5027_v58 = vmul.f32 -1.442695, %v4156_v48  ;;  %v6487_v21 = vpop.eup %6486  ;;  %4366 = vst.msk [vmem:[%s7995_s29 + $0x80] sm:$0xff] %vm4349_vm1, %v6485_v35 }
 0x25e   : > { %6506 = vrcp.f32 %v4275_v17  ;;  %v6489_v55 = vpop.eup %6488  ;;  %v4278_v61 = vadd.f32 1.0, %v6487_v21  ;;  %v5026_v29 = vmul.f32 -1.442695, %v4155_v50 }
 0x25f   : > { %6508 = vpow2.f32 %v5024_v47  ;;  %v6491_v63 = vpop.eup %6490  ;;  %v4277_v8 = vadd.f32 1.0, %v6489_v55 }
 0x260   : > { %6510 = vpow2.f32 %v5027_v58  ;;  %4369 = vst.msk [vmem:[%s7995_s29 + $0x98] sm:$0xff] %vm4349_vm1, %v6491_v63 }
 0x261   : > { %v6493_v7 = vpop.eup %6492  ;;  %6512 = vrcp.f32 %v4278_v61 }
 0x262   : > { %v6495_v51 = vpop.eup %6494  ;;  %6514 = vrcp.f32 %v4277_v8  ;;  %v4280_v10 = vadd.f32 1.0, %v6493_v7 }
 0x263   : > { %v6497_v19 = vpop.eup %6496  ;;  %4368 = vst.msk [vmem:[%s7995_s29 + $0x90] sm:$0xff] %vm4349_vm1, %v6495_v51  ;;  %6516 = vpow2.f32 %v5026_v29 }
 0x264   : > { %v6499_v59 = vpop.eup %6498  ;;  %4371 = vst.msk [vmem:[%s7995_s29 + $0xa8] sm:$0xff] %vm4349_vm1, %v6497_v19  ;;  %6518 = vrcp.f32 %v4280_v10 }
 0x265   : > { %v6501_v1 = vpop.eup %6500  ;;  %4370 = vst.msk [vmem:[%s7995_s29 + $0xa0] sm:$0xff] %vm4349_vm1, %v6499_v59 }
 0x266   : > { %v6503_v3 = vpop.eup %6502  ;;  %v4279_v9 = vadd.f32 1.0, %v6501_v1 }
 0x267   : > { %v6505_v11 = vpop.eup %6504  ;;  %v4282_v15 = vadd.f32 1.0, %v6503_v3 }
 0x268   : > { %v6507_v16 = vpop.eup %6506  ;;  %4373 = vst.msk [vmem:[%s7995_s29 + $0xb8] sm:$0xff] %vm4349_vm1, %v6505_v11  ;;  %6520 = vrcp.f32 %v4279_v9 }
 0x269   : > { %v6509_v18 = vpop.eup %6508  ;;  %4372 = vst.msk [vmem:[%s7995_s29 + $0xb0] sm:$0xff] %vm4349_vm1, %v6507_v16  ;;  %6522 = vrcp.f32 %v4282_v15 }
 0x26a   : > { %v6511_v22 = vpop.eup %6510  ;;  %v4281_v23 = vadd.f32 1.0, %v6509_v18 }
 0x26b   : > { %v6513_v24 = vpop.eup %6512  ;;  %v4284_v27 = vadd.f32 1.0, %v6511_v22 }
 0x26c   : > { %v6515_v28 = vpop.eup %6514  ;;  %4375 = vst.msk [vmem:[%s7995_s29 + $0xc8] sm:$0xff] %vm4349_vm1, %v6513_v24  ;;  %6524 = vrcp.f32 %v4281_v23 }
 0x26d   : > { %v6517_v30 = vpop.eup %6516  ;;  %4374 = vst.msk [vmem:[%s7995_s29 + $0xc0] sm:$0xff] %vm4349_vm1, %v6515_v28  ;;  %6526 = vrcp.f32 %v4284_v27 }
 0x26e   : > { %v6519_v32 = vpop.eup %6518  ;;  %v4283_v36 = vadd.f32 1.0, %v6517_v30 }
 0x26f   : > { %4377 = vst.msk [vmem:[%s7995_s29 + $0xd8] sm:$0xff] %vm4349_vm1, %v6519_v32 }
 0x270   : > { %6528 = vrcp.f32 %v4283_v36 }
 0x272   : > { %v6521_v37 = vpop.eup %6520 }
 0x273   : > { %v6523_v38 = vpop.eup %6522  ;;  %4376 = vst.msk [vmem:[%s7995_s29 + $0xd0] sm:$0xff] %vm4349_vm1, %v6521_v37 }
 0x274   : > { %4379 = vst.msk [vmem:[%s7995_s29 + $0xe8] sm:$0xff] %vm4349_vm1, %v6523_v38 }
 0x276   : > { %v6525_v41 = vpop.eup %6524 }
 0x277   : > { %v6527_v60 = vpop.eup %6526  ;;  %4378 = vst.msk [vmem:[%s7995_s29 + $0xe0] sm:$0xff] %vm4349_vm1, %v6525_v41 }
 0x278   : > { %4381 = vst.msk [vmem:[%s7995_s29 + $0xf8] sm:$0xff] %vm4349_vm1, %v6527_v60 }
 0x27a   : > { %v6529_v62 = vpop.eup %6528 }
 0x27b   : > { %4380 = vst.msk [vmem:[%s7995_s29 + $0xf0] sm:$0xff] %vm4349_vm1, %v6529_v62 }
 0x27c PF: > { %p10_p9 = scmp.ge.s32.totalorder %s6591_s16, 4   ;;  %s8220_s12 = smov %s6548_s13 }
 0x27d   : > { %s8221_s13 = smov %s6600_s19  ;;  %s8222_s14 = smov %s6591_s16 }
 0x27e   :  { %12 = sbr.rel (!%p10_p9) target bundleno = 2 (0x2), region = 115 }

// kernel: san_forward.5
= control target key start
LH: loop header
LB: loop body
LE: loop exit
PB: predicated region body
PF: predicated region fallthrough
CT: control target
= control target key end

     0   :  { %vm81_vm0 = vcmask 1040384   ;;  %vm32_vm1 = vcmask 72704   ;;  %vm1294_vm2 = vmmov 1   ;;  %vm947_vm4 = vcmask 130048   ;;  %s1787_s1 = inlined_call_operand.vmem [shape: f32[9,16], index: 1, kind: input, shape index: {}]   ;;  %s1788_s0 = inlined_call_operand.vmem [shape: f32[4,128,9], index: 0, kind: input, shape index: {}]   ;;  %s1789_s2 = inlined_call_operand.vmem [shape: f32[1,16], index: 2, kind: input, shape index: {}]   ;;  %s1790_s3 = inlined_call_operand.vmem [shape: f32[128,16], index: 3, kind: output, shape index: {}]  }
   0x1   :  { %v14_v0 = vld [vmem:[%s1787_s1] sm:$0xff]  ;;  %v15_v1 = vld [vmem:[%s1787_s1 + $0x8] sm:$0x1]  ;;  %vm1321_vm3 = vmpackc.low %vm81_vm0, %vm1294_vm2 }
   0x2   :  { %v1269_v3 = vpack.c.bf16 %v15_v1, %v14_v0  ;;  %v16_v4 = vld [vmem:[%s1788_s0] sm:$0xff]  ;;  %v17_v6 = vld [vmem:[%s1788_s0 + $0x8] sm:$0xff]  ;;  %v18_v8 = vld [vmem:[%s1788_s0 + $0x10] sm:$0xff] }
   0x3   :  { %v985_v5 = vld [vmem:[%s1788_s0 + $0x80] sm:$0xff]  ;;  %1161 = vmatprep.mubr.msk.f32.mxu0 %vm32_vm1, %v16_v4  ;;  %v986_v7 = vld [vmem:[%s1788_s0 + $0x88] sm:$0xff]  ;;  %v987_v9 = vld [vmem:[%s1788_s0 + $0x90] sm:$0xff] }
   0x4   :  { %1189 = vmatprep.mubr.msk.f32.mxu1 %vm32_vm1, %v985_v5  ;;  %1271 = vmatprep.subr.msk.bf16.mxu0 %vm1321_vm3, %v1269_v3  ;;  %v19_v10 = vld [vmem:[%s1788_s0 + $0x18] sm:$0xff]  ;;  %v20_v12 = vld [vmem:[%s1788_s0 + $0x20] sm:$0xff]  ;;  %v21_v14 = vld [vmem:[%s1788_s0 + $0x28] sm:$0xff] }
   0x5   :  { %1277 = vmatprep.subr.msk.bf16.mxu1 %vm1321_vm3, %v1269_v3  ;;  %1274 = vmatpush3.bf16.msk.msra.mxu0 %vm1321_vm3, %v1269_v3  ;;  %v988_v11 = vld [vmem:[%s1788_s0 + $0x98] sm:$0xff]  ;;  %v989_v13 = vld [vmem:[%s1788_s0 + $0xa0] sm:$0xff]  ;;  %v990_v15 = vld [vmem:[%s1788_s0 + $0xa8] sm:$0xff] }
   0x6   :  { %1280 = vmatpush3.bf16.msk.msra.mxu1 %vm1321_vm3, %v1269_v3  ;;  %1283 = vmatprep.subr.msk.bf16.mxu0 %vm1321_vm3, %v1269_v3  ;;  %v22_v16 = vld [vmem:[%s1788_s0 + $0x30] sm:$0xff]  ;;  %v23_v18 = vld [vmem:[%s1788_s0 + $0x38] sm:$0xff]  ;;  %v24_v20 = vld [vmem:[%s1788_s0 + $0x40] sm:$0xff] }
   0x7   :  { %1289 = vmatprep.subr.msk.bf16.mxu1 %vm1321_vm3, %v1269_v3  ;;  %v991_v17 = vld [vmem:[%s1788_s0 + $0xb0] sm:$0xff]  ;;  %v992_v19 = vld [vmem:[%s1788_s0 + $0xb8] sm:$0xff]  ;;  %v993_v21 = vld [vmem:[%s1788_s0 + $0xc0] sm:$0xff] }
   0x8   :  { %1162 = vmatmul.mubr.msk.f32.vlgmr.msra.gmra.mrb[0].mxu0 %vm32_vm1, %v17_v6  ;;  %v25_v22 = vld [vmem:[%s1788_s0 + $0x48] sm:$0xff]  ;;  %v26_v24 = vld [vmem:[%s1788_s0 + $0x50] sm:$0xff]  ;;  %v27_v26 = vld [vmem:[%s1788_s0 + $0x58] sm:$0xff] }
   0x9   :  { %1190 = vmatmul.mubr.msk.f32.vlgmr.msra.gmra.mrb[0].mxu1 %vm32_vm1, %v986_v7  ;;  %1286 = vmatpush3.bf16.msk.msra.mxu0 %vm1321_vm3, %v1269_v3  ;;  %v994_v23 = vld [vmem:[%s1788_s0 + $0xc8] sm:$0xff]  ;;  %v995_v25 = vld [vmem:[%s1788_s0 + $0xd0] sm:$0xff]  ;;  %v996_v27 = vld [vmem:[%s1788_s0 + $0xd8] sm:$0xff] }
   0xa   :  { %1164 = vmatprep.mubr.msk.f32.mxu0 %vm32_vm1, %v18_v8  ;;  %1192 = vmatprep.mubr.msk.f32.mxu1 %vm32_vm1, %v987_v9  ;;  %v28_v28 = vld [vmem:[%s1788_s0 + $0x60] sm:$0xff]  ;;  %v29_v30 = vld [vmem:[%s1788_s0 + $0x68] sm:$0xff]  ;;  %v30_v32 = vld [vmem:[%s1788_s0 + $0x70] sm:$0xff] }
   0xb   :  { %1292 = vmatpush3.bf16.msk.msra.mxu1 %vm1321_vm3, %v1269_v3  ;;  %v997_v29 = vld [vmem:[%s1788_s0 + $0xe0] sm:$0xff]  ;;  %v998_v31 = vld [vmem:[%s1788_s0 + $0xe8] sm:$0xff]  ;;  %v999_v33 = vld [vmem:[%s1788_s0 + $0xf0] sm:$0xff] }
   0xc   :  { %1165 = vmatmul.mubr.msk.f32.gmra.mrb[2].mxu0 %vm32_vm1, %v19_v10  ;;  %v31_v34 = vld [vmem:[%s1788_s0 + $0x78] sm:$0xff]  ;;  %v1018_v36 = vld [vmem:[%s1788_s0 + $0x100] sm:$0xff]  ;;  %v1019_v38 = vld [vmem:[%s1788_s0 + $0x108] sm:$0xff] }
   0xd   :  { %1193 = vmatmul.mubr.msk.f32.gmra.mrb[2].mxu1 %vm32_vm1, %v988_v11  ;;  %1167 = vmatprep.mubr.msk.f32.mxu0 %vm32_vm1, %v20_v12  ;;  %v1000_v35 = vld [vmem:[%s1788_s0 + $0xf8] sm:$0xff]  ;;  %v1051_v37 = vld [vmem:[%s1788_s0 + $0x180] sm:$0xff]  ;;  %v1052_v39 = vld [vmem:[%s1788_s0 + $0x188] sm:$0xff] }
   0xe   :  { %1195 = vmatprep.mubr.msk.f32.mxu1 %vm32_vm1, %v989_v13  ;;  %v1020_v40 = vld [vmem:[%s1788_s0 + $0x110] sm:$0xff]  ;;  %v1021_v42 = vld [vmem:[%s1788_s0 + $0x118] sm:$0xff]  ;;  %v1022_v44 = vld [vmem:[%s1788_s0 + $0x120] sm:$0xff] }
   0xf   :  { %v1053_v41 = vld [vmem:[%s1788_s0 + $0x190] sm:$0xff]  ;;  %v1054_v43 = vld [vmem:[%s1788_s0 + $0x198] sm:$0xff]  ;;  %v1055_v45 = vld [vmem:[%s1788_s0 + $0x1a0] sm:$0xff] }
  0x10   :  { %1168 = vmatmul.mubr.msk.f32.gmra.mrb[4].mxu0 %vm32_vm1, %v21_v14  ;;  %v1023_v46 = vld [vmem:[%s1788_s0 + $0x128] sm:$0xff]  ;;  %v1024_v48 = vld [vmem:[%s1788_s0 + $0x130] sm:$0xff]  ;;  %v1025_v50 = vld [vmem:[%s1788_s0 + $0x138] sm:$0xff] }
  0x11   :  { %1196 = vmatmul.mubr.msk.f32.gmra.mrb[4].mxu1 %vm32_vm1, %v990_v15  ;;  %1170 = vmatprep.mubr.msk.f32.mxu0 %vm32_vm1, %v22_v16  ;;  %v1056_v47 = vld [vmem:[%s1788_s0 + $0x1a8] sm:$0xff]  ;;  %v1057_v49 = vld [vmem:[%s1788_s0 + $0x1b0] sm:$0xff]  ;;  %v1058_v51 = vld [vmem:[%s1788_s0 + $0x1b8] sm:$0xff] }
  0x12   :  { %1198 = vmatprep.mubr.msk.f32.mxu1 %vm32_vm1, %v991_v17  ;;  %v1026_v52 = vld [vmem:[%s1788_s0 + $0x140] sm:$0xff]  ;;  %v1027_v54 = vld [vmem:[%s1788_s0 + $0x148] sm:$0xff]  ;;  %v1028_v56 = vld [vmem:[%s1788_s0 + $0x150] sm:$0xff] }
  0x13   :  { %v1059_v53 = vld [vmem:[%s1788_s0 + $0x1c0] sm:$0xff]  ;;  %v1060_v55 = vld [vmem:[%s1788_s0 + $0x1c8] sm:$0xff]  ;;  %v1061_v57 = vld [vmem:[%s1788_s0 + $0x1d0] sm:$0xff] }
  0x14   :  { %1171 = vmatmul.mubr.msk.f32.gmra.mrb[6].mxu0 %vm32_vm1, %v23_v18  ;;  %v1029_v58 = vld [vmem:[%s1788_s0 + $0x158] sm:$0xff]  ;;  %v1030_v60 = vld [vmem:[%s1788_s0 + $0x160] sm:$0xff]  ;;  %v1031_v62 = vld [vmem:[%s1788_s0 + $0x168] sm:$0xff] }
  0x15   :  { %1199 = vmatmul.mubr.msk.f32.gmra.mrb[6].mxu1 %vm32_vm1, %v992_v19  ;;  %1173 = vmatprep.mubr.msk.f32.mxu0 %vm32_vm1, %v24_v20  ;;  %v1062_v59 = vld [vmem:[%s1788_s0 + $0x1d8] sm:$0xff]  ;;  %v1063_v61 = vld [vmem:[%s1788_s0 + $0x1e0] sm:$0xff]  ;;  %v1064_v63 = vld [vmem:[%s1788_s0 + $0x1e8] sm:$0xff] }
  0x16   :  { %1201 = vmatprep.mubr.msk.f32.mxu1 %vm32_vm1, %v993_v21  ;;  %v1032_v0 = vld [vmem:[%s1788_s0 + $0x170] sm:$0xff]  ;;  %v1033_v2 = vld [vmem:[%s1788_s0 + $0x178] sm:$0xff] }
  0x17   :  { %v1065_v1 = vld [vmem:[%s1788_s0 + $0x1f0] sm:$0xff]  ;;  %v1066_v3 = vld [vmem:[%s1788_s0 + $0x1f8] sm:$0xff] }
  0x18   :  { %1174 = vmatmul.mubr.msk.f32.gmra.mrb[8].mxu0 %vm32_vm1, %v25_v22 }
  0x19   :  { %1202 = vmatmul.mubr.msk.f32.gmra.mrb[8].mxu1 %vm32_vm1, %v994_v23  ;;  %1176 = vmatprep.mubr.msk.f32.mxu0 %vm32_vm1, %v26_v24 }
  0x1a   :  { %1204 = vmatprep.mubr.msk.f32.mxu1 %vm32_vm1, %v995_v25 }
  0x1c   :  { %1177 = vmatmul.mubr.msk.f32.gmra.mrb[10].mxu0 %vm32_vm1, %v27_v26 }
  0x1d   :  { %1205 = vmatmul.mubr.msk.f32.gmra.mrb[10].mxu1 %vm32_vm1, %v996_v27  ;;  %1179 = vmatprep.mubr.msk.f32.mxu0 %vm32_vm1, %v28_v28 }
  0x1e   :  { %1207 = vmatprep.mubr.msk.f32.mxu1 %vm32_vm1, %v997_v29 }
  0x20   :  { %1180 = vmatmul.mubr.msk.f32.gmra.mrb[12].mxu0 %vm32_vm1, %v29_v30 }
  0x21   :  { %1208 = vmatmul.mubr.msk.f32.gmra.mrb[12].mxu1 %vm32_vm1, %v998_v31  ;;  %1182 = vmatprep.mubr.msk.f32.mxu0 %vm32_vm1, %v30_v32 }
  0x22   :  { %1210 = vmatprep.mubr.msk.f32.mxu1 %vm32_vm1, %v999_v33 }
  0x24   :  { %1183 = vmatmul.mubr.msk.f32.gmra.mrb[14].mxu0 %vm32_vm1, %v31_v34 }
  0x25   :  { %1211 = vmatmul.mubr.msk.f32.gmra.mrb[14].mxu1 %vm32_vm1, %v1000_v35  ;;  %1217 = vmatprep.mubr.msk.f32.mxu0 %vm32_vm1, %v1018_v36 }
  0x26   :  { %1245 = vmatprep.mubr.msk.f32.mxu1 %vm32_vm1, %v1051_v37 }
  0x28   :  { %1218 = vmatmul.mubr.msk.f32.vlgmr.msra.gmra.mrb[16].mxu0 %vm32_vm1, %v1019_v38 }
  0x29   :  { %1246 = vmatmul.mubr.msk.f32.vlgmr.msra.gmra.mrb[16].mxu1 %vm32_vm1, %v1052_v39  ;;  %1220 = vmatprep.mubr.msk.f32.mxu0 %vm32_vm1, %v1020_v40 }
  0x2a   :  { %1248 = vmatprep.mubr.msk.f32.mxu1 %vm32_vm1, %v1053_v41 }
  0x2c   :  { %1221 = vmatmul.mubr.msk.f32.gmra.mrb[18].mxu0 %vm32_vm1, %v1021_v42 }
  0x2d   :  { %1249 = vmatmul.mubr.msk.f32.gmra.mrb[18].mxu1 %vm32_vm1, %v1054_v43  ;;  %1223 = vmatprep.mubr.msk.f32.mxu0 %vm32_vm1, %v1022_v44 }
  0x2e   :  { %1251 = vmatprep.mubr.msk.f32.mxu1 %vm32_vm1, %v1055_v45 }
  0x30   :  { %1224 = vmatmul.mubr.msk.f32.gmra.mrb[20].mxu0 %vm32_vm1, %v1023_v46 }
  0x31   :  { %1252 = vmatmul.mubr.msk.f32.gmra.mrb[20].mxu1 %vm32_vm1, %v1056_v47  ;;  %1226 = vmatprep.mubr.msk.f32.mxu0 %vm32_vm1, %v1024_v48 }
  0x32   :  { %1254 = vmatprep.mubr.msk.f32.mxu1 %vm32_vm1, %v1057_v49 }
  0x34   :  { %1227 = vmatmul.mubr.msk.f32.gmra.mrb[22].mxu0 %vm32_vm1, %v1025_v50 }
  0x35   :  { %1255 = vmatmul.mubr.msk.f32.gmra.mrb[22].mxu1 %vm32_vm1, %v1058_v51  ;;  %1229 = vmatprep.mubr.msk.f32.mxu0 %vm32_vm1, %v1026_v52 }
  0x36   :  { %1257 = vmatprep.mubr.msk.f32.mxu1 %vm32_vm1, %v1059_v53 }
  0x38   :  { %1230 = vmatmul.mubr.msk.f32.gmra.mrb[24].mxu0 %vm32_vm1, %v1027_v54 }
  0x39   :  { %1258 = vmatmul.mubr.msk.f32.gmra.mrb[24].mxu1 %vm32_vm1, %v1060_v55  ;;  %1232 = vmatprep.mubr.msk.f32.mxu0 %vm32_vm1, %v1028_v56 }
  0x3a   :  { %1260 = vmatprep.mubr.msk.f32.mxu1 %vm32_vm1, %v1061_v57 }
  0x3c   :  { %1233 = vmatmul.mubr.msk.f32.gmra.mrb[26].mxu0 %vm32_vm1, %v1029_v58  ;;  %v1672_v58 = vld [vmem:[%s1789_s2] ss:$0 sm:$0xff] }
  0x3d   :  { %1261 = vmatmul.mubr.msk.f32.gmra.mrb[26].mxu1 %vm32_vm1, %v1062_v59  ;;  %1235 = vmatprep.mubr.msk.f32.mxu0 %vm32_vm1, %v1030_v60 }
  0x3e   :  { %1263 = vmatprep.mubr.msk.f32.mxu1 %vm32_vm1, %v1063_v61 }
  0x40   :  { %1236 = vmatmul.mubr.msk.f32.gmra.mrb[28].mxu0 %vm32_vm1, %v1031_v62 }
  0x41   :  { %1264 = vmatmul.mubr.msk.f32.gmra.mrb[28].mxu1 %vm32_vm1, %v1064_v63  ;;  %1238 = vmatprep.mubr.msk.f32.mxu0 %vm32_vm1, %v1032_v0 }
  0x42   :  { %1266 = vmatprep.mubr.msk.f32.mxu1 %vm32_vm1, %v1065_v1 }
  0x44   :  { %1239 = vmatmul.mubr.msk.f32.gmra.mrb[30].mxu0 %vm32_vm1, %v1033_v2 }
  0x45   :  { %1267 = vmatmul.mubr.msk.f32.gmra.mrb[30].mxu1 %vm32_vm1, %v1066_v3 }
  0xdb   :  { %v1163_v4 = vpop.f32.mrb[0].mxu0 }
  0xdc   :  { %v1191_v5 = vpop.f32.mrb[0].mxu1  ;;  %v151_v7 = vpop.f32.mrb[1].mxu0 }
  0xdd   :  { %v441_v6 = vmax.f32 %v1163_v4, %v1191_v5  ;;  %v361_v8 = vpop.f32.mrb[1].mxu1 }
  0xde   :  { %v440_v9 = vmax.f32 %v151_v7, %v361_v8 }
  0xdf   :  { %v1166_v10 = vpop.f32.mrb[2].mxu0 }
  0xe0   :  { %v1194_v11 = vpop.f32.mrb[2].mxu1  ;;  %v161_v13 = vpop.f32.mrb[3].mxu0 }
  0xe1   :  { %v443_v12 = vmax.f32 %v1166_v10, %v1194_v11  ;;  %v371_v14 = vpop.f32.mrb[3].mxu1 }
  0xe2   :  { %v442_v15 = vmax.f32 %v161_v13, %v371_v14 }
  0xe3   :  { %v1597_v16 = vpop.f32.mrb[4].mxu0 }
  0xe4   :  { %v1599_v17 = vpop.f32.mrb[4].mxu1  ;;  %v1603_v19 = vpop.f32.mrb[5].mxu0 }
  0xe5   :  { %v445_v18 = vmax.f32 %v1597_v16, %v1599_v17  ;;  %v1605_v20 = vpop.f32.mrb[5].mxu1 }
  0xe6   :  { %v444_v21 = vmax.f32 %v1603_v19, %v1605_v20 }
  0xe7   :  { %v1609_v22 = vpop.f32.mrb[6].mxu0 }
  0xe8   :  { %v1611_v23 = vpop.f32.mrb[6].mxu1  ;;  %v1615_v25 = vpop.f32.mrb[7].mxu0 }
  0xe9   :  { %v447_v24 = vmax.f32 %v1609_v22, %v1611_v23  ;;  %v1617_v26 = vpop.f32.mrb[7].mxu1 }
  0xea   :  { %v446_v27 = vmax.f32 %v1615_v25, %v1617_v26 }
  0xeb   :  { %v1621_v28 = vpop.f32.mrb[8].mxu0 }
  0xec   :  { %v1623_v29 = vpop.f32.mrb[8].mxu1  ;;  %v1627_v31 = vpop.f32.mrb[9].mxu0 }
  0xed   :  { %v449_v30 = vmax.f32 %v1621_v28, %v1623_v29  ;;  %v1629_v32 = vpop.f32.mrb[9].mxu1 }
  0xee   :  { %v448_v33 = vmax.f32 %v1627_v31, %v1629_v32 }
  0xef   :  { %v1633_v34 = vpop.f32.mrb[10].mxu0 }
  0xf0   :  { %v1635_v35 = vpop.f32.mrb[10].mxu1  ;;  %v1639_v37 = vpop.f32.mrb[11].mxu0 }
  0xf1   :  { %v451_v36 = vmax.f32 %v1633_v34, %v1635_v35  ;;  %v1641_v38 = vpop.f32.mrb[11].mxu1 }
  0xf2   :  { %v450_v39 = vmax.f32 %v1639_v37, %v1641_v38 }
  0xf3   :  { %v1645_v40 = vpop.f32.mrb[12].mxu0 }
  0xf4   :  { %v1647_v41 = vpop.f32.mrb[12].mxu1  ;;  %v1651_v43 = vpop.f32.mrb[13].mxu0 }
  0xf5   :  { %v453_v42 = vmax.f32 %v1645_v40, %v1647_v41  ;;  %v1653_v44 = vpop.f32.mrb[13].mxu1 }
  0xf6   :  { %v452_v45 = vmax.f32 %v1651_v43, %v1653_v44 }
  0xf7   :  { %v1657_v46 = vpop.f32.mrb[14].mxu0 }
  0xf8   :  { %v1659_v47 = vpop.f32.mrb[14].mxu1  ;;  %v1663_v49 = vpop.f32.mrb[15].mxu0 }
  0xf9   :  { %v455_v48 = vmax.f32 %v1657_v46, %v1659_v47  ;;  %v1665_v50 = vpop.f32.mrb[15].mxu1 }
  0xfa   :  { %v454_v51 = vmax.f32 %v1663_v49, %v1665_v50 }
  0xfb   :  { %v1219_v52 = vpop.f32.mrb[16].mxu0 }
  0xfc   :  { %v1247_v53 = vpop.f32.mrb[16].mxu1  ;;  %v667_v54 = vmax.f32 %v441_v6, %v1219_v52  ;;  %v587_v55 = vpop.f32.mrb[17].mxu0 }
  0xfd   :  { %v813_v56 = vpop.f32.mrb[17].mxu1  ;;  %v666_v57 = vmax.f32 %v440_v9, %v587_v55 }
  0xfe   :  { %v893_v59 = vmax.f32 %v667_v54, %v1247_v53 }
  0xff   :  { %v892_v60 = vmax.f32 %v666_v57, %v813_v56  ;;  %v1222_v61 = vpop.f32.mrb[18].mxu0 }
 0x100   :  { %v1250_v62 = vpop.f32.mrb[18].mxu1  ;;  %v916_v63 = vadd.f32 %v1672_v58, %v893_v59  ;;  %v669_v0 = vmax.f32 %v443_v12, %v1222_v61  ;;  %v597_v1 = vpop.f32.mrb[19].mxu0 }
 0x101   :  { %v823_v2 = vpop.f32.mrb[19].mxu1  ;;  %v915_v3 = vadd.f32 %v1672_v58, %v892_v60  ;;  %v668_v4 = vmax.f32 %v442_v15, %v597_v1 }
 0x102   :  { %v932_v5 = vmax.f32 %v916_v63, 0.0  ;;  %v895_v6 = vmax.f32 %v669_v0, %v1250_v62 }
 0x103   :  { %v931_v7 = vmax.f32 %v915_v3, 0.0  ;;  %v894_v8 = vmax.f32 %v668_v4, %v823_v2  ;;  %v1225_v9 = vpop.f32.mrb[20].mxu0 }
 0x104   :  { %v1253_v10 = vpop.f32.mrb[20].mxu1  ;;  %949 = vst.msk [vmem:[%s1790_s3 + $0x8] sm:$0xff] %vm947_vm4, %v932_v5  ;;  %v918_v11 = vadd.f32 %v1672_v58, %v895_v6  ;;  %v671_v12 = vmax.f32 %v445_v18, %v1225_v9  ;;  %v607_v13 = vpop.f32.mrb[21].mxu0 }
 0x105   :  { %v833_v14 = vpop.f32.mrb[21].mxu1  ;;  %948 = vst.msk [vmem:[%s1790_s3] sm:$0xff] %vm947_vm4, %v931_v7  ;;  %v917_v15 = vadd.f32 %v1672_v58, %v894_v8  ;;  %v670_v16 = vmax.f32 %v444_v21, %v607_v13 }
 0x106   :  { %v934_v17 = vmax.f32 %v918_v11, 0.0  ;;  %v897_v52 = vmax.f32 %v671_v12, %v1253_v10 }
 0x107   :  { %v933_v53 = vmax.f32 %v917_v15, 0.0  ;;  %v896_v54 = vmax.f32 %v670_v16, %v833_v14  ;;  %v1228_v55 = vpop.f32.mrb[22].mxu0 }
 0x108   :  { %v1256_v56 = vpop.f32.mrb[22].mxu1  ;;  %951 = vst.msk [vmem:[%s1790_s3 + $0x18] sm:$0xff] %vm947_vm4, %v934_v17  ;;  %v920_v18 = vadd.f32 %v1672_v58, %v897_v52  ;;  %v673_v57 = vmax.f32 %v447_v24, %v1228_v55  ;;  %v617_v59 = vpop.f32.mrb[23].mxu0 }
 0x109   :  { %v843_v19 = vpop.f32.mrb[23].mxu1  ;;  %950 = vst.msk [vmem:[%s1790_s3 + $0x10] sm:$0xff] %vm947_vm4, %v933_v53  ;;  %v919_v20 = vadd.f32 %v1672_v58, %v896_v54  ;;  %v672_v21 = vmax.f32 %v446_v27, %v617_v59 }
 0x10a   :  { %v936_v60 = vmax.f32 %v920_v18, 0.0  ;;  %v899_v61 = vmax.f32 %v673_v57, %v1256_v56 }
 0x10b   :  { %v935_v62 = vmax.f32 %v919_v20, 0.0  ;;  %v898_v63 = vmax.f32 %v672_v21, %v843_v19  ;;  %v1231_v0 = vpop.f32.mrb[24].mxu0 }
 0x10c   :  { %v1259_v22 = vpop.f32.mrb[24].mxu1  ;;  %953 = vst.msk [vmem:[%s1790_s3 + $0x28] sm:$0xff] %vm947_vm4, %v936_v60  ;;  %v922_v23 = vadd.f32 %v1672_v58, %v899_v61  ;;  %v675_v24 = vmax.f32 %v449_v30, %v1231_v0  ;;  %v627_v1 = vpop.f32.mrb[25].mxu0 }
 0x10d   :  { %v853_v25 = vpop.f32.mrb[25].mxu1  ;;  %952 = vst.msk [vmem:[%s1790_s3 + $0x20] sm:$0xff] %vm947_vm4, %v935_v62  ;;  %v921_v26 = vadd.f32 %v1672_v58, %v898_v63  ;;  %v674_v27 = vmax.f32 %v448_v33, %v627_v1 }
 0x10e   :  { %v938_v2 = vmax.f32 %v922_v23, 0.0  ;;  %v901_v3 = vmax.f32 %v675_v24, %v1259_v22 }
 0x10f   :  { %v937_v4 = vmax.f32 %v921_v26, 0.0  ;;  %v900_v5 = vmax.f32 %v674_v27, %v853_v25  ;;  %v1234_v6 = vpop.f32.mrb[26].mxu0 }
 0x110   :  { %v1262_v28 = vpop.f32.mrb[26].mxu1  ;;  %955 = vst.msk [vmem:[%s1790_s3 + $0x38] sm:$0xff] %vm947_vm4, %v938_v2  ;;  %v924_v29 = vadd.f32 %v1672_v58, %v901_v3  ;;  %v677_v30 = vmax.f32 %v451_v36, %v1234_v6  ;;  %v637_v7 = vpop.f32.mrb[27].mxu0 }
 0x111   :  { %v863_v31 = vpop.f32.mrb[27].mxu1  ;;  %954 = vst.msk [vmem:[%s1790_s3 + $0x30] sm:$0xff] %vm947_vm4, %v937_v4  ;;  %v923_v32 = vadd.f32 %v1672_v58, %v900_v5  ;;  %v676_v33 = vmax.f32 %v450_v39, %v637_v7 }
 0x112   :  { %v940_v8 = vmax.f32 %v924_v29, 0.0  ;;  %v903_v9 = vmax.f32 %v677_v30, %v1262_v28 }
 0x113   :  { %v939_v10 = vmax.f32 %v923_v32, 0.0  ;;  %v902_v11 = vmax.f32 %v676_v33, %v863_v31  ;;  %v1237_v12 = vpop.f32.mrb[28].mxu0 }
 0x114   :  { %v1265_v34 = vpop.f32.mrb[28].mxu1  ;;  %957 = vst.msk [vmem:[%s1790_s3 + $0x48] sm:$0xff] %vm947_vm4, %v940_v8  ;;  %v926_v35 = vadd.f32 %v1672_v58, %v903_v9  ;;  %v679_v36 = vmax.f32 %v453_v42, %v1237_v12  ;;  %v647_v13 = vpop.f32.mrb[29].mxu0 }
 0x115   :  { %v873_v37 = vpop.f32.mrb[29].mxu1  ;;  %956 = vst.msk [vmem:[%s1790_s3 + $0x40] sm:$0xff] %vm947_vm4, %v939_v10  ;;  %v925_v38 = vadd.f32 %v1672_v58, %v902_v11  ;;  %v678_v39 = vmax.f32 %v452_v45, %v647_v13 }
 0x116   :  { %v942_v14 = vmax.f32 %v926_v35, 0.0  ;;  %v905_v15 = vmax.f32 %v679_v36, %v1265_v34 }
 0x117   :  { %v941_v16 = vmax.f32 %v925_v38, 0.0  ;;  %v904_v17 = vmax.f32 %v678_v39, %v873_v37  ;;  %v1240_v52 = vpop.f32.mrb[30].mxu0 }
 0x118   :  { %v1268_v40 = vpop.f32.mrb[30].mxu1  ;;  %959 = vst.msk [vmem:[%s1790_s3 + $0x58] sm:$0xff] %vm947_vm4, %v942_v14  ;;  %v928_v41 = vadd.f32 %v1672_v58, %v905_v15  ;;  %v681_v42 = vmax.f32 %v455_v48, %v1240_v52  ;;  %v657_v53 = vpop.f32.mrb[31].mxu0 }
 0x119   :  { %v883_v43 = vpop.f32.mrb[31].mxu1  ;;  %958 = vst.msk [vmem:[%s1790_s3 + $0x50] sm:$0xff] %vm947_vm4, %v941_v16  ;;  %v927_v44 = vadd.f32 %v1672_v58, %v904_v17  ;;  %v680_v45 = vmax.f32 %v454_v51, %v657_v53 }
 0x11a   :  { %v944_v54 = vmax.f32 %v928_v41, 0.0  ;;  %v907_v55 = vmax.f32 %v681_v42, %v1268_v40 }
 0x11b   :  { %v943_v56 = vmax.f32 %v927_v44, 0.0  ;;  %v906_v18 = vmax.f32 %v680_v45, %v883_v43 }
 0x11c   :  { %961 = vst.msk [vmem:[%s1790_s3 + $0x68] sm:$0xff] %vm947_vm4, %v944_v54  ;;  %v930_v46 = vadd.f32 %v1672_v58, %v907_v55 }
 0x11d   :  { %960 = vst.msk [vmem:[%s1790_s3 + $0x60] sm:$0xff] %vm947_vm4, %v943_v56  ;;  %v929_v47 = vadd.f32 %v1672_v58, %v906_v18 }
 0x11e   :  { %v946_v48 = vmax.f32 %v930_v46, 0.0 }
 0x11f   :  { %v945_v49 = vmax.f32 %v929_v47, 0.0 }
 0x120   :  { %963 = vst.msk [vmem:[%s1790_s3 + $0x78] sm:$0xff] %vm947_vm4, %v946_v48 }
 0x121   :  { %962 = vst.msk [vmem:[%s1790_s3 + $0x70] sm:$0xff] %vm947_vm4, %v945_v49 }

// kernel: san_forward.9
= control target key start
LH: loop header
LB: loop body
LE: loop exit
PB: predicated region body
PF: predicated region fallthrough
CT: control target
= control target key end

     0   :  { %v2290_v3 = vmov 0.0|0.0   ;;  %vm2291_vm0 = vmmov 0   ;;  %v2292_v11 = vmov 0.0   ;;  %s2701_s0 = inlined_call_operand.vmem [shape: f32[8,2,32], index: 0, kind: input, shape index: {}]   ;;  %s2702_s1 = inlined_call_operand.vmem [shape: f32[32,96], index: 1, kind: input, shape index: {}]   ;;  %s2703_s2 = inlined_call_operand.vmem [shape: f32[32,96], index: 2, kind: input, shape index: {}]   ;;  %s2704_s3 = inlined_call_operand.vmem [shape: f32[1,96], index: 3, kind: input, shape index: {}]   ;;  %s2705_s4 = inlined_call_operand.vmem [shape: f32[1,96], index: 4, kind: input, shape index: {}]   ;;  %s2706_s5 = inlined_call_operand.vmem [shape: f32[2,128], index: 5, kind: input, shape index: {}]   ;;  %s2707_s6 = inlined_call_operand.vmem [shape: f32[2,128,32], index: 6, kind: input, shape index: {}]   ;;  %s2708_s7 = inlined_call_operand.hbm [shape: f32[2,32], index: 7, kind: output, shape index: {}]  }
   0x1   :  { %v27_v0 = vld [vmem:[%s2702_s1] sm:$0xff]  ;;  %v28_v1 = vld [vmem:[%s2702_s1 + $0x8] sm:$0xff]  ;;  %2067 = vmatprep.subr.bf16.mxu0 %v2290_v3  ;;  %2073 = vmatprep.subr.bf16.mxu1 %v2290_v3  ;;  %v29_v6 = vld [vmem:[%s2702_s1 + $0x10] sm:$0xff] }
   0x2   :  { %v31_v2 = vld [vmem:[%s2703_s2] sm:$0xff]  ;;  %v2348_v4 = vpack.c.bf16 %v28_v1, %v27_v0  ;;  %v32_v5 = vld [vmem:[%s2703_s2 + $0x8] sm:$0xff]  ;;  %v30_v7 = vld [vmem:[%s2702_s1 + $0x18] sm:$0xff]  ;;  %1829 = vmatprep.mubr.msk.f32.mxu0 %vm2291_vm0, %v2292_v11  ;;  %1840 = vmatprep.mubr.msk.f32.mxu1 %vm2291_vm0, %v2292_v11 }
   0x3   :  { %v2359_v8 = vpack.c.bf16 %v32_v5, %v31_v2  ;;  %v33_v9 = vld [vmem:[%s2703_s2 + $0x10] sm:$0xff]  ;;  %v34_v10 = vld [vmem:[%s2703_s2 + $0x18] sm:$0xff]  ;;  %v2372_v12 = vpack.c.bf16 %v30_v7, %v29_v6 }
   0x4   :  { %2069 = vmatpush3.bf16.msra.mxu0 %v2348_v4 }
   0x5   :  { %12 = vsyncpa [#allocation3], 0  ;;  %2075 = vmatpush3.bf16.msra.mxu1 %v2359_v8  ;;  %2070 = vmatprep.subr.bf16.mxu0 %v2290_v3  ;;  %v2376_v13 = vpack.c.bf16 %v34_v10, %v33_v9  ;;  %v37_v14 = vld [vmem:[%s2701_s0] sm:$0x3]  ;;  %vm44_vm1 = vcmask 261120   ;;  %s2293_s19 = smov 64  }
   0x6   :  { %2076 = vmatprep.subr.bf16.mxu1 %v2290_v3  ;;  %v2403_v15 = vld [vmem:[%s2705_s4] ss:$0 sm:$0xff]  ;;  %s2294_s4 = smov 96   ;;  %v1663_v33 = vld [vmem:[%s2701_s0 + $0x2] sm:$0x3]  ;;  %vm1643_vm2 = vcmask 254976  }
   0x7   :  { %v2410_v21 = vld [vmem:[%s2704_s3] ss:$0 sm:$0xff]  ;;  %v1667_v56 = vld [vmem:[%s2701_s0 + $0x4] sm:$0x3] }
   0x8   :  { %2072 = vmatpush3.bf16.msra.mxu0 %v2372_v12 }
   0x9   :  { %2078 = vmatpush3.bf16.msra.mxu1 %v2376_v13  ;;  %2079 = vmatprep.subr.bf16.mxu0 %v2290_v3 }
   0xa   :  { %2085 = vmatprep.subr.bf16.mxu1 %v2290_v3 }
   0xb   :  { %1830 = vmatmul.mubr.msk.f32.vlgmr.msra.gmra.mrb[0].mxu0 %vm44_vm1, %v37_v14 }
   0xc   :  { %1841 = vmatmul.mubr.f32.vlgmr.msra.gmra.mrb[0].mxu1 %v2292_v11  ;;  %2081 = vmatpush3.bf16.msra.mxu0 %v2348_v4 }
   0xd   :  { %2087 = vmatpush3.bf16.msra.mxu1 %v2359_v8  ;;  %2082 = vmatprep.subr.bf16.mxu0 %v2290_v3 }
   0xe   :  { %2088 = vmatprep.subr.bf16.mxu1 %v2290_v3  ;;  %1851 = vmatprep.mubr.msk.f32.mxu0 %vm2291_vm0, %v2292_v11 }
   0xf   :  { %1862 = vmatprep.mubr.msk.f32.mxu1 %vm2291_vm0, %v2292_v11 }
  0x10   :  { %2084 = vmatpush3.bf16.msra.mxu0 %v2372_v12 }
  0x11   :  { %2090 = vmatpush3.bf16.msra.mxu1 %v2376_v13  ;;  %2091 = vmatprep.subr.bf16.mxu0 %v2290_v3 }
  0x12   :  { %2097 = vmatprep.subr.bf16.mxu1 %v2290_v3 }
  0x13   :  { %1852 = vmatmul.mubr.msk.f32.vlgmr.msra.gmra.mrb[2].mxu0 %vm44_vm1, %v1663_v33 }
  0x14   :  { %2093 = vmatpush3.bf16.msra.mxu0 %v2348_v4  ;;  %1873 = vmatprep.mubr.msk.f32.mxu0 %vm2291_vm0, %v2292_v11 }
  0x15   :  { %2094 = vmatprep.subr.bf16.mxu0 %v2290_v3 }
  0x18   :  { %2096 = vmatpush3.bf16.msra.mxu0 %v2372_v12 }
  0x19   :  { %2103 = vmatprep.subr.bf16.mxu0 %v2290_v3 }
  0x1b   :  { %1874 = vmatmul.mubr.msk.f32.vlgmr.msra.gmra.mrb[4].mxu0 %vm44_vm1, %v1667_v56 }
  0x1c   :  { %2105 = vmatpush3.bf16.msra.mxu0 %v2348_v4  ;;  %1895 = vmatprep.mubr.msk.f32.mxu0 %vm2291_vm0, %v2292_v11 }
  0x1d   :  { %2106 = vmatprep.subr.bf16.mxu0 %v2290_v3 }
  0x20   :  { %2108 = vmatpush3.bf16.msra.mxu0 %v2372_v12 }
  0x21   :  { %2115 = vmatprep.subr.bf16.mxu0 %v2290_v3 }
  0xde   :  { %v114_v16 = vpop.f32.mrb[0].mxu0 }
  0xdf   :  { %v193_v17 = vpop.f32.mrb[0].mxu1  ;;  %v1831_v18 = vpop.f32.mrb[1].mxu0  ;;  %v115_v22 = vadd.f32 %v2410_v21, %v114_v16 }
  0xe0   :  { %v194_v19 = vadd.f32 %v2403_v15, %v193_v17  ;;  %v1842_v20 = vpop.f32.mrb[1].mxu1 }
  0xe2   :  { %205 = vrot.lane.b32.xlu0 %v194_v19, %s2293_s19  ;;  %v197_v23 = vadd.f32 %v194_v19, %v115_v22 }
  0xe4   :  { %v1662_v24 = vmul.f32 -1.442695, %v197_v23  ;;  %v1671_v23 = vld [vmem:[%s2701_s0 + $0x6] sm:$0x3] }
  0xe5   :  { %1896 = vmatmul.mubr.msk.f32.vlgmr.msra.gmra.mrb[6].mxu0 %vm44_vm1, %v1671_v23 }
  0xe6   :  { %2218 = vpow2.f32 %v1662_v24  ;;  %v294_v40 = vpop.f32.mrb[2].mxu0  ;;  %2117 = vmatpush3.bf16.msra.mxu0 %v2348_v4  ;;  %1917 = vmatprep.mubr.msk.f32.mxu0 %vm2291_vm0, %v2292_v11 }
  0xe7   :  { %v1853_v41 = vpop.f32.mrb[3].mxu0  ;;  %v295_v45 = vadd.f32 %v2410_v21, %v294_v40  ;;  %2118 = vmatprep.subr.bf16.mxu0 %v2290_v3 }
  0xea   :  { %2120 = vmatpush3.bf16.msra.mxu0 %v2372_v12 }
  0xeb   :  { %2127 = vmatprep.subr.bf16.mxu0 %v2290_v3 }
  0xee   :  { %v470_v63 = vpop.f32.mrb[4].mxu0 }
  0xef   :  { %v1875_v0 = vpop.f32.mrb[5].mxu0  ;;  %v471_v6 = vadd.f32 %v2410_v21, %v470_v63 }
  0xf0   :  { %v2219_v25 = vpop.eup %2218 }
  0xf1   :  { %v201_v26 = vadd.f32 1.0, %v2219_v25 }
  0xf3   :  { %2220 = vrcp.f32 %v201_v26 }
  0xfd   :  { %v2221_v27 = vpop.eup %2220 }
  0xfe   :  { %v215_v34 = vsub.f32 1.0, %v2221_v27  ;;  %v221_v36 = vmul.f32 0.0, %v2221_v27 }
 0x154   :  { %v206_v28 = vpop.permute.xlu0 %205 }
 0x155   :  { %v208_v29 = vmul.f32 %v2221_v27, %v206_v28 }
 0x157   :  { %210 = vrot.lane.b32.xlu0 %v208_v29, %s2293_s19 }
 0x1c9   :  { %v211_v30 = vpop.permute.xlu0 %210 }
 0x1ca   :  { %v213_v31 = vadd.f32 %v211_v30, %v115_v22  ;;  %v646_v30 = vpop.f32.mrb[6].mxu0 }
 0x1cc   :  { %2222 = vtanh.f32 %v213_v31  ;;  %v1897_v31 = vpop.f32.mrb[7].mxu0 }
 0x1d6   :  { %v2223_v32 = vpop.eup %2222 }
 0x1d7   :  { %217 = vrot.lane.b32.xlu1 %v2223_v32, %s2294_s4 }
 0x249   :  { %v218_v35 = vpop.permute.xlu1 %217 }
 0x24a   :  { %v220_v37 = vmul.f32 %v218_v35, %v215_v34  ;;  %v647_v35 = vadd.f32 %v2410_v21, %v646_v30 }
 0x24c   :  { %v222_v38 = vadd.f32 %v221_v36, %v220_v37 }
 0x24e   :  { %299 = vrot.lane.b32.xlu1 %v222_v38, %s2294_s4 }
 0x2c0   :  { %v300_v39 = vpop.permute.xlu1 %299 }
 0x2c1   :  { %1863 = vmatmul.mubr.msk.f32.vlgmr.msra.gmra.mrb[2].mxu1 %vm44_vm1, %v300_v39 }
 0x2c2   :  { %2099 = vmatpush3.bf16.msra.mxu1 %v2359_v8  ;;  %1884 = vmatprep.mubr.msk.f32.mxu1 %vm2291_vm0, %v2292_v11 }
 0x2c3   :  { %2100 = vmatprep.subr.bf16.mxu1 %v2290_v3 }
 0x2c6   :  { %2102 = vmatpush3.bf16.msra.mxu1 %v2376_v13 }
 0x2c7   :  { %2109 = vmatprep.subr.bf16.mxu1 %v2290_v3 }
 0x394   :  { %v369_v42 = vpop.f32.mrb[2].mxu1 }
 0x395   :  { %v370_v43 = vadd.f32 %v2403_v15, %v369_v42  ;;  %v1864_v44 = vpop.f32.mrb[3].mxu1 }
 0x397   :  { %381 = vrot.lane.b32.xlu0 %v370_v43, %s2293_s19  ;;  %v373_v46 = vadd.f32 %v370_v43, %v295_v45 }
 0x399   :  { %v1666_v47 = vmul.f32 -1.442695, %v373_v46  ;;  %v1675_v46 = vld [vmem:[%s2701_s0 + $0x8] sm:$0x3] }
 0x39a   :  { %1918 = vmatmul.mubr.msk.f32.vlgmr.msra.gmra.mrb[8].mxu0 %vm44_vm1, %v1675_v46 }
 0x39b   :  { %2224 = vpow2.f32 %v1666_v47  ;;  %2129 = vmatpush3.bf16.msra.mxu0 %v2348_v4  ;;  %1939 = vmatprep.mubr.msk.f32.mxu0 %vm2291_vm0, %v2292_v11 }
 0x39c   :  { %2130 = vmatprep.subr.bf16.mxu0 %v2290_v3 }
 0x39f   :  { %2132 = vmatpush3.bf16.msra.mxu0 %v2372_v12 }
 0x3a0   :  { %2139 = vmatprep.subr.bf16.mxu0 %v2290_v3 }
 0x3a5   :  { %v2225_v48 = vpop.eup %2224 }
 0x3a6   :  { %v377_v49 = vadd.f32 1.0, %v2225_v48 }
 0x3a8   :  { %2226 = vrcp.f32 %v377_v49 }
 0x3b2   :  { %v2227_v50 = vpop.eup %2226 }
 0x3b3   :  { %v391_v57 = vsub.f32 1.0, %v2227_v50  ;;  %v397_v59 = vmul.f32 %v2227_v50, %v222_v38 }
 0x409   :  { %v382_v51 = vpop.permute.xlu0 %381 }
 0x40a   :  { %v384_v52 = vmul.f32 %v2227_v50, %v382_v51 }
 0x40c   :  { %386 = vrot.lane.b32.xlu1 %v384_v52, %s2293_s19 }
 0x47e   :  { %v387_v53 = vpop.permute.xlu1 %386 }
 0x47f   :  { %v389_v54 = vadd.f32 %v387_v53, %v295_v45  ;;  %v822_v53 = vpop.f32.mrb[8].mxu0 }
 0x481   :  { %2228 = vtanh.f32 %v389_v54  ;;  %v1919_v54 = vpop.f32.mrb[9].mxu0 }
 0x48b   :  { %v2229_v55 = vpop.eup %2228 }
 0x48c   :  { %393 = vrot.lane.b32.xlu0 %v2229_v55, %s2294_s4 }
 0x4fe   :  { %v394_v58 = vpop.permute.xlu0 %393 }
 0x4ff   :  { %v396_v60 = vmul.f32 %v394_v58, %v391_v57  ;;  %v823_v58 = vadd.f32 %v2410_v21, %v822_v53 }
 0x501   :  { %v398_v61 = vadd.f32 %v397_v59, %v396_v60 }
 0x503   :  { %475 = vrot.lane.b32.xlu1 %v398_v61, %s2294_s4 }
 0x575   :  { %v476_v62 = vpop.permute.xlu1 %475 }
 0x576   :  { %1885 = vmatmul.mubr.msk.f32.vlgmr.msra.gmra.mrb[4].mxu1 %vm44_vm1, %v476_v62 }
 0x577   :  { %2111 = vmatpush3.bf16.msra.mxu1 %v2359_v8  ;;  %1906 = vmatprep.mubr.msk.f32.mxu1 %vm2291_vm0, %v2292_v11 }
 0x578   :  { %2112 = vmatprep.subr.bf16.mxu1 %v2290_v3 }
 0x57b   :  { %2114 = vmatpush3.bf16.msra.mxu1 %v2376_v13 }
 0x57c   :  { %2121 = vmatprep.subr.bf16.mxu1 %v2290_v3 }
 0x649   :  { %v545_v1 = vpop.f32.mrb[4].mxu1 }
 0x64a   :  { %v546_v2 = vadd.f32 %v2403_v15, %v545_v1  ;;  %v1886_v5 = vpop.f32.mrb[5].mxu1 }
 0x64c   :  { %557 = vrot.lane.b32.xlu0 %v546_v2, %s2293_s19  ;;  %v549_v7 = vadd.f32 %v546_v2, %v471_v6 }
 0x64e   :  { %v1670_v9 = vmul.f32 -1.442695, %v549_v7  ;;  %v1679_v7 = vld [vmem:[%s2701_s0 + $0xa] sm:$0x3] }
 0x64f   :  { %1940 = vmatmul.mubr.msk.f32.vlgmr.msra.gmra.mrb[10].mxu0 %vm44_vm1, %v1679_v7  ;;  %v1458_v7 = vld [vmem:[%s2707_s6 + $0x10] sm:$0xff] }
 0x650   :  { %2230 = vpow2.f32 %v1670_v9  ;;  %2141 = vmatpush3.bf16.msra.mxu0 %v2348_v4  ;;  %1961 = vmatprep.mubr.msk.f32.mxu0 %vm2291_vm0, %v2292_v11 }
 0x651   :  { %2142 = vmatprep.subr.bf16.mxu0 %v2290_v3 }
 0x654   :  { %2144 = vmatpush3.bf16.msra.mxu0 %v2372_v12 }
 0x655   :  { %2151 = vmatprep.subr.bf16.mxu0 %v2290_v3 }
 0x65a   :  { %v2231_v10 = vpop.eup %2230 }
 0x65b   :  { %v553_v14 = vadd.f32 1.0, %v2231_v10 }
 0x65d   :  { %2232 = vrcp.f32 %v553_v14 }
 0x667   :  { %v2233_v16 = vpop.eup %2232 }
 0x668   :  { %v567_v24 = vsub.f32 1.0, %v2233_v16  ;;  %v573_v26 = vmul.f32 %v2233_v16, %v398_v61 }
 0x6be   :  { %v558_v17 = vpop.permute.xlu0 %557 }
 0x6bf   :  { %v560_v18 = vmul.f32 %v2233_v16, %v558_v17 }
 0x6c1   :  { %562 = vrot.lane.b32.xlu1 %v560_v18, %s2293_s19 }
 0x733   :  { %v563_v19 = vpop.permute.xlu1 %562 }
 0x734   :  { %v565_v20 = vadd.f32 %v563_v19, %v471_v6  ;;  %v998_v19 = vpop.f32.mrb[10].mxu0 }
 0x736   :  { %2234 = vtanh.f32 %v565_v20  ;;  %v1941_v20 = vpop.f32.mrb[11].mxu0 }
 0x740   :  { %v2235_v22 = vpop.eup %2234 }
 0x741   :  { %569 = vrot.lane.b32.xlu0 %v2235_v22, %s2294_s4 }
 0x7b3   :  { %v570_v25 = vpop.permute.xlu0 %569 }
 0x7b4   :  { %v572_v27 = vmul.f32 %v570_v25, %v567_v24  ;;  %v999_v25 = vadd.f32 %v2410_v21, %v998_v19  ;;  %v1461_v19 = vld [vmem:[%s2707_s6 + $0x28] sm:$0xff] }
 0x7b6   :  { %v574_v28 = vadd.f32 %v573_v26, %v572_v27 }
 0x7b8   :  { %651 = vrot.lane.b32.xlu1 %v574_v28, %s2294_s4 }
 0x82a   :  { %v652_v29 = vpop.permute.xlu1 %651 }
 0x82b   :  { %1907 = vmatmul.mubr.msk.f32.vlgmr.msra.gmra.mrb[6].mxu1 %vm44_vm1, %v652_v29 }
 0x82c   :  { %2123 = vmatpush3.bf16.msra.mxu1 %v2359_v8  ;;  %1928 = vmatprep.mubr.msk.f32.mxu1 %vm2291_vm0, %v2292_v11 }
 0x82d   :  { %2124 = vmatprep.subr.bf16.mxu1 %v2290_v3 }
 0x830   :  { %2126 = vmatpush3.bf16.msra.mxu1 %v2376_v13 }
 0x831   :  { %2133 = vmatprep.subr.bf16.mxu1 %v2290_v3 }
 0x8fe   :  { %v721_v32 = vpop.f32.mrb[6].mxu1 }
 0x8ff   :  { %v722_v33 = vadd.f32 %v2403_v15, %v721_v32  ;;  %v1908_v34 = vpop.f32.mrb[7].mxu1 }
 0x901   :  { %733 = vrot.lane.b32.xlu0 %v722_v33, %s2293_s19  ;;  %v725_v36 = vadd.f32 %v722_v33, %v647_v35 }
 0x903   :  { %v1674_v37 = vmul.f32 -1.442695, %v725_v36  ;;  %v1683_v36 = vld [vmem:[%s2701_s0 + $0xc] sm:$0x3] }
 0x904   :  { %1962 = vmatmul.mubr.msk.f32.vlgmr.msra.gmra.mrb[12].mxu0 %vm44_vm1, %v1683_v36  ;;  %v1466_v36 = vld [vmem:[%s2707_s6 + $0x50] sm:$0xff] }
 0x905   :  { %2236 = vpow2.f32 %v1674_v37  ;;  %2153 = vmatpush3.bf16.msra.mxu0 %v2348_v4  ;;  %1983 = vmatprep.mubr.msk.f32.mxu0 %vm2291_vm0, %v2292_v11 }
 0x906   :  { %2154 = vmatprep.subr.bf16.mxu0 %v2290_v3 }
 0x909   :  { %2156 = vmatpush3.bf16.msra.mxu0 %v2372_v12 }
 0x90a   :  { %2163 = vmatprep.subr.bf16.mxu0 %v2290_v3 }
 0x90f   :  { %v2237_v38 = vpop.eup %2236 }
 0x910   :  { %v729_v39 = vadd.f32 1.0, %v2237_v38 }
 0x912   :  { %2238 = vrcp.f32 %v729_v39 }
 0x91c   :  { %v2239_v40 = vpop.eup %2238 }
 0x91d   :  { %v743_v47 = vsub.f32 1.0, %v2239_v40  ;;  %v749_v49 = vmul.f32 %v2239_v40, %v574_v28 }
 0x973   :  { %v734_v41 = vpop.permute.xlu0 %733 }
 0x974   :  { %v736_v42 = vmul.f32 %v2239_v40, %v734_v41 }
 0x976   :  { %738 = vrot.lane.b32.xlu1 %v736_v42, %s2293_s19 }
 0x9d7   :  { %v1174_v4 = vpop.f32.mrb[12].mxu0 }
 0x9d8   :  { %v1963_v12 = vpop.f32.mrb[13].mxu0  ;;  %v1175_v46 = vadd.f32 %v2410_v21, %v1174_v4  ;;  %v1469_v4 = vld [vmem:[%s2707_s6 + $0x68] sm:$0xff] }
 0x9e8   :  { %v739_v43 = vpop.permute.xlu1 %738 }
 0x9e9   :  { %v741_v44 = vadd.f32 %v739_v43, %v647_v35 }
 0x9eb   :  { %2240 = vtanh.f32 %v741_v44 }
 0x9f5   :  { %v2241_v45 = vpop.eup %2240 }
 0x9f6   :  { %745 = vrot.lane.b32.xlu0 %v2241_v45, %s2294_s4 }
 0xa68   :  { %v746_v48 = vpop.permute.xlu0 %745 }
 0xa69   :  { %v748_v50 = vmul.f32 %v746_v48, %v743_v47 }
 0xa6b   :  { %v750_v51 = vadd.f32 %v749_v49, %v748_v50 }
 0xa6d   :  { %827 = vrot.lane.b32.xlu1 %v750_v51, %s2294_s4 }
 0xadf   :  { %v828_v52 = vpop.permute.xlu1 %827 }
 0xae0   :  { %1929 = vmatmul.mubr.msk.f32.vlgmr.msra.gmra.mrb[8].mxu1 %vm44_vm1, %v828_v52 }
 0xae1   :  { %2135 = vmatpush3.bf16.msra.mxu1 %v2359_v8  ;;  %1950 = vmatprep.mubr.msk.f32.mxu1 %vm2291_vm0, %v2292_v11 }
 0xae2   :  { %2136 = vmatprep.subr.bf16.mxu1 %v2290_v3 }
 0xae5   :  { %2138 = vmatpush3.bf16.msra.mxu1 %v2376_v13 }
 0xae6   :  { %2145 = vmatprep.subr.bf16.mxu1 %v2290_v3 }
 0xbb3   :  { %v897_v55 = vpop.f32.mrb[8].mxu1 }
 0xbb4   :  { %v898_v56 = vadd.f32 %v2403_v15, %v897_v55  ;;  %v1930_v57 = vpop.f32.mrb[9].mxu1  ;;  %v1687_v55 = vld [vmem:[%s2701_s0 + $0xe] sm:$0x3] }
 0xbb5   :  { %1984 = vmatmul.mubr.msk.f32.vlgmr.msra.gmra.mrb[14].mxu0 %vm44_vm1, %v1687_v55 }
 0xbb6   :  { %909 = vrot.lane.b32.xlu0 %v898_v56, %s2293_s19  ;;  %v901_v59 = vadd.f32 %v898_v56, %v823_v58  ;;  %2029 = vmatprep.mubr.msk.f32.mxu0 %vm2291_vm0, %v2292_v11 }
 0xbb8   :  { %v1678_v60 = vmul.f32 -1.442695, %v901_v59 }
 0xbba   :  { %2242 = vpow2.f32 %v1678_v60 }
 0xbc4   :  { %v2243_v61 = vpop.eup %2242 }
 0xbc5   :  { %v905_v62 = vadd.f32 1.0, %v2243_v61 }
 0xbc7   :  { %2244 = vrcp.f32 %v905_v62 }
 0xbd1   :  { %v2245_v63 = vpop.eup %2244 }
 0xbd2   :  { %v919_v9 = vsub.f32 1.0, %v2245_v63  ;;  %v925_v14 = vmul.f32 %v2245_v63, %v750_v51 }
 0xc28   :  { %v910_v0 = vpop.permute.xlu0 %909 }
 0xc29   :  { %v912_v1 = vmul.f32 %v2245_v63, %v910_v0  ;;  %v1456_v0 = vld [vmem:[%s2707_s6] sm:$0xff] }
 0xc2b   :  { %914 = vrot.lane.b32.xlu1 %v912_v1, %s2293_s19  ;;  %v1457_v1 = vld [vmem:[%s2707_s6 + $0x8] sm:$0xff] }
 0xc88   :  { %v2566_v62 = vpop.f32.mrb[14].mxu0 }
 0xc89   :  { %v1985_v63 = vpop.f32.mrb[15].mxu0  ;;  %v1351_v55 = vadd.f32 %v2410_v21, %v2566_v62 }
 0xc9d   :  { %v915_v2 = vpop.permute.xlu1 %914 }
 0xc9e   :  { %v917_v5 = vadd.f32 %v915_v2, %v823_v58  ;;  %v2164_v2 = vpack.c.bf16 %v1457_v1, %v1456_v0 }
 0xca0   :  { %2246 = vtanh.f32 %v917_v5  ;;  %v1691_v5 = vld [vmem:[%s2707_s6 + $0x80] sm:$0xff]  ;;  %2165 = vmatpush3.bf16.msra.mxu0 %v2164_v2 }
 0xca1   :  { %2166 = vmatprep.subr.bf16.mxu0 %v2290_v3 }
 0xcaa   :  { %v2247_v6 = vpop.eup %2246 }
 0xcab   :  { %921 = vrot.lane.b32.xlu0 %v2247_v6, %s2294_s4 }
 0xd1d   :  { %v922_v10 = vpop.permute.xlu0 %921 }
 0xd1e   :  { %v924_v16 = vmul.f32 %v922_v10, %v919_v9  ;;  %v1459_v9 = vld [vmem:[%s2707_s6 + $0x18] sm:$0xff] }
 0xd1f   :  { %v2167_v10 = vpack.c.bf16 %v1459_v9, %v1458_v7 }
 0xd20   :  { %v926_v17 = vadd.f32 %v925_v14, %v924_v16  ;;  %v1693_v14 = vld [vmem:[%s2707_s6 + $0x90] sm:$0xff]  ;;  %v1694_v16 = vld [vmem:[%s2707_s6 + $0x98] sm:$0xff] }
 0xd21   :  { %2168 = vmatpush3.bf16.msra.mxu0 %v2167_v10 }
 0xd22   :  { %1003 = vrot.lane.b32.xlu1 %v926_v17, %s2294_s4  ;;  %2169 = vmatprep.subr.bf16.mxu0 %v2290_v3 }
 0xd94   :  { %v1004_v18 = vpop.permute.xlu1 %1003 }
 0xd95   :  { %1951 = vmatmul.mubr.msk.f32.vlgmr.msra.gmra.mrb[10].mxu1 %vm44_vm1, %v1004_v18  ;;  %v1460_v18 = vld [vmem:[%s2707_s6 + $0x20] sm:$0xff] }
 0xd96   :  { %2147 = vmatpush3.bf16.msra.mxu1 %v2359_v8  ;;  %1972 = vmatprep.mubr.msk.f32.mxu1 %vm2291_vm0, %v2292_v11  ;;  %v2170_v20 = vpack.c.bf16 %v1461_v19, %v1460_v18 }
 0xd97   :  { %2148 = vmatprep.subr.bf16.mxu1 %v2290_v3 }
 0xd98   :  { %2171 = vmatpush3.bf16.msra.mxu0 %v2170_v20 }
 0xd99   :  { %2172 = vmatprep.subr.bf16.mxu0 %v2290_v3 }
 0xd9a   :  { %2150 = vmatpush3.bf16.msra.mxu1 %v2376_v13 }
 0xd9b   :  { %2157 = vmatprep.subr.bf16.mxu1 %v2290_v3 }
 0xe68   :  { %v1073_v22 = vpop.f32.mrb[10].mxu1 }
 0xe69   :  { %v1074_v23 = vadd.f32 %v2403_v15, %v1073_v22  ;;  %v1952_v24 = vpop.f32.mrb[11].mxu1  ;;  %v1695_v22 = vld [vmem:[%s2707_s6 + $0xa0] sm:$0xff] }
 0xe6b   :  { %1085 = vrot.lane.b32.xlu0 %v1074_v23, %s2293_s19  ;;  %v1077_v26 = vadd.f32 %v1074_v23, %v999_v25  ;;  %v1696_v23 = vld [vmem:[%s2707_s6 + $0xa8] sm:$0xff] }
 0xe6c   :  { %v2194_v24 = vpack.c.bf16 %v1696_v23, %v1695_v22 }
 0xe6d   :  { %v1682_v27 = vmul.f32 -1.442695, %v1077_v26  ;;  %v1463_v26 = vld [vmem:[%s2707_s6 + $0x38] sm:$0xff] }
 0xe6f   :  { %2248 = vpow2.f32 %v1682_v27 }
 0xe79   :  { %v2249_v28 = vpop.eup %2248 }
 0xe7a   :  { %v1081_v29 = vadd.f32 1.0, %v2249_v28  ;;  %v1697_v28 = vld [vmem:[%s2707_s6 + $0xb0] sm:$0xff] }
 0xe7c   :  { %2250 = vrcp.f32 %v1081_v29  ;;  %v1698_v29 = vld [vmem:[%s2707_s6 + $0xb8] sm:$0xff] }
 0xe86   :  { %v2251_v30 = vpop.eup %2250 }
 0xe87   :  { %v1095_v37 = vsub.f32 1.0, %v2251_v30  ;;  %v1101_v39 = vmul.f32 %v2251_v30, %v926_v17  ;;  %v2191_v17 = vpack.c.bf16 %v1694_v16, %v1693_v14 }
 0xedd   :  { %v1086_v31 = vpop.permute.xlu0 %1085 }
 0xede   :  { %v1088_v32 = vmul.f32 %v2251_v30, %v1086_v31  ;;  %v2197_v30 = vpack.c.bf16 %v1698_v29, %v1697_v28  ;;  %v1464_v31 = vld [vmem:[%s2707_s6 + $0x40] sm:$0xff] }
 0xee0   :  { %1090 = vrot.lane.b32.xlu1 %v1088_v32, %s2293_s19  ;;  %v1465_v32 = vld [vmem:[%s2707_s6 + $0x48] sm:$0xff] }
 0xf52   :  { %v1091_v33 = vpop.permute.xlu1 %1090 }
 0xf53   :  { %v1093_v34 = vadd.f32 %v1091_v33, %v999_v25  ;;  %v1462_v25 = vld [vmem:[%s2707_s6 + $0x30] sm:$0xff]  ;;  %v1699_v33 = vld [vmem:[%s2707_s6 + $0xc0] sm:$0xff] }
 0xf54   :  { %v2173_v27 = vpack.c.bf16 %v1463_v26, %v1462_v25 }
 0xf55   :  { %2252 = vtanh.f32 %v1093_v34  ;;  %v2176_v34 = vpack.c.bf16 %v1465_v32, %v1464_v31 }
 0xf56   :  { %2174 = vmatpush3.bf16.msra.mxu0 %v2173_v27 }
 0xf57   :  { %2175 = vmatprep.subr.bf16.mxu0 %v2290_v3 }
 0xf5a   :  { %2177 = vmatpush3.bf16.msra.mxu0 %v2176_v34 }
 0xf5b   :  { %2178 = vmatprep.subr.bf16.mxu0 %v2290_v3 }
 0xf5f   :  { %v2253_v35 = vpop.eup %2252 }
 0xf60   :  { %1097 = vrot.lane.b32.xlu0 %v2253_v35, %s2294_s4  ;;  %v1700_v35 = vld [vmem:[%s2707_s6 + $0xc8] sm:$0xff] }
 0xfd2   :  { %v1098_v38 = vpop.permute.xlu0 %1097 }
 0xfd3   :  { %v1100_v40 = vmul.f32 %v1098_v38, %v1095_v37  ;;  %v1467_v37 = vld [vmem:[%s2707_s6 + $0x58] sm:$0xff]  ;;  %v2200_v38 = vpack.c.bf16 %v1700_v35, %v1699_v33 }
 0xfd5   :  { %v1102_v41 = vadd.f32 %v1101_v39, %v1100_v40  ;;  %v1701_v39 = vld [vmem:[%s2707_s6 + $0xd0] sm:$0xff]  ;;  %v1702_v40 = vld [vmem:[%s2707_s6 + $0xd8] sm:$0xff] }
 0xfd6   :  { %v2203_v12 = vpack.c.bf16 %v1702_v40, %v1701_v39 }
 0xfd7   :  { %1179 = vrot.lane.b32.xlu1 %v1102_v41, %s2294_s4 }
0x1049   :  { %v1180_v42 = vpop.permute.xlu1 %1179 }
0x104a   :  { %1973 = vmatmul.mubr.msk.f32.vlgmr.msra.gmra.mrb[12].mxu1 %vm44_vm1, %v1180_v42  ;;  %v1468_v42 = vld [vmem:[%s2707_s6 + $0x60] sm:$0xff] }
0x104b   :  { %2159 = vmatpush3.bf16.msra.mxu1 %v2359_v8  ;;  %1994 = vmatprep.mubr.msk.f32.mxu1 %vm2291_vm0, %v2292_v11 }
0x104c   :  { %2160 = vmatprep.subr.bf16.mxu1 %v2290_v3 }
0x104f   :  { %2162 = vmatpush3.bf16.msra.mxu1 %v2376_v13 }
0x1050   :  { %2187 = vmatprep.subr.bf16.mxu1 %v2290_v3 }
0x111d   :  { %v1249_v43 = vpop.f32.mrb[12].mxu1 }
0x111e   :  { %v1250_v44 = vadd.f32 %v2403_v15, %v1249_v43  ;;  %v1974_v45 = vpop.f32.mrb[13].mxu1  ;;  %v1703_v43 = vld [vmem:[%s2707_s6 + $0xe0] sm:$0xff] }
0x111f   :  { %v2182_v45 = vpack.c.bf16 %v1469_v4, %v1468_v42 }
0x1120   :  { %1261 = vrot.lane.b32.xlu0 %v1250_v44, %s2293_s19  ;;  %v1253_v8 = vadd.f32 %v1250_v44, %v1175_v46  ;;  %v1704_v44 = vld [vmem:[%s2707_s6 + $0xe8] sm:$0xff] }
0x1122   :  { %v1686_v47 = vmul.f32 -1.442695, %v1253_v8  ;;  %v1471_v8 = vld [vmem:[%s2707_s6 + $0x78] sm:$0xff] }
0x1124   :  { %2254 = vpow2.f32 %v1686_v47  ;;  %v2206_v47 = vpack.c.bf16 %v1704_v44, %v1703_v43 }
0x112e   :  { %v2255_v48 = vpop.eup %2254 }
0x112f   :  { %v1257_v49 = vadd.f32 1.0, %v2255_v48  ;;  %v1705_v48 = vld [vmem:[%s2707_s6 + $0xf0] sm:$0xff] }
0x1131   :  { %2256 = vrcp.f32 %v1257_v49  ;;  %v1706_v49 = vld [vmem:[%s2707_s6 + $0xf8] sm:$0xff] }
0x113b   :  { %v2257_v50 = vpop.eup %2256 }
0x113c   :  { %v1271_v56 = vsub.f32 1.0, %v2257_v50  ;;  %v1277_v58 = vmul.f32 %v2257_v50, %v1102_v41  ;;  %v2179_v41 = vpack.c.bf16 %v1467_v37, %v1466_v36 }
0x113e   :  { %2180 = vmatpush3.bf16.msra.mxu0 %v2179_v41 }
0x113f   :  { %2181 = vmatprep.subr.bf16.mxu0 %v2290_v3 }
0x1142   :  { %2183 = vmatpush3.bf16.msra.mxu0 %v2182_v45 }
0x1143   :  { %2184 = vmatprep.subr.bf16.mxu0 %v2290_v3 }
0x1192   :  { %v1262_v13 = vpop.permute.xlu0 %1261 }
0x1193   :  { %v1264_v51 = vmul.f32 %v2257_v50, %v1262_v13  ;;  %v2209_v13 = vpack.c.bf16 %v1706_v49, %v1705_v48 }
0x1195   :  { %1266 = vrot.lane.b32.xlu1 %v1264_v51, %s2293_s19  ;;  %v1455_v51 = vld [vmem:[%s2706_s5] sm:$0x3]  ;;  %s2295_s5 = smov 32  }
0x1207   :  { %v1267_v52 = vpop.permute.xlu1 %1266 }
0x1208   :  { %v1269_v53 = vadd.f32 %v1267_v52, %v1175_v46  ;;  %v1470_v46 = vld [vmem:[%s2707_s6 + $0x70] sm:$0xff] }
0x1209   :  { %v2185_v50 = vpack.c.bf16 %v1471_v8, %v1470_v46 }
0x120a   :  { %2258 = vtanh.f32 %v1269_v53 }
0x120b   :  { %2186 = vmatpush3.bf16.msra.mxu0 %v2185_v50 }
0x120e   :  { %2030 = vmatmul.mubr.f32.vlgmr.msra.gmra.mrb[16].mxu0 %v1455_v51 }
0x1214   :  { %v2259_v54 = vpop.eup %2258 }
0x1215   :  { %1273 = vrot.lane.b32.xlu0 %v2259_v54, %s2294_s4 }
0x1287   :  { %v1274_v57 = vpop.permute.xlu0 %1273 }
0x1288   :  { %v1276_v59 = vmul.f32 %v1274_v57, %v1271_v56 }
0x128a   :  { %v2559_v60 = vadd.f32 %v1277_v58, %v1276_v59 }
0x128c   :  { %1355 = vrot.lane.b32.xlu1 %v2559_v60, %s2294_s4 }
0x12e1   :  { %v1538_v0 = vpop.f32.mrb[16].mxu0 }
0x12e2   :  { %v2031_v1 = vpop.f32.mrb[17].mxu0 }
0x12fe   :  { %v1356_v61 = vpop.permute.xlu1 %1355 }
0x12ff   :  { %1995 = vmatmul.mubr.msk.f32.vlgmr.msra.gmra.mrb[14].mxu1 %vm44_vm1, %v1356_v61 }
0x1300   :  { %2064 = vmatprep.mubr.msk.f32.mxu1 %vm2291_vm0, %v2292_v11  ;;  %v1692_v11 = vld [vmem:[%s2707_s6 + $0x88] sm:$0xff]  ;;  %s2296_s6 = smov [#allocation2]  }
0x1301   :  { %v2188_v6 = vpack.c.bf16 %v1692_v11, %v1691_v5 }
0x1303   :  { %2189 = vmatpush3.bf16.msra.mxu1 %v2188_v6 }
0x1304   :  { %2190 = vmatprep.subr.bf16.mxu1 %v2290_v3 }
0x1307   :  { %2192 = vmatpush3.bf16.msra.mxu1 %v2191_v17 }
0x1308   :  { %2193 = vmatprep.subr.bf16.mxu1 %v2290_v3 }
0x130b   :  { %2195 = vmatpush3.bf16.msra.mxu1 %v2194_v24 }
0x130c   :  { %2196 = vmatprep.subr.bf16.mxu1 %v2290_v3 }
0x130f   :  { %2198 = vmatpush3.bf16.msra.mxu1 %v2197_v30 }
0x1310   :  { %2199 = vmatprep.subr.bf16.mxu1 %v2290_v3 }
0x1313   :  { %2201 = vmatpush3.bf16.msra.mxu1 %v2200_v38 }
0x1314   :  { %2202 = vmatprep.subr.bf16.mxu1 %v2290_v3 }
0x1317   :  { %2204 = vmatpush3.bf16.msra.mxu1 %v2203_v12 }
0x1318   :  { %2205 = vmatprep.subr.bf16.mxu1 %v2290_v3 }
0x131b   :  { %2207 = vmatpush3.bf16.msra.mxu1 %v2206_v47 }
0x131c   :  { %2208 = vmatprep.subr.bf16.mxu1 %v2290_v3 }
0x131f   :  { %2210 = vmatpush3.bf16.msra.mxu1 %v2209_v13 }
0x1322   :  { %2065 = vmatmul.mubr.f32.vlgmr.msra.gmra.mrb[16].mxu1 %v1455_v51 }
0x13d2   :  { %v1425_v52 = vpop.f32.mrb[14].mxu1 }
0x13d3   :  { %v1426_v53 = vadd.f32 %v2403_v15, %v1425_v52  ;;  %v1996_v54 = vpop.f32.mrb[15].mxu1 }
0x13d5   :  { %1437 = vrot.lane.b32.xlu0 %v1426_v53, %s2293_s19  ;;  %v1429_v56 = vadd.f32 %v1426_v53, %v1351_v55 }
0x13d7   :  { %v1690_v57 = vmul.f32 -1.442695, %v1429_v56 }
0x13d9   :  { %2260 = vpow2.f32 %v1690_v57 }
0x13e3   :  { %v2261_v3 = vpop.eup %2260 }
0x13e4   :  { %v1433_v58 = vadd.f32 1.0, %v2261_v3 }
0x13e6   :  { %2262 = vrcp.f32 %v1433_v58 }
0x13f0   :  { %v2263_v59 = vpop.eup %2262 }
0x13f1   :  { %v1447_v62 = vsub.f32 1.0, %v2263_v59  ;;  %v1453_v9 = vmul.f32 %v2263_v59, %v2559_v60 }
0x13f5   :  { %v1630_v15 = vpop.f32.mrb[16].mxu1 }
0x13f6   :  { %v2066_v2 = vpop.f32.mrb[17].mxu1 }
0x1447   :  { %v1438_v61 = vpop.permute.xlu0 %1437 }
0x1448   :  { %v1440_v63 = vmul.f32 %v2263_v59, %v1438_v61 }
0x144a   :  { %1442 = vrot.lane.b32.xlu1 %v1440_v63, %s2293_s19  ;;  %s1651_s19 = sshll.u32 %s2296_s6, 4  ;;  %s1652_s19 = int_to_ptr.vmem [resolvable:$true] %s1651_s19 }
0x144b   :  { %s2266_s23 = scalar_lea.vmem %s1652_s19, 32  ;;  %p2271_p1 = scmp.lt.s32.totalorder %s1652_s19, %s1652_s19 }
0x144c   :  { %p2267_p0 = scmp.ne.s32.totalorder %s1652_s19, %s2266_s23  ;;  %p2272_p2 = scmp.lt.s32.totalorder %s2266_s23, %s2266_s23 }
0x144e   :  { %1543 = vrot.lane.b32.xlu1 %v1538_v0, %s2295_s5  ;;  %p2273_p3 = por %p2272_p2, %p2271_p1 }
0x1450   :  { %p2274_p4 = pnand %p2273_p3, %p2267_p0 }
0x14bc   :  { %v1443_v5 = vpop.permute.xlu1 %1442 }
0x14bd   :  { %v1445_v11 = vadd.f32 %v1443_v5, %v1351_v55 }
0x14bf   :  { %2264 = vtanh.f32 %v1445_v11 }
0x14c0   :  { %v1544_v10 = vpop.permute.xlu1 %1543 }
0x14c9   :  { %v2265_v21 = vpop.eup %2264 }
0x14ca   :  { %1449 = vrot.lane.b32.xlu0 %v2265_v21, %s2294_s4 }
0x14ce   :  { %1635 = vrot.lane.b32.xlu0 %v1630_v15, %s2295_s5 }
0x153c   :  { %v1450_v6 = vpop.permute.xlu0 %1449 }
0x153d   :  { %v1452_v7 = vmul.f32 %v1450_v6, %v1447_v62 }
0x153f   :  { %v1454_v14 = vadd.f32 %v1453_v9, %v1452_v7 }
0x1540   :  { %v1636_v16 = vpop.permute.xlu0 %1635 }
0x1541   :  { %v1546_v17 = vadd.f32 %v1544_v10, %v1454_v14 }
0x1543   :  { %v1638_v18 = vadd.f32 %v1636_v16, %v1546_v17 }
0x1545   :  { %1640 = vrot.lane.b32.xlu1 %v1638_v18, %s2294_s4 }
0x15b7   :  { %v1641_v19 = vpop.permute.xlu1 %1640 }
0x15b8   :  { %1644 = vst.msk [vmem:[#allocation2] sm:$0x3] %vm1643_vm2, %v1641_v19 }
0x15b9   :  { %2277 = shalt.err (!%p2274_p4)
}
0x15ba   :  { %s2278_s26 = scalar_lea.hbm %s2708_s7, 32 }
0x15bb   :  { %p2279_p5 = scmp.ne.s32.totalorder %s2708_s7, %s2278_s26  ;;  %p2282_p6 = scmp.lt.u32.totalorder %s2278_s26, %s2708_s7 }
0x15bd   :  { %p2284_p7 = pnand %p2282_p6, %p2279_p5 }
0x15bf   :  { %2287 = shalt.err (!%p2284_p7)
}
0x15c0   :  { %1654 = dma.vmem_to_hbm [thread:$0]  %s1652_s19, 32, %s2708_s7, [#allocation3]  }
0x15c1   :  { %2288 = dma.done.wait [#allocation3], 32  }
0x15c2   :  { %2289 = vsyncadd [#allocation3], 4294967264 }
0x15c3   :  { %1658 = vsyncpa [#allocation3], 1 }

// kernel: san_forward.7
= control target key start
LH: loop header
LB: loop body
LE: loop exit
PB: predicated region body
PF: predicated region fallthrough
CT: control target
= control target key end

     0   :  { %v16101_v22 = vmov 1983009808   ;;  %v32_v24 = vlaneseq  ;;  %vm12384_vm0 = vcmask 523264   ;;  %s19673_s1 = inlined_call_operand.vmem [shape: bf16[1024,64], index: 1, kind: input, shape index: {}]   ;;  %s19674_s0 = inlined_call_operand.vmem [shape: f32[2,1024], index: 0, kind: input, shape index: {}]   ;;  %s19675_s4 = inlined_call_operand.vmem [shape: bf16[16384,64], index: 4, kind: input, shape index: {}]   ;;  %s19676_s3 = inlined_call_operand.vmem [shape: f32[2,16384], index: 3, kind: input, shape index: {}]   ;;  %s19677_s2 = inlined_call_operand.vmem [shape: f32[1,64], index: 2, kind: input, shape index: {}]   ;;  %s19678_s5 = inlined_call_operand.vmem [shape: f32[1,64], index: 5, kind: input, shape index: {}]   ;;  %s19679_s6 = inlined_call_operand.vmem [shape: f32[2,128], index: 6, kind: output, shape index: {}]  }
   0x1   :  { %v14979_v0 = vld [vmem:[%s19673_s1 + $0x40] sm:$0xff]   ;;  %v14983_v4 = vld [vmem:[%s19673_s1 + $0x48] sm:$0xff]   ;;  %v14987_v8 = vld [vmem:[%s19673_s1 + $0x50] sm:$0xff]   ;;  %v30_v23 = vunpack.c.l.s4 %v16101_v22 }
   0x2   :  { %v14980_v1 = vld [vmem:[%s19673_s1 + $0xc0] sm:$0xff]   ;;  %13481 = vmatprep.subr.bf16.mxu0 %v14979_v0  ;;  %v14984_v5 = vld [vmem:[%s19673_s1 + $0xc8] sm:$0xff]   ;;  %v14988_v9 = vld [vmem:[%s19673_s1 + $0xd0] sm:$0xff]   ;;  %v33_v30 = vshrl.u32 %v32_v24, 7 }
   0x3   :  { %v14981_v2 = vld [vmem:[%s19673_s1] sm:$0xff]   ;;  %13503 = vmatprep.subr.bf16.mxu1 %v14980_v1  ;;  %v14985_v6 = vld [vmem:[%s19673_s1 + $0x8] sm:$0xff]   ;;  %v14989_v10 = vld [vmem:[%s19673_s1 + $0x10] sm:$0xff]   ;;  %v31_v29 = vunpack.c.0.s8 %v30_v23 }
   0x4   :  { %v14982_v3 = vld [vmem:[%s19673_s1 + $0x80] sm:$0xff]   ;;  %13482 = vmatpush3.bf16.msra.mxu0 %v14981_v2  ;;  %v14986_v7 = vld [vmem:[%s19673_s1 + $0x88] sm:$0xff]   ;;  %v14990_v11 = vld [vmem:[%s19673_s1 + $0x90] sm:$0xff]  }
   0x5   :  { %13504 = vmatpush3.bf16.msra.mxu1 %v14982_v3  ;;  %13483 = vmatprep.subr.bf16.mxu0 %v14983_v4  ;;  %v14991_v12 = vld [vmem:[%s19673_s1 + $0x58] sm:$0xff]   ;;  %v14995_v16 = vld [vmem:[%s19673_s1 + $0x60] sm:$0xff]   ;;  %v14999_v20 = vld [vmem:[%s19673_s1 + $0x68] sm:$0xff]   ;;  %v16228_v35 = vsub.s32 %v31_v29, %v33_v30 }
   0x6   :  { %13505 = vmatprep.subr.bf16.mxu1 %v14984_v5  ;;  %v14992_v13 = vld [vmem:[%s19673_s1 + $0xd8] sm:$0xff]   ;;  %v14996_v17 = vld [vmem:[%s19673_s1 + $0xe0] sm:$0xff]   ;;  %v15000_v21 = vld [vmem:[%s19673_s1 + $0xe8] sm:$0xff]  }
   0x7   :  { %v14993_v14 = vld [vmem:[%s19673_s1 + $0x18] sm:$0xff]   ;;  %v14997_v18 = vld [vmem:[%s19673_s1 + $0x20] sm:$0xff]   ;;  %v15001_v25 = vld [vmem:[%s19673_s1 + $0x28] sm:$0xff]  }
   0x8   :  { %13484 = vmatpush3.bf16.msra.mxu0 %v14985_v6  ;;  %v14994_v15 = vld [vmem:[%s19673_s1 + $0x98] sm:$0xff]   ;;  %v14998_v19 = vld [vmem:[%s19673_s1 + $0xa0] sm:$0xff]   ;;  %v15002_v26 = vld [vmem:[%s19673_s1 + $0xa8] sm:$0xff]  }
   0x9   :  { %13506 = vmatpush3.bf16.msra.mxu1 %v14986_v7  ;;  %13485 = vmatprep.subr.bf16.mxu0 %v14987_v8  ;;  %v15003_v27 = vld [vmem:[%s19673_s1 + $0x70] sm:$0xff]   ;;  %v15007_v33 = vld [vmem:[%s19673_s1 + $0x78] sm:$0xff]   ;;  %v24_v38 = vld [vmem:[%s19674_s0] sm:$0xff] }
   0xa   :  { %13507 = vmatprep.subr.bf16.mxu1 %v14988_v9  ;;  %v15004_v28 = vld [vmem:[%s19673_s1 + $0xf0] sm:$0xff]   ;;  %v15008_v34 = vld [vmem:[%s19673_s1 + $0xf8] sm:$0xff]   ;;  %v25_v39 = vld [vmem:[%s19674_s0 + $0x8] sm:$0xff]  ;;  %v35_v40 = vrot.slane %v24_v38, %v16228_v35  ;;  %v28_v42 = vcombine.high %v24_v38, %v24_v38 }
   0xb   :  { %v15005_v31 = vld [vmem:[%s19673_s1 + $0x30] sm:$0xff]   ;;  %v15009_v36 = vld [vmem:[%s19673_s1 + $0x38] sm:$0xff]   ;;  %v45_v41 = vcombine.high %v25_v39, %v25_v39  ;;  %v15013_v43 = vld [vmem:[%s19673_s1 + $0x140] sm:$0xff]   ;;  %v16247_v44 = vrot.slane %v25_v39, %v16228_v35 }
   0xc   :  { %13486 = vmatpush3.bf16.msra.mxu0 %v14989_v10  ;;  %v15006_v32 = vld [vmem:[%s19673_s1 + $0xb0] sm:$0xff]   ;;  %v15010_v37 = vld [vmem:[%s19673_s1 + $0xb8] sm:$0xff]   ;;  %v15014_v45 = vld [vmem:[%s19673_s1 + $0x1c0] sm:$0xff]   ;;  %v43_v46 = vcombine.high %v35_v40, %v35_v40  ;;  %v42_v47 = vrot.slane %v28_v42, %v16228_v35  ;;  %v70_v49 = vpack.c.bf16 %v35_v40, %v35_v40 }
   0xd   :  { %13508 = vmatpush3.bf16.msra.mxu1 %v14990_v11  ;;  %13487 = vmatprep.subr.bf16.mxu0 %v14991_v12  ;;  %v60_v48 = vcombine.high %v16247_v44, %v16247_v44  ;;  %v15015_v50 = vld [vmem:[%s19673_s1 + $0x100] sm:$0xff]   ;;  %v16259_v51 = vrot.slane %v45_v41, %v16228_v35  ;;  %v15017_v56 = vld [vmem:[%s19673_s1 + $0x148] sm:$0xff]   ;;  %v15021_v0 = vld [vmem:[%s19673_s1 + $0x150] sm:$0xff]  }
   0xe   :  { %13509 = vmatprep.subr.bf16.mxu1 %v14992_v13  ;;  %v71_v52 = vpack.c.bf16 %v43_v46, %v43_v46  ;;  %v44_v53 = vcombine.high %v42_v47, %v42_v47  ;;  %v15016_v54 = vld [vmem:[%s19673_s1 + $0x180] sm:$0xff]   ;;  %v72_v55 = vpack.c.bf16 %v42_v47, %v42_v47  ;;  %v15018_v59 = vld [vmem:[%s19673_s1 + $0x1c8] sm:$0xff]   ;;  %v15022_v1 = vld [vmem:[%s19673_s1 + $0x1d0] sm:$0xff]  }
   0xf   :  { %v61_v57 = vcombine.high %v16259_v51, %v16259_v51  ;;  %v75_v60 = vpack.c.bf16 %v60_v48, %v60_v48  ;;  %v15019_v61 = vld [vmem:[%s19673_s1 + $0x108] sm:$0xff]   ;;  %v15023_v2 = vld [vmem:[%s19673_s1 + $0x110] sm:$0xff]   ;;  %v15025_v4 = vld [vmem:[%s19673_s1 + $0x158] sm:$0xff]   ;;  %v76_v29 = vpack.c.bf16 %v16259_v51, %v16259_v51 }
  0x10   :  { %13488 = vmatpush3.bf16.msra.mxu0 %v14993_v14  ;;  %629 = vmatprep.mubr.bf16.mxu0 %v71_v52  ;;  %v73_v58 = vpack.c.bf16 %v44_v53, %v44_v53  ;;  %v15020_v63 = vld [vmem:[%s19673_s1 + $0x188] sm:$0xff]   ;;  %v15024_v3 = vld [vmem:[%s19673_s1 + $0x190] sm:$0xff]   ;;  %v15026_v5 = vld [vmem:[%s19673_s1 + $0x1d8] sm:$0xff]  }
  0x11   :  { %13510 = vmatpush3.bf16.msra.mxu1 %v14994_v15  ;;  %13489 = vmatprep.subr.bf16.mxu0 %v14995_v16  ;;  %v77_v62 = vpack.c.bf16 %v61_v57, %v61_v57  ;;  %v15027_v6 = vld [vmem:[%s19673_s1 + $0x118] sm:$0xff]   ;;  %v15029_v8 = vld [vmem:[%s19673_s1 + $0x160] sm:$0xff]   ;;  %v15033_v12 = vld [vmem:[%s19673_s1 + $0x168] sm:$0xff]  }
  0x12   :  { %13511 = vmatprep.subr.bf16.mxu1 %v14996_v17  ;;  %669 = vmatprep.mubr.bf16.mxu1 %v73_v58  ;;  %v15028_v7 = vld [vmem:[%s19673_s1 + $0x198] sm:$0xff]   ;;  %v15030_v9 = vld [vmem:[%s19673_s1 + $0x1e0] sm:$0xff]   ;;  %v15034_v13 = vld [vmem:[%s19673_s1 + $0x1e8] sm:$0xff]  }
  0x13   :  { %v15031_v10 = vld [vmem:[%s19673_s1 + $0x120] sm:$0xff]   ;;  %v15035_v14 = vld [vmem:[%s19673_s1 + $0x128] sm:$0xff]   ;;  %v15037_v16 = vld [vmem:[%s19673_s1 + $0x170] sm:$0xff]  }
  0x14   :  { %13490 = vmatpush3.bf16.msra.mxu0 %v14997_v18  ;;  %v15032_v11 = vld [vmem:[%s19673_s1 + $0x1a0] sm:$0xff]   ;;  %v15036_v15 = vld [vmem:[%s19673_s1 + $0x1a8] sm:$0xff]   ;;  %v15038_v17 = vld [vmem:[%s19673_s1 + $0x1f0] sm:$0xff]  }
  0x15   :  { %13512 = vmatpush3.bf16.msra.mxu1 %v14998_v19  ;;  %13491 = vmatprep.subr.bf16.mxu0 %v14999_v20  ;;  %v15039_v18 = vld [vmem:[%s19673_s1 + $0x130] sm:$0xff]   ;;  %v15041_v20 = vld [vmem:[%s19673_s1 + $0x178] sm:$0xff]   ;;  %v15045_v24 = vld [vmem:[%s19675_s4 + $0x40] sm:$0xff]  }
  0x16   :  { %13513 = vmatprep.subr.bf16.mxu1 %v15000_v21  ;;  %v15040_v19 = vld [vmem:[%s19673_s1 + $0x1b0] sm:$0xff]   ;;  %v15042_v21 = vld [vmem:[%s19673_s1 + $0x1f8] sm:$0xff]   ;;  %v15049_v30 = vld [vmem:[%s19675_s4 + $0x48] sm:$0xff]  }
  0x17   :  { %v15043_v22 = vld [vmem:[%s19673_s1 + $0x138] sm:$0xff]   ;;  %v15056_v38 = vld [vmem:[%s19675_s4 + $0x90] sm:$0xff]   ;;  %v15064_v46 = vld [vmem:[%s19675_s4 + $0xa0] sm:$0xff]  }
  0x18   :  { %13492 = vmatpush3.bf16.msra.mxu0 %v15001_v25  ;;  %v15044_v23 = vld [vmem:[%s19673_s1 + $0x1b8] sm:$0xff]   ;;  %v15046_v25 = vld [vmem:[%s19675_s4 + $0xc0] sm:$0xff]   ;;  %v15065_v47 = vld [vmem:[%s19675_s4 + $0x68] sm:$0xff]  }
  0x19   :  { %13514 = vmatpush3.bf16.msra.mxu1 %v15002_v26  ;;  %13493 = vmatprep.subr.bf16.mxu0 %v15003_v27  ;;  %v74_v26 = vpack.c.bf16 %v16247_v44, %v16247_v44  ;;  %v15047_v27 = vld [vmem:[%s19675_s4] sm:$0xff]   ;;  %v15057_v39 = vld [vmem:[%s19675_s4 + $0x58] sm:$0xff]   ;;  %v15066_v48 = vld [vmem:[%s19675_s4 + $0xe8] sm:$0xff]  }
  0x1a   :  { %13515 = vmatprep.subr.bf16.mxu1 %v15004_v28  ;;  %v15048_v28 = vld [vmem:[%s19675_s4 + $0x80] sm:$0xff]   ;;  %v15058_v40 = vld [vmem:[%s19675_s4 + $0xd8] sm:$0xff]   ;;  %v15069_v51 = vld [vmem:[%s19675_s4 + $0x70] sm:$0xff]  }
  0x1b   :  { %v15059_v41 = vld [vmem:[%s19675_s4 + $0x18] sm:$0xff]   ;;  %v15062_v44 = vld [vmem:[%s19675_s4 + $0xe0] sm:$0xff]   ;;  %v15070_v52 = vld [vmem:[%s19675_s4 + $0xf0] sm:$0xff]  }
  0x1c   :  { %13494 = vmatpush3.bf16.msra.mxu0 %v15005_v31  ;;  %v15050_v31 = vld [vmem:[%s19675_s4 + $0xc8] sm:$0xff]   ;;  %v15060_v42 = vld [vmem:[%s19675_s4 + $0x98] sm:$0xff]   ;;  %v15071_v53 = vld [vmem:[%s19675_s4 + $0x30] sm:$0xff]  }
  0x1d   :  { %13516 = vmatpush3.bf16.msra.mxu1 %v15006_v32  ;;  %13495 = vmatprep.subr.bf16.mxu0 %v15007_v33  ;;  %v15051_v32 = vld [vmem:[%s19675_s4 + $0x8] sm:$0xff]   ;;  %v15075_v57 = vld [vmem:[%s19675_s4 + $0x38] sm:$0xff]   ;;  %v757_v58 = vld [vmem:[%s19676_s3] sm:$0xff] }
  0x1e   :  { %13517 = vmatprep.subr.bf16.mxu1 %v15008_v34  ;;  %v15052_v33 = vld [vmem:[%s19675_s4 + $0x88] sm:$0xff]   ;;  %v15053_v34 = vld [vmem:[%s19675_s4 + $0x50] sm:$0xff]  }
  0x20   :  { %13496 = vmatpush3.bf16.msra.mxu0 %v15009_v36  ;;  %v15054_v36 = vld [vmem:[%s19675_s4 + $0xd0] sm:$0xff]  }
  0x21   :  { %13518 = vmatpush3.bf16.msra.mxu1 %v15010_v37  ;;  %13525 = vmatprep.subr.bf16.mxu0 %v15013_v43  ;;  %v15055_v37 = vld [vmem:[%s19675_s4 + $0x10] sm:$0xff]   ;;  %v15061_v43 = vld [vmem:[%s19675_s4 + $0x60] sm:$0xff]  }
  0x22   :  { %13547 = vmatprep.subr.bf16.mxu1 %v15014_v45  ;;  %v15063_v45 = vld [vmem:[%s19675_s4 + $0x20] sm:$0xff]  }
  0x23   :  { %630 = vmatmul.mubr.bf16.vlgmr.msra.gmra.mrb[0].mxu0 %v70_v49  ;;  %v15067_v49 = vld [vmem:[%s19675_s4 + $0x28] sm:$0xff]  }
  0x24   :  { %13526 = vmatpush3.bf16.msra.mxu0 %v15015_v50  ;;  %670 = vmatmul.mubr.bf16.vlgmr.msra.gmra.mrb[0].mxu1 %v72_v55  ;;  %v15068_v50 = vld [vmem:[%s19675_s4 + $0xa8] sm:$0xff]   ;;  %v15073_v55 = vld [vmem:[%s19675_s4 + $0x78] sm:$0xff]  }
  0x25   :  { %13527 = vmatprep.subr.bf16.mxu0 %v15017_v56  ;;  %13548 = vmatpush3.bf16.msra.mxu1 %v15016_v54  ;;  %v15072_v54 = vld [vmem:[%s19675_s4 + $0xb0] sm:$0xff]   ;;  %v15074_v56 = vld [vmem:[%s19675_s4 + $0xf8] sm:$0xff]  }
  0x26   :  { %709 = vmatprep.mubr.bf16.mxu0 %v75_v60  ;;  %13549 = vmatprep.subr.bf16.mxu1 %v15018_v59  ;;  %v15076_v59 = vld [vmem:[%s19675_s4 + $0xb8] sm:$0xff]   ;;  %v828_v60 = vrot.slane %v757_v58, %v16228_v35 }
  0x27   :  { %749 = vmatprep.mubr.bf16.mxu1 %v77_v62  ;;  %v15078_v62 = vld [vmem:[%s19675_s4 + $0x140] sm:$0xff]  }
  0x28   :  { %13528 = vmatpush3.bf16.msra.mxu0 %v15019_v61  ;;  %v821_v61 = vcombine.high %v757_v58, %v757_v58  ;;  %v15121_v58 = vld [vmem:[%s19675_s4 + $0x210] sm:$0xff]  }
  0x29   :  { %13529 = vmatprep.subr.bf16.mxu0 %v15021_v0  ;;  %13550 = vmatpush3.bf16.msra.mxu1 %v15020_v63  ;;  %v836_v63 = vcombine.high %v828_v60, %v828_v60 }
  0x2a   :  { %13551 = vmatprep.subr.bf16.mxu1 %v15022_v1  ;;  %v835_v0 = vrot.slane %v821_v61, %v16228_v35  ;;  %v15079_v1 = vld [vmem:[%s19675_s4 + $0x1c0] sm:$0xff]   ;;  %v15124_v61 = vld [vmem:[%s19675_s4 + $0x2d8] sm:$0xff]  }
  0x2c   :  { %13530 = vmatpush3.bf16.msra.mxu0 %v15023_v2  ;;  %v1493_v2 = vpack.c.bf16 %v828_v60, %v828_v60  ;;  %v15123_v60 = vld [vmem:[%s19675_s4 + $0x258] sm:$0xff]  }
  0x2d   :  { %13531 = vmatprep.subr.bf16.mxu0 %v15025_v4  ;;  %13552 = vmatpush3.bf16.msra.mxu1 %v15024_v3  ;;  %v15080_v3 = vld [vmem:[%s19675_s4 + $0x100] sm:$0xff]   ;;  %v1494_v4 = vpack.c.bf16 %v836_v63, %v836_v63  ;;  %v15126_v63 = vld [vmem:[%s19675_s4 + $0x298] sm:$0xff]  }
  0x2e   :  { %13553 = vmatprep.subr.bf16.mxu1 %v15026_v5  ;;  %v837_v5 = vcombine.high %v835_v0, %v835_v0 }
  0x30   :  { %13532 = vmatpush3.bf16.msra.mxu0 %v15027_v6  ;;  %v15081_v6 = vld [vmem:[%s19675_s4 + $0x180] sm:$0xff]  }
  0x31   :  { %13533 = vmatprep.subr.bf16.mxu0 %v15029_v8  ;;  %13554 = vmatpush3.bf16.msra.mxu1 %v15028_v7  ;;  %v1495_v7 = vpack.c.bf16 %v835_v0, %v835_v0  ;;  %v15082_v8 = vld [vmem:[%s19675_s4 + $0x148] sm:$0xff]   ;;  %v15127_v0 = vld [vmem:[%s19675_s4 + $0x260] sm:$0xff]  }
  0x32   :  { %13555 = vmatprep.subr.bf16.mxu1 %v15030_v9  ;;  %v1496_v9 = vpack.c.bf16 %v837_v5, %v837_v5  ;;  %v15132_v5 = vld [vmem:[%s19675_s4 + $0x2e8] sm:$0xff]  }
  0x34   :  { %13534 = vmatpush3.bf16.msra.mxu0 %v15031_v10  ;;  %v15083_v10 = vld [vmem:[%s19675_s4 + $0x1c8] sm:$0xff]  }
  0x35   :  { %13535 = vmatprep.subr.bf16.mxu0 %v15033_v12  ;;  %13556 = vmatpush3.bf16.msra.mxu1 %v15032_v11  ;;  %v15084_v11 = vld [vmem:[%s19675_s4 + $0x108] sm:$0xff]  }
  0x36   :  { %13557 = vmatprep.subr.bf16.mxu1 %v15034_v13  ;;  %v15085_v12 = vld [vmem:[%s19675_s4 + $0x188] sm:$0xff]   ;;  %v15086_v13 = vld [vmem:[%s19675_s4 + $0x150] sm:$0xff]  }
  0x38   :  { %13536 = vmatpush3.bf16.msra.mxu0 %v15035_v14  ;;  %v15087_v14 = vld [vmem:[%s19675_s4 + $0x1d0] sm:$0xff]  }
  0x39   :  { %13537 = vmatprep.subr.bf16.mxu0 %v15037_v16  ;;  %13558 = vmatpush3.bf16.msra.mxu1 %v15036_v15  ;;  %v15088_v15 = vld [vmem:[%s19675_s4 + $0x110] sm:$0xff]  }
  0x3a   :  { %13559 = vmatprep.subr.bf16.mxu1 %v15038_v17  ;;  %v15089_v16 = vld [vmem:[%s19675_s4 + $0x190] sm:$0xff]   ;;  %v15090_v17 = vld [vmem:[%s19675_s4 + $0x158] sm:$0xff]  }
  0x3c   :  { %13538 = vmatpush3.bf16.msra.mxu0 %v15039_v18  ;;  %v15091_v18 = vld [vmem:[%s19675_s4 + $0x1d8] sm:$0xff]  }
  0x3d   :  { %13539 = vmatprep.subr.bf16.mxu0 %v15041_v20  ;;  %13560 = vmatpush3.bf16.msra.mxu1 %v15040_v19  ;;  %v15092_v19 = vld [vmem:[%s19675_s4 + $0x118] sm:$0xff]  }
  0x3e   :  { %13561 = vmatprep.subr.bf16.mxu1 %v15042_v21  ;;  %v15093_v20 = vld [vmem:[%s19675_s4 + $0x198] sm:$0xff]   ;;  %v15094_v21 = vld [vmem:[%s19675_s4 + $0x160] sm:$0xff]  }
  0x40   :  { %13540 = vmatpush3.bf16.msra.mxu0 %v15043_v22  ;;  %v15095_v22 = vld [vmem:[%s19675_s4 + $0x1e0] sm:$0xff]  }
  0x41   :  { %13569 = vmatprep.subr.bf16.mxu0 %v15045_v24  ;;  %13562 = vmatpush3.bf16.msra.mxu1 %v15044_v23  ;;  %v15096_v23 = vld [vmem:[%s19675_s4 + $0x120] sm:$0xff]  }
  0x42   :  { %13591 = vmatprep.subr.bf16.mxu1 %v15046_v25  ;;  %v15097_v24 = vld [vmem:[%s19675_s4 + $0x1a0] sm:$0xff]   ;;  %v15098_v25 = vld [vmem:[%s19675_s4 + $0x168] sm:$0xff]  }
  0x43   :  { %710 = vmatmul.mubr.bf16.vlgmr.msra.gmra.mrb[4].mxu0 %v74_v26  ;;  %v15099_v26 = vld [vmem:[%s19675_s4 + $0x1e8] sm:$0xff]  }
  0x44   :  { %13570 = vmatpush3.bf16.msra.mxu0 %v15047_v27  ;;  %750 = vmatmul.mubr.bf16.vlgmr.msra.gmra.mrb[4].mxu1 %v76_v29  ;;  %v15100_v27 = vld [vmem:[%s19675_s4 + $0x128] sm:$0xff]   ;;  %v15102_v29 = vld [vmem:[%s19675_s4 + $0x170] sm:$0xff]  }
  0x45   :  { %13571 = vmatprep.subr.bf16.mxu0 %v15049_v30  ;;  %13592 = vmatpush3.bf16.msra.mxu1 %v15048_v28  ;;  %v15101_v28 = vld [vmem:[%s19675_s4 + $0x1a8] sm:$0xff]   ;;  %v15103_v30 = vld [vmem:[%s19675_s4 + $0x1f0] sm:$0xff]  }
  0x46   :  { %13593 = vmatprep.subr.bf16.mxu1 %v15050_v31  ;;  %9852 = vmatprep.mubr.bf16.mxu0 %v1494_v4  ;;  %v15104_v31 = vld [vmem:[%s19675_s4 + $0x130] sm:$0xff]   ;;  %v15131_v4 = vld [vmem:[%s19675_s4 + $0x268] sm:$0xff]  }
  0x47   :  { %9892 = vmatprep.mubr.bf16.mxu1 %v1496_v9  ;;  %v15136_v9 = vld [vmem:[%s19675_s4 + $0x2f0] sm:$0xff]  }
  0x48   :  { %13572 = vmatpush3.bf16.msra.mxu0 %v15051_v32  ;;  %v15105_v32 = vld [vmem:[%s19675_s4 + $0x1b0] sm:$0xff]  }
  0x49   :  { %13573 = vmatprep.subr.bf16.mxu0 %v15053_v34  ;;  %13594 = vmatpush3.bf16.msra.mxu1 %v15052_v33  ;;  %v15106_v33 = vld [vmem:[%s19675_s4 + $0x178] sm:$0xff]  }
  0x4a   :  { %13595 = vmatprep.subr.bf16.mxu1 %v15054_v36  ;;  %v15107_v34 = vld [vmem:[%s19675_s4 + $0x1f8] sm:$0xff]  }
  0x4b   :  { %v15108_v36 = vld [vmem:[%s19675_s4 + $0x138] sm:$0xff]  }
  0x4c   :  { %13574 = vmatpush3.bf16.msra.mxu0 %v15055_v37  ;;  %v758_v37 = vld [vmem:[%s19676_s3 + $0x8] sm:$0xff] }
  0x4d   :  { %13575 = vmatprep.subr.bf16.mxu0 %v15057_v39  ;;  %13596 = vmatpush3.bf16.msra.mxu1 %v15056_v38  ;;  %v845_v38 = vrot.slane %v758_v37, %v16228_v35  ;;  %v838_v39 = vcombine.high %v758_v37, %v758_v37  ;;  %v15154_v37 = vld [vmem:[%s19675_s4 + $0x310] sm:$0xff]  }
  0x4e   :  { %13597 = vmatprep.subr.bf16.mxu1 %v15058_v40  ;;  %v15111_v40 = vld [vmem:[%s19675_s4 + $0x240] sm:$0xff]  }
  0x50   :  { %13576 = vmatpush3.bf16.msra.mxu0 %v15059_v41  ;;  %v15109_v41 = vld [vmem:[%s19675_s4 + $0x1b8] sm:$0xff]  }
  0x51   :  { %13577 = vmatprep.subr.bf16.mxu0 %v15061_v43  ;;  %13598 = vmatpush3.bf16.msra.mxu1 %v15060_v42  ;;  %v853_v42 = vcombine.high %v845_v38, %v845_v38  ;;  %v852_v43 = vrot.slane %v838_v39, %v16228_v35  ;;  %v15156_v39 = vld [vmem:[%s19675_s4 + $0x358] sm:$0xff]  }
  0x52   :  { %13599 = vmatprep.subr.bf16.mxu1 %v15062_v44  ;;  %v15112_v44 = vld [vmem:[%s19675_s4 + $0x2c0] sm:$0xff]  }
  0x54   :  { %13578 = vmatpush3.bf16.msra.mxu0 %v15063_v45  ;;  %v1497_v45 = vpack.c.bf16 %v845_v38, %v845_v38  ;;  %v15155_v38 = vld [vmem:[%s19675_s4 + $0x390] sm:$0xff]  }
  0x55   :  { %13579 = vmatprep.subr.bf16.mxu0 %v15065_v47  ;;  %13600 = vmatpush3.bf16.msra.mxu1 %v15064_v46  ;;  %v15113_v46 = vld [vmem:[%s19675_s4 + $0x200] sm:$0xff]   ;;  %v1498_v47 = vpack.c.bf16 %v853_v42, %v853_v42  ;;  %v15159_v42 = vld [vmem:[%s19675_s4 + $0x398] sm:$0xff]  }
  0x56   :  { %13601 = vmatprep.subr.bf16.mxu1 %v15066_v48  ;;  %v854_v48 = vcombine.high %v852_v43, %v852_v43 }
  0x58   :  { %13580 = vmatpush3.bf16.msra.mxu0 %v15067_v49  ;;  %v15114_v49 = vld [vmem:[%s19675_s4 + $0x280] sm:$0xff]  }
  0x59   :  { %13581 = vmatprep.subr.bf16.mxu0 %v15069_v51  ;;  %13602 = vmatpush3.bf16.msra.mxu1 %v15068_v50  ;;  %v1499_v50 = vpack.c.bf16 %v852_v43, %v852_v43  ;;  %v15115_v51 = vld [vmem:[%s19675_s4 + $0x248] sm:$0xff]   ;;  %v15160_v43 = vld [vmem:[%s19675_s4 + $0x360] sm:$0xff]  }
  0x5a   :  { %13603 = vmatprep.subr.bf16.mxu1 %v15070_v52  ;;  %v1500_v52 = vpack.c.bf16 %v854_v48, %v854_v48  ;;  %v15165_v48 = vld [vmem:[%s19675_s4 + $0x3e8] sm:$0xff]  }
  0x5c   :  { %13582 = vmatpush3.bf16.msra.mxu0 %v15071_v53  ;;  %v15116_v53 = vld [vmem:[%s19675_s4 + $0x2c8] sm:$0xff]  }
  0x5d   :  { %13583 = vmatprep.subr.bf16.mxu0 %v15073_v55  ;;  %13604 = vmatpush3.bf16.msra.mxu1 %v15072_v54  ;;  %v15117_v54 = vld [vmem:[%s19675_s4 + $0x208] sm:$0xff]  }
  0x5e   :  { %13605 = vmatprep.subr.bf16.mxu1 %v15074_v56  ;;  %v15118_v55 = vld [vmem:[%s19675_s4 + $0x288] sm:$0xff]   ;;  %v15119_v56 = vld [vmem:[%s19675_s4 + $0x250] sm:$0xff]  }
  0x60   :  { %13584 = vmatpush3.bf16.msra.mxu0 %v15075_v57  ;;  %v15120_v57 = vld [vmem:[%s19675_s4 + $0x2d0] sm:$0xff]  }
  0x61   :  { %13613 = vmatprep.subr.bf16.mxu0 %v15078_v62  ;;  %13606 = vmatpush3.bf16.msra.mxu1 %v15076_v59  ;;  %v15122_v59 = vld [vmem:[%s19675_s4 + $0x290] sm:$0xff]   ;;  %v15125_v62 = vld [vmem:[%s19675_s4 + $0x218] sm:$0xff]  }
  0x62   :  { %13635 = vmatprep.subr.bf16.mxu1 %v15079_v1  ;;  %v15128_v1 = vld [vmem:[%s19675_s4 + $0x2e0] sm:$0xff]  }
  0x63   :  { %9853 = vmatmul.mubr.bf16.vlgmr.msra.gmra.mrb[8].mxu0 %v1493_v2  ;;  %v15129_v2 = vld [vmem:[%s19675_s4 + $0x220] sm:$0xff]  }
  0x64   :  { %13614 = vmatpush3.bf16.msra.mxu0 %v15080_v3  ;;  %9893 = vmatmul.mubr.bf16.vlgmr.msra.gmra.mrb[8].mxu1 %v1495_v7  ;;  %v15130_v3 = vld [vmem:[%s19675_s4 + $0x2a0] sm:$0xff]   ;;  %v15134_v7 = vld [vmem:[%s19675_s4 + $0x2a8] sm:$0xff]  }
  0x65   :  { %13615 = vmatprep.subr.bf16.mxu0 %v15082_v8  ;;  %13636 = vmatpush3.bf16.msra.mxu1 %v15081_v6  ;;  %v15133_v6 = vld [vmem:[%s19675_s4 + $0x228] sm:$0xff]   ;;  %v15135_v8 = vld [vmem:[%s19675_s4 + $0x270] sm:$0xff]  }
  0x66   :  { %13637 = vmatprep.subr.bf16.mxu1 %v15083_v10  ;;  %9932 = vmatprep.mubr.bf16.mxu0 %v1498_v47  ;;  %v15137_v10 = vld [vmem:[%s19675_s4 + $0x230] sm:$0xff]   ;;  %v15164_v47 = vld [vmem:[%s19675_s4 + $0x368] sm:$0xff]  }
  0x67   :  { %9972 = vmatprep.mubr.bf16.mxu1 %v1500_v52  ;;  %v15169_v52 = vld [vmem:[%s19675_s4 + $0x3f0] sm:$0xff]  }
  0x68   :  { %13616 = vmatpush3.bf16.msra.mxu0 %v15084_v11  ;;  %v15138_v11 = vld [vmem:[%s19675_s4 + $0x2b0] sm:$0xff]  }
  0x69   :  { %13617 = vmatprep.subr.bf16.mxu0 %v15086_v13  ;;  %13638 = vmatpush3.bf16.msra.mxu1 %v15085_v12  ;;  %v15139_v12 = vld [vmem:[%s19675_s4 + $0x278] sm:$0xff]  }
  0x6a   :  { %13639 = vmatprep.subr.bf16.mxu1 %v15087_v14  ;;  %v15140_v13 = vld [vmem:[%s19675_s4 + $0x2f8] sm:$0xff]  }
  0x6b   :  { %v15141_v14 = vld [vmem:[%s19675_s4 + $0x238] sm:$0xff]  }
  0x6c   :  { %13618 = vmatpush3.bf16.msra.mxu0 %v15088_v15  ;;  %v759_v15 = vld [vmem:[%s19676_s3 + $0x10] sm:$0xff] }
  0x6d   :  { %13619 = vmatprep.subr.bf16.mxu0 %v15090_v17  ;;  %13640 = vmatpush3.bf16.msra.mxu1 %v15089_v16  ;;  %v15142_v16 = vld [vmem:[%s19675_s4 + $0x2b8] sm:$0xff]   ;;  %v862_v17 = vrot.slane %v759_v15, %v16228_v35 }
  0x6e   :  { %13641 = vmatprep.subr.bf16.mxu1 %v15091_v18  ;;  %v855_v18 = vcombine.high %v759_v15, %v759_v15  ;;  %v15187_v15 = vld [vmem:[%s19675_s4 + $0x410] sm:$0xff]  }
  0x70   :  { %13620 = vmatpush3.bf16.msra.mxu0 %v15092_v19  ;;  %v15144_v19 = vld [vmem:[%s19675_s4 + $0x340] sm:$0xff]  }
  0x71   :  { %13621 = vmatprep.subr.bf16.mxu0 %v15094_v21  ;;  %13642 = vmatpush3.bf16.msra.mxu1 %v15093_v20  ;;  %v870_v20 = vcombine.high %v862_v17, %v862_v17  ;;  %v869_v21 = vrot.slane %v855_v18, %v16228_v35  ;;  %v15190_v18 = vld [vmem:[%s19675_s4 + $0x4d8] sm:$0xff]  }
  0x72   :  { %13643 = vmatprep.subr.bf16.mxu1 %v15095_v22  ;;  %v15145_v22 = vld [vmem:[%s19675_s4 + $0x3c0] sm:$0xff]  }
  0x74   :  { %13622 = vmatpush3.bf16.msra.mxu0 %v15096_v23  ;;  %v1501_v23 = vpack.c.bf16 %v862_v17, %v862_v17  ;;  %v15189_v17 = vld [vmem:[%s19675_s4 + $0x458] sm:$0xff]  }
  0x75   :  { %13623 = vmatprep.subr.bf16.mxu0 %v15098_v25  ;;  %13644 = vmatpush3.bf16.msra.mxu1 %v15097_v24  ;;  %v15146_v24 = vld [vmem:[%s19675_s4 + $0x300] sm:$0xff]   ;;  %v1502_v25 = vpack.c.bf16 %v870_v20, %v870_v20  ;;  %v15192_v20 = vld [vmem:[%s19675_s4 + $0x498] sm:$0xff]  }
  0x76   :  { %13645 = vmatprep.subr.bf16.mxu1 %v15099_v26  ;;  %v871_v26 = vcombine.high %v869_v21, %v869_v21 }
  0x78   :  { %13624 = vmatpush3.bf16.msra.mxu0 %v15100_v27  ;;  %v15147_v27 = vld [vmem:[%s19675_s4 + $0x380] sm:$0xff]  }
  0x79   :  { %13625 = vmatprep.subr.bf16.mxu0 %v15102_v29  ;;  %13646 = vmatpush3.bf16.msra.mxu1 %v15101_v28  ;;  %v1503_v28 = vpack.c.bf16 %v869_v21, %v869_v21  ;;  %v15148_v29 = vld [vmem:[%s19675_s4 + $0x348] sm:$0xff]   ;;  %v15193_v21 = vld [vmem:[%s19675_s4 + $0x460] sm:$0xff]  }
  0x7a   :  { %13647 = vmatprep.subr.bf16.mxu1 %v15103_v30  ;;  %v1504_v30 = vpack.c.bf16 %v871_v26, %v871_v26  ;;  %v15198_v26 = vld [vmem:[%s19675_s4 + $0x4e8] sm:$0xff]  }
  0x7c   :  { %13626 = vmatpush3.bf16.msra.mxu0 %v15104_v31  ;;  %v15149_v31 = vld [vmem:[%s19675_s4 + $0x3c8] sm:$0xff]  }
  0x7d   :  { %13627 = vmatprep.subr.bf16.mxu0 %v15106_v33  ;;  %13648 = vmatpush3.bf16.msra.mxu1 %v15105_v32  ;;  %v15150_v32 = vld [vmem:[%s19675_s4 + $0x308] sm:$0xff]  }
  0x7e   :  { %13649 = vmatprep.subr.bf16.mxu1 %v15107_v34  ;;  %v15151_v33 = vld [vmem:[%s19675_s4 + $0x388] sm:$0xff]   ;;  %v15152_v34 = vld [vmem:[%s19675_s4 + $0x350] sm:$0xff]  }
  0x80   :  { %13628 = vmatpush3.bf16.msra.mxu0 %v15108_v36  ;;  %v15153_v36 = vld [vmem:[%s19675_s4 + $0x3d0] sm:$0xff]  }
  0x81   :  { %13657 = vmatprep.subr.bf16.mxu0 %v15111_v40  ;;  %13650 = vmatpush3.bf16.msra.mxu1 %v15109_v41  ;;  %v15157_v40 = vld [vmem:[%s19675_s4 + $0x3d8] sm:$0xff]  }
  0x82   :  { %13679 = vmatprep.subr.bf16.mxu1 %v15112_v44  ;;  %v15158_v41 = vld [vmem:[%s19675_s4 + $0x318] sm:$0xff]   ;;  %v15161_v44 = vld [vmem:[%s19675_s4 + $0x3e0] sm:$0xff]  }
  0x83   :  { %9933 = vmatmul.mubr.bf16.vlgmr.msra.gmra.mrb[12].mxu0 %v1497_v45  ;;  %v15162_v45 = vld [vmem:[%s19675_s4 + $0x320] sm:$0xff]  }
  0x84   :  { %13658 = vmatpush3.bf16.msra.mxu0 %v15113_v46  ;;  %9973 = vmatmul.mubr.bf16.vlgmr.msra.gmra.mrb[12].mxu1 %v1499_v50  ;;  %v15163_v46 = vld [vmem:[%s19675_s4 + $0x3a0] sm:$0xff]   ;;  %v15167_v50 = vld [vmem:[%s19675_s4 + $0x3a8] sm:$0xff]  }
  0x85   :  { %13659 = vmatprep.subr.bf16.mxu0 %v15115_v51  ;;  %13680 = vmatpush3.bf16.msra.mxu1 %v15114_v49  ;;  %v15166_v49 = vld [vmem:[%s19675_s4 + $0x328] sm:$0xff]   ;;  %v15168_v51 = vld [vmem:[%s19675_s4 + $0x370] sm:$0xff]  }
  0x86   :  { %13681 = vmatprep.subr.bf16.mxu1 %v15116_v53  ;;  %10012 = vmatprep.mubr.bf16.mxu0 %v1502_v25  ;;  %v15170_v53 = vld [vmem:[%s19675_s4 + $0x330] sm:$0xff]   ;;  %v15197_v25 = vld [vmem:[%s19675_s4 + $0x468] sm:$0xff]  }
  0x87   :  { %10052 = vmatprep.mubr.bf16.mxu1 %v1504_v30  ;;  %v15202_v30 = vld [vmem:[%s19675_s4 + $0x4f0] sm:$0xff]  }
  0x88   :  { %13660 = vmatpush3.bf16.msra.mxu0 %v15117_v54  ;;  %v15171_v54 = vld [vmem:[%s19675_s4 + $0x3b0] sm:$0xff]  }
  0x89   :  { %13661 = vmatprep.subr.bf16.mxu0 %v15119_v56  ;;  %13682 = vmatpush3.bf16.msra.mxu1 %v15118_v55  ;;  %v15172_v55 = vld [vmem:[%s19675_s4 + $0x378] sm:$0xff]  }
  0x8a   :  { %13683 = vmatprep.subr.bf16.mxu1 %v15120_v57  ;;  %v15173_v56 = vld [vmem:[%s19675_s4 + $0x3f8] sm:$0xff]  }
  0x8b   :  { %v15174_v57 = vld [vmem:[%s19675_s4 + $0x338] sm:$0xff]  }
  0x8c   :  { %13662 = vmatpush3.bf16.msra.mxu0 %v15121_v58  ;;  %v760_v58 = vld [vmem:[%s19676_s3 + $0x18] sm:$0xff] }
  0x8d   :  { %13663 = vmatprep.subr.bf16.mxu0 %v15123_v60  ;;  %13684 = vmatpush3.bf16.msra.mxu1 %v15122_v59  ;;  %v15175_v59 = vld [vmem:[%s19675_s4 + $0x3b8] sm:$0xff]   ;;  %v879_v60 = vrot.slane %v760_v58, %v16228_v35 }
  0x8e   :  { %13685 = vmatprep.subr.bf16.mxu1 %v15124_v61  ;;  %v872_v61 = vcombine.high %v760_v58, %v760_v58  ;;  %v15220_v58 = vld [vmem:[%s19675_s4 + $0x510] sm:$0xff]  }
  0x90   :  { %13664 = vmatpush3.bf16.msra.mxu0 %v15125_v62  ;;  %v15177_v62 = vld [vmem:[%s19675_s4 + $0x440] sm:$0xff]  }
  0x91   :  { %13665 = vmatprep.subr.bf16.mxu0 %v15127_v0  ;;  %13686 = vmatpush3.bf16.msra.mxu1 %v15126_v63  ;;  %v887_v63 = vcombine.high %v879_v60, %v879_v60  ;;  %v886_v0 = vrot.slane %v872_v61, %v16228_v35  ;;  %v15223_v61 = vld [vmem:[%s19675_s4 + $0x5d8] sm:$0xff]  }
  0x92   :  { %13687 = vmatprep.subr.bf16.mxu1 %v15128_v1  ;;  %v15178_v1 = vld [vmem:[%s19675_s4 + $0x4c0] sm:$0xff]  }
  0x94   :  { %13666 = vmatpush3.bf16.msra.mxu0 %v15129_v2  ;;  %v1505_v2 = vpack.c.bf16 %v879_v60, %v879_v60  ;;  %v15221_v60 = vld [vmem:[%s19675_s4 + $0x590] sm:$0xff]  }
  0x95   :  { %13667 = vmatprep.subr.bf16.mxu0 %v15131_v4  ;;  %13688 = vmatpush3.bf16.msra.mxu1 %v15130_v3  ;;  %v15179_v3 = vld [vmem:[%s19675_s4 + $0x400] sm:$0xff]   ;;  %v1506_v4 = vpack.c.bf16 %v887_v63, %v887_v63 }
  0x96   :  { %13689 = vmatprep.subr.bf16.mxu1 %v15132_v5  ;;  %v888_v5 = vcombine.high %v886_v0, %v886_v0  ;;  %v15226_v63 = vld [vmem:[%s19675_s4 + $0x560] sm:$0xff]  }
  0x98   :  { %13668 = vmatpush3.bf16.msra.mxu0 %v15133_v6  ;;  %v15180_v6 = vld [vmem:[%s19675_s4 + $0x480] sm:$0xff]  }
  0x99   :  { %13669 = vmatprep.subr.bf16.mxu0 %v15135_v8  ;;  %13690 = vmatpush3.bf16.msra.mxu1 %v15134_v7  ;;  %v1507_v7 = vpack.c.bf16 %v886_v0, %v886_v0  ;;  %v15181_v8 = vld [vmem:[%s19675_s4 + $0x448] sm:$0xff]   ;;  %v15225_v0 = vld [vmem:[%s19675_s4 + $0x598] sm:$0xff]  }
  0x9a   :  { %13691 = vmatprep.subr.bf16.mxu1 %v15136_v9  ;;  %v1508_v9 = vpack.c.bf16 %v888_v5, %v888_v5  ;;  %v15231_v5 = vld [vmem:[%s19675_s4 + $0x5e8] sm:$0xff]  }
  0x9c   :  { %13670 = vmatpush3.bf16.msra.mxu0 %v15137_v10  ;;  %v15182_v10 = vld [vmem:[%s19675_s4 + $0x4c8] sm:$0xff]  }
  0x9d   :  { %13671 = vmatprep.subr.bf16.mxu0 %v15139_v12  ;;  %13692 = vmatpush3.bf16.msra.mxu1 %v15138_v11  ;;  %v15183_v11 = vld [vmem:[%s19675_s4 + $0x408] sm:$0xff]  }
  0x9e   :  { %13693 = vmatprep.subr.bf16.mxu1 %v15140_v13  ;;  %v15184_v12 = vld [vmem:[%s19675_s4 + $0x488] sm:$0xff]   ;;  %v15185_v13 = vld [vmem:[%s19675_s4 + $0x450] sm:$0xff]  }
  0xa0   :  { %13672 = vmatpush3.bf16.msra.mxu0 %v15141_v14  ;;  %v15186_v14 = vld [vmem:[%s19675_s4 + $0x4d0] sm:$0xff]  }
  0xa1   :  { %13701 = vmatprep.subr.bf16.mxu0 %v15144_v19  ;;  %13694 = vmatpush3.bf16.msra.mxu1 %v15142_v16  ;;  %v15188_v16 = vld [vmem:[%s19675_s4 + $0x490] sm:$0xff]   ;;  %v15191_v19 = vld [vmem:[%s19675_s4 + $0x418] sm:$0xff]  }
  0xa2   :  { %13723 = vmatprep.subr.bf16.mxu1 %v15145_v22  ;;  %v15194_v22 = vld [vmem:[%s19675_s4 + $0x4e0] sm:$0xff]  }
  0xa3   :  { %10013 = vmatmul.mubr.bf16.vlgmr.msra.gmra.mrb[16].mxu0 %v1501_v23  ;;  %v15195_v23 = vld [vmem:[%s19675_s4 + $0x420] sm:$0xff]  }
  0xa4   :  { %13702 = vmatpush3.bf16.msra.mxu0 %v15146_v24  ;;  %10053 = vmatmul.mubr.bf16.vlgmr.msra.gmra.mrb[16].mxu1 %v1503_v28  ;;  %v15196_v24 = vld [vmem:[%s19675_s4 + $0x4a0] sm:$0xff]   ;;  %v15200_v28 = vld [vmem:[%s19675_s4 + $0x4a8] sm:$0xff]  }
  0xa5   :  { %13703 = vmatprep.subr.bf16.mxu0 %v15148_v29  ;;  %13724 = vmatpush3.bf16.msra.mxu1 %v15147_v27  ;;  %v15199_v27 = vld [vmem:[%s19675_s4 + $0x428] sm:$0xff]   ;;  %v15201_v29 = vld [vmem:[%s19675_s4 + $0x470] sm:$0xff]  }
  0xa6   :  { %13725 = vmatprep.subr.bf16.mxu1 %v15149_v31  ;;  %10092 = vmatprep.mubr.bf16.mxu0 %v1506_v4  ;;  %v15203_v31 = vld [vmem:[%s19675_s4 + $0x430] sm:$0xff]   ;;  %v15230_v4 = vld [vmem:[%s19675_s4 + $0x568] sm:$0xff]  }
  0xa7   :  { %10132 = vmatprep.mubr.bf16.mxu1 %v1508_v9  ;;  %v15233_v9 = vld [vmem:[%s19675_s4 + $0x5a8] sm:$0xff]  }
  0xa8   :  { %13704 = vmatpush3.bf16.msra.mxu0 %v15150_v32  ;;  %v15204_v32 = vld [vmem:[%s19675_s4 + $0x4b0] sm:$0xff]  }
  0xa9   :  { %13705 = vmatprep.subr.bf16.mxu0 %v15152_v34  ;;  %13726 = vmatpush3.bf16.msra.mxu1 %v15151_v33  ;;  %v15205_v33 = vld [vmem:[%s19675_s4 + $0x478] sm:$0xff]  }
  0xaa   :  { %13727 = vmatprep.subr.bf16.mxu1 %v15153_v36  ;;  %v15206_v34 = vld [vmem:[%s19675_s4 + $0x4f8] sm:$0xff]  }
  0xab   :  { %v15207_v36 = vld [vmem:[%s19675_s4 + $0x438] sm:$0xff]  }
  0xac   :  { %13706 = vmatpush3.bf16.msra.mxu0 %v15154_v37  ;;  %v761_v37 = vld [vmem:[%s19676_s3 + $0x20] sm:$0xff] }
  0xad   :  { %13707 = vmatprep.subr.bf16.mxu0 %v15156_v39  ;;  %13728 = vmatpush3.bf16.msra.mxu1 %v15155_v38  ;;  %v896_v38 = vrot.slane %v761_v37, %v16228_v35  ;;  %v889_v39 = vcombine.high %v761_v37, %v761_v37 }
  0xae   :  { %13729 = vmatprep.subr.bf16.mxu1 %v15157_v40  ;;  %v15210_v40 = vld [vmem:[%s19675_s4 + $0x540] sm:$0xff]  }
  0xb0   :  { %13708 = vmatpush3.bf16.msra.mxu0 %v15158_v41  ;;  %v15208_v41 = vld [vmem:[%s19675_s4 + $0x4b8] sm:$0xff]  }
  0xb1   :  { %13709 = vmatprep.subr.bf16.mxu0 %v15160_v43  ;;  %13730 = vmatpush3.bf16.msra.mxu1 %v15159_v42  ;;  %v904_v42 = vcombine.high %v896_v38, %v896_v38  ;;  %v903_v43 = vrot.slane %v889_v39, %v16228_v35 }
  0xb2   :  { %13731 = vmatprep.subr.bf16.mxu1 %v15161_v44  ;;  %v15211_v44 = vld [vmem:[%s19675_s4 + $0x5c0] sm:$0xff]  }
  0xb4   :  { %13710 = vmatpush3.bf16.msra.mxu0 %v15162_v45  ;;  %v1509_v45 = vpack.c.bf16 %v896_v38, %v896_v38  ;;  %v15245_v38 = vld [vmem:[%s19675_s4 + $0x600] sm:$0xff]  }
  0xb5   :  { %13711 = vmatprep.subr.bf16.mxu0 %v15164_v47  ;;  %13732 = vmatpush3.bf16.msra.mxu1 %v15163_v46  ;;  %v1510_v46 = vpack.c.bf16 %v904_v42, %v904_v42  ;;  %v905_v47 = vcombine.high %v903_v43, %v903_v43 }
  0xb6   :  { %13733 = vmatprep.subr.bf16.mxu1 %v15165_v48  ;;  %v15212_v48 = vld [vmem:[%s19675_s4 + $0x500] sm:$0xff]  }
  0xb8   :  { %13712 = vmatpush3.bf16.msra.mxu0 %v15166_v49  ;;  %v1511_v49 = vpack.c.bf16 %v903_v43, %v903_v43  ;;  %v15247_v43 = vld [vmem:[%s19675_s4 + $0x648] sm:$0xff]  }
  0xb9   :  { %13713 = vmatprep.subr.bf16.mxu0 %v15168_v51  ;;  %13734 = vmatpush3.bf16.msra.mxu1 %v15167_v50  ;;  %v15214_v50 = vld [vmem:[%s19675_s4 + $0x548] sm:$0xff]   ;;  %v1512_v51 = vpack.c.bf16 %v905_v47, %v905_v47 }
  0xba   :  { %13735 = vmatprep.subr.bf16.mxu1 %v15169_v52  ;;  %v15213_v52 = vld [vmem:[%s19675_s4 + $0x580] sm:$0xff]   ;;  %v15250_v47 = vld [vmem:[%s19675_s4 + $0x688] sm:$0xff]  }
  0xbc   :  { %13714 = vmatpush3.bf16.msra.mxu0 %v15170_v53  ;;  %v15215_v53 = vld [vmem:[%s19675_s4 + $0x5c8] sm:$0xff]  }
  0xbd   :  { %13715 = vmatprep.subr.bf16.mxu0 %v15172_v55  ;;  %13736 = vmatpush3.bf16.msra.mxu1 %v15171_v54  ;;  %v15216_v54 = vld [vmem:[%s19675_s4 + $0x508] sm:$0xff]   ;;  %v15218_v55 = vld [vmem:[%s19675_s4 + $0x550] sm:$0xff]  }
  0xbe   :  { %13737 = vmatprep.subr.bf16.mxu1 %v15173_v56  ;;  %v15217_v56 = vld [vmem:[%s19675_s4 + $0x588] sm:$0xff]  }
  0xc0   :  { %13716 = vmatpush3.bf16.msra.mxu0 %v15174_v57  ;;  %v15219_v57 = vld [vmem:[%s19675_s4 + $0x5d0] sm:$0xff]  }
  0xc1   :  { %13745 = vmatprep.subr.bf16.mxu0 %v15177_v62  ;;  %13738 = vmatpush3.bf16.msra.mxu1 %v15175_v59  ;;  %v15222_v59 = vld [vmem:[%s19675_s4 + $0x558] sm:$0xff]  }
  0xc2   :  { %13767 = vmatprep.subr.bf16.mxu1 %v15178_v1  ;;  %v15224_v62 = vld [vmem:[%s19675_s4 + $0x518] sm:$0xff]   ;;  %v15227_v1 = vld [vmem:[%s19675_s4 + $0x5e0] sm:$0xff]  }
  0xc3   :  { %10093 = vmatmul.mubr.bf16.vlgmr.msra.gmra.mrb[20].mxu0 %v1505_v2  ;;  %v15228_v2 = vld [vmem:[%s19675_s4 + $0x520] sm:$0xff]  }
  0xc4   :  { %13746 = vmatpush3.bf16.msra.mxu0 %v15179_v3  ;;  %10133 = vmatmul.mubr.bf16.vlgmr.msra.gmra.mrb[20].mxu1 %v1507_v7  ;;  %v15229_v3 = vld [vmem:[%s19675_s4 + $0x5a0] sm:$0xff]   ;;  %v15232_v7 = vld [vmem:[%s19675_s4 + $0x528] sm:$0xff]  }
  0xc5   :  { %13747 = vmatprep.subr.bf16.mxu0 %v15181_v8  ;;  %13768 = vmatpush3.bf16.msra.mxu1 %v15180_v6  ;;  %v12391_v6 = vld [vmem:[%s19677_s2] ss:$0 sm:$0xff] }
  0xc6   :  { %13769 = vmatprep.subr.bf16.mxu1 %v15182_v10  ;;  %10172 = vmatprep.mubr.bf16.mxu0 %v1510_v46  ;;  %v15249_v46 = vld [vmem:[%s19675_s4 + $0x608] sm:$0xff]  }
  0xc7   :  { %10212 = vmatprep.mubr.bf16.mxu1 %v1512_v51  ;;  %v15254_v51 = vld [vmem:[%s19675_s4 + $0x690] sm:$0xff]  }
  0xc8   :  { %13748 = vmatpush3.bf16.msra.mxu0 %v15183_v11  ;;  %v15234_v11 = vld [vmem:[%s19675_s4 + $0x570] sm:$0xff]  }
  0xc9   :  { %13749 = vmatprep.subr.bf16.mxu0 %v15185_v13  ;;  %13770 = vmatpush3.bf16.msra.mxu1 %v15184_v12 }
  0xca   :  { %13771 = vmatprep.subr.bf16.mxu1 %v15186_v14 }
  0xcc   :  { %13750 = vmatpush3.bf16.msra.mxu0 %v15187_v15  ;;  %v15235_v15 = vld [vmem:[%s19675_s4 + $0x5f0] sm:$0xff]  }
  0xcd   :  { %13751 = vmatprep.subr.bf16.mxu0 %v15189_v17  ;;  %13772 = vmatpush3.bf16.msra.mxu1 %v15188_v16  ;;  %v15236_v16 = vld [vmem:[%s19675_s4 + $0x530] sm:$0xff]  }
  0xce   :  { %13773 = vmatprep.subr.bf16.mxu1 %v15190_v18 }
  0xd0   :  { %13752 = vmatpush3.bf16.msra.mxu0 %v15191_v19 }
  0xd1   :  { %13753 = vmatprep.subr.bf16.mxu0 %v15193_v21  ;;  %13774 = vmatpush3.bf16.msra.mxu1 %v15192_v20 }
  0xd2   :  { %13775 = vmatprep.subr.bf16.mxu1 %v15194_v22  ;;  %v15237_v22 = vld [vmem:[%s19675_s4 + $0x5b0] sm:$0xff]  }
  0xd4   :  { %13754 = vmatpush3.bf16.msra.mxu0 %v15195_v23 }
  0xd5   :  { %13755 = vmatprep.subr.bf16.mxu0 %v15197_v25  ;;  %13776 = vmatpush3.bf16.msra.mxu1 %v15196_v24  ;;  %v15238_v24 = vld [vmem:[%s19675_s4 + $0x578] sm:$0xff]  }
  0xd6   :  { %13777 = vmatprep.subr.bf16.mxu1 %v15198_v26  ;;  %v15239_v26 = vld [vmem:[%s19675_s4 + $0x5f8] sm:$0xff]  }
  0xd8   :  { %13756 = vmatpush3.bf16.msra.mxu0 %v15199_v27  ;;  %v15240_v27 = vld [vmem:[%s19675_s4 + $0x538] sm:$0xff]  }
  0xd9   :  { %13757 = vmatprep.subr.bf16.mxu0 %v15201_v29  ;;  %13778 = vmatpush3.bf16.msra.mxu1 %v15200_v28  ;;  %v762_v28 = vld [vmem:[%s19676_s3 + $0x28] sm:$0xff] }
  0xda   :  { %13779 = vmatprep.subr.bf16.mxu1 %v15202_v30  ;;  %v913_v29 = vrot.slane %v762_v28, %v16228_v35  ;;  %v906_v30 = vcombine.high %v762_v28, %v762_v28  ;;  %v15278_v28 = vld [vmem:[%s19675_s4 + $0x700] sm:$0xff]  }
  0xdc   :  { %13758 = vmatpush3.bf16.msra.mxu0 %v15203_v31  ;;  %v15243_v31 = vld [vmem:[%s19675_s4 + $0x640] sm:$0xff]   ;;  %v1513_v37 = vpack.c.bf16 %v913_v29, %v913_v29 }
  0xdd   :  { %13759 = vmatprep.subr.bf16.mxu0 %v15205_v33  ;;  %13780 = vmatpush3.bf16.msra.mxu1 %v15204_v32  ;;  %v15241_v32 = vld [vmem:[%s19675_s4 + $0x5b8] sm:$0xff]   ;;  %v921_v33 = vcombine.high %v913_v29, %v913_v29 }
  0xde   :  { %13781 = vmatprep.subr.bf16.mxu1 %v15206_v34  ;;  %v920_v34 = vrot.slane %v906_v30, %v16228_v35 }
  0xdf   :  { %v1514_v39 = vpack.c.bf16 %v921_v33, %v921_v33  ;;  %v15280_v33 = vld [vmem:[%s19675_s4 + $0x748] sm:$0xff]  }
  0xe0   :  { %13760 = vmatpush3.bf16.msra.mxu0 %v15207_v36  ;;  %v15244_v36 = vld [vmem:[%s19675_s4 + $0x6c0] sm:$0xff]   ;;  %v1515_v42 = vpack.c.bf16 %v920_v34, %v920_v34 }
  0xe1   :  { %13789 = vmatprep.subr.bf16.mxu0 %v15210_v40  ;;  %13782 = vmatpush3.bf16.msra.mxu1 %v15208_v41  ;;  %v922_v40 = vcombine.high %v920_v34, %v920_v34  ;;  %v15246_v41 = vld [vmem:[%s19675_s4 + $0x680] sm:$0xff]  }
  0xe2   :  { %13811 = vmatprep.subr.bf16.mxu1 %v15211_v44 }
  0xe3   :  { %10173 = vmatmul.mubr.bf16.vlgmr.msra.gmra.mrb[24].mxu0 %v1509_v45  ;;  %v1516_v44 = vpack.c.bf16 %v922_v40, %v922_v40  ;;  %v15248_v45 = vld [vmem:[%s19675_s4 + $0x6c8] sm:$0xff]   ;;  %v15285_v40 = vld [vmem:[%s19675_s4 + $0x7d0] sm:$0xff]  }
  0xe4   :  { %13790 = vmatpush3.bf16.msra.mxu0 %v15212_v48  ;;  %10213 = vmatmul.mubr.bf16.vlgmr.msra.gmra.mrb[24].mxu1 %v1511_v49  ;;  %v15251_v48 = vld [vmem:[%s19675_s4 + $0x650] sm:$0xff]  }
  0xe5   :  { %13791 = vmatprep.subr.bf16.mxu0 %v15214_v50  ;;  %13812 = vmatpush3.bf16.msra.mxu1 %v15213_v52  ;;  %v15252_v49 = vld [vmem:[%s19675_s4 + $0x6d0] sm:$0xff]   ;;  %v15255_v52 = vld [vmem:[%s19675_s4 + $0x658] sm:$0xff]  }
  0xe6   :  { %13813 = vmatprep.subr.bf16.mxu1 %v15215_v53  ;;  %10252 = vmatprep.mubr.bf16.mxu0 %v1514_v39  ;;  %v15253_v50 = vld [vmem:[%s19675_s4 + $0x610] sm:$0xff]   ;;  %v15256_v53 = vld [vmem:[%s19675_s4 + $0x6d8] sm:$0xff]  }
  0xe7   :  { %10292 = vmatprep.mubr.bf16.mxu1 %v1516_v44  ;;  %v15284_v39 = vld [vmem:[%s19675_s4 + $0x750] sm:$0xff]   ;;  %v15289_v44 = vld [vmem:[%s19675_s4 + $0x7d8] sm:$0xff]  }
  0xe8   :  { %13792 = vmatpush3.bf16.msra.mxu0 %v15216_v54  ;;  %v15257_v54 = vld [vmem:[%s19675_s4 + $0x618] sm:$0xff]  }
  0xe9   :  { %13793 = vmatprep.subr.bf16.mxu0 %v15218_v55  ;;  %13814 = vmatpush3.bf16.msra.mxu1 %v15217_v56  ;;  %v15258_v55 = vld [vmem:[%s19675_s4 + $0x698] sm:$0xff]   ;;  %v15259_v56 = vld [vmem:[%s19675_s4 + $0x660] sm:$0xff]  }
  0xea   :  { %13815 = vmatprep.subr.bf16.mxu1 %v15219_v57  ;;  %v15260_v57 = vld [vmem:[%s19675_s4 + $0x6e0] sm:$0xff]  }
  0xec   :  { %13794 = vmatpush3.bf16.msra.mxu0 %v15220_v58  ;;  %v15261_v58 = vld [vmem:[%s19675_s4 + $0x620] sm:$0xff]  }
  0xed   :  { %13795 = vmatprep.subr.bf16.mxu0 %v15222_v59  ;;  %13816 = vmatpush3.bf16.msra.mxu1 %v15221_v60  ;;  %v15262_v59 = vld [vmem:[%s19675_s4 + $0x6a0] sm:$0xff]   ;;  %v15263_v60 = vld [vmem:[%s19675_s4 + $0x668] sm:$0xff]  }
  0xee   :  { %13817 = vmatprep.subr.bf16.mxu1 %v15223_v61  ;;  %v15264_v61 = vld [vmem:[%s19675_s4 + $0x6e8] sm:$0xff]  }
  0xf0   :  { %13796 = vmatpush3.bf16.msra.mxu0 %v15224_v62 }
  0xf1   :  { %13797 = vmatprep.subr.bf16.mxu0 %v15226_v63  ;;  %13818 = vmatpush3.bf16.msra.mxu1 %v15225_v0  ;;  %v15265_v63 = vld [vmem:[%s19675_s4 + $0x628] sm:$0xff]  }
  0xf2   :  { %13819 = vmatprep.subr.bf16.mxu1 %v15227_v1  ;;  %v15266_v1 = vld [vmem:[%s19675_s4 + $0x6a8] sm:$0xff]  }
  0xf4   :  { %13798 = vmatpush3.bf16.msra.mxu0 %v15228_v2 }
  0xf5   :  { %13799 = vmatprep.subr.bf16.mxu0 %v15230_v4  ;;  %13820 = vmatpush3.bf16.msra.mxu1 %v15229_v3 }
  0xf6   :  { %v13497_v8 = vpop.f32.mrb[0].mxu0  ;;  %13821 = vmatprep.subr.bf16.mxu1 %v15231_v5  ;;  %v15267_v5 = vld [vmem:[%s19675_s4 + $0x670] sm:$0xff]  }
  0xf7   :  { %v13498_v10 = vpop.f32.mrb[1].mxu0  ;;  %v13519_v12 = vpop.f32.mrb[0].mxu1 }
  0xf8   :  { %v13499_v13 = vadd.f32 %v13498_v10, %v13497_v8  ;;  %v13500_v14 = vpop.f32.mrb[2].mxu0  ;;  %v13520_v17 = vpop.f32.mrb[1].mxu1  ;;  %13800 = vmatpush3.bf16.msra.mxu0 %v15232_v7 }
  0xf9   :  { %v13501_v18 = vpop.f32.mrb[3].mxu0  ;;  %v13521_v20 = vadd.f32 %v13520_v17, %v13519_v12  ;;  %v13522_v21 = vpop.f32.mrb[2].mxu1  ;;  %13801 = vmatprep.subr.bf16.mxu0 %v15234_v11  ;;  %13822 = vmatpush3.bf16.msra.mxu1 %v15233_v9  ;;  %v15269_v12 = vld [vmem:[%s19675_s4 + $0x630] sm:$0xff]   ;;  %v15272_v17 = vld [vmem:[%s19675_s4 + $0x6f8] sm:$0xff]  }
  0xfa   :  { %v632_v19 = vadd.f32 %v13499_v13, %v12391_v6  ;;  %v13523_v23 = vpop.f32.mrb[3].mxu1  ;;  %13823 = vmatprep.subr.bf16.mxu1 %v15235_v15  ;;  %v15268_v6 = vld [vmem:[%s19675_s4 + $0x6f0] sm:$0xff]   ;;  %v15273_v18 = vld [vmem:[%s19675_s4 + $0x638] sm:$0xff]  }
  0xfb   :  { %v15270_v14 = vld [vmem:[%s19675_s4 + $0x6b0] sm:$0xff]   ;;  %v15276_v23 = vld [vmem:[%s19675_s4 + $0x740] sm:$0xff]  }
  0xfc   :  { %v16949_v25 = vadd.f32 %v13521_v20, %v632_v19  ;;  %13802 = vmatpush3.bf16.msra.mxu0 %v15236_v16  ;;  %v15271_v16 = vld [vmem:[%s19675_s4 + $0x678] sm:$0xff]   ;;  %v763_v19 = vld [vmem:[%s19676_s3 + $0x30] sm:$0xff] }
  0xfd   :  { %13803 = vmatprep.subr.bf16.mxu0 %v15238_v24  ;;  %13824 = vmatpush3.bf16.msra.mxu1 %v15237_v22  ;;  %v15274_v20 = vld [vmem:[%s19675_s4 + $0x6b8] sm:$0xff]   ;;  %v930_v21 = vrot.slane %v763_v19, %v16228_v35  ;;  %v923_v22 = vcombine.high %v763_v19, %v763_v19  ;;  %v15310_v19 = vld [vmem:[%s19675_s4 + $0x8c0] sm:$0xff]  }
  0xfe   :  { %13825 = vmatprep.subr.bf16.mxu1 %v15239_v26  ;;  %v15277_v26 = vld [vmem:[%s19675_s4 + $0x7c0] sm:$0xff]  }
  0xff   :  { %v938_v24 = vcombine.high %v930_v21, %v930_v21 }
 0x100   :  { %13804 = vmatpush3.bf16.msra.mxu0 %v15240_v27  ;;  %v1517_v27 = vpack.c.bf16 %v930_v21, %v930_v21  ;;  %v15311_v21 = vld [vmem:[%s19675_s4 + $0x800] sm:$0xff]  }
 0x101   :  { %13833 = vmatprep.subr.bf16.mxu0 %v15243_v31  ;;  %13826 = vmatpush3.bf16.msra.mxu1 %v15241_v32  ;;  %v1518_v29 = vpack.c.bf16 %v938_v24, %v938_v24  ;;  %v15279_v31 = vld [vmem:[%s19675_s4 + $0x780] sm:$0xff]  }
 0x102   :  { %13855 = vmatprep.subr.bf16.mxu1 %v15244_v36  ;;  %v15281_v36 = vld [vmem:[%s19675_s4 + $0x7c8] sm:$0xff]   ;;  %v15312_v24 = vld [vmem:[%s19675_s4 + $0x880] sm:$0xff]  }
 0x103   :  { %10253 = vmatmul.mubr.bf16.vlgmr.msra.gmra.mrb[28].mxu0 %v1513_v37  ;;  %v15282_v37 = vld [vmem:[%s19675_s4 + $0x708] sm:$0xff]  }
 0x104   :  { %13834 = vmatpush3.bf16.msra.mxu0 %v15245_v38  ;;  %10293 = vmatmul.mubr.bf16.vlgmr.msra.gmra.mrb[28].mxu1 %v1515_v42  ;;  %v15283_v38 = vld [vmem:[%s19675_s4 + $0x788] sm:$0xff]   ;;  %v15287_v42 = vld [vmem:[%s19675_s4 + $0x790] sm:$0xff]  }
 0x105   :  { %13835 = vmatprep.subr.bf16.mxu0 %v15247_v43  ;;  %13856 = vmatpush3.bf16.msra.mxu1 %v15246_v41  ;;  %v15286_v41 = vld [vmem:[%s19675_s4 + $0x710] sm:$0xff]   ;;  %v15288_v43 = vld [vmem:[%s19675_s4 + $0x758] sm:$0xff]  }
 0x106   :  { %13857 = vmatprep.subr.bf16.mxu1 %v15248_v45  ;;  %10332 = vmatprep.mubr.bf16.mxu0 %v1518_v29  ;;  %v15290_v45 = vld [vmem:[%s19675_s4 + $0x718] sm:$0xff]   ;;  %v15315_v29 = vld [vmem:[%s19675_s4 + $0x808] sm:$0xff]  }
 0x108   :  { %13836 = vmatpush3.bf16.msra.mxu0 %v15249_v46  ;;  %v15291_v46 = vld [vmem:[%s19675_s4 + $0x798] sm:$0xff]  }
 0x109   :  { %13837 = vmatprep.subr.bf16.mxu0 %v15251_v48  ;;  %13858 = vmatpush3.bf16.msra.mxu1 %v15250_v47  ;;  %v15292_v47 = vld [vmem:[%s19675_s4 + $0x760] sm:$0xff]  }
 0x10a   :  { %13859 = vmatprep.subr.bf16.mxu1 %v15252_v49  ;;  %v15293_v48 = vld [vmem:[%s19675_s4 + $0x7e0] sm:$0xff]  }
 0x10b   :  { %v15294_v49 = vld [vmem:[%s19675_s4 + $0x720] sm:$0xff]  }
 0x10c   :  { %13838 = vmatpush3.bf16.msra.mxu0 %v15253_v50  ;;  %v15295_v50 = vld [vmem:[%s19675_s4 + $0x7a0] sm:$0xff]  }
 0x10d   :  { %13839 = vmatprep.subr.bf16.mxu0 %v15255_v52  ;;  %13860 = vmatpush3.bf16.msra.mxu1 %v15254_v51  ;;  %v15296_v51 = vld [vmem:[%s19675_s4 + $0x768] sm:$0xff]   ;;  %v12456_v52 = vld [vmem:[%s19678_s5] ss:$0 sm:$0xff] }
 0x10e   :  { %13861 = vmatprep.subr.bf16.mxu1 %v15256_v53 }
 0x110   :  { %13840 = vmatpush3.bf16.msra.mxu0 %v15257_v54  ;;  %v15297_v54 = vld [vmem:[%s19675_s4 + $0x7e8] sm:$0xff]  }
 0x111   :  { %13841 = vmatprep.subr.bf16.mxu0 %v15259_v56  ;;  %13862 = vmatpush3.bf16.msra.mxu1 %v15258_v55  ;;  %v15298_v56 = vld [vmem:[%s19675_s4 + $0x728] sm:$0xff]  }
 0x112   :  { %13863 = vmatprep.subr.bf16.mxu1 %v15260_v57 }
 0x114   :  { %13842 = vmatpush3.bf16.msra.mxu0 %v15261_v58 }
 0x115   :  { %13843 = vmatprep.subr.bf16.mxu0 %v15263_v60  ;;  %13864 = vmatpush3.bf16.msra.mxu1 %v15262_v59  ;;  %v15299_v60 = vld [vmem:[%s19675_s4 + $0x7a8] sm:$0xff]  }
 0x116   :  { %v13541_v62 = vpop.f32.mrb[4].mxu0  ;;  %13865 = vmatprep.subr.bf16.mxu1 %v15264_v61  ;;  %v15300_v61 = vld [vmem:[%s19675_s4 + $0x770] sm:$0xff]  }
 0x117   :  { %v13542_v0 = vpop.f32.mrb[5].mxu0  ;;  %v13563_v2 = vpop.f32.mrb[4].mxu1 }
 0x118   :  { %v13543_v3 = vadd.f32 %v13542_v0, %v13541_v62  ;;  %v13544_v4 = vpop.f32.mrb[6].mxu0  ;;  %v13564_v7 = vpop.f32.mrb[5].mxu1  ;;  %13844 = vmatpush3.bf16.msra.mxu0 %v15265_v63 }
 0x119   :  { %v13545_v8 = vpop.f32.mrb[7].mxu0  ;;  %v13565_v10 = vadd.f32 %v13564_v7, %v13563_v2  ;;  %v13566_v11 = vpop.f32.mrb[6].mxu1  ;;  %13845 = vmatprep.subr.bf16.mxu0 %v15267_v5  ;;  %13866 = vmatpush3.bf16.msra.mxu1 %v15266_v1  ;;  %v15302_v5 = vld [vmem:[%s19675_s4 + $0x730] sm:$0xff]   ;;  %v15304_v7 = vld [vmem:[%s19675_s4 + $0x778] sm:$0xff]  }
 0x11a   :  { %v712_v9 = vadd.f32 %v13543_v3, %v16949_v25  ;;  %v13567_v13 = vpop.f32.mrb[7].mxu1  ;;  %13867 = vmatprep.subr.bf16.mxu1 %v15268_v6  ;;  %v937_v25 = vrot.slane %v923_v22, %v16228_v35  ;;  %v15301_v3 = vld [vmem:[%s19675_s4 + $0x7f0] sm:$0xff]   ;;  %v764_v11 = vld [vmem:[%s19676_s3 + $0x38] sm:$0xff] }
 0x11b   :  { %v15303_v8 = vld [vmem:[%s19675_s4 + $0x7b0] sm:$0xff]   ;;  %v940_v13 = vcombine.high %v764_v11, %v764_v11 }
 0x11c   :  { %v17050_v15 = vadd.f32 %v13565_v10, %v712_v9  ;;  %13846 = vmatpush3.bf16.msra.mxu0 %v15269_v12  ;;  %v939_v30 = vcombine.high %v937_v25, %v937_v25  ;;  %v1519_v32 = vpack.c.bf16 %v937_v25, %v937_v25  ;;  %v15305_v9 = vld [vmem:[%s19675_s4 + $0x7f8] sm:$0xff]   ;;  %v947_v12 = vrot.slane %v764_v11, %v16228_v35 }
 0x11d   :  { %13847 = vmatprep.subr.bf16.mxu0 %v15271_v16  ;;  %13868 = vmatpush3.bf16.msra.mxu1 %v15270_v14  ;;  %v15306_v10 = vld [vmem:[%s19675_s4 + $0x738] sm:$0xff]   ;;  %v15309_v14 = vld [vmem:[%s19675_s4 + $0x840] sm:$0xff]  }
 0x11e   :  { %13869 = vmatprep.subr.bf16.mxu1 %v15272_v17  ;;  %v1520_v34 = vpack.c.bf16 %v939_v30, %v939_v30  ;;  %v15307_v16 = vld [vmem:[%s19675_s4 + $0x7b8] sm:$0xff]   ;;  %v955_v17 = vcombine.high %v947_v12, %v947_v12  ;;  %v15316_v30 = vld [vmem:[%s19675_s4 + $0x888] sm:$0xff]  }
 0x120   :  { %13848 = vmatpush3.bf16.msra.mxu0 %v15273_v18  ;;  %10372 = vmatprep.mubr.bf16.mxu1 %v1520_v34  ;;  %v954_v18 = vrot.slane %v940_v13, %v16228_v35  ;;  %v1522_v22 = vpack.c.bf16 %v955_v17, %v955_v17  ;;  %v15320_v34 = vld [vmem:[%s19675_s4 + $0x890] sm:$0xff]  }
 0x121   :  { %13877 = vmatprep.subr.bf16.mxu0 %v15276_v23  ;;  %13870 = vmatpush3.bf16.msra.mxu1 %v15274_v20  ;;  %v1521_v20 = vpack.c.bf16 %v947_v12, %v947_v12  ;;  %v15344_v12 = vld [vmem:[%s19675_s4 + $0x900] sm:$0xff]  }
 0x122   :  { %13899 = vmatprep.subr.bf16.mxu1 %v15277_v26  ;;  %v956_v23 = vcombine.high %v954_v18, %v954_v18  ;;  %v1523_v25 = vpack.c.bf16 %v954_v18, %v954_v18  ;;  %v15313_v26 = vld [vmem:[%s19675_s4 + $0x848] sm:$0xff]  }
 0x123   :  { %10333 = vmatmul.mubr.bf16.vlgmr.msra.gmra.mrb[32].mxu0 %v1517_v27  ;;  %v15346_v18 = vld [vmem:[%s19675_s4 + $0x948] sm:$0xff]  }
 0x124   :  { %13878 = vmatpush3.bf16.msra.mxu0 %v15278_v28  ;;  %10373 = vmatmul.mubr.bf16.vlgmr.msra.gmra.mrb[32].mxu1 %v1519_v32  ;;  %v1524_v27 = vpack.c.bf16 %v956_v23, %v956_v23  ;;  %v15314_v28 = vld [vmem:[%s19675_s4 + $0x8c8] sm:$0xff]   ;;  %v15318_v32 = vld [vmem:[%s19675_s4 + $0x8d0] sm:$0xff]  }
 0x125   :  { %13879 = vmatprep.subr.bf16.mxu0 %v15280_v33  ;;  %13900 = vmatpush3.bf16.msra.mxu1 %v15279_v31  ;;  %v15317_v31 = vld [vmem:[%s19675_s4 + $0x850] sm:$0xff]  }
 0x126   :  { %13901 = vmatprep.subr.bf16.mxu1 %v15281_v36  ;;  %10412 = vmatprep.mubr.bf16.mxu0 %v1522_v22  ;;  %v15319_v33 = vld [vmem:[%s19675_s4 + $0x810] sm:$0xff]   ;;  %v15321_v36 = vld [vmem:[%s19675_s4 + $0x858] sm:$0xff]   ;;  %v15349_v22 = vld [vmem:[%s19675_s4 + $0x988] sm:$0xff]  }
 0x127   :  { %10452 = vmatprep.mubr.bf16.mxu1 %v1524_v27  ;;  %v15350_v23 = vld [vmem:[%s19675_s4 + $0x950] sm:$0xff]   ;;  %v15354_v27 = vld [vmem:[%s19675_s4 + $0x958] sm:$0xff]  }
 0x128   :  { %13880 = vmatpush3.bf16.msra.mxu0 %v15282_v37  ;;  %v15322_v37 = vld [vmem:[%s19675_s4 + $0x8d8] sm:$0xff]  }
 0x129   :  { %13881 = vmatprep.subr.bf16.mxu0 %v15284_v39  ;;  %13902 = vmatpush3.bf16.msra.mxu1 %v15283_v38  ;;  %v15323_v38 = vld [vmem:[%s19675_s4 + $0x818] sm:$0xff]  }
 0x12a   :  { %13903 = vmatprep.subr.bf16.mxu1 %v15285_v40  ;;  %v15324_v39 = vld [vmem:[%s19675_s4 + $0x898] sm:$0xff]   ;;  %v15325_v40 = vld [vmem:[%s19675_s4 + $0x860] sm:$0xff]  }
 0x12c   :  { %13882 = vmatpush3.bf16.msra.mxu0 %v15286_v41  ;;  %v15326_v41 = vld [vmem:[%s19675_s4 + $0x8e0] sm:$0xff]  }
 0x12d   :  { %13883 = vmatprep.subr.bf16.mxu0 %v15288_v43  ;;  %13904 = vmatpush3.bf16.msra.mxu1 %v15287_v42  ;;  %v15327_v42 = vld [vmem:[%s19675_s4 + $0x820] sm:$0xff]  }
 0x12e   :  { %13905 = vmatprep.subr.bf16.mxu1 %v15289_v44  ;;  %v15328_v43 = vld [vmem:[%s19675_s4 + $0x8a0] sm:$0xff]   ;;  %v15329_v44 = vld [vmem:[%s19675_s4 + $0x868] sm:$0xff]  }
 0x130   :  { %13884 = vmatpush3.bf16.msra.mxu0 %v15290_v45  ;;  %v15330_v45 = vld [vmem:[%s19675_s4 + $0x8e8] sm:$0xff]  }
 0x131   :  { %13885 = vmatprep.subr.bf16.mxu0 %v15292_v47  ;;  %13906 = vmatpush3.bf16.msra.mxu1 %v15291_v46  ;;  %v15331_v47 = vld [vmem:[%s19675_s4 + $0x828] sm:$0xff]  }
 0x132   :  { %13907 = vmatprep.subr.bf16.mxu1 %v15293_v48 }
 0x134   :  { %13886 = vmatpush3.bf16.msra.mxu0 %v15294_v49  ;;  %v15333_v49 = vld [vmem:[%s19675_s4 + $0x870] sm:$0xff]  }
 0x135   :  { %13887 = vmatprep.subr.bf16.mxu0 %v15296_v51  ;;  %13908 = vmatpush3.bf16.msra.mxu1 %v15295_v50 }
 0x136   :  { %v13585_v53 = vpop.f32.mrb[8].mxu0  ;;  %13909 = vmatprep.subr.bf16.mxu1 %v15297_v54  ;;  %v15332_v54 = vld [vmem:[%s19675_s4 + $0x8a8] sm:$0xff]  }
 0x137   :  { %v13586_v55 = vpop.f32.mrb[9].mxu0  ;;  %v13607_v57 = vpop.f32.mrb[8].mxu1 }
 0x138   :  { %v13587_v58 = vadd.f32 %v13586_v55, %v13585_v53  ;;  %v13588_v59 = vpop.f32.mrb[10].mxu0  ;;  %v13608_v62 = vpop.f32.mrb[9].mxu1  ;;  %13888 = vmatpush3.bf16.msra.mxu0 %v15298_v56  ;;  %v15334_v56 = vld [vmem:[%s19675_s4 + $0x8f0] sm:$0xff]  }
 0x139   :  { %v13589_v63 = vpop.f32.mrb[11].mxu0  ;;  %v13609_v1 = vadd.f32 %v13608_v62, %v13607_v57  ;;  %v13610_v2 = vpop.f32.mrb[10].mxu1  ;;  %13889 = vmatprep.subr.bf16.mxu0 %v15300_v61  ;;  %13910 = vmatpush3.bf16.msra.mxu1 %v15299_v60  ;;  %v15335_v60 = vld [vmem:[%s19675_s4 + $0x830] sm:$0xff]   ;;  %v15337_v62 = vld [vmem:[%s19675_s4 + $0x878] sm:$0xff]  }
 0x13a   :  { %v9855_v0 = vadd.f32 %v13587_v58, %v12456_v52  ;;  %v13611_v4 = vpop.f32.mrb[11].mxu1  ;;  %13911 = vmatprep.subr.bf16.mxu1 %v15301_v3  ;;  %v15339_v2 = vld [vmem:[%s19675_s4 + $0x838] sm:$0xff]   ;;  %v765_v3 = vld [vmem:[%s19676_s3 + $0x40] sm:$0xff] }
 0x13b   :  { %v964_v4 = vrot.slane %v765_v3, %v16228_v35 }
 0x13c   :  { %v17153_v6 = vadd.f32 %v13609_v1, %v9855_v0  ;;  %13890 = vmatpush3.bf16.msra.mxu0 %v15302_v5  ;;  %v15336_v0 = vld [vmem:[%s19675_s4 + $0x8b0] sm:$0xff]   ;;  %v15338_v1 = vld [vmem:[%s19675_s4 + $0x8f8] sm:$0xff]   ;;  %v957_v5 = vcombine.high %v765_v3, %v765_v3 }
 0x13d   :  { %13891 = vmatprep.subr.bf16.mxu0 %v15304_v7  ;;  %13912 = vmatpush3.bf16.msra.mxu1 %v15303_v8  ;;  %v15340_v7 = vld [vmem:[%s19675_s4 + $0x8b8] sm:$0xff]   ;;  %v972_v8 = vcombine.high %v964_v4, %v964_v4  ;;  %v1525_v11 = vpack.c.bf16 %v964_v4, %v964_v4 }
 0x13e   :  { %13913 = vmatprep.subr.bf16.mxu1 %v15305_v9  ;;  %v971_v9 = vrot.slane %v957_v5, %v16228_v35 }
 0x13f   :  { %v1526_v13 = vpack.c.bf16 %v972_v8, %v972_v8  ;;  %v15379_v8 = vld [vmem:[%s19675_s4 + $0xa48] sm:$0xff]  }
 0x140   :  { %13892 = vmatpush3.bf16.msra.mxu0 %v15306_v10  ;;  %v15343_v10 = vld [vmem:[%s19675_s4 + $0x9c0] sm:$0xff]   ;;  %v1527_v17 = vpack.c.bf16 %v971_v9, %v971_v9 }
 0x141   :  { %13921 = vmatprep.subr.bf16.mxu0 %v15309_v14  ;;  %13914 = vmatpush3.bf16.msra.mxu1 %v15307_v16  ;;  %v973_v14 = vcombine.high %v971_v9, %v971_v9  ;;  %v15345_v16 = vld [vmem:[%s19675_s4 + $0x980] sm:$0xff]  }
 0x142   :  { %13943 = vmatprep.subr.bf16.mxu1 %v15310_v19 }
 0x143   :  { %10413 = vmatmul.mubr.bf16.vlgmr.msra.gmra.mrb[36].mxu0 %v1521_v20  ;;  %v1528_v19 = vpack.c.bf16 %v973_v14, %v973_v14  ;;  %v15347_v20 = vld [vmem:[%s19675_s4 + $0x9c8] sm:$0xff]  }
 0x144   :  { %13922 = vmatpush3.bf16.msra.mxu0 %v15311_v21  ;;  %10453 = vmatmul.mubr.bf16.vlgmr.msra.gmra.mrb[36].mxu1 %v1523_v25  ;;  %v15348_v21 = vld [vmem:[%s19675_s4 + $0x908] sm:$0xff]   ;;  %v15352_v25 = vld [vmem:[%s19675_s4 + $0x910] sm:$0xff]  }
 0x145   :  { %13923 = vmatprep.subr.bf16.mxu0 %v15313_v26  ;;  %13944 = vmatpush3.bf16.msra.mxu1 %v15312_v24  ;;  %v15351_v24 = vld [vmem:[%s19675_s4 + $0x9d0] sm:$0xff]   ;;  %v15382_v14 = vld [vmem:[%s19675_s4 + $0xa88] sm:$0xff]  }
 0x146   :  { %13945 = vmatprep.subr.bf16.mxu1 %v15314_v28  ;;  %10492 = vmatprep.mubr.bf16.mxu0 %v1526_v13  ;;  %v15353_v26 = vld [vmem:[%s19675_s4 + $0x990] sm:$0xff]   ;;  %v15355_v28 = vld [vmem:[%s19675_s4 + $0x9d8] sm:$0xff]  }
 0x147   :  { %10532 = vmatprep.mubr.bf16.mxu1 %v1528_v19  ;;  %v15383_v13 = vld [vmem:[%s19675_s4 + $0xa50] sm:$0xff]  }
 0x148   :  { %13924 = vmatpush3.bf16.msra.mxu0 %v15315_v29  ;;  %v15356_v29 = vld [vmem:[%s19675_s4 + $0x918] sm:$0xff]   ;;  %v15386_v19 = vld [vmem:[%s19675_s4 + $0xa90] sm:$0xff]  }
 0x149   :  { %13925 = vmatprep.subr.bf16.mxu0 %v15317_v31  ;;  %13946 = vmatpush3.bf16.msra.mxu1 %v15316_v30  ;;  %v15357_v30 = vld [vmem:[%s19675_s4 + $0x998] sm:$0xff]   ;;  %v15358_v31 = vld [vmem:[%s19675_s4 + $0x960] sm:$0xff]  }
 0x14a   :  { %13947 = vmatprep.subr.bf16.mxu1 %v15318_v32  ;;  %v15359_v32 = vld [vmem:[%s19675_s4 + $0x9e0] sm:$0xff]  }
 0x14c   :  { %13926 = vmatpush3.bf16.msra.mxu0 %v15319_v33  ;;  %v15360_v33 = vld [vmem:[%s19675_s4 + $0x920] sm:$0xff]  }
 0x14d   :  { %13927 = vmatprep.subr.bf16.mxu0 %v15321_v36  ;;  %13948 = vmatpush3.bf16.msra.mxu1 %v15320_v34  ;;  %v15361_v34 = vld [vmem:[%s19675_s4 + $0x9a0] sm:$0xff]   ;;  %v15362_v36 = vld [vmem:[%s19675_s4 + $0x968] sm:$0xff]  }
 0x14e   :  { %13949 = vmatprep.subr.bf16.mxu1 %v15322_v37 }
 0x150   :  { %13928 = vmatpush3.bf16.msra.mxu0 %v15323_v38  ;;  %v15363_v38 = vld [vmem:[%s19675_s4 + $0x9e8] sm:$0xff]  }
 0x151   :  { %13929 = vmatprep.subr.bf16.mxu0 %v15325_v40  ;;  %13950 = vmatpush3.bf16.msra.mxu1 %v15324_v39  ;;  %v15364_v40 = vld [vmem:[%s19675_s4 + $0x928] sm:$0xff]  }
 0x152   :  { %13951 = vmatprep.subr.bf16.mxu1 %v15326_v41 }
 0x154   :  { %13930 = vmatpush3.bf16.msra.mxu0 %v15327_v42 }
 0x155   :  { %13931 = vmatprep.subr.bf16.mxu0 %v15329_v44  ;;  %13952 = vmatpush3.bf16.msra.mxu1 %v15328_v43  ;;  %v15365_v44 = vld [vmem:[%s19675_s4 + $0x9a8] sm:$0xff]  }
 0x156   :  { %v13629_v46 = vpop.f32.mrb[12].mxu0  ;;  %13953 = vmatprep.subr.bf16.mxu1 %v15330_v45  ;;  %v15366_v45 = vld [vmem:[%s19675_s4 + $0x970] sm:$0xff]  }
 0x157   :  { %v13630_v48 = vpop.f32.mrb[13].mxu0  ;;  %v13651_v50 = vpop.f32.mrb[12].mxu1 }
 0x158   :  { %v13631_v51 = vadd.f32 %v13630_v48, %v13629_v46  ;;  %v13632_v52 = vpop.f32.mrb[14].mxu0  ;;  %v13652_v53 = vpop.f32.mrb[13].mxu1  ;;  %13932 = vmatpush3.bf16.msra.mxu0 %v15331_v47 }
 0x159   :  { %v13633_v55 = vpop.f32.mrb[15].mxu0  ;;  %v13653_v58 = vadd.f32 %v13652_v53, %v13651_v50  ;;  %v13654_v59 = vpop.f32.mrb[14].mxu1  ;;  %13933 = vmatprep.subr.bf16.mxu0 %v15333_v49  ;;  %13954 = vmatpush3.bf16.msra.mxu1 %v15332_v54  ;;  %v15368_v53 = vld [vmem:[%s19675_s4 + $0x930] sm:$0xff]  }
 0x15a   :  { %v9935_v57 = vadd.f32 %v13631_v51, %v17153_v6  ;;  %v13655_v61 = vpop.f32.mrb[15].mxu1  ;;  %13955 = vmatprep.subr.bf16.mxu1 %v15334_v56  ;;  %v15342_v6 = vld [vmem:[%s19675_s4 + $0x940] sm:$0xff]   ;;  %v15367_v51 = vld [vmem:[%s19675_s4 + $0x9f0] sm:$0xff]   ;;  %v15370_v56 = vld [vmem:[%s19675_s4 + $0x978] sm:$0xff]  }
 0x15b   :  { %v15369_v55 = vld [vmem:[%s19675_s4 + $0x9b0] sm:$0xff]   ;;  %v766_v59 = vld [vmem:[%s19676_s3 + $0x48] sm:$0xff] }
 0x15c   :  { %v17260_v63 = vadd.f32 %v13653_v58, %v9935_v57  ;;  %13934 = vmatpush3.bf16.msra.mxu0 %v15335_v60  ;;  %v15371_v57 = vld [vmem:[%s19675_s4 + $0x9f8] sm:$0xff]   ;;  %v981_v60 = vrot.slane %v766_v59, %v16228_v35  ;;  %v974_v61 = vcombine.high %v766_v59, %v766_v59 }
 0x15d   :  { %13935 = vmatprep.subr.bf16.mxu0 %v15337_v62  ;;  %13956 = vmatpush3.bf16.msra.mxu1 %v15336_v0  ;;  %v15372_v58 = vld [vmem:[%s19675_s4 + $0x938] sm:$0xff]   ;;  %v15375_v62 = vld [vmem:[%s19675_s4 + $0xa40] sm:$0xff]  }
 0x15e   :  { %13957 = vmatprep.subr.bf16.mxu1 %v15338_v1  ;;  %v989_v0 = vcombine.high %v981_v60, %v981_v60  ;;  %v988_v1 = vrot.slane %v974_v61, %v16228_v35  ;;  %v1529_v3 = vpack.c.bf16 %v981_v60, %v981_v60  ;;  %v15410_v60 = vld [vmem:[%s19675_s4 + $0xb00] sm:$0xff]  }
 0x160   :  { %13936 = vmatpush3.bf16.msra.mxu0 %v15339_v2  ;;  %v15376_v2 = vld [vmem:[%s19675_s4 + $0xac0] sm:$0xff]   ;;  %v1530_v4 = vpack.c.bf16 %v989_v0, %v989_v0  ;;  %v990_v5 = vcombine.high %v988_v1, %v988_v1 }
 0x161   :  { %13965 = vmatprep.subr.bf16.mxu0 %v15342_v6  ;;  %13958 = vmatpush3.bf16.msra.mxu1 %v15340_v7  ;;  %v15377_v6 = vld [vmem:[%s19675_s4 + $0xa00] sm:$0xff]   ;;  %v1531_v7 = vpack.c.bf16 %v988_v1, %v988_v1  ;;  %v15412_v1 = vld [vmem:[%s19675_s4 + $0xb48] sm:$0xff]  }
 0x162   :  { %13987 = vmatprep.subr.bf16.mxu1 %v15343_v10  ;;  %v1532_v9 = vpack.c.bf16 %v990_v5, %v990_v5  ;;  %v15378_v10 = vld [vmem:[%s19675_s4 + $0xa80] sm:$0xff]   ;;  %v15415_v5 = vld [vmem:[%s19675_s4 + $0xb88] sm:$0xff]  }
 0x163   :  { %10493 = vmatmul.mubr.bf16.vlgmr.msra.gmra.mrb[40].mxu0 %v1525_v11  ;;  %v15380_v11 = vld [vmem:[%s19675_s4 + $0xac8] sm:$0xff]  }
 0x164   :  { %13966 = vmatpush3.bf16.msra.mxu0 %v15344_v12  ;;  %10533 = vmatmul.mubr.bf16.vlgmr.msra.gmra.mrb[40].mxu1 %v1527_v17  ;;  %v15381_v12 = vld [vmem:[%s19675_s4 + $0xa08] sm:$0xff]   ;;  %v15385_v17 = vld [vmem:[%s19675_s4 + $0xa10] sm:$0xff]  }
 0x165   :  { %13967 = vmatprep.subr.bf16.mxu0 %v15346_v18  ;;  %13988 = vmatpush3.bf16.msra.mxu1 %v15345_v16  ;;  %v15384_v16 = vld [vmem:[%s19675_s4 + $0xad0] sm:$0xff]   ;;  %v15387_v18 = vld [vmem:[%s19675_s4 + $0xa58] sm:$0xff]  }
 0x166   :  { %13989 = vmatprep.subr.bf16.mxu1 %v15347_v20  ;;  %10572 = vmatprep.mubr.bf16.mxu0 %v1530_v4  ;;  %v15388_v20 = vld [vmem:[%s19675_s4 + $0xad8] sm:$0xff]   ;;  %v15414_v4 = vld [vmem:[%s19675_s4 + $0xb08] sm:$0xff]  }
 0x167   :  { %10612 = vmatprep.mubr.bf16.mxu1 %v1532_v9  ;;  %v15419_v9 = vld [vmem:[%s19675_s4 + $0xb90] sm:$0xff]  }
 0x168   :  { %13968 = vmatpush3.bf16.msra.mxu0 %v15348_v21  ;;  %v15389_v21 = vld [vmem:[%s19675_s4 + $0xa18] sm:$0xff]  }
 0x169   :  { %13969 = vmatprep.subr.bf16.mxu0 %v15350_v23  ;;  %13990 = vmatpush3.bf16.msra.mxu1 %v15349_v22  ;;  %v15391_v22 = vld [vmem:[%s19675_s4 + $0xa60] sm:$0xff]   ;;  %v15390_v23 = vld [vmem:[%s19675_s4 + $0xa98] sm:$0xff]  }
 0x16a   :  { %13991 = vmatprep.subr.bf16.mxu1 %v15351_v24  ;;  %v15392_v24 = vld [vmem:[%s19675_s4 + $0xae0] sm:$0xff]  }
 0x16c   :  { %13970 = vmatpush3.bf16.msra.mxu0 %v15352_v25  ;;  %v15393_v25 = vld [vmem:[%s19675_s4 + $0xa20] sm:$0xff]  }
 0x16d   :  { %13971 = vmatprep.subr.bf16.mxu0 %v15354_v27  ;;  %13992 = vmatpush3.bf16.msra.mxu1 %v15353_v26  ;;  %v15395_v27 = vld [vmem:[%s19675_s4 + $0xa68] sm:$0xff]  }
 0x16e   :  { %13993 = vmatprep.subr.bf16.mxu1 %v15355_v28  ;;  %v15394_v28 = vld [vmem:[%s19675_s4 + $0xaa0] sm:$0xff]  }
 0x170   :  { %13972 = vmatpush3.bf16.msra.mxu0 %v15356_v29 }
 0x171   :  { %13973 = vmatprep.subr.bf16.mxu0 %v15358_v31  ;;  %13994 = vmatpush3.bf16.msra.mxu1 %v15357_v30 }
 0x172   :  { %13995 = vmatprep.subr.bf16.mxu1 %v15359_v32  ;;  %v15396_v32 = vld [vmem:[%s19675_s4 + $0xae8] sm:$0xff]  }
 0x174   :  { %13974 = vmatpush3.bf16.msra.mxu0 %v15360_v33 }
 0x175   :  { %13975 = vmatprep.subr.bf16.mxu0 %v15362_v36  ;;  %13996 = vmatpush3.bf16.msra.mxu1 %v15361_v34  ;;  %v15397_v34 = vld [vmem:[%s19675_s4 + $0xa28] sm:$0xff]  }
 0x176   :  { %v13673_v37 = vpop.f32.mrb[16].mxu0  ;;  %13997 = vmatprep.subr.bf16.mxu1 %v15363_v38 }
 0x177   :  { %v13674_v39 = vpop.f32.mrb[17].mxu0  ;;  %v13695_v41 = vpop.f32.mrb[16].mxu1 }
 0x178   :  { %v13675_v42 = vadd.f32 %v13674_v39, %v13673_v37  ;;  %v13676_v43 = vpop.f32.mrb[18].mxu0  ;;  %v13696_v46 = vpop.f32.mrb[17].mxu1  ;;  %13976 = vmatpush3.bf16.msra.mxu0 %v15364_v40  ;;  %v15398_v37 = vld [vmem:[%s19675_s4 + $0xaa8] sm:$0xff]  }
 0x179   :  { %v13677_v47 = vpop.f32.mrb[19].mxu0  ;;  %v13697_v49 = vadd.f32 %v13696_v46, %v13695_v41  ;;  %v13698_v50 = vpop.f32.mrb[18].mxu1  ;;  %13977 = vmatprep.subr.bf16.mxu0 %v15366_v45  ;;  %13998 = vmatpush3.bf16.msra.mxu1 %v15365_v44  ;;  %v15400_v44 = vld [vmem:[%s19675_s4 + $0xaf0] sm:$0xff]  }
 0x17a   :  { %v10015_v48 = vadd.f32 %v13675_v42, %v17260_v63  ;;  %v13699_v52 = vpop.f32.mrb[19].mxu1  ;;  %13999 = vmatprep.subr.bf16.mxu1 %v15367_v51  ;;  %v15373_v63 = vld [vmem:[%s19675_s4 + $0x9b8] sm:$0xff]   ;;  %v15399_v42 = vld [vmem:[%s19675_s4 + $0xa70] sm:$0xff]  }
 0x17b   :  { %v15401_v46 = vld [vmem:[%s19675_s4 + $0xa30] sm:$0xff]   ;;  %v15405_v50 = vld [vmem:[%s19675_s4 + $0xa38] sm:$0xff]  }
 0x17c   :  { %v17361_v54 = vadd.f32 %v13697_v49, %v10015_v48  ;;  %13978 = vmatpush3.bf16.msra.mxu0 %v15368_v53  ;;  %v15402_v47 = vld [vmem:[%s19675_s4 + $0xab0] sm:$0xff]   ;;  %v15403_v48 = vld [vmem:[%s19675_s4 + $0xa78] sm:$0xff]  }
 0x17d   :  { %13979 = vmatprep.subr.bf16.mxu0 %v15370_v56  ;;  %14000 = vmatpush3.bf16.msra.mxu1 %v15369_v55  ;;  %v15404_v49 = vld [vmem:[%s19675_s4 + $0xaf8] sm:$0xff]   ;;  %v767_v51 = vld [vmem:[%s19676_s3 + $0x50] sm:$0xff]  ;;  %v15408_v55 = vld [vmem:[%s19675_s4 + $0xb40] sm:$0xff]  }
 0x17e   :  { %14001 = vmatprep.subr.bf16.mxu1 %v15371_v57  ;;  %v15406_v52 = vld [vmem:[%s19675_s4 + $0xab8] sm:$0xff]   ;;  %v998_v53 = vrot.slane %v767_v51, %v16228_v35 }
 0x180   :  { %13980 = vmatpush3.bf16.msra.mxu0 %v15372_v58  ;;  %v1006_v56 = vcombine.high %v998_v53, %v998_v53  ;;  %v15409_v58 = vld [vmem:[%s19675_s4 + $0xbc0] sm:$0xff]   ;;  %v1533_v59 = vpack.c.bf16 %v998_v53, %v998_v53 }
 0x181   :  { %14009 = vmatprep.subr.bf16.mxu0 %v15375_v62  ;;  %14002 = vmatpush3.bf16.msra.mxu1 %v15373_v63  ;;  %v15411_v63 = vld [vmem:[%s19675_s4 + $0xb80] sm:$0xff]  }
 0x182   :  { %14031 = vmatprep.subr.bf16.mxu1 %v15376_v2  ;;  %v1534_v61 = vpack.c.bf16 %v1006_v56, %v1006_v56 }
 0x183   :  { %10573 = vmatmul.mubr.bf16.vlgmr.msra.gmra.mrb[44].mxu0 %v1529_v3  ;;  %v15413_v3 = vld [vmem:[%s19675_s4 + $0xbc8] sm:$0xff]  }
 0x184   :  { %14010 = vmatpush3.bf16.msra.mxu0 %v15377_v6  ;;  %10613 = vmatmul.mubr.bf16.vlgmr.msra.gmra.mrb[44].mxu1 %v1531_v7  ;;  %v15416_v6 = vld [vmem:[%s19675_s4 + $0xb50] sm:$0xff]  }
 0x185   :  { %14011 = vmatprep.subr.bf16.mxu0 %v15379_v8  ;;  %14032 = vmatpush3.bf16.msra.mxu1 %v15378_v10  ;;  %v15417_v7 = vld [vmem:[%s19675_s4 + $0xbd0] sm:$0xff]   ;;  %v15420_v10 = vld [vmem:[%s19675_s4 + $0xb58] sm:$0xff]  }
 0x186   :  { %14033 = vmatprep.subr.bf16.mxu1 %v15380_v11  ;;  %10652 = vmatprep.mubr.bf16.mxu0 %v1534_v61  ;;  %v15418_v8 = vld [vmem:[%s19675_s4 + $0xb10] sm:$0xff]   ;;  %v15421_v11 = vld [vmem:[%s19675_s4 + $0xbd8] sm:$0xff]   ;;  %v15448_v61 = vld [vmem:[%s19675_s4 + $0xc88] sm:$0xff]  }
 0x188   :  { %14012 = vmatpush3.bf16.msra.mxu0 %v15381_v12  ;;  %v15422_v12 = vld [vmem:[%s19675_s4 + $0xb18] sm:$0xff]  }
 0x189   :  { %14013 = vmatprep.subr.bf16.mxu0 %v15383_v13  ;;  %14034 = vmatpush3.bf16.msra.mxu1 %v15382_v14  ;;  %v15423_v13 = vld [vmem:[%s19675_s4 + $0xb98] sm:$0xff]   ;;  %v15424_v14 = vld [vmem:[%s19675_s4 + $0xb60] sm:$0xff]  }
 0x18a   :  { %14035 = vmatprep.subr.bf16.mxu1 %v15384_v16  ;;  %v15425_v16 = vld [vmem:[%s19675_s4 + $0xbe0] sm:$0xff]  }
 0x18c   :  { %14014 = vmatpush3.bf16.msra.mxu0 %v15385_v17  ;;  %v15426_v17 = vld [vmem:[%s19675_s4 + $0xb20] sm:$0xff]  }
 0x18d   :  { %14015 = vmatprep.subr.bf16.mxu0 %v15387_v18  ;;  %14036 = vmatpush3.bf16.msra.mxu1 %v15386_v19  ;;  %v15427_v18 = vld [vmem:[%s19675_s4 + $0xba0] sm:$0xff]   ;;  %v15428_v19 = vld [vmem:[%s19675_s4 + $0xb68] sm:$0xff]  }
 0x18e   :  { %14037 = vmatprep.subr.bf16.mxu1 %v15388_v20 }
 0x190   :  { %14016 = vmatpush3.bf16.msra.mxu0 %v15389_v21  ;;  %v15429_v21 = vld [vmem:[%s19675_s4 + $0xbe8] sm:$0xff]  }
 0x191   :  { %14017 = vmatprep.subr.bf16.mxu0 %v15391_v22  ;;  %14038 = vmatpush3.bf16.msra.mxu1 %v15390_v23  ;;  %v15430_v23 = vld [vmem:[%s19675_s4 + $0xb28] sm:$0xff]  }
 0x192   :  { %14039 = vmatprep.subr.bf16.mxu1 %v15392_v24 }
 0x194   :  { %14018 = vmatpush3.bf16.msra.mxu0 %v15393_v25 }
 0x195   :  { %14019 = vmatprep.subr.bf16.mxu0 %v15395_v27  ;;  %14040 = vmatpush3.bf16.msra.mxu1 %v15394_v28  ;;  %v15431_v28 = vld [vmem:[%s19675_s4 + $0xba8] sm:$0xff]  }
 0x196   :  { %v13717_v26 = vpop.f32.mrb[20].mxu0  ;;  %14041 = vmatprep.subr.bf16.mxu1 %v15396_v32 }
 0x197   :  { %v13718_v29 = vpop.f32.mrb[21].mxu0  ;;  %v13739_v30 = vpop.f32.mrb[20].mxu1 }
 0x198   :  { %v13719_v31 = vadd.f32 %v13718_v29, %v13717_v26  ;;  %v13720_v33 = vpop.f32.mrb[22].mxu0  ;;  %v13740_v36 = vpop.f32.mrb[21].mxu1  ;;  %14020 = vmatpush3.bf16.msra.mxu0 %v15397_v34  ;;  %v15433_v34 = vld [vmem:[%s19675_s4 + $0xbf0] sm:$0xff]  }
 0x199   :  { %v13721_v38 = vpop.f32.mrb[23].mxu0  ;;  %v13741_v40 = vadd.f32 %v13740_v36, %v13739_v30  ;;  %v13742_v41 = vpop.f32.mrb[22].mxu1  ;;  %14021 = vmatprep.subr.bf16.mxu0 %v15399_v42  ;;  %14042 = vmatpush3.bf16.msra.mxu1 %v15398_v37  ;;  %v15432_v30 = vld [vmem:[%s19675_s4 + $0xb70] sm:$0xff]   ;;  %v15438_v42 = vld [vmem:[%s19675_s4 + $0xb38] sm:$0xff]  }
 0x19a   :  { %v10095_v39 = vadd.f32 %v13719_v31, %v17361_v54  ;;  %v13743_v43 = vpop.f32.mrb[23].mxu1  ;;  %14043 = vmatprep.subr.bf16.mxu1 %v15400_v44  ;;  %v991_v54 = vcombine.high %v767_v51, %v767_v51  ;;  %v15434_v37 = vld [vmem:[%s19675_s4 + $0xb30] sm:$0xff]   ;;  %v15437_v41 = vld [vmem:[%s19675_s4 + $0xbf8] sm:$0xff]  }
 0x19b   :  { %v768_v43 = vld [vmem:[%s19676_s3 + $0x58] sm:$0xff] }
 0x19c   :  { %v17462_v45 = vadd.f32 %v13741_v40, %v10095_v39  ;;  %14022 = vmatpush3.bf16.msra.mxu0 %v15401_v46  ;;  %v1005_v57 = vrot.slane %v991_v54, %v16228_v35  ;;  %v15436_v39 = vld [vmem:[%s19675_s4 + $0xb78] sm:$0xff]   ;;  %v15435_v40 = vld [vmem:[%s19675_s4 + $0xbb0] sm:$0xff]   ;;  %v1015_v44 = vrot.slane %v768_v43, %v16228_v35  ;;  %v15441_v46 = vld [vmem:[%s19675_s4 + $0xc40] sm:$0xff]  }
 0x19d   :  { %14023 = vmatprep.subr.bf16.mxu0 %v15403_v48  ;;  %14044 = vmatpush3.bf16.msra.mxu1 %v15402_v47  ;;  %v15439_v47 = vld [vmem:[%s19675_s4 + $0xbb8] sm:$0xff]  }
 0x19e   :  { %14045 = vmatprep.subr.bf16.mxu1 %v15404_v49  ;;  %v1007_v62 = vcombine.high %v1005_v57, %v1005_v57  ;;  %v1535_v0 = vpack.c.bf16 %v1005_v57, %v1005_v57  ;;  %v1023_v48 = vcombine.high %v1015_v44, %v1015_v44  ;;  %v1537_v51 = vpack.c.bf16 %v1015_v44, %v1015_v44  ;;  %v15445_v57 = vld [vmem:[%s19675_s4 + $0xc48] sm:$0xff]  }
 0x1a0   :  { %14024 = vmatpush3.bf16.msra.mxu0 %v15405_v50  ;;  %v1536_v2 = vpack.c.bf16 %v1007_v62, %v1007_v62  ;;  %v15442_v50 = vld [vmem:[%s19675_s4 + $0xcc0] sm:$0xff]   ;;  %v1538_v53 = vpack.c.bf16 %v1023_v48, %v1023_v48  ;;  %v15449_v62 = vld [vmem:[%s19675_s4 + $0xc50] sm:$0xff]   ;;  %v15478_v48 = vld [vmem:[%s19675_s4 + $0xd48] sm:$0xff]  }
 0x1a1   :  { %14053 = vmatprep.subr.bf16.mxu0 %v15408_v55  ;;  %14046 = vmatpush3.bf16.msra.mxu1 %v15406_v52  ;;  %v15443_v52 = vld [vmem:[%s19675_s4 + $0xc00] sm:$0xff]  }
 0x1a2   :  { %14075 = vmatprep.subr.bf16.mxu1 %v15409_v58  ;;  %10692 = vmatprep.mubr.bf16.mxu1 %v1536_v2  ;;  %v15444_v55 = vld [vmem:[%s19675_s4 + $0xc80] sm:$0xff]   ;;  %v15453_v2 = vld [vmem:[%s19675_s4 + $0xc58] sm:$0xff]  }
 0x1a3   :  { %10653 = vmatmul.mubr.bf16.vlgmr.msra.gmra.mrb[48].mxu0 %v1533_v59  ;;  %v15446_v59 = vld [vmem:[%s19675_s4 + $0xcc8] sm:$0xff]  }
 0x1a4   :  { %14054 = vmatpush3.bf16.msra.mxu0 %v15410_v60  ;;  %10693 = vmatmul.mubr.bf16.vlgmr.msra.gmra.mrb[48].mxu1 %v1535_v0  ;;  %v15447_v60 = vld [vmem:[%s19675_s4 + $0xc08] sm:$0xff]   ;;  %v15451_v0 = vld [vmem:[%s19675_s4 + $0xc10] sm:$0xff]  }
 0x1a5   :  { %14055 = vmatprep.subr.bf16.mxu0 %v15412_v1  ;;  %14076 = vmatpush3.bf16.msra.mxu1 %v15411_v63  ;;  %v15450_v63 = vld [vmem:[%s19675_s4 + $0xcd0] sm:$0xff]  }
 0x1a6   :  { %14077 = vmatprep.subr.bf16.mxu1 %v15413_v3  ;;  %10732 = vmatprep.mubr.bf16.mxu0 %v1538_v53  ;;  %v15452_v1 = vld [vmem:[%s19675_s4 + $0xc90] sm:$0xff]   ;;  %v15454_v3 = vld [vmem:[%s19675_s4 + $0xcd8] sm:$0xff]  }
 0x1a7   :  { %v15482_v53 = vld [vmem:[%s19675_s4 + $0xd50] sm:$0xff]  }
 0x1a8   :  { %14056 = vmatpush3.bf16.msra.mxu0 %v15414_v4  ;;  %v15455_v4 = vld [vmem:[%s19675_s4 + $0xc18] sm:$0xff]  }
 0x1a9   :  { %14057 = vmatprep.subr.bf16.mxu0 %v15416_v6  ;;  %14078 = vmatpush3.bf16.msra.mxu1 %v15415_v5  ;;  %v15456_v5 = vld [vmem:[%s19675_s4 + $0xc98] sm:$0xff]   ;;  %v15457_v6 = vld [vmem:[%s19675_s4 + $0xc60] sm:$0xff]  }
 0x1aa   :  { %14079 = vmatprep.subr.bf16.mxu1 %v15417_v7  ;;  %v15458_v7 = vld [vmem:[%s19675_s4 + $0xce0] sm:$0xff]  }
 0x1ac   :  { %14058 = vmatpush3.bf16.msra.mxu0 %v15418_v8  ;;  %v15459_v8 = vld [vmem:[%s19675_s4 + $0xc20] sm:$0xff]  }
 0x1ad   :  { %14059 = vmatprep.subr.bf16.mxu0 %v15420_v10  ;;  %14080 = vmatpush3.bf16.msra.mxu1 %v15419_v9  ;;  %v15460_v9 = vld [vmem:[%s19675_s4 + $0xca0] sm:$0xff]   ;;  %v15461_v10 = vld [vmem:[%s19675_s4 + $0xc68] sm:$0xff]  }
 0x1ae   :  { %14081 = vmatprep.subr.bf16.mxu1 %v15421_v11 }
 0x1b0   :  { %14060 = vmatpush3.bf16.msra.mxu0 %v15422_v12  ;;  %v15462_v12 = vld [vmem:[%s19675_s4 + $0xce8] sm:$0xff]  }
 0x1b1   :  { %14061 = vmatprep.subr.bf16.mxu0 %v15424_v14  ;;  %14082 = vmatpush3.bf16.msra.mxu1 %v15423_v13  ;;  %v15463_v14 = vld [vmem:[%s19675_s4 + $0xc28] sm:$0xff]  }
 0x1b2   :  { %14083 = vmatprep.subr.bf16.mxu1 %v15425_v16 }
 0x1b4   :  { %14062 = vmatpush3.bf16.msra.mxu0 %v15426_v17 }
 0x1b5   :  { %14063 = vmatprep.subr.bf16.mxu0 %v15428_v19  ;;  %14084 = vmatpush3.bf16.msra.mxu1 %v15427_v18  ;;  %v15464_v19 = vld [vmem:[%s19675_s4 + $0xca8] sm:$0xff]  }
 0x1b6   :  { %v13761_v20 = vpop.f32.mrb[24].mxu0  ;;  %14085 = vmatprep.subr.bf16.mxu1 %v15429_v21 }
 0x1b7   :  { %v13762_v22 = vpop.f32.mrb[25].mxu0  ;;  %v13783_v24 = vpop.f32.mrb[24].mxu1 }
 0x1b8   :  { %v13763_v25 = vadd.f32 %v13762_v22, %v13761_v20  ;;  %v13764_v26 = vpop.f32.mrb[26].mxu0  ;;  %v13784_v27 = vpop.f32.mrb[25].mxu1  ;;  %14064 = vmatpush3.bf16.msra.mxu0 %v15430_v23  ;;  %v15465_v20 = vld [vmem:[%s19675_s4 + $0xc70] sm:$0xff]  }
 0x1b9   :  { %v13765_v29 = vpop.f32.mrb[27].mxu0  ;;  %v13785_v32 = vadd.f32 %v13784_v27, %v13783_v24  ;;  %v13786_v33 = vpop.f32.mrb[26].mxu1  ;;  %14065 = vmatprep.subr.bf16.mxu0 %v15432_v30  ;;  %14086 = vmatpush3.bf16.msra.mxu1 %v15431_v28  ;;  %v15466_v26 = vld [vmem:[%s19675_s4 + $0xcf0] sm:$0xff]  }
 0x1ba   :  { %v10175_v31 = vadd.f32 %v13763_v25, %v17462_v45  ;;  %v13787_v36 = vpop.f32.mrb[27].mxu1  ;;  %14087 = vmatprep.subr.bf16.mxu1 %v15433_v34  ;;  %v1008_v45 = vcombine.high %v768_v43, %v768_v43  ;;  %v15467_v28 = vld [vmem:[%s19675_s4 + $0xc30] sm:$0xff]   ;;  %v15471_v33 = vld [vmem:[%s19675_s4 + $0xc38] sm:$0xff]   ;;  %v769_v34 = vld [vmem:[%s19676_s3 + $0x60] sm:$0xff] }
 0x1bb   :  { %v15468_v30 = vld [vmem:[%s19675_s4 + $0xcb0] sm:$0xff]   ;;  %v1032_v36 = vrot.slane %v769_v34, %v16228_v35 }
 0x1bc   :  { %v17569_v38 = vadd.f32 %v13785_v32, %v10175_v31  ;;  %14066 = vmatpush3.bf16.msra.mxu0 %v15434_v37  ;;  %v1022_v49 = vrot.slane %v1008_v45, %v16228_v35  ;;  %v15469_v31 = vld [vmem:[%s19675_s4 + $0xc78] sm:$0xff]   ;;  %v1025_v37 = vcombine.high %v769_v34, %v769_v34 }
 0x1bd   :  { %14067 = vmatprep.subr.bf16.mxu0 %v15436_v39  ;;  %14088 = vmatpush3.bf16.msra.mxu1 %v15435_v40  ;;  %v15470_v32 = vld [vmem:[%s19675_s4 + $0xcf8] sm:$0xff]   ;;  %v1040_v40 = vcombine.high %v1032_v36, %v1032_v36  ;;  %v1541_v43 = vpack.c.bf16 %v1032_v36, %v1032_v36  ;;  %v15509_v36 = vld [vmem:[%s19675_s4 + $0xe00] sm:$0xff]  }
 0x1be   :  { %14089 = vmatprep.subr.bf16.mxu1 %v15437_v41  ;;  %v1024_v54 = vcombine.high %v1022_v49, %v1022_v49  ;;  %v1539_v56 = vpack.c.bf16 %v1022_v49, %v1022_v49  ;;  %v15472_v39 = vld [vmem:[%s19675_s4 + $0xcb8] sm:$0xff]   ;;  %v1039_v41 = vrot.slane %v1025_v37, %v16228_v35 }
 0x1bf   :  { %v1542_v44 = vpack.c.bf16 %v1040_v40, %v1040_v40 }
 0x1c0   :  { %14068 = vmatpush3.bf16.msra.mxu0 %v15438_v42  ;;  %v1540_v58 = vpack.c.bf16 %v1024_v54, %v1024_v54  ;;  %v15475_v42 = vld [vmem:[%s19675_s4 + $0xdc0] sm:$0xff]   ;;  %v1041_v45 = vcombine.high %v1039_v41, %v1039_v41  ;;  %v15481_v54 = vld [vmem:[%s19675_s4 + $0xd88] sm:$0xff]  }
 0x1c1   :  { %14097 = vmatprep.subr.bf16.mxu0 %v15441_v46  ;;  %14090 = vmatpush3.bf16.msra.mxu1 %v15439_v47  ;;  %v15476_v46 = vld [vmem:[%s19675_s4 + $0xd00] sm:$0xff]   ;;  %v1543_v47 = vpack.c.bf16 %v1039_v41, %v1039_v41  ;;  %v15511_v41 = vld [vmem:[%s19675_s4 + $0xe48] sm:$0xff]  }
 0x1c2   :  { %14119 = vmatprep.subr.bf16.mxu1 %v15442_v50  ;;  %10772 = vmatprep.mubr.bf16.mxu1 %v1540_v58  ;;  %v1544_v49 = vpack.c.bf16 %v1041_v45, %v1041_v45  ;;  %v15477_v50 = vld [vmem:[%s19675_s4 + $0xd80] sm:$0xff]   ;;  %v15485_v58 = vld [vmem:[%s19675_s4 + $0xd90] sm:$0xff]   ;;  %v15514_v45 = vld [vmem:[%s19675_s4 + $0xe88] sm:$0xff]  }
 0x1c3   :  { %10733 = vmatmul.mubr.bf16.vlgmr.msra.gmra.mrb[52].mxu0 %v1537_v51  ;;  %v15479_v51 = vld [vmem:[%s19675_s4 + $0xdc8] sm:$0xff]  }
 0x1c4   :  { %14098 = vmatpush3.bf16.msra.mxu0 %v15443_v52  ;;  %10773 = vmatmul.mubr.bf16.vlgmr.msra.gmra.mrb[52].mxu1 %v1539_v56  ;;  %v15480_v52 = vld [vmem:[%s19675_s4 + $0xd08] sm:$0xff]   ;;  %v15484_v56 = vld [vmem:[%s19675_s4 + $0xd10] sm:$0xff]  }
 0x1c5   :  { %14099 = vmatprep.subr.bf16.mxu0 %v15445_v57  ;;  %14120 = vmatpush3.bf16.msra.mxu1 %v15444_v55  ;;  %v15483_v55 = vld [vmem:[%s19675_s4 + $0xdd0] sm:$0xff]   ;;  %v15486_v57 = vld [vmem:[%s19675_s4 + $0xd58] sm:$0xff]  }
 0x1c6   :  { %14121 = vmatprep.subr.bf16.mxu1 %v15446_v59  ;;  %10812 = vmatprep.mubr.bf16.mxu0 %v1542_v44  ;;  %v15487_v59 = vld [vmem:[%s19675_s4 + $0xdd8] sm:$0xff]   ;;  %v15513_v44 = vld [vmem:[%s19675_s4 + $0xe08] sm:$0xff]  }
 0x1c7   :  { %10852 = vmatprep.mubr.bf16.mxu1 %v1544_v49  ;;  %v15518_v49 = vld [vmem:[%s19675_s4 + $0xe90] sm:$0xff]  }
 0x1c8   :  { %14100 = vmatpush3.bf16.msra.mxu0 %v15447_v60  ;;  %v15488_v60 = vld [vmem:[%s19675_s4 + $0xd18] sm:$0xff]  }
 0x1c9   :  { %14101 = vmatprep.subr.bf16.mxu0 %v15449_v62  ;;  %14122 = vmatpush3.bf16.msra.mxu1 %v15448_v61  ;;  %v15490_v61 = vld [vmem:[%s19675_s4 + $0xd60] sm:$0xff]   ;;  %v15489_v62 = vld [vmem:[%s19675_s4 + $0xd98] sm:$0xff]  }
 0x1ca   :  { %14123 = vmatprep.subr.bf16.mxu1 %v15450_v63  ;;  %v15491_v63 = vld [vmem:[%s19675_s4 + $0xde0] sm:$0xff]  }
 0x1cc   :  { %14102 = vmatpush3.bf16.msra.mxu0 %v15451_v0  ;;  %v15492_v0 = vld [vmem:[%s19675_s4 + $0xd20] sm:$0xff]  }
 0x1cd   :  { %14103 = vmatprep.subr.bf16.mxu0 %v15453_v2  ;;  %14124 = vmatpush3.bf16.msra.mxu1 %v15452_v1  ;;  %v15494_v2 = vld [vmem:[%s19675_s4 + $0xd68] sm:$0xff]  }
 0x1ce   :  { %14125 = vmatprep.subr.bf16.mxu1 %v15454_v3  ;;  %v15493_v3 = vld [vmem:[%s19675_s4 + $0xda0] sm:$0xff]  }
 0x1d0   :  { %14104 = vmatpush3.bf16.msra.mxu0 %v15455_v4 }
 0x1d1   :  { %14105 = vmatprep.subr.bf16.mxu0 %v15457_v6  ;;  %14126 = vmatpush3.bf16.msra.mxu1 %v15456_v5 }
 0x1d2   :  { %14127 = vmatprep.subr.bf16.mxu1 %v15458_v7  ;;  %v15495_v7 = vld [vmem:[%s19675_s4 + $0xde8] sm:$0xff]  }
 0x1d4   :  { %14106 = vmatpush3.bf16.msra.mxu0 %v15459_v8 }
 0x1d5   :  { %14107 = vmatprep.subr.bf16.mxu0 %v15461_v10  ;;  %14128 = vmatpush3.bf16.msra.mxu1 %v15460_v9  ;;  %v15496_v9 = vld [vmem:[%s19675_s4 + $0xd28] sm:$0xff]  }
 0x1d6   :  { %v13805_v11 = vpop.f32.mrb[28].mxu0  ;;  %14129 = vmatprep.subr.bf16.mxu1 %v15462_v12 }
 0x1d7   :  { %v13806_v13 = vpop.f32.mrb[29].mxu0  ;;  %v13827_v16 = vpop.f32.mrb[28].mxu1 }
 0x1d8   :  { %v13807_v17 = vadd.f32 %v13806_v13, %v13805_v11  ;;  %v13808_v18 = vpop.f32.mrb[30].mxu0  ;;  %v13828_v21 = vpop.f32.mrb[29].mxu1  ;;  %14108 = vmatpush3.bf16.msra.mxu0 %v15463_v14  ;;  %v15497_v11 = vld [vmem:[%s19675_s4 + $0xda8] sm:$0xff]  }
 0x1d9   :  { %v13809_v22 = vpop.f32.mrb[31].mxu0  ;;  %v13829_v24 = vadd.f32 %v13828_v21, %v13827_v16  ;;  %v13830_v25 = vpop.f32.mrb[30].mxu1  ;;  %14109 = vmatprep.subr.bf16.mxu0 %v15465_v20  ;;  %14130 = vmatpush3.bf16.msra.mxu1 %v15464_v19  ;;  %v15499_v19 = vld [vmem:[%s19675_s4 + $0xdf0] sm:$0xff]  }
 0x1da   :  { %v10255_v23 = vadd.f32 %v13807_v17, %v17569_v38  ;;  %v13831_v27 = vpop.f32.mrb[31].mxu1  ;;  %14131 = vmatprep.subr.bf16.mxu1 %v15466_v26  ;;  %v15474_v38 = vld [vmem:[%s19675_s4 + $0xd40] sm:$0xff]   ;;  %v15498_v17 = vld [vmem:[%s19675_s4 + $0xd70] sm:$0xff]   ;;  %v15504_v25 = vld [vmem:[%s19675_s4 + $0xd38] sm:$0xff]  }
 0x1db   :  { %v15500_v21 = vld [vmem:[%s19675_s4 + $0xd30] sm:$0xff]   ;;  %v770_v26 = vld [vmem:[%s19676_s3 + $0x68] sm:$0xff]  ;;  %v15505_v27 = vld [vmem:[%s19675_s4 + $0xdb8] sm:$0xff]  }
 0x1dc   :  { %v17673_v29 = vadd.f32 %v13829_v24, %v10255_v23  ;;  %14110 = vmatpush3.bf16.msra.mxu0 %v15467_v28  ;;  %v15501_v22 = vld [vmem:[%s19675_s4 + $0xdb0] sm:$0xff]   ;;  %v15502_v23 = vld [vmem:[%s19675_s4 + $0xd78] sm:$0xff]   ;;  %v1049_v28 = vrot.slane %v770_v26, %v16228_v35 }
 0x1dd   :  { %14111 = vmatprep.subr.bf16.mxu0 %v15469_v31  ;;  %14132 = vmatpush3.bf16.msra.mxu1 %v15468_v30  ;;  %v15503_v24 = vld [vmem:[%s19675_s4 + $0xdf8] sm:$0xff]   ;;  %v15507_v30 = vld [vmem:[%s19675_s4 + $0xe40] sm:$0xff]  }
 0x1de   :  { %14133 = vmatprep.subr.bf16.mxu1 %v15470_v32  ;;  %v1057_v31 = vcombine.high %v1049_v28, %v1049_v28  ;;  %v1545_v34 = vpack.c.bf16 %v1049_v28, %v1049_v28 }
 0x1e0   :  { %14112 = vmatpush3.bf16.msra.mxu0 %v15471_v33  ;;  %v15508_v33 = vld [vmem:[%s19675_s4 + $0xec0] sm:$0xff]   ;;  %v1546_v37 = vpack.c.bf16 %v1057_v31, %v1057_v31 }
 0x1e1   :  { %14141 = vmatprep.subr.bf16.mxu0 %v15474_v38  ;;  %14134 = vmatpush3.bf16.msra.mxu1 %v15472_v39  ;;  %v15510_v39 = vld [vmem:[%s19675_s4 + $0xe80] sm:$0xff]  }
 0x1e2   :  { %14163 = vmatprep.subr.bf16.mxu1 %v15475_v42 }
 0x1e3   :  { %10813 = vmatmul.mubr.bf16.vlgmr.msra.gmra.mrb[56].mxu0 %v1541_v43  ;;  %v15512_v43 = vld [vmem:[%s19675_s4 + $0xec8] sm:$0xff]  }
 0x1e4   :  { %14142 = vmatpush3.bf16.msra.mxu0 %v15476_v46  ;;  %10853 = vmatmul.mubr.bf16.vlgmr.msra.gmra.mrb[56].mxu1 %v1543_v47  ;;  %v15515_v46 = vld [vmem:[%s19675_s4 + $0xe50] sm:$0xff]  }
 0x1e5   :  { %14143 = vmatprep.subr.bf16.mxu0 %v15478_v48  ;;  %14164 = vmatpush3.bf16.msra.mxu1 %v15477_v50  ;;  %v15516_v47 = vld [vmem:[%s19675_s4 + $0xed0] sm:$0xff]   ;;  %v15519_v50 = vld [vmem:[%s19675_s4 + $0xe58] sm:$0xff]  }
 0x1e6   :  { %14165 = vmatprep.subr.bf16.mxu1 %v15479_v51  ;;  %10892 = vmatprep.mubr.bf16.mxu0 %v1546_v37  ;;  %v15517_v48 = vld [vmem:[%s19675_s4 + $0xe10] sm:$0xff]   ;;  %v15520_v51 = vld [vmem:[%s19675_s4 + $0xed8] sm:$0xff]   ;;  %v15547_v37 = vld [vmem:[%s19675_s4 + $0xf88] sm:$0xff]  }
 0x1e8   :  { %14144 = vmatpush3.bf16.msra.mxu0 %v15480_v52  ;;  %v15521_v52 = vld [vmem:[%s19675_s4 + $0xe18] sm:$0xff]  }
 0x1e9   :  { %14145 = vmatprep.subr.bf16.mxu0 %v15482_v53  ;;  %14166 = vmatpush3.bf16.msra.mxu1 %v15481_v54  ;;  %v15522_v53 = vld [vmem:[%s19675_s4 + $0xe98] sm:$0xff]   ;;  %v15523_v54 = vld [vmem:[%s19675_s4 + $0xe60] sm:$0xff]  }
 0x1ea   :  { %14167 = vmatprep.subr.bf16.mxu1 %v15483_v55  ;;  %v15524_v55 = vld [vmem:[%s19675_s4 + $0xee0] sm:$0xff]  }
 0x1ec   :  { %14146 = vmatpush3.bf16.msra.mxu0 %v15484_v56  ;;  %v15525_v56 = vld [vmem:[%s19675_s4 + $0xe20] sm:$0xff]  }
 0x1ed   :  { %14147 = vmatprep.subr.bf16.mxu0 %v15486_v57  ;;  %14168 = vmatpush3.bf16.msra.mxu1 %v15485_v58  ;;  %v15526_v57 = vld [vmem:[%s19675_s4 + $0xea0] sm:$0xff]   ;;  %v15527_v58 = vld [vmem:[%s19675_s4 + $0xe68] sm:$0xff]  }
 0x1ee   :  { %14169 = vmatprep.subr.bf16.mxu1 %v15487_v59 }
 0x1f0   :  { %14148 = vmatpush3.bf16.msra.mxu0 %v15488_v60  ;;  %v15528_v60 = vld [vmem:[%s19675_s4 + $0xee8] sm:$0xff]  }
 0x1f1   :  { %14149 = vmatprep.subr.bf16.mxu0 %v15490_v61  ;;  %14170 = vmatpush3.bf16.msra.mxu1 %v15489_v62  ;;  %v15529_v62 = vld [vmem:[%s19675_s4 + $0xe28] sm:$0xff]  }
 0x1f2   :  { %14171 = vmatprep.subr.bf16.mxu1 %v15491_v63 }
 0x1f4   :  { %14150 = vmatpush3.bf16.msra.mxu0 %v15492_v0 }
 0x1f5   :  { %14151 = vmatprep.subr.bf16.mxu0 %v15494_v2  ;;  %14172 = vmatpush3.bf16.msra.mxu1 %v15493_v3  ;;  %v15530_v3 = vld [vmem:[%s19675_s4 + $0xea8] sm:$0xff]  }
 0x1f6   :  { %v13849_v1 = vpop.f32.mrb[32].mxu0  ;;  %14173 = vmatprep.subr.bf16.mxu1 %v15495_v7 }
 0x1f7   :  { %v13850_v4 = vpop.f32.mrb[33].mxu0  ;;  %v13871_v5 = vpop.f32.mrb[32].mxu1 }
 0x1f8   :  { %v13851_v6 = vadd.f32 %v13850_v4, %v13849_v1  ;;  %v13852_v8 = vpop.f32.mrb[34].mxu0  ;;  %v13872_v10 = vpop.f32.mrb[33].mxu1  ;;  %14152 = vmatpush3.bf16.msra.mxu0 %v15496_v9  ;;  %v15532_v9 = vld [vmem:[%s19675_s4 + $0xef0] sm:$0xff]  }
 0x1f9   :  { %v13853_v12 = vpop.f32.mrb[35].mxu0  ;;  %v13873_v14 = vadd.f32 %v13872_v10, %v13871_v5  ;;  %v13874_v16 = vpop.f32.mrb[34].mxu1  ;;  %14153 = vmatprep.subr.bf16.mxu0 %v15498_v17  ;;  %14174 = vmatpush3.bf16.msra.mxu1 %v15497_v11  ;;  %v15531_v5 = vld [vmem:[%s19675_s4 + $0xe70] sm:$0xff]   ;;  %v15537_v17 = vld [vmem:[%s19675_s4 + $0xe38] sm:$0xff]  }
 0x1fa   :  { %v10335_v13 = vadd.f32 %v13851_v6, %v17673_v29  ;;  %v13875_v18 = vpop.f32.mrb[35].mxu1  ;;  %14175 = vmatprep.subr.bf16.mxu1 %v15499_v19  ;;  %v1042_v29 = vcombine.high %v770_v26, %v770_v26  ;;  %v15533_v11 = vld [vmem:[%s19675_s4 + $0xe30] sm:$0xff]   ;;  %v15536_v16 = vld [vmem:[%s19675_s4 + $0xef8] sm:$0xff]  }
 0x1fb   :  { %v771_v18 = vld [vmem:[%s19676_s3 + $0x70] sm:$0xff] }
 0x1fc   :  { %v17774_v20 = vadd.f32 %v13873_v14, %v10335_v13  ;;  %14154 = vmatpush3.bf16.msra.mxu0 %v15500_v21  ;;  %v1056_v32 = vrot.slane %v1042_v29, %v16228_v35  ;;  %v15535_v13 = vld [vmem:[%s19675_s4 + $0xe78] sm:$0xff]   ;;  %v15534_v14 = vld [vmem:[%s19675_s4 + $0xeb0] sm:$0xff]   ;;  %v1066_v19 = vrot.slane %v771_v18, %v16228_v35  ;;  %v15540_v21 = vld [vmem:[%s19675_s4 + $0xf40] sm:$0xff]  }
 0x1fd   :  { %14155 = vmatprep.subr.bf16.mxu0 %v15502_v23  ;;  %14176 = vmatpush3.bf16.msra.mxu1 %v15501_v22  ;;  %v15538_v22 = vld [vmem:[%s19675_s4 + $0xeb8] sm:$0xff]  }
 0x1fe   :  { %14177 = vmatprep.subr.bf16.mxu1 %v15503_v24  ;;  %v1058_v38 = vcombine.high %v1056_v32, %v1056_v32  ;;  %v1547_v40 = vpack.c.bf16 %v1056_v32, %v1056_v32  ;;  %v1074_v23 = vcombine.high %v1066_v19, %v1066_v19  ;;  %v1549_v26 = vpack.c.bf16 %v1066_v19, %v1066_v19  ;;  %v15544_v32 = vld [vmem:[%s19675_s4 + $0xf48] sm:$0xff]   ;;  %v15575_v19 = vld [vmem:[%s19675_s4 + $0x1000] sm:$0xff]  }
 0x200   :  { %14156 = vmatpush3.bf16.msra.mxu0 %v15504_v25  ;;  %v1548_v42 = vpack.c.bf16 %v1058_v38, %v1058_v38  ;;  %v15541_v25 = vld [vmem:[%s19675_s4 + $0xfc0] sm:$0xff]   ;;  %v1550_v28 = vpack.c.bf16 %v1074_v23, %v1074_v23  ;;  %v15548_v38 = vld [vmem:[%s19675_s4 + $0xf50] sm:$0xff]  }
 0x201   :  { %14185 = vmatprep.subr.bf16.mxu0 %v15507_v30  ;;  %14178 = vmatpush3.bf16.msra.mxu1 %v15505_v27  ;;  %v15542_v27 = vld [vmem:[%s19675_s4 + $0xf00] sm:$0xff]  }
 0x202   :  { %14207 = vmatprep.subr.bf16.mxu1 %v15508_v33  ;;  %10932 = vmatprep.mubr.bf16.mxu1 %v1548_v42  ;;  %v15543_v30 = vld [vmem:[%s19675_s4 + $0xf80] sm:$0xff]   ;;  %v15552_v42 = vld [vmem:[%s19675_s4 + $0xf58] sm:$0xff]  }
 0x203   :  { %10893 = vmatmul.mubr.bf16.vlgmr.msra.gmra.mrb[60].mxu0 %v1545_v34  ;;  %v15545_v34 = vld [vmem:[%s19675_s4 + $0xfc8] sm:$0xff]  }
 0x204   :  { %14186 = vmatpush3.bf16.msra.mxu0 %v15509_v36  ;;  %10933 = vmatmul.mubr.bf16.vlgmr.msra.gmra.mrb[60].mxu1 %v1547_v40  ;;  %v15546_v36 = vld [vmem:[%s19675_s4 + $0xf08] sm:$0xff]   ;;  %v15550_v40 = vld [vmem:[%s19675_s4 + $0xf10] sm:$0xff]  }
 0x205   :  { %14187 = vmatprep.subr.bf16.mxu0 %v15511_v41  ;;  %14208 = vmatpush3.bf16.msra.mxu1 %v15510_v39  ;;  %v15549_v39 = vld [vmem:[%s19675_s4 + $0xfd0] sm:$0xff]  }
 0x206   :  { %14209 = vmatprep.subr.bf16.mxu1 %v15512_v43  ;;  %10972 = vmatprep.mubr.bf16.mxu0 %v1550_v28  ;;  %v15551_v41 = vld [vmem:[%s19675_s4 + $0xf90] sm:$0xff]   ;;  %v15553_v43 = vld [vmem:[%s19675_s4 + $0xfd8] sm:$0xff]   ;;  %v15580_v28 = vld [vmem:[%s19675_s4 + $0x1088] sm:$0xff]  }
 0x208   :  { %14188 = vmatpush3.bf16.msra.mxu0 %v15513_v44  ;;  %v15554_v44 = vld [vmem:[%s19675_s4 + $0xf18] sm:$0xff]  }
 0x209   :  { %14189 = vmatprep.subr.bf16.mxu0 %v15515_v46  ;;  %14210 = vmatpush3.bf16.msra.mxu1 %v15514_v45  ;;  %v15555_v45 = vld [vmem:[%s19675_s4 + $0xf98] sm:$0xff]   ;;  %v15556_v46 = vld [vmem:[%s19675_s4 + $0xf60] sm:$0xff]  }
 0x20a   :  { %14211 = vmatprep.subr.bf16.mxu1 %v15516_v47  ;;  %v15557_v47 = vld [vmem:[%s19675_s4 + $0xfe0] sm:$0xff]  }
 0x20c   :  { %14190 = vmatpush3.bf16.msra.mxu0 %v15517_v48  ;;  %v15558_v48 = vld [vmem:[%s19675_s4 + $0xf20] sm:$0xff]  }
 0x20d   :  { %14191 = vmatprep.subr.bf16.mxu0 %v15519_v50  ;;  %14212 = vmatpush3.bf16.msra.mxu1 %v15518_v49  ;;  %v15559_v49 = vld [vmem:[%s19675_s4 + $0xfa0] sm:$0xff]   ;;  %v15560_v50 = vld [vmem:[%s19675_s4 + $0xf68] sm:$0xff]  }
 0x20e   :  { %14213 = vmatprep.subr.bf16.mxu1 %v15520_v51 }
 0x210   :  { %14192 = vmatpush3.bf16.msra.mxu0 %v15521_v52  ;;  %v15561_v52 = vld [vmem:[%s19675_s4 + $0xfe8] sm:$0xff]  }
 0x211   :  { %14193 = vmatprep.subr.bf16.mxu0 %v15523_v54  ;;  %14214 = vmatpush3.bf16.msra.mxu1 %v15522_v53  ;;  %v15562_v54 = vld [vmem:[%s19675_s4 + $0xf28] sm:$0xff]  }
 0x212   :  { %14215 = vmatprep.subr.bf16.mxu1 %v15524_v55 }
 0x214   :  { %14194 = vmatpush3.bf16.msra.mxu0 %v15525_v56 }
 0x215   :  { %14195 = vmatprep.subr.bf16.mxu0 %v15527_v58  ;;  %14216 = vmatpush3.bf16.msra.mxu1 %v15526_v57  ;;  %v15563_v58 = vld [vmem:[%s19675_s4 + $0xfa8] sm:$0xff]  }
 0x216   :  { %v13893_v59 = vpop.f32.mrb[36].mxu0  ;;  %14217 = vmatprep.subr.bf16.mxu1 %v15528_v60 }
 0x217   :  { %v13894_v61 = vpop.f32.mrb[37].mxu0  ;;  %v13915_v63 = vpop.f32.mrb[36].mxu1 }
 0x218   :  { %v13895_v0 = vadd.f32 %v13894_v61, %v13893_v59  ;;  %v13896_v1 = vpop.f32.mrb[38].mxu0  ;;  %v13916_v2 = vpop.f32.mrb[37].mxu1  ;;  %14196 = vmatpush3.bf16.msra.mxu0 %v15529_v62  ;;  %v15564_v59 = vld [vmem:[%s19675_s4 + $0xf70] sm:$0xff]  }
 0x219   :  { %v13897_v4 = vpop.f32.mrb[39].mxu0  ;;  %v13917_v7 = vadd.f32 %v13916_v2, %v13915_v63  ;;  %v13918_v8 = vpop.f32.mrb[38].mxu1  ;;  %14197 = vmatprep.subr.bf16.mxu0 %v15531_v5  ;;  %14218 = vmatpush3.bf16.msra.mxu1 %v15530_v3  ;;  %v15565_v1 = vld [vmem:[%s19675_s4 + $0xff0] sm:$0xff]  }
 0x21a   :  { %v10415_v6 = vadd.f32 %v13895_v0, %v17774_v20  ;;  %v13919_v10 = vpop.f32.mrb[39].mxu1  ;;  %14219 = vmatprep.subr.bf16.mxu1 %v15532_v9  ;;  %v1059_v20 = vcombine.high %v771_v18, %v771_v18  ;;  %v15566_v3 = vld [vmem:[%s19675_s4 + $0xf30] sm:$0xff]   ;;  %v15570_v8 = vld [vmem:[%s19675_s4 + $0xf38] sm:$0xff]  }
 0x21b   :  { %v15567_v5 = vld [vmem:[%s19675_s4 + $0xfb0] sm:$0xff]   ;;  %v772_v9 = vld [vmem:[%s19676_s3 + $0x78] sm:$0xff] }
 0x21c   :  { %v17881_v12 = vadd.f32 %v13917_v7, %v10415_v6  ;;  %14198 = vmatpush3.bf16.msra.mxu0 %v15533_v11  ;;  %v1073_v24 = vrot.slane %v1059_v20, %v16228_v35  ;;  %v15568_v6 = vld [vmem:[%s19675_s4 + $0xf78] sm:$0xff]   ;;  %v1083_v10 = vrot.slane %v772_v9, %v16228_v35  ;;  %v1076_v11 = vcombine.high %v772_v9, %v772_v9 }
 0x21d   :  { %14199 = vmatprep.subr.bf16.mxu0 %v15535_v13  ;;  %14220 = vmatpush3.bf16.msra.mxu1 %v15534_v14  ;;  %v15569_v7 = vld [vmem:[%s19675_s4 + $0xff8] sm:$0xff]  }
 0x21e   :  { %14221 = vmatprep.subr.bf16.mxu1 %v15536_v16  ;;  %v1075_v29 = vcombine.high %v1073_v24, %v1073_v24  ;;  %v1551_v31 = vpack.c.bf16 %v1073_v24, %v1073_v24  ;;  %v15571_v13 = vld [vmem:[%s19675_s4 + $0xfb8] sm:$0xff]   ;;  %v1091_v14 = vcombine.high %v1083_v10, %v1083_v10  ;;  %v1090_v16 = vrot.slane %v1076_v11, %v16228_v35  ;;  %v15577_v24 = vld [vmem:[%s19675_s4 + $0x1048] sm:$0xff]  }
 0x21f   :  { %v1553_v18 = vpack.c.bf16 %v1083_v10, %v1083_v10  ;;  %v15608_v10 = vld [vmem:[%s19675_s4 + $0x1100] sm:$0xff]  }
 0x220   :  { %14200 = vmatpush3.bf16.msra.mxu0 %v15537_v17  ;;  %v1552_v33 = vpack.c.bf16 %v1075_v29, %v1075_v29  ;;  %v15574_v17 = vld [vmem:[%s19675_s4 + $0x10c0] sm:$0xff]   ;;  %v1554_v20 = vpack.c.bf16 %v1091_v14, %v1091_v14  ;;  %v1555_v23 = vpack.c.bf16 %v1090_v16, %v1090_v16  ;;  %v15581_v29 = vld [vmem:[%s19675_s4 + $0x1050] sm:$0xff]  }
 0x221   :  { %14229 = vmatprep.subr.bf16.mxu0 %v15540_v21  ;;  %14222 = vmatpush3.bf16.msra.mxu1 %v15538_v22  ;;  %v1092_v21 = vcombine.high %v1090_v16, %v1090_v16  ;;  %v15576_v22 = vld [vmem:[%s19675_s4 + $0x1080] sm:$0xff]   ;;  %v15610_v16 = vld [vmem:[%s19675_s4 + $0x1148] sm:$0xff]  }
 0x222   :  { %14251 = vmatprep.subr.bf16.mxu1 %v15541_v25  ;;  %11012 = vmatprep.mubr.bf16.mxu1 %v1552_v33  ;;  %v15585_v33 = vld [vmem:[%s19675_s4 + $0x1058] sm:$0xff]  }
 0x223   :  { %10973 = vmatmul.mubr.bf16.vlgmr.msra.gmra.mrb[64].mxu0 %v1549_v26  ;;  %v1556_v25 = vpack.c.bf16 %v1092_v21, %v1092_v21  ;;  %v15578_v26 = vld [vmem:[%s19675_s4 + $0x10c8] sm:$0xff]   ;;  %v15614_v21 = vld [vmem:[%s19675_s4 + $0x1150] sm:$0xff]  }
 0x224   :  { %14230 = vmatpush3.bf16.msra.mxu0 %v15542_v27  ;;  %11013 = vmatmul.mubr.bf16.vlgmr.msra.gmra.mrb[64].mxu1 %v1551_v31  ;;  %v15579_v27 = vld [vmem:[%s19675_s4 + $0x1008] sm:$0xff]   ;;  %v15583_v31 = vld [vmem:[%s19675_s4 + $0x1010] sm:$0xff]  }
 0x225   :  { %14231 = vmatprep.subr.bf16.mxu0 %v15544_v32  ;;  %14252 = vmatpush3.bf16.msra.mxu1 %v15543_v30  ;;  %v15582_v30 = vld [vmem:[%s19675_s4 + $0x10d0] sm:$0xff]  }
 0x226   :  { %14253 = vmatprep.subr.bf16.mxu1 %v15545_v34  ;;  %11052 = vmatprep.mubr.bf16.mxu0 %v1554_v20  ;;  %v15584_v32 = vld [vmem:[%s19675_s4 + $0x1090] sm:$0xff]   ;;  %v15586_v34 = vld [vmem:[%s19675_s4 + $0x10d8] sm:$0xff]   ;;  %v15613_v20 = vld [vmem:[%s19675_s4 + $0x1188] sm:$0xff]  }
 0x227   :  { %11092 = vmatprep.mubr.bf16.mxu1 %v1556_v25  ;;  %v15618_v25 = vld [vmem:[%s19675_s4 + $0x1158] sm:$0xff]  }
 0x228   :  { %14232 = vmatpush3.bf16.msra.mxu0 %v15546_v36  ;;  %v15587_v36 = vld [vmem:[%s19675_s4 + $0x1018] sm:$0xff]  }
 0x229   :  { %14233 = vmatprep.subr.bf16.mxu0 %v15548_v38  ;;  %14254 = vmatpush3.bf16.msra.mxu1 %v15547_v37  ;;  %v15588_v37 = vld [vmem:[%s19675_s4 + $0x1098] sm:$0xff]   ;;  %v15589_v38 = vld [vmem:[%s19675_s4 + $0x1060] sm:$0xff]  }
 0x22a   :  { %14255 = vmatprep.subr.bf16.mxu1 %v15549_v39  ;;  %v15590_v39 = vld [vmem:[%s19675_s4 + $0x10e0] sm:$0xff]  }
 0x22c   :  { %14234 = vmatpush3.bf16.msra.mxu0 %v15550_v40  ;;  %v15591_v40 = vld [vmem:[%s19675_s4 + $0x1020] sm:$0xff]  }
 0x22d   :  { %14235 = vmatprep.subr.bf16.mxu0 %v15552_v42  ;;  %14256 = vmatpush3.bf16.msra.mxu1 %v15551_v41  ;;  %v15592_v41 = vld [vmem:[%s19675_s4 + $0x10a0] sm:$0xff]   ;;  %v15593_v42 = vld [vmem:[%s19675_s4 + $0x1068] sm:$0xff]  }
 0x22e   :  { %14257 = vmatprep.subr.bf16.mxu1 %v15553_v43 }
 0x230   :  { %14236 = vmatpush3.bf16.msra.mxu0 %v15554_v44  ;;  %v15594_v44 = vld [vmem:[%s19675_s4 + $0x10e8] sm:$0xff]  }
 0x231   :  { %14237 = vmatprep.subr.bf16.mxu0 %v15556_v46  ;;  %14258 = vmatpush3.bf16.msra.mxu1 %v15555_v45  ;;  %v15595_v46 = vld [vmem:[%s19675_s4 + $0x1028] sm:$0xff]  }
 0x232   :  { %14259 = vmatprep.subr.bf16.mxu1 %v15557_v47 }
 0x234   :  { %14238 = vmatpush3.bf16.msra.mxu0 %v15558_v48 }
 0x235   :  { %14239 = vmatprep.subr.bf16.mxu0 %v15560_v50  ;;  %14260 = vmatpush3.bf16.msra.mxu1 %v15559_v49  ;;  %v15596_v50 = vld [vmem:[%s19675_s4 + $0x10a8] sm:$0xff]  }
 0x236   :  { %v13937_v51 = vpop.f32.mrb[40].mxu0  ;;  %14261 = vmatprep.subr.bf16.mxu1 %v15561_v52 }
 0x237   :  { %v13938_v53 = vpop.f32.mrb[41].mxu0  ;;  %v13959_v55 = vpop.f32.mrb[40].mxu1 }
 0x238   :  { %v13939_v56 = vadd.f32 %v13938_v53, %v13937_v51  ;;  %v13940_v57 = vpop.f32.mrb[42].mxu0  ;;  %v13960_v60 = vpop.f32.mrb[41].mxu1  ;;  %14240 = vmatpush3.bf16.msra.mxu0 %v15562_v54  ;;  %v15597_v51 = vld [vmem:[%s19675_s4 + $0x1070] sm:$0xff]  }
 0x239   :  { %v13941_v61 = vpop.f32.mrb[43].mxu0  ;;  %v13961_v63 = vadd.f32 %v13960_v60, %v13959_v55  ;;  %v13962_v0 = vpop.f32.mrb[42].mxu1  ;;  %14241 = vmatprep.subr.bf16.mxu0 %v15564_v59  ;;  %14262 = vmatpush3.bf16.msra.mxu1 %v15563_v58  ;;  %v15598_v57 = vld [vmem:[%s19675_s4 + $0x10f0] sm:$0xff]  }
 0x23a   :  { %v10495_v62 = vadd.f32 %v13939_v56, %v17881_v12  ;;  %v13963_v2 = vpop.f32.mrb[43].mxu1  ;;  %14263 = vmatprep.subr.bf16.mxu1 %v15565_v1  ;;  %v15573_v12 = vld [vmem:[%s19675_s4 + $0x1040] sm:$0xff]   ;;  %v15599_v59 = vld [vmem:[%s19675_s4 + $0x1030] sm:$0xff]   ;;  %v15603_v0 = vld [vmem:[%s19675_s4 + $0x1038] sm:$0xff]  }
 0x23b   :  { %v15600_v61 = vld [vmem:[%s19675_s4 + $0x10b0] sm:$0xff]   ;;  %v773_v1 = vld [vmem:[%s19676_s3 + $0x80] sm:$0xff]  ;;  %v15604_v2 = vld [vmem:[%s19675_s4 + $0x10b8] sm:$0xff]  }
 0x23c   :  { %v17985_v4 = vadd.f32 %v13961_v63, %v10495_v62  ;;  %14242 = vmatpush3.bf16.msra.mxu0 %v15566_v3  ;;  %v15601_v62 = vld [vmem:[%s19675_s4 + $0x1078] sm:$0xff]   ;;  %v1100_v3 = vrot.slane %v773_v1, %v16228_v35 }
 0x23d   :  { %14243 = vmatprep.subr.bf16.mxu0 %v15568_v6  ;;  %14264 = vmatpush3.bf16.msra.mxu1 %v15567_v5  ;;  %v15602_v63 = vld [vmem:[%s19675_s4 + $0x10f8] sm:$0xff]   ;;  %v15606_v5 = vld [vmem:[%s19675_s4 + $0x1140] sm:$0xff]  }
 0x23e   :  { %14265 = vmatprep.subr.bf16.mxu1 %v15569_v7  ;;  %v1108_v6 = vcombine.high %v1100_v3, %v1100_v3  ;;  %v1557_v9 = vpack.c.bf16 %v1100_v3, %v1100_v3 }
 0x240   :  { %14244 = vmatpush3.bf16.msra.mxu0 %v15570_v8  ;;  %v15607_v8 = vld [vmem:[%s19675_s4 + $0x11c0] sm:$0xff]   ;;  %v1558_v11 = vpack.c.bf16 %v1108_v6, %v1108_v6 }
 0x241   :  { %14273 = vmatprep.subr.bf16.mxu0 %v15573_v12  ;;  %14266 = vmatpush3.bf16.msra.mxu1 %v15571_v13  ;;  %v15609_v13 = vld [vmem:[%s19675_s4 + $0x1180] sm:$0xff]  }
 0x242   :  { %14295 = vmatprep.subr.bf16.mxu1 %v15574_v17 }
 0x243   :  { %11053 = vmatmul.mubr.bf16.vlgmr.msra.gmra.mrb[68].mxu0 %v1553_v18  ;;  %v15611_v18 = vld [vmem:[%s19675_s4 + $0x11c8] sm:$0xff]  }
 0x244   :  { %14274 = vmatpush3.bf16.msra.mxu0 %v15575_v19  ;;  %11093 = vmatmul.mubr.bf16.vlgmr.msra.gmra.mrb[68].mxu1 %v1555_v23  ;;  %v15612_v19 = vld [vmem:[%s19675_s4 + $0x1108] sm:$0xff]   ;;  %v15616_v23 = vld [vmem:[%s19675_s4 + $0x1110] sm:$0xff]  }
 0x245   :  { %14275 = vmatprep.subr.bf16.mxu0 %v15577_v24  ;;  %14296 = vmatpush3.bf16.msra.mxu1 %v15576_v22  ;;  %v15615_v22 = vld [vmem:[%s19675_s4 + $0x11d0] sm:$0xff]  }
 0x246   :  { %14297 = vmatprep.subr.bf16.mxu1 %v15578_v26  ;;  %11132 = vmatprep.mubr.bf16.mxu0 %v1558_v11  ;;  %v15617_v24 = vld [vmem:[%s19675_s4 + $0x1190] sm:$0xff]   ;;  %v15619_v26 = vld [vmem:[%s19675_s4 + $0x11d8] sm:$0xff]   ;;  %v15646_v11 = vld [vmem:[%s19675_s4 + $0x1288] sm:$0xff]  }
 0x248   :  { %14276 = vmatpush3.bf16.msra.mxu0 %v15579_v27  ;;  %v15620_v27 = vld [vmem:[%s19675_s4 + $0x1118] sm:$0xff]  }
 0x249   :  { %14277 = vmatprep.subr.bf16.mxu0 %v15581_v29  ;;  %14298 = vmatpush3.bf16.msra.mxu1 %v15580_v28  ;;  %v15621_v28 = vld [vmem:[%s19675_s4 + $0x1198] sm:$0xff]   ;;  %v15622_v29 = vld [vmem:[%s19675_s4 + $0x1160] sm:$0xff]  }
 0x24a   :  { %14299 = vmatprep.subr.bf16.mxu1 %v15582_v30  ;;  %v15623_v30 = vld [vmem:[%s19675_s4 + $0x11e0] sm:$0xff]  }
 0x24c   :  { %14278 = vmatpush3.bf16.msra.mxu0 %v15583_v31  ;;  %v15624_v31 = vld [vmem:[%s19675_s4 + $0x1120] sm:$0xff]  }
 0x24d   :  { %14279 = vmatprep.subr.bf16.mxu0 %v15585_v33  ;;  %14300 = vmatpush3.bf16.msra.mxu1 %v15584_v32  ;;  %v15625_v32 = vld [vmem:[%s19675_s4 + $0x11a0] sm:$0xff]   ;;  %v15626_v33 = vld [vmem:[%s19675_s4 + $0x1168] sm:$0xff]  }
 0x24e   :  { %14301 = vmatprep.subr.bf16.mxu1 %v15586_v34 }
 0x250   :  { %14280 = vmatpush3.bf16.msra.mxu0 %v15587_v36  ;;  %v15627_v36 = vld [vmem:[%s19675_s4 + $0x11e8] sm:$0xff]  }
 0x251   :  { %14281 = vmatprep.subr.bf16.mxu0 %v15589_v38  ;;  %14302 = vmatpush3.bf16.msra.mxu1 %v15588_v37  ;;  %v15628_v38 = vld [vmem:[%s19675_s4 + $0x1128] sm:$0xff]  }
 0x252   :  { %14303 = vmatprep.subr.bf16.mxu1 %v15590_v39 }
 0x254   :  { %14282 = vmatpush3.bf16.msra.mxu0 %v15591_v40 }
 0x255   :  { %14283 = vmatprep.subr.bf16.mxu0 %v15593_v42  ;;  %14304 = vmatpush3.bf16.msra.mxu1 %v15592_v41 }
 0x256   :  { %v13981_v43 = vpop.f32.mrb[44].mxu0  ;;  %14305 = vmatprep.subr.bf16.mxu1 %v15594_v44 }
 0x257   :  { %v13982_v45 = vpop.f32.mrb[45].mxu0  ;;  %v14003_v47 = vpop.f32.mrb[44].mxu1 }
 0x258   :  { %v13983_v48 = vadd.f32 %v13982_v45, %v13981_v43  ;;  %v13984_v49 = vpop.f32.mrb[46].mxu0  ;;  %v14004_v52 = vpop.f32.mrb[45].mxu1  ;;  %14284 = vmatpush3.bf16.msra.mxu0 %v15595_v46  ;;  %v15629_v43 = vld [vmem:[%s19675_s4 + $0x11a8] sm:$0xff]   ;;  %v15630_v45 = vld [vmem:[%s19675_s4 + $0x1170] sm:$0xff]  }
 0x259   :  { %v13985_v53 = vpop.f32.mrb[47].mxu0  ;;  %v14005_v55 = vadd.f32 %v14004_v52, %v14003_v47  ;;  %v14006_v56 = vpop.f32.mrb[46].mxu1  ;;  %14285 = vmatprep.subr.bf16.mxu0 %v15597_v51  ;;  %14306 = vmatpush3.bf16.msra.mxu1 %v15596_v50  ;;  %v15631_v49 = vld [vmem:[%s19675_s4 + $0x11f0] sm:$0xff]  }
 0x25a   :  { %v10575_v54 = vadd.f32 %v13983_v48, %v17985_v4  ;;  %v14007_v58 = vpop.f32.mrb[47].mxu1  ;;  %14307 = vmatprep.subr.bf16.mxu1 %v15598_v57  ;;  %v1093_v4 = vcombine.high %v773_v1, %v773_v1  ;;  %v15632_v51 = vld [vmem:[%s19675_s4 + $0x1130] sm:$0xff]   ;;  %v15634_v53 = vld [vmem:[%s19675_s4 + $0x1178] sm:$0xff]   ;;  %v774_v57 = vld [vmem:[%s19676_s3 + $0x88] sm:$0xff] }
 0x25b   :  { %v15636_v56 = vld [vmem:[%s19675_s4 + $0x1138] sm:$0xff]   ;;  %v1117_v58 = vrot.slane %v774_v57, %v16228_v35 }
 0x25c   :  { %v18089_v60 = vadd.f32 %v14005_v55, %v10575_v54  ;;  %14286 = vmatpush3.bf16.msra.mxu0 %v15599_v59  ;;  %v1107_v7 = vrot.slane %v1093_v4, %v16228_v35  ;;  %v15633_v54 = vld [vmem:[%s19675_s4 + $0x11b0] sm:$0xff]   ;;  %v15635_v55 = vld [vmem:[%s19675_s4 + $0x11f8] sm:$0xff]   ;;  %v1110_v59 = vcombine.high %v774_v57, %v774_v57 }
 0x25d   :  { %14287 = vmatprep.subr.bf16.mxu0 %v15601_v62  ;;  %14308 = vmatpush3.bf16.msra.mxu1 %v15600_v61  ;;  %v15637_v61 = vld [vmem:[%s19675_s4 + $0x11b8] sm:$0xff]   ;;  %v1125_v62 = vcombine.high %v1117_v58, %v1117_v58  ;;  %v1561_v1 = vpack.c.bf16 %v1117_v58, %v1117_v58  ;;  %v15674_v58 = vld [vmem:[%s19675_s4 + $0x1300] sm:$0xff]  }
 0x25e   :  { %14309 = vmatprep.subr.bf16.mxu1 %v15602_v63  ;;  %v1109_v12 = vcombine.high %v1107_v7, %v1107_v7  ;;  %v1559_v14 = vpack.c.bf16 %v1107_v7, %v1107_v7  ;;  %v1124_v63 = vrot.slane %v1110_v59, %v16228_v35  ;;  %v15643_v7 = vld [vmem:[%s19675_s4 + $0x1248] sm:$0xff]  }
 0x25f   :  { %v1562_v3 = vpack.c.bf16 %v1125_v62, %v1125_v62 }
 0x260   :  { %14288 = vmatpush3.bf16.msra.mxu0 %v15603_v0  ;;  %v1560_v17 = vpack.c.bf16 %v1109_v12, %v1109_v12  ;;  %v15640_v0 = vld [vmem:[%s19675_s4 + $0x12c0] sm:$0xff]   ;;  %v1126_v4 = vcombine.high %v1124_v63, %v1124_v63  ;;  %v1563_v6 = vpack.c.bf16 %v1124_v63, %v1124_v63  ;;  %v15647_v12 = vld [vmem:[%s19675_s4 + $0x1250] sm:$0xff]   ;;  %v15676_v63 = vld [vmem:[%s19675_s4 + $0x1348] sm:$0xff]  }
 0x261   :  { %14317 = vmatprep.subr.bf16.mxu0 %v15606_v5  ;;  %14310 = vmatpush3.bf16.msra.mxu1 %v15604_v2  ;;  %v15641_v2 = vld [vmem:[%s19675_s4 + $0x1200] sm:$0xff]  }
 0x262   :  { %14339 = vmatprep.subr.bf16.mxu1 %v15607_v8  ;;  %11172 = vmatprep.mubr.bf16.mxu1 %v1560_v17  ;;  %v15642_v5 = vld [vmem:[%s19675_s4 + $0x1280] sm:$0xff]   ;;  %v1564_v8 = vpack.c.bf16 %v1126_v4, %v1126_v4  ;;  %v15651_v17 = vld [vmem:[%s19675_s4 + $0x1258] sm:$0xff]   ;;  %v15680_v4 = vld [vmem:[%s19675_s4 + $0x1350] sm:$0xff]  }
 0x263   :  { %11133 = vmatmul.mubr.bf16.vlgmr.msra.gmra.mrb[72].mxu0 %v1557_v9  ;;  %v15644_v9 = vld [vmem:[%s19675_s4 + $0x12c8] sm:$0xff]  }
 0x264   :  { %14318 = vmatpush3.bf16.msra.mxu0 %v15608_v10  ;;  %11173 = vmatmul.mubr.bf16.vlgmr.msra.gmra.mrb[72].mxu1 %v1559_v14  ;;  %v15645_v10 = vld [vmem:[%s19675_s4 + $0x1208] sm:$0xff]   ;;  %v15649_v14 = vld [vmem:[%s19675_s4 + $0x1210] sm:$0xff]  }
 0x265   :  { %14319 = vmatprep.subr.bf16.mxu0 %v15610_v16  ;;  %14340 = vmatpush3.bf16.msra.mxu1 %v15609_v13  ;;  %v15648_v13 = vld [vmem:[%s19675_s4 + $0x12d0] sm:$0xff]  }
 0x266   :  { %14341 = vmatprep.subr.bf16.mxu1 %v15611_v18  ;;  %11212 = vmatprep.mubr.bf16.mxu0 %v1562_v3  ;;  %v15650_v16 = vld [vmem:[%s19675_s4 + $0x1290] sm:$0xff]   ;;  %v15652_v18 = vld [vmem:[%s19675_s4 + $0x12d8] sm:$0xff]   ;;  %v15679_v3 = vld [vmem:[%s19675_s4 + $0x1388] sm:$0xff]  }
 0x267   :  { %11252 = vmatprep.mubr.bf16.mxu1 %v1564_v8  ;;  %v15684_v8 = vld [vmem:[%s19675_s4 + $0x1358] sm:$0xff]  }
 0x268   :  { %14320 = vmatpush3.bf16.msra.mxu0 %v15612_v19  ;;  %v15653_v19 = vld [vmem:[%s19675_s4 + $0x1218] sm:$0xff]  }
 0x269   :  { %14321 = vmatprep.subr.bf16.mxu0 %v15614_v21  ;;  %14342 = vmatpush3.bf16.msra.mxu1 %v15613_v20  ;;  %v15654_v20 = vld [vmem:[%s19675_s4 + $0x1298] sm:$0xff]   ;;  %v15655_v21 = vld [vmem:[%s19675_s4 + $0x1260] sm:$0xff]  }
 0x26a   :  { %14343 = vmatprep.subr.bf16.mxu1 %v15615_v22  ;;  %v15656_v22 = vld [vmem:[%s19675_s4 + $0x12e0] sm:$0xff]  }
 0x26c   :  { %14322 = vmatpush3.bf16.msra.mxu0 %v15616_v23  ;;  %v15657_v23 = vld [vmem:[%s19675_s4 + $0x1220] sm:$0xff]  }
 0x26d   :  { %14323 = vmatprep.subr.bf16.mxu0 %v15618_v25  ;;  %14344 = vmatpush3.bf16.msra.mxu1 %v15617_v24  ;;  %v15658_v24 = vld [vmem:[%s19675_s4 + $0x12a0] sm:$0xff]   ;;  %v15659_v25 = vld [vmem:[%s19675_s4 + $0x1268] sm:$0xff]  }
 0x26e   :  { %14345 = vmatprep.subr.bf16.mxu1 %v15619_v26 }
 0x270   :  { %14324 = vmatpush3.bf16.msra.mxu0 %v15620_v27  ;;  %v15660_v27 = vld [vmem:[%s19675_s4 + $0x12e8] sm:$0xff]  }
 0x271   :  { %14325 = vmatprep.subr.bf16.mxu0 %v15622_v29  ;;  %14346 = vmatpush3.bf16.msra.mxu1 %v15621_v28  ;;  %v15661_v29 = vld [vmem:[%s19675_s4 + $0x1228] sm:$0xff]  }
 0x272   :  { %14347 = vmatprep.subr.bf16.mxu1 %v15623_v30 }
 0x274   :  { %14326 = vmatpush3.bf16.msra.mxu0 %v15624_v31 }
 0x275   :  { %14327 = vmatprep.subr.bf16.mxu0 %v15626_v33  ;;  %14348 = vmatpush3.bf16.msra.mxu1 %v15625_v32  ;;  %v15662_v33 = vld [vmem:[%s19675_s4 + $0x12a8] sm:$0xff]  }
 0x276   :  { %v14025_v34 = vpop.f32.mrb[48].mxu0  ;;  %14349 = vmatprep.subr.bf16.mxu1 %v15627_v36 }
 0x277   :  { %v14026_v37 = vpop.f32.mrb[49].mxu0  ;;  %v14047_v39 = vpop.f32.mrb[48].mxu1 }
 0x278   :  { %v14027_v40 = vadd.f32 %v14026_v37, %v14025_v34  ;;  %v14028_v41 = vpop.f32.mrb[50].mxu0  ;;  %v14048_v42 = vpop.f32.mrb[49].mxu1  ;;  %14328 = vmatpush3.bf16.msra.mxu0 %v15628_v38  ;;  %v15663_v34 = vld [vmem:[%s19675_s4 + $0x1270] sm:$0xff]  }
 0x279   :  { %v14029_v44 = vpop.f32.mrb[51].mxu0  ;;  %v14049_v47 = vadd.f32 %v14048_v42, %v14047_v39  ;;  %v14050_v48 = vpop.f32.mrb[50].mxu1  ;;  %14329 = vmatprep.subr.bf16.mxu0 %v15630_v45  ;;  %14350 = vmatpush3.bf16.msra.mxu1 %v15629_v43  ;;  %v15664_v41 = vld [vmem:[%s19675_s4 + $0x12f0] sm:$0xff]  }
 0x27a   :  { %v10655_v46 = vadd.f32 %v14027_v40, %v18089_v60  ;;  %v14051_v50 = vpop.f32.mrb[51].mxu1  ;;  %14351 = vmatprep.subr.bf16.mxu1 %v15631_v49  ;;  %v15639_v60 = vld [vmem:[%s19675_s4 + $0x1240] sm:$0xff]   ;;  %v15665_v43 = vld [vmem:[%s19675_s4 + $0x1230] sm:$0xff]   ;;  %v15669_v48 = vld [vmem:[%s19675_s4 + $0x1238] sm:$0xff]  }
 0x27b   :  { %v15666_v45 = vld [vmem:[%s19675_s4 + $0x12b0] sm:$0xff]  }
 0x27c   :  { %v18193_v52 = vadd.f32 %v14049_v47, %v10655_v46  ;;  %14330 = vmatpush3.bf16.msra.mxu0 %v15632_v51  ;;  %v15667_v46 = vld [vmem:[%s19675_s4 + $0x1278] sm:$0xff]   ;;  %v775_v49 = vld [vmem:[%s19676_s3 + $0x90] sm:$0xff] }
 0x27d   :  { %14331 = vmatprep.subr.bf16.mxu0 %v15634_v53  ;;  %14352 = vmatpush3.bf16.msra.mxu1 %v15633_v54  ;;  %v15668_v47 = vld [vmem:[%s19675_s4 + $0x12f8] sm:$0xff]   ;;  %v1134_v50 = vrot.slane %v775_v49, %v16228_v35  ;;  %v1127_v51 = vcombine.high %v775_v49, %v775_v49 }
 0x27e   :  { %14353 = vmatprep.subr.bf16.mxu1 %v15635_v55  ;;  %v15670_v53 = vld [vmem:[%s19675_s4 + $0x12b8] sm:$0xff]  }
 0x27f   :  { %v1142_v54 = vcombine.high %v1134_v50, %v1134_v50  ;;  %v1141_v55 = vrot.slane %v1127_v51, %v16228_v35  ;;  %v1565_v57 = vpack.c.bf16 %v1134_v50, %v1134_v50  ;;  %v15707_v50 = vld [vmem:[%s19675_s4 + $0x1400] sm:$0xff]  }
 0x280   :  { %14332 = vmatpush3.bf16.msra.mxu0 %v15636_v56  ;;  %v15673_v56 = vld [vmem:[%s19675_s4 + $0x13c0] sm:$0xff]  }
 0x281   :  { %14361 = vmatprep.subr.bf16.mxu0 %v15639_v60  ;;  %14354 = vmatpush3.bf16.msra.mxu1 %v15637_v61  ;;  %v1566_v59 = vpack.c.bf16 %v1142_v54, %v1142_v54  ;;  %v1143_v60 = vcombine.high %v1141_v55, %v1141_v55  ;;  %v15675_v61 = vld [vmem:[%s19675_s4 + $0x1380] sm:$0xff]   ;;  %v1567_v62 = vpack.c.bf16 %v1141_v55, %v1141_v55  ;;  %v15709_v55 = vld [vmem:[%s19675_s4 + $0x1448] sm:$0xff]  }
 0x282   :  { %14383 = vmatprep.subr.bf16.mxu1 %v15640_v0 }
 0x283   :  { %11213 = vmatmul.mubr.bf16.vlgmr.msra.gmra.mrb[76].mxu0 %v1561_v1  ;;  %v1568_v0 = vpack.c.bf16 %v1143_v60, %v1143_v60  ;;  %v15677_v1 = vld [vmem:[%s19675_s4 + $0x13c8] sm:$0xff]   ;;  %v15713_v60 = vld [vmem:[%s19675_s4 + $0x1450] sm:$0xff]  }
 0x284   :  { %14362 = vmatpush3.bf16.msra.mxu0 %v15641_v2  ;;  %11253 = vmatmul.mubr.bf16.vlgmr.msra.gmra.mrb[76].mxu1 %v1563_v6  ;;  %v15678_v2 = vld [vmem:[%s19675_s4 + $0x1308] sm:$0xff]   ;;  %v15682_v6 = vld [vmem:[%s19675_s4 + $0x1310] sm:$0xff]  }
 0x285   :  { %14363 = vmatprep.subr.bf16.mxu0 %v15643_v7  ;;  %14384 = vmatpush3.bf16.msra.mxu1 %v15642_v5  ;;  %v15681_v5 = vld [vmem:[%s19675_s4 + $0x13d0] sm:$0xff]  }
 0x286   :  { %14385 = vmatprep.subr.bf16.mxu1 %v15644_v9  ;;  %11292 = vmatprep.mubr.bf16.mxu0 %v1566_v59  ;;  %v15683_v7 = vld [vmem:[%s19675_s4 + $0x1390] sm:$0xff]   ;;  %v15685_v9 = vld [vmem:[%s19675_s4 + $0x13d8] sm:$0xff]   ;;  %v15712_v59 = vld [vmem:[%s19675_s4 + $0x1488] sm:$0xff]  }
 0x287   :  { %11332 = vmatprep.mubr.bf16.mxu1 %v1568_v0  ;;  %v15717_v0 = vld [vmem:[%s19675_s4 + $0x1458] sm:$0xff]  }
 0x288   :  { %14364 = vmatpush3.bf16.msra.mxu0 %v15645_v10  ;;  %v15686_v10 = vld [vmem:[%s19675_s4 + $0x1318] sm:$0xff]  }
 0x289   :  { %14365 = vmatprep.subr.bf16.mxu0 %v15647_v12  ;;  %14386 = vmatpush3.bf16.msra.mxu1 %v15646_v11  ;;  %v15687_v11 = vld [vmem:[%s19675_s4 + $0x1398] sm:$0xff]   ;;  %v15688_v12 = vld [vmem:[%s19675_s4 + $0x1360] sm:$0xff]  }
 0x28a   :  { %14387 = vmatprep.subr.bf16.mxu1 %v15648_v13  ;;  %v15689_v13 = vld [vmem:[%s19675_s4 + $0x13e0] sm:$0xff]  }
 0x28c   :  { %14366 = vmatpush3.bf16.msra.mxu0 %v15649_v14  ;;  %v15690_v14 = vld [vmem:[%s19675_s4 + $0x1320] sm:$0xff]  }
 0x28d   :  { %14367 = vmatprep.subr.bf16.mxu0 %v15651_v17  ;;  %14388 = vmatpush3.bf16.msra.mxu1 %v15650_v16  ;;  %v15691_v16 = vld [vmem:[%s19675_s4 + $0x13a0] sm:$0xff]   ;;  %v15692_v17 = vld [vmem:[%s19675_s4 + $0x1368] sm:$0xff]  }
 0x28e   :  { %14389 = vmatprep.subr.bf16.mxu1 %v15652_v18 }
 0x290   :  { %14368 = vmatpush3.bf16.msra.mxu0 %v15653_v19  ;;  %v15693_v19 = vld [vmem:[%s19675_s4 + $0x13e8] sm:$0xff]  }
 0x291   :  { %14369 = vmatprep.subr.bf16.mxu0 %v15655_v21  ;;  %14390 = vmatpush3.bf16.msra.mxu1 %v15654_v20  ;;  %v15694_v21 = vld [vmem:[%s19675_s4 + $0x1328] sm:$0xff]  }
 0x292   :  { %14391 = vmatprep.subr.bf16.mxu1 %v15656_v22 }
 0x294   :  { %14370 = vmatpush3.bf16.msra.mxu0 %v15657_v23 }
 0x295   :  { %14371 = vmatprep.subr.bf16.mxu0 %v15659_v25  ;;  %14392 = vmatpush3.bf16.msra.mxu1 %v15658_v24  ;;  %v15695_v25 = vld [vmem:[%s19675_s4 + $0x13a8] sm:$0xff]  }
 0x296   :  { %v14069_v26 = vpop.f32.mrb[52].mxu0  ;;  %14393 = vmatprep.subr.bf16.mxu1 %v15660_v27 }
 0x297   :  { %v14070_v28 = vpop.f32.mrb[53].mxu0  ;;  %v14091_v30 = vpop.f32.mrb[52].mxu1 }
 0x298   :  { %v14071_v31 = vadd.f32 %v14070_v28, %v14069_v26  ;;  %v14072_v32 = vpop.f32.mrb[54].mxu0  ;;  %v14092_v36 = vpop.f32.mrb[53].mxu1  ;;  %14372 = vmatpush3.bf16.msra.mxu0 %v15661_v29  ;;  %v15696_v26 = vld [vmem:[%s19675_s4 + $0x1370] sm:$0xff]  }
 0x299   :  { %v14073_v37 = vpop.f32.mrb[55].mxu0  ;;  %v14093_v39 = vadd.f32 %v14092_v36, %v14091_v30  ;;  %v14094_v40 = vpop.f32.mrb[54].mxu1  ;;  %14373 = vmatprep.subr.bf16.mxu0 %v15663_v34  ;;  %14394 = vmatpush3.bf16.msra.mxu1 %v15662_v33  ;;  %v15697_v32 = vld [vmem:[%s19675_s4 + $0x13f0] sm:$0xff]  }
 0x29a   :  { %v10735_v38 = vadd.f32 %v14071_v31, %v18193_v52  ;;  %v14095_v42 = vpop.f32.mrb[55].mxu1  ;;  %14395 = vmatprep.subr.bf16.mxu1 %v15664_v41  ;;  %v15672_v52 = vld [vmem:[%s19675_s4 + $0x1340] sm:$0xff]   ;;  %v15698_v34 = vld [vmem:[%s19675_s4 + $0x1330] sm:$0xff]   ;;  %v15702_v40 = vld [vmem:[%s19675_s4 + $0x1338] sm:$0xff]  }
 0x29b   :  { %v15699_v37 = vld [vmem:[%s19675_s4 + $0x13b0] sm:$0xff]   ;;  %v776_v41 = vld [vmem:[%s19676_s3 + $0x98] sm:$0xff] }
 0x29c   :  { %v18297_v44 = vadd.f32 %v14093_v39, %v10735_v38  ;;  %14374 = vmatpush3.bf16.msra.mxu0 %v15665_v43  ;;  %v15700_v38 = vld [vmem:[%s19675_s4 + $0x1378] sm:$0xff]   ;;  %v1151_v43 = vrot.slane %v776_v41, %v16228_v35 }
 0x29d   :  { %14375 = vmatprep.subr.bf16.mxu0 %v15667_v46  ;;  %14396 = vmatpush3.bf16.msra.mxu1 %v15666_v45  ;;  %v15701_v39 = vld [vmem:[%s19675_s4 + $0x13f8] sm:$0xff]   ;;  %v15705_v45 = vld [vmem:[%s19675_s4 + $0x1440] sm:$0xff]  }
 0x29e   :  { %14397 = vmatprep.subr.bf16.mxu1 %v15668_v47  ;;  %v15703_v42 = vld [vmem:[%s19675_s4 + $0x13b8] sm:$0xff]   ;;  %v1159_v46 = vcombine.high %v1151_v43, %v1151_v43  ;;  %v1569_v49 = vpack.c.bf16 %v1151_v43, %v1151_v43 }
 0x2a0   :  { %14376 = vmatpush3.bf16.msra.mxu0 %v15669_v48  ;;  %v15706_v48 = vld [vmem:[%s19675_s4 + $0x14c0] sm:$0xff]   ;;  %v1570_v51 = vpack.c.bf16 %v1159_v46, %v1159_v46 }
 0x2a1   :  { %14405 = vmatprep.subr.bf16.mxu0 %v15672_v52  ;;  %14398 = vmatpush3.bf16.msra.mxu1 %v15670_v53  ;;  %v15708_v53 = vld [vmem:[%s19675_s4 + $0x1480] sm:$0xff]  }
 0x2a2   :  { %14427 = vmatprep.subr.bf16.mxu1 %v15673_v56 }
 0x2a3   :  { %11293 = vmatmul.mubr.bf16.vlgmr.msra.gmra.mrb[80].mxu0 %v1565_v57  ;;  %v15710_v57 = vld [vmem:[%s19675_s4 + $0x14c8] sm:$0xff]  }
 0x2a4   :  { %14406 = vmatpush3.bf16.msra.mxu0 %v15674_v58  ;;  %11333 = vmatmul.mubr.bf16.vlgmr.msra.gmra.mrb[80].mxu1 %v1567_v62  ;;  %v15711_v58 = vld [vmem:[%s19675_s4 + $0x1408] sm:$0xff]   ;;  %v15715_v62 = vld [vmem:[%s19675_s4 + $0x1410] sm:$0xff]  }
 0x2a5   :  { %14407 = vmatprep.subr.bf16.mxu0 %v15676_v63  ;;  %14428 = vmatpush3.bf16.msra.mxu1 %v15675_v61  ;;  %v15714_v61 = vld [vmem:[%s19675_s4 + $0x14d0] sm:$0xff]  }
 0x2a6   :  { %14429 = vmatprep.subr.bf16.mxu1 %v15677_v1  ;;  %11372 = vmatprep.mubr.bf16.mxu0 %v1570_v51  ;;  %v15716_v63 = vld [vmem:[%s19675_s4 + $0x1490] sm:$0xff]   ;;  %v15718_v1 = vld [vmem:[%s19675_s4 + $0x14d8] sm:$0xff]   ;;  %v15745_v51 = vld [vmem:[%s19675_s4 + $0x1588] sm:$0xff]  }
 0x2a8   :  { %14408 = vmatpush3.bf16.msra.mxu0 %v15678_v2  ;;  %v15719_v2 = vld [vmem:[%s19675_s4 + $0x1418] sm:$0xff]  }
 0x2a9   :  { %14409 = vmatprep.subr.bf16.mxu0 %v15680_v4  ;;  %14430 = vmatpush3.bf16.msra.mxu1 %v15679_v3  ;;  %v15720_v3 = vld [vmem:[%s19675_s4 + $0x1498] sm:$0xff]   ;;  %v15721_v4 = vld [vmem:[%s19675_s4 + $0x1460] sm:$0xff]  }
 0x2aa   :  { %14431 = vmatprep.subr.bf16.mxu1 %v15681_v5  ;;  %v15722_v5 = vld [vmem:[%s19675_s4 + $0x14e0] sm:$0xff]  }
 0x2ac   :  { %14410 = vmatpush3.bf16.msra.mxu0 %v15682_v6  ;;  %v15723_v6 = vld [vmem:[%s19675_s4 + $0x1420] sm:$0xff]  }
 0x2ad   :  { %14411 = vmatprep.subr.bf16.mxu0 %v15684_v8  ;;  %14432 = vmatpush3.bf16.msra.mxu1 %v15683_v7  ;;  %v15724_v7 = vld [vmem:[%s19675_s4 + $0x14a0] sm:$0xff]   ;;  %v15725_v8 = vld [vmem:[%s19675_s4 + $0x1468] sm:$0xff]  }
 0x2ae   :  { %14433 = vmatprep.subr.bf16.mxu1 %v15685_v9 }
 0x2b0   :  { %14412 = vmatpush3.bf16.msra.mxu0 %v15686_v10  ;;  %v15726_v10 = vld [vmem:[%s19675_s4 + $0x14e8] sm:$0xff]  }
 0x2b1   :  { %14413 = vmatprep.subr.bf16.mxu0 %v15688_v12  ;;  %14434 = vmatpush3.bf16.msra.mxu1 %v15687_v11  ;;  %v15727_v12 = vld [vmem:[%s19675_s4 + $0x1428] sm:$0xff]  }
 0x2b2   :  { %14435 = vmatprep.subr.bf16.mxu1 %v15689_v13 }
 0x2b4   :  { %14414 = vmatpush3.bf16.msra.mxu0 %v15690_v14 }
 0x2b5   :  { %14415 = vmatprep.subr.bf16.mxu0 %v15692_v17  ;;  %14436 = vmatpush3.bf16.msra.mxu1 %v15691_v16 }
 0x2b6   :  { %v14113_v18 = vpop.f32.mrb[56].mxu0  ;;  %14437 = vmatprep.subr.bf16.mxu1 %v15693_v19 }
 0x2b7   :  { %v14114_v20 = vpop.f32.mrb[57].mxu0  ;;  %v14135_v22 = vpop.f32.mrb[56].mxu1 }
 0x2b8   :  { %v14115_v23 = vadd.f32 %v14114_v20, %v14113_v18  ;;  %v14116_v24 = vpop.f32.mrb[58].mxu0  ;;  %v14136_v27 = vpop.f32.mrb[57].mxu1  ;;  %14416 = vmatpush3.bf16.msra.mxu0 %v15694_v21  ;;  %v15728_v18 = vld [vmem:[%s19675_s4 + $0x14a8] sm:$0xff]   ;;  %v15729_v20 = vld [vmem:[%s19675_s4 + $0x1470] sm:$0xff]  }
 0x2b9   :  { %v14117_v28 = vpop.f32.mrb[59].mxu0  ;;  %v14137_v30 = vadd.f32 %v14136_v27, %v14135_v22  ;;  %v14138_v31 = vpop.f32.mrb[58].mxu1  ;;  %14417 = vmatprep.subr.bf16.mxu0 %v15696_v26  ;;  %14438 = vmatpush3.bf16.msra.mxu1 %v15695_v25  ;;  %v15730_v24 = vld [vmem:[%s19675_s4 + $0x14f0] sm:$0xff]  }
 0x2ba   :  { %v10815_v29 = vadd.f32 %v14115_v23, %v18297_v44  ;;  %v14139_v33 = vpop.f32.mrb[59].mxu1  ;;  %14439 = vmatprep.subr.bf16.mxu1 %v15697_v32  ;;  %v1144_v44 = vcombine.high %v776_v41, %v776_v41  ;;  %v15731_v26 = vld [vmem:[%s19675_s4 + $0x1430] sm:$0xff]   ;;  %v15733_v28 = vld [vmem:[%s19675_s4 + $0x1478] sm:$0xff]   ;;  %v777_v32 = vld [vmem:[%s19676_s3 + $0xa0] sm:$0xff] }
 0x2bb   :  { %v15735_v31 = vld [vmem:[%s19675_s4 + $0x1438] sm:$0xff]   ;;  %v1168_v33 = vrot.slane %v777_v32, %v16228_v35 }
 0x2bc   :  { %v18401_v36 = vadd.f32 %v14137_v30, %v10815_v29  ;;  %14418 = vmatpush3.bf16.msra.mxu0 %v15698_v34  ;;  %v1158_v47 = vrot.slane %v1144_v44, %v16228_v35  ;;  %v15732_v29 = vld [vmem:[%s19675_s4 + $0x14b0] sm:$0xff]   ;;  %v15734_v30 = vld [vmem:[%s19675_s4 + $0x14f8] sm:$0xff]   ;;  %v1161_v34 = vcombine.high %v777_v32, %v777_v32 }
 0x2bd   :  { %14419 = vmatprep.subr.bf16.mxu0 %v15700_v38  ;;  %14440 = vmatpush3.bf16.msra.mxu1 %v15699_v37  ;;  %v15736_v37 = vld [vmem:[%s19675_s4 + $0x14b8] sm:$0xff]   ;;  %v1176_v38 = vcombine.high %v1168_v33, %v1168_v33  ;;  %v1573_v41 = vpack.c.bf16 %v1168_v33, %v1168_v33  ;;  %v15773_v33 = vld [vmem:[%s19675_s4 + $0x1600] sm:$0xff]  }
 0x2be   :  { %14441 = vmatprep.subr.bf16.mxu1 %v15701_v39  ;;  %v1160_v52 = vcombine.high %v1158_v47, %v1158_v47  ;;  %v1571_v54 = vpack.c.bf16 %v1158_v47, %v1158_v47  ;;  %v1175_v39 = vrot.slane %v1161_v34, %v16228_v35  ;;  %v15742_v47 = vld [vmem:[%s19675_s4 + $0x1548] sm:$0xff]  }
 0x2bf   :  { %v1574_v43 = vpack.c.bf16 %v1176_v38, %v1176_v38 }
 0x2c0   :  { %14420 = vmatpush3.bf16.msra.mxu0 %v15702_v40  ;;  %v1572_v56 = vpack.c.bf16 %v1160_v52, %v1160_v52  ;;  %v15739_v40 = vld [vmem:[%s19675_s4 + $0x15c0] sm:$0xff]   ;;  %v1177_v44 = vcombine.high %v1175_v39, %v1175_v39  ;;  %v1575_v46 = vpack.c.bf16 %v1175_v39, %v1175_v39  ;;  %v15746_v52 = vld [vmem:[%s19675_s4 + $0x1550] sm:$0xff]   ;;  %v15775_v39 = vld [vmem:[%s19675_s4 + $0x1648] sm:$0xff]  }
 0x2c1   :  { %14449 = vmatprep.subr.bf16.mxu0 %v15705_v45  ;;  %14442 = vmatpush3.bf16.msra.mxu1 %v15703_v42  ;;  %v15740_v42 = vld [vmem:[%s19675_s4 + $0x1500] sm:$0xff]  }
 0x2c2   :  { %14471 = vmatprep.subr.bf16.mxu1 %v15706_v48  ;;  %11412 = vmatprep.mubr.bf16.mxu1 %v1572_v56  ;;  %v15741_v45 = vld [vmem:[%s19675_s4 + $0x1580] sm:$0xff]   ;;  %v1576_v48 = vpack.c.bf16 %v1177_v44, %v1177_v44  ;;  %v15750_v56 = vld [vmem:[%s19675_s4 + $0x1558] sm:$0xff]   ;;  %v15779_v44 = vld [vmem:[%s19675_s4 + $0x1650] sm:$0xff]  }
 0x2c3   :  { %11373 = vmatmul.mubr.bf16.vlgmr.msra.gmra.mrb[84].mxu0 %v1569_v49  ;;  %v15743_v49 = vld [vmem:[%s19675_s4 + $0x15c8] sm:$0xff]  }
 0x2c4   :  { %14450 = vmatpush3.bf16.msra.mxu0 %v15707_v50  ;;  %11413 = vmatmul.mubr.bf16.vlgmr.msra.gmra.mrb[84].mxu1 %v1571_v54  ;;  %v15744_v50 = vld [vmem:[%s19675_s4 + $0x1508] sm:$0xff]   ;;  %v15748_v54 = vld [vmem:[%s19675_s4 + $0x1510] sm:$0xff]  }
 0x2c5   :  { %14451 = vmatprep.subr.bf16.mxu0 %v15709_v55  ;;  %14472 = vmatpush3.bf16.msra.mxu1 %v15708_v53  ;;  %v15747_v53 = vld [vmem:[%s19675_s4 + $0x15d0] sm:$0xff]  }
 0x2c6   :  { %14473 = vmatprep.subr.bf16.mxu1 %v15710_v57  ;;  %11452 = vmatprep.mubr.bf16.mxu0 %v1574_v43  ;;  %v15749_v55 = vld [vmem:[%s19675_s4 + $0x1590] sm:$0xff]   ;;  %v15751_v57 = vld [vmem:[%s19675_s4 + $0x15d8] sm:$0xff]   ;;  %v15778_v43 = vld [vmem:[%s19675_s4 + $0x1688] sm:$0xff]  }
 0x2c7   :  { %11492 = vmatprep.mubr.bf16.mxu1 %v1576_v48  ;;  %v15783_v48 = vld [vmem:[%s19675_s4 + $0x1658] sm:$0xff]  }
 0x2c8   :  { %14452 = vmatpush3.bf16.msra.mxu0 %v15711_v58  ;;  %v15752_v58 = vld [vmem:[%s19675_s4 + $0x1518] sm:$0xff]  }
 0x2c9   :  { %14453 = vmatprep.subr.bf16.mxu0 %v15713_v60  ;;  %14474 = vmatpush3.bf16.msra.mxu1 %v15712_v59  ;;  %v15753_v59 = vld [vmem:[%s19675_s4 + $0x1598] sm:$0xff]   ;;  %v15754_v60 = vld [vmem:[%s19675_s4 + $0x1560] sm:$0xff]  }
 0x2ca   :  { %14475 = vmatprep.subr.bf16.mxu1 %v15714_v61  ;;  %v15755_v61 = vld [vmem:[%s19675_s4 + $0x15e0] sm:$0xff]  }
 0x2cc   :  { %14454 = vmatpush3.bf16.msra.mxu0 %v15715_v62  ;;  %v15756_v62 = vld [vmem:[%s19675_s4 + $0x1520] sm:$0xff]  }
 0x2cd   :  { %14455 = vmatprep.subr.bf16.mxu0 %v15717_v0  ;;  %14476 = vmatpush3.bf16.msra.mxu1 %v15716_v63  ;;  %v15757_v63 = vld [vmem:[%s19675_s4 + $0x15a0] sm:$0xff]   ;;  %v15758_v0 = vld [vmem:[%s19675_s4 + $0x1568] sm:$0xff]  }
 0x2ce   :  { %14477 = vmatprep.subr.bf16.mxu1 %v15718_v1 }
 0x2d0   :  { %14456 = vmatpush3.bf16.msra.mxu0 %v15719_v2  ;;  %v15759_v2 = vld [vmem:[%s19675_s4 + $0x15e8] sm:$0xff]  }
 0x2d1   :  { %14457 = vmatprep.subr.bf16.mxu0 %v15721_v4  ;;  %14478 = vmatpush3.bf16.msra.mxu1 %v15720_v3  ;;  %v15760_v4 = vld [vmem:[%s19675_s4 + $0x1528] sm:$0xff]  }
 0x2d2   :  { %14479 = vmatprep.subr.bf16.mxu1 %v15722_v5 }
 0x2d4   :  { %14458 = vmatpush3.bf16.msra.mxu0 %v15723_v6 }
 0x2d5   :  { %14459 = vmatprep.subr.bf16.mxu0 %v15725_v8  ;;  %14480 = vmatpush3.bf16.msra.mxu1 %v15724_v7  ;;  %v15761_v8 = vld [vmem:[%s19675_s4 + $0x15a8] sm:$0xff]  }
 0x2d6   :  { %v14157_v9 = vpop.f32.mrb[60].mxu0  ;;  %14481 = vmatprep.subr.bf16.mxu1 %v15726_v10 }
 0x2d7   :  { %v14158_v11 = vpop.f32.mrb[61].mxu0  ;;  %v14179_v13 = vpop.f32.mrb[60].mxu1 }
 0x2d8   :  { %v14159_v14 = vadd.f32 %v14158_v11, %v14157_v9  ;;  %v14160_v16 = vpop.f32.mrb[62].mxu0  ;;  %v14180_v17 = vpop.f32.mrb[61].mxu1  ;;  %14460 = vmatpush3.bf16.msra.mxu0 %v15727_v12  ;;  %v15762_v9 = vld [vmem:[%s19675_s4 + $0x1570] sm:$0xff]  }
 0x2d9   :  { %v14161_v19 = vpop.f32.mrb[63].mxu0  ;;  %v14181_v22 = vadd.f32 %v14180_v17, %v14179_v13  ;;  %v14182_v23 = vpop.f32.mrb[62].mxu1  ;;  %14461 = vmatprep.subr.bf16.mxu0 %v15729_v20  ;;  %14482 = vmatpush3.bf16.msra.mxu1 %v15728_v18  ;;  %v15763_v16 = vld [vmem:[%s19675_s4 + $0x15f0] sm:$0xff]  }
 0x2da   :  { %v10895_v21 = vadd.f32 %v14159_v14, %v18401_v36  ;;  %v14183_v25 = vpop.f32.mrb[63].mxu1  ;;  %14483 = vmatprep.subr.bf16.mxu1 %v15730_v24  ;;  %v15738_v36 = vld [vmem:[%s19675_s4 + $0x1540] sm:$0xff]   ;;  %v15764_v18 = vld [vmem:[%s19675_s4 + $0x1530] sm:$0xff]   ;;  %v15768_v23 = vld [vmem:[%s19675_s4 + $0x1538] sm:$0xff]  }
 0x2db   :  { %v15765_v20 = vld [vmem:[%s19675_s4 + $0x15b0] sm:$0xff]   ;;  %v778_v24 = vld [vmem:[%s19676_s3 + $0xa8] sm:$0xff] }
 0x2dc   :  { %v18505_v27 = vadd.f32 %v14181_v22, %v10895_v21  ;;  %14462 = vmatpush3.bf16.msra.mxu0 %v15731_v26  ;;  %v15766_v21 = vld [vmem:[%s19675_s4 + $0x1578] sm:$0xff]   ;;  %v1185_v25 = vrot.slane %v778_v24, %v16228_v35  ;;  %v1178_v26 = vcombine.high %v778_v24, %v778_v24 }
 0x2dd   :  { %14463 = vmatprep.subr.bf16.mxu0 %v15733_v28  ;;  %14484 = vmatpush3.bf16.msra.mxu1 %v15732_v29  ;;  %v15767_v22 = vld [vmem:[%s19675_s4 + $0x15f8] sm:$0xff]  }
 0x2de   :  { %14485 = vmatprep.subr.bf16.mxu1 %v15734_v30  ;;  %v15769_v28 = vld [vmem:[%s19675_s4 + $0x15b8] sm:$0xff]   ;;  %v1193_v29 = vcombine.high %v1185_v25, %v1185_v25  ;;  %v1192_v30 = vrot.slane %v1178_v26, %v16228_v35  ;;  %v1577_v32 = vpack.c.bf16 %v1185_v25, %v1185_v25  ;;  %v15806_v25 = vld [vmem:[%s19675_s4 + $0x1700] sm:$0xff]  }
 0x2e0   :  { %14464 = vmatpush3.bf16.msra.mxu0 %v15735_v31  ;;  %v15772_v31 = vld [vmem:[%s19675_s4 + $0x16c0] sm:$0xff]   ;;  %v1578_v34 = vpack.c.bf16 %v1193_v29, %v1193_v29  ;;  %v1579_v38 = vpack.c.bf16 %v1192_v30, %v1192_v30 }
 0x2e1   :  { %14493 = vmatprep.subr.bf16.mxu0 %v15738_v36  ;;  %14486 = vmatpush3.bf16.msra.mxu1 %v15736_v37  ;;  %v1194_v36 = vcombine.high %v1192_v30, %v1192_v30  ;;  %v15774_v37 = vld [vmem:[%s19675_s4 + $0x1680] sm:$0xff]   ;;  %v15808_v30 = vld [vmem:[%s19675_s4 + $0x1748] sm:$0xff]  }
 0x2e2   :  { %14515 = vmatprep.subr.bf16.mxu1 %v15739_v40 }
 0x2e3   :  { %11453 = vmatmul.mubr.bf16.vlgmr.msra.gmra.mrb[88].mxu0 %v1573_v41  ;;  %v1580_v40 = vpack.c.bf16 %v1194_v36, %v1194_v36  ;;  %v15776_v41 = vld [vmem:[%s19675_s4 + $0x16c8] sm:$0xff]   ;;  %v15812_v36 = vld [vmem:[%s19675_s4 + $0x1750] sm:$0xff]  }
 0x2e4   :  { %14494 = vmatpush3.bf16.msra.mxu0 %v15740_v42  ;;  %11493 = vmatmul.mubr.bf16.vlgmr.msra.gmra.mrb[88].mxu1 %v1575_v46  ;;  %v15777_v42 = vld [vmem:[%s19675_s4 + $0x1608] sm:$0xff]   ;;  %v15781_v46 = vld [vmem:[%s19675_s4 + $0x1610] sm:$0xff]  }
 0x2e5   :  { %14495 = vmatprep.subr.bf16.mxu0 %v15742_v47  ;;  %14516 = vmatpush3.bf16.msra.mxu1 %v15741_v45  ;;  %v15780_v45 = vld [vmem:[%s19675_s4 + $0x16d0] sm:$0xff]  }
 0x2e6   :  { %14517 = vmatprep.subr.bf16.mxu1 %v15743_v49  ;;  %11532 = vmatprep.mubr.bf16.mxu0 %v1578_v34  ;;  %v15782_v47 = vld [vmem:[%s19675_s4 + $0x1690] sm:$0xff]   ;;  %v15784_v49 = vld [vmem:[%s19675_s4 + $0x16d8] sm:$0xff]   ;;  %v15811_v34 = vld [vmem:[%s19675_s4 + $0x1788] sm:$0xff]  }
 0x2e7   :  { %11572 = vmatprep.mubr.bf16.mxu1 %v1580_v40  ;;  %v15816_v40 = vld [vmem:[%s19675_s4 + $0x1758] sm:$0xff]  }
 0x2e8   :  { %14496 = vmatpush3.bf16.msra.mxu0 %v15744_v50  ;;  %v15785_v50 = vld [vmem:[%s19675_s4 + $0x1618] sm:$0xff]  }
 0x2e9   :  { %14497 = vmatprep.subr.bf16.mxu0 %v15746_v52  ;;  %14518 = vmatpush3.bf16.msra.mxu1 %v15745_v51  ;;  %v15786_v51 = vld [vmem:[%s19675_s4 + $0x1698] sm:$0xff]   ;;  %v15787_v52 = vld [vmem:[%s19675_s4 + $0x1660] sm:$0xff]  }
 0x2ea   :  { %14519 = vmatprep.subr.bf16.mxu1 %v15747_v53  ;;  %v15788_v53 = vld [vmem:[%s19675_s4 + $0x16e0] sm:$0xff]  }
 0x2ec   :  { %14498 = vmatpush3.bf16.msra.mxu0 %v15748_v54  ;;  %v15789_v54 = vld [vmem:[%s19675_s4 + $0x1620] sm:$0xff]  }
 0x2ed   :  { %14499 = vmatprep.subr.bf16.mxu0 %v15750_v56  ;;  %14520 = vmatpush3.bf16.msra.mxu1 %v15749_v55  ;;  %v15790_v55 = vld [vmem:[%s19675_s4 + $0x16a0] sm:$0xff]   ;;  %v15791_v56 = vld [vmem:[%s19675_s4 + $0x1668] sm:$0xff]  }
 0x2ee   :  { %14521 = vmatprep.subr.bf16.mxu1 %v15751_v57 }
 0x2f0   :  { %14500 = vmatpush3.bf16.msra.mxu0 %v15752_v58  ;;  %v15792_v58 = vld [vmem:[%s19675_s4 + $0x16e8] sm:$0xff]  }
 0x2f1   :  { %14501 = vmatprep.subr.bf16.mxu0 %v15754_v60  ;;  %14522 = vmatpush3.bf16.msra.mxu1 %v15753_v59  ;;  %v15793_v60 = vld [vmem:[%s19675_s4 + $0x1628] sm:$0xff]  }
 0x2f2   :  { %14523 = vmatprep.subr.bf16.mxu1 %v15755_v61 }
 0x2f4   :  { %14502 = vmatpush3.bf16.msra.mxu0 %v15756_v62 }
 0x2f5   :  { %14503 = vmatprep.subr.bf16.mxu0 %v15758_v0  ;;  %14524 = vmatpush3.bf16.msra.mxu1 %v15757_v63  ;;  %v15794_v0 = vld [vmem:[%s19675_s4 + $0x16a8] sm:$0xff]  }
 0x2f6   :  { %v14201_v1 = vpop.f32.mrb[64].mxu0  ;;  %14525 = vmatprep.subr.bf16.mxu1 %v15759_v2 }
 0x2f7   :  { %v14202_v3 = vpop.f32.mrb[65].mxu0  ;;  %v14223_v5 = vpop.f32.mrb[64].mxu1 }
 0x2f8   :  { %v14203_v6 = vadd.f32 %v14202_v3, %v14201_v1  ;;  %v14204_v7 = vpop.f32.mrb[66].mxu0  ;;  %v14224_v10 = vpop.f32.mrb[65].mxu1  ;;  %14504 = vmatpush3.bf16.msra.mxu0 %v15760_v4  ;;  %v15795_v1 = vld [vmem:[%s19675_s4 + $0x1670] sm:$0xff]  }
 0x2f9   :  { %v14205_v11 = vpop.f32.mrb[67].mxu0  ;;  %v14225_v13 = vadd.f32 %v14224_v10, %v14223_v5  ;;  %v14226_v14 = vpop.f32.mrb[66].mxu1  ;;  %14505 = vmatprep.subr.bf16.mxu0 %v15762_v9  ;;  %14526 = vmatpush3.bf16.msra.mxu1 %v15761_v8  ;;  %v15796_v7 = vld [vmem:[%s19675_s4 + $0x16f0] sm:$0xff]  }
 0x2fa   :  { %v10975_v12 = vadd.f32 %v14203_v6, %v18505_v27  ;;  %v14227_v17 = vpop.f32.mrb[67].mxu1  ;;  %14527 = vmatprep.subr.bf16.mxu1 %v15763_v16  ;;  %v15771_v27 = vld [vmem:[%s19675_s4 + $0x1640] sm:$0xff]   ;;  %v15797_v9 = vld [vmem:[%s19675_s4 + $0x1630] sm:$0xff]   ;;  %v15801_v14 = vld [vmem:[%s19675_s4 + $0x1638] sm:$0xff]  }
 0x2fb   :  { %v15798_v11 = vld [vmem:[%s19675_s4 + $0x16b0] sm:$0xff]   ;;  %v15802_v17 = vld [vmem:[%s19675_s4 + $0x16b8] sm:$0xff]  }
 0x2fc   :  { %v18609_v19 = vadd.f32 %v14225_v13, %v10975_v12  ;;  %14506 = vmatpush3.bf16.msra.mxu0 %v15764_v18  ;;  %v15799_v12 = vld [vmem:[%s19675_s4 + $0x1678] sm:$0xff]   ;;  %v779_v16 = vld [vmem:[%s19676_s3 + $0xb0] sm:$0xff] }
 0x2fd   :  { %14507 = vmatprep.subr.bf16.mxu0 %v15766_v21  ;;  %14528 = vmatpush3.bf16.msra.mxu1 %v15765_v20  ;;  %v15800_v13 = vld [vmem:[%s19675_s4 + $0x16f8] sm:$0xff]   ;;  %v1202_v18 = vrot.slane %v779_v16, %v16228_v35  ;;  %v15804_v20 = vld [vmem:[%s19675_s4 + $0x1740] sm:$0xff]  }
 0x2fe   :  { %14529 = vmatprep.subr.bf16.mxu1 %v15767_v22 }
 0x2ff   :  { %v1210_v21 = vcombine.high %v1202_v18, %v1202_v18  ;;  %v1581_v24 = vpack.c.bf16 %v1202_v18, %v1202_v18 }
 0x300   :  { %14508 = vmatpush3.bf16.msra.mxu0 %v15768_v23  ;;  %v15805_v23 = vld [vmem:[%s19675_s4 + $0x17c0] sm:$0xff]  }
 0x301   :  { %14537 = vmatprep.subr.bf16.mxu0 %v15771_v27  ;;  %14530 = vmatpush3.bf16.msra.mxu1 %v15769_v28  ;;  %v1582_v26 = vpack.c.bf16 %v1210_v21, %v1210_v21  ;;  %v15807_v28 = vld [vmem:[%s19675_s4 + $0x1780] sm:$0xff]  }
 0x302   :  { %14559 = vmatprep.subr.bf16.mxu1 %v15772_v31 }
 0x303   :  { %11533 = vmatmul.mubr.bf16.vlgmr.msra.gmra.mrb[92].mxu0 %v1577_v32  ;;  %v15809_v32 = vld [vmem:[%s19675_s4 + $0x17c8] sm:$0xff]  }
 0x304   :  { %14538 = vmatpush3.bf16.msra.mxu0 %v15773_v33  ;;  %11573 = vmatmul.mubr.bf16.vlgmr.msra.gmra.mrb[92].mxu1 %v1579_v38  ;;  %v15810_v33 = vld [vmem:[%s19675_s4 + $0x1708] sm:$0xff]   ;;  %v15814_v38 = vld [vmem:[%s19675_s4 + $0x1710] sm:$0xff]  }
 0x305   :  { %14539 = vmatprep.subr.bf16.mxu0 %v15775_v39  ;;  %14560 = vmatpush3.bf16.msra.mxu1 %v15774_v37  ;;  %v15813_v37 = vld [vmem:[%s19675_s4 + $0x17d0] sm:$0xff]  }
 0x306   :  { %14561 = vmatprep.subr.bf16.mxu1 %v15776_v41  ;;  %11612 = vmatprep.mubr.bf16.mxu0 %v1582_v26  ;;  %v15815_v39 = vld [vmem:[%s19675_s4 + $0x1790] sm:$0xff]   ;;  %v15817_v41 = vld [vmem:[%s19675_s4 + $0x17d8] sm:$0xff]   ;;  %v15844_v26 = vld [vmem:[%s19675_s4 + $0x1888] sm:$0xff]  }
 0x308   :  { %14540 = vmatpush3.bf16.msra.mxu0 %v15777_v42  ;;  %v15818_v42 = vld [vmem:[%s19675_s4 + $0x1718] sm:$0xff]  }
 0x309   :  { %14541 = vmatprep.subr.bf16.mxu0 %v15779_v44  ;;  %14562 = vmatpush3.bf16.msra.mxu1 %v15778_v43  ;;  %v15819_v43 = vld [vmem:[%s19675_s4 + $0x1798] sm:$0xff]   ;;  %v15820_v44 = vld [vmem:[%s19675_s4 + $0x1760] sm:$0xff]  }
 0x30a   :  { %14563 = vmatprep.subr.bf16.mxu1 %v15780_v45  ;;  %v15821_v45 = vld [vmem:[%s19675_s4 + $0x17e0] sm:$0xff]  }
 0x30c   :  { %14542 = vmatpush3.bf16.msra.mxu0 %v15781_v46  ;;  %v15822_v46 = vld [vmem:[%s19675_s4 + $0x1720] sm:$0xff]  }
 0x30d   :  { %14543 = vmatprep.subr.bf16.mxu0 %v15783_v48  ;;  %14564 = vmatpush3.bf16.msra.mxu1 %v15782_v47  ;;  %v15823_v47 = vld [vmem:[%s19675_s4 + $0x17a0] sm:$0xff]   ;;  %v15824_v48 = vld [vmem:[%s19675_s4 + $0x1768] sm:$0xff]  }
 0x30e   :  { %14565 = vmatprep.subr.bf16.mxu1 %v15784_v49 }
 0x310   :  { %14544 = vmatpush3.bf16.msra.mxu0 %v15785_v50  ;;  %v15825_v50 = vld [vmem:[%s19675_s4 + $0x17e8] sm:$0xff]  }
 0x311   :  { %14545 = vmatprep.subr.bf16.mxu0 %v15787_v52  ;;  %14566 = vmatpush3.bf16.msra.mxu1 %v15786_v51  ;;  %v15826_v52 = vld [vmem:[%s19675_s4 + $0x1728] sm:$0xff]  }
 0x312   :  { %14567 = vmatprep.subr.bf16.mxu1 %v15788_v53 }
 0x314   :  { %14546 = vmatpush3.bf16.msra.mxu0 %v15789_v54 }
 0x315   :  { %14547 = vmatprep.subr.bf16.mxu0 %v15791_v56  ;;  %14568 = vmatpush3.bf16.msra.mxu1 %v15790_v55 }
 0x316   :  { %v14245_v57 = vpop.f32.mrb[68].mxu0  ;;  %14569 = vmatprep.subr.bf16.mxu1 %v15792_v58 }
 0x317   :  { %v14246_v59 = vpop.f32.mrb[69].mxu0  ;;  %v14267_v61 = vpop.f32.mrb[68].mxu1 }
 0x318   :  { %v14247_v62 = vadd.f32 %v14246_v59, %v14245_v57  ;;  %v14248_v63 = vpop.f32.mrb[70].mxu0  ;;  %v14268_v2 = vpop.f32.mrb[69].mxu1  ;;  %14548 = vmatpush3.bf16.msra.mxu0 %v15793_v60  ;;  %v15827_v57 = vld [vmem:[%s19675_s4 + $0x17a8] sm:$0xff]   ;;  %v15828_v59 = vld [vmem:[%s19675_s4 + $0x1770] sm:$0xff]  }
 0x319   :  { %v14249_v3 = vpop.f32.mrb[71].mxu0  ;;  %v14269_v5 = vadd.f32 %v14268_v2, %v14267_v61  ;;  %v14270_v6 = vpop.f32.mrb[70].mxu1  ;;  %14549 = vmatprep.subr.bf16.mxu0 %v15795_v1  ;;  %14570 = vmatpush3.bf16.msra.mxu1 %v15794_v0  ;;  %v15829_v63 = vld [vmem:[%s19675_s4 + $0x17f0] sm:$0xff]  }
 0x31a   :  { %v11055_v4 = vadd.f32 %v14247_v62, %v18609_v19  ;;  %v14271_v8 = vpop.f32.mrb[71].mxu1  ;;  %14571 = vmatprep.subr.bf16.mxu1 %v15796_v7  ;;  %v1195_v19 = vcombine.high %v779_v16, %v779_v16  ;;  %v15830_v1 = vld [vmem:[%s19675_s4 + $0x1730] sm:$0xff]   ;;  %v15832_v3 = vld [vmem:[%s19675_s4 + $0x1778] sm:$0xff]  }
 0x31b   :  { %v15834_v6 = vld [vmem:[%s19675_s4 + $0x1738] sm:$0xff]  }
 0x31c   :  { %v18713_v10 = vadd.f32 %v14269_v5, %v11055_v4  ;;  %14550 = vmatpush3.bf16.msra.mxu0 %v15797_v9  ;;  %v1209_v22 = vrot.slane %v1195_v19, %v16228_v35  ;;  %v15831_v4 = vld [vmem:[%s19675_s4 + $0x17b0] sm:$0xff]   ;;  %v15833_v5 = vld [vmem:[%s19675_s4 + $0x17f8] sm:$0xff]  }
 0x31d   :  { %14551 = vmatprep.subr.bf16.mxu0 %v15799_v12  ;;  %14572 = vmatpush3.bf16.msra.mxu1 %v15798_v11  ;;  %v780_v7 = vld [vmem:[%s19676_s3 + $0xb8] sm:$0xff] }
 0x31e   :  { %14573 = vmatprep.subr.bf16.mxu1 %v15800_v13  ;;  %v1211_v27 = vcombine.high %v1209_v22, %v1209_v22  ;;  %v1583_v29 = vpack.c.bf16 %v1209_v22, %v1209_v22  ;;  %v1219_v8 = vrot.slane %v780_v7, %v16228_v35  ;;  %v1212_v9 = vcombine.high %v780_v7, %v780_v7  ;;  %v15835_v11 = vld [vmem:[%s19675_s4 + $0x17b8] sm:$0xff]   ;;  %v15841_v22 = vld [vmem:[%s19675_s4 + $0x1848] sm:$0xff]  }
 0x320   :  { %14552 = vmatpush3.bf16.msra.mxu0 %v15801_v14  ;;  %v1584_v31 = vpack.c.bf16 %v1211_v27, %v1211_v27  ;;  %v1227_v12 = vcombine.high %v1219_v8, %v1219_v8  ;;  %v1226_v13 = vrot.slane %v1212_v9, %v16228_v35  ;;  %v15838_v14 = vld [vmem:[%s19675_s4 + $0x18c0] sm:$0xff]   ;;  %v1585_v16 = vpack.c.bf16 %v1219_v8, %v1219_v8  ;;  %v15845_v27 = vld [vmem:[%s19675_s4 + $0x1850] sm:$0xff]  }
 0x321   :  { %14581 = vmatprep.subr.bf16.mxu0 %v15804_v20  ;;  %14574 = vmatpush3.bf16.msra.mxu1 %v15802_v17  ;;  %v15839_v17 = vld [vmem:[%s19675_s4 + $0x1800] sm:$0xff]  }
 0x322   :  { %14603 = vmatprep.subr.bf16.mxu1 %v15805_v23  ;;  %11652 = vmatprep.mubr.bf16.mxu1 %v1584_v31  ;;  %v1586_v18 = vpack.c.bf16 %v1227_v12, %v1227_v12  ;;  %v1228_v19 = vcombine.high %v1226_v13, %v1226_v13  ;;  %v15840_v20 = vld [vmem:[%s19675_s4 + $0x1880] sm:$0xff]   ;;  %v1587_v21 = vpack.c.bf16 %v1226_v13, %v1226_v13  ;;  %v15849_v31 = vld [vmem:[%s19675_s4 + $0x1858] sm:$0xff]   ;;  %v15874_v13 = vld [vmem:[%s19675_s4 + $0x1948] sm:$0xff]  }
 0x323   :  { %11613 = vmatmul.mubr.bf16.vlgmr.msra.gmra.mrb[96].mxu0 %v1581_v24  ;;  %v15842_v24 = vld [vmem:[%s19675_s4 + $0x18c8] sm:$0xff]   ;;  %v15872_v8 = vld [vmem:[%s19675_s4 + $0x1900] sm:$0xff]  }
 0x324   :  { %14582 = vmatpush3.bf16.msra.mxu0 %v15806_v25  ;;  %11653 = vmatmul.mubr.bf16.vlgmr.msra.gmra.mrb[96].mxu1 %v1583_v29  ;;  %v1588_v23 = vpack.c.bf16 %v1228_v19, %v1228_v19  ;;  %v15843_v25 = vld [vmem:[%s19675_s4 + $0x1808] sm:$0xff]   ;;  %v15847_v29 = vld [vmem:[%s19675_s4 + $0x1810] sm:$0xff]  }
 0x325   :  { %14583 = vmatprep.subr.bf16.mxu0 %v15808_v30  ;;  %14604 = vmatpush3.bf16.msra.mxu1 %v15807_v28  ;;  %v15846_v28 = vld [vmem:[%s19675_s4 + $0x18d0] sm:$0xff]  }
 0x326   :  { %14605 = vmatprep.subr.bf16.mxu1 %v15809_v32  ;;  %11692 = vmatprep.mubr.bf16.mxu0 %v1586_v18  ;;  %v15848_v30 = vld [vmem:[%s19675_s4 + $0x1890] sm:$0xff]   ;;  %v15850_v32 = vld [vmem:[%s19675_s4 + $0x18d8] sm:$0xff]   ;;  %v15877_v18 = vld [vmem:[%s19675_s4 + $0x1988] sm:$0xff]  }
 0x327   :  { %11732 = vmatprep.mubr.bf16.mxu1 %v1588_v23  ;;  %v15878_v19 = vld [vmem:[%s19675_s4 + $0x1950] sm:$0xff]   ;;  %v15882_v23 = vld [vmem:[%s19675_s4 + $0x1958] sm:$0xff]  }
 0x328   :  { %14584 = vmatpush3.bf16.msra.mxu0 %v15810_v33  ;;  %v15851_v33 = vld [vmem:[%s19675_s4 + $0x1818] sm:$0xff]  }
 0x329   :  { %14585 = vmatprep.subr.bf16.mxu0 %v15812_v36  ;;  %14606 = vmatpush3.bf16.msra.mxu1 %v15811_v34  ;;  %v15852_v34 = vld [vmem:[%s19675_s4 + $0x1898] sm:$0xff]   ;;  %v15853_v36 = vld [vmem:[%s19675_s4 + $0x1860] sm:$0xff]  }
 0x32a   :  { %14607 = vmatprep.subr.bf16.mxu1 %v15813_v37  ;;  %v15854_v37 = vld [vmem:[%s19675_s4 + $0x18e0] sm:$0xff]  }
 0x32c   :  { %14586 = vmatpush3.bf16.msra.mxu0 %v15814_v38  ;;  %v15855_v38 = vld [vmem:[%s19675_s4 + $0x1820] sm:$0xff]  }
 0x32d   :  { %14587 = vmatprep.subr.bf16.mxu0 %v15816_v40  ;;  %14608 = vmatpush3.bf16.msra.mxu1 %v15815_v39  ;;  %v15856_v39 = vld [vmem:[%s19675_s4 + $0x18a0] sm:$0xff]   ;;  %v15857_v40 = vld [vmem:[%s19675_s4 + $0x1868] sm:$0xff]  }
 0x32e   :  { %14609 = vmatprep.subr.bf16.mxu1 %v15817_v41 }
 0x330   :  { %14588 = vmatpush3.bf16.msra.mxu0 %v15818_v42  ;;  %v15858_v42 = vld [vmem:[%s19675_s4 + $0x18e8] sm:$0xff]  }
 0x331   :  { %14589 = vmatprep.subr.bf16.mxu0 %v15820_v44  ;;  %14610 = vmatpush3.bf16.msra.mxu1 %v15819_v43  ;;  %v15859_v44 = vld [vmem:[%s19675_s4 + $0x1828] sm:$0xff]  }
 0x332   :  { %14611 = vmatprep.subr.bf16.mxu1 %v15821_v45 }
 0x334   :  { %14590 = vmatpush3.bf16.msra.mxu0 %v15822_v46 }
 0x335   :  { %14591 = vmatprep.subr.bf16.mxu0 %v15824_v48  ;;  %14612 = vmatpush3.bf16.msra.mxu1 %v15823_v47  ;;  %v15860_v48 = vld [vmem:[%s19675_s4 + $0x18a8] sm:$0xff]  }
 0x336   :  { %v14289_v49 = vpop.f32.mrb[72].mxu0  ;;  %14613 = vmatprep.subr.bf16.mxu1 %v15825_v50 }
 0x337   :  { %v14290_v51 = vpop.f32.mrb[73].mxu0  ;;  %v14311_v53 = vpop.f32.mrb[72].mxu1 }
 0x338   :  { %v14291_v54 = vadd.f32 %v14290_v51, %v14289_v49  ;;  %v14292_v55 = vpop.f32.mrb[74].mxu0  ;;  %v14312_v56 = vpop.f32.mrb[73].mxu1  ;;  %14592 = vmatpush3.bf16.msra.mxu0 %v15826_v52  ;;  %v15861_v49 = vld [vmem:[%s19675_s4 + $0x1870] sm:$0xff]  }
 0x339   :  { %v14293_v58 = vpop.f32.mrb[75].mxu0  ;;  %v14313_v61 = vadd.f32 %v14312_v56, %v14311_v53  ;;  %v14314_v62 = vpop.f32.mrb[74].mxu1  ;;  %14593 = vmatprep.subr.bf16.mxu0 %v15828_v59  ;;  %14614 = vmatpush3.bf16.msra.mxu1 %v15827_v57  ;;  %v15862_v55 = vld [vmem:[%s19675_s4 + $0x18f0] sm:$0xff]  }
 0x33a   :  { %v11135_v60 = vadd.f32 %v14291_v54, %v18713_v10  ;;  %v14315_v0 = vpop.f32.mrb[75].mxu1  ;;  %14615 = vmatprep.subr.bf16.mxu1 %v15829_v63  ;;  %v15837_v10 = vld [vmem:[%s19675_s4 + $0x1840] sm:$0xff]   ;;  %v15863_v57 = vld [vmem:[%s19675_s4 + $0x1830] sm:$0xff]   ;;  %v15867_v62 = vld [vmem:[%s19675_s4 + $0x1838] sm:$0xff]  }
 0x33b   :  { %v15864_v59 = vld [vmem:[%s19675_s4 + $0x18b0] sm:$0xff]   ;;  %v781_v63 = vld [vmem:[%s19676_s3 + $0xc0] sm:$0xff] }
 0x33c   :  { %v18817_v2 = vadd.f32 %v14313_v61, %v11135_v60  ;;  %14594 = vmatpush3.bf16.msra.mxu0 %v15830_v1  ;;  %v15865_v60 = vld [vmem:[%s19675_s4 + $0x1878] sm:$0xff]   ;;  %v1236_v0 = vrot.slane %v781_v63, %v16228_v35  ;;  %v1229_v1 = vcombine.high %v781_v63, %v781_v63 }
 0x33d   :  { %14595 = vmatprep.subr.bf16.mxu0 %v15832_v3  ;;  %14616 = vmatpush3.bf16.msra.mxu1 %v15831_v4  ;;  %v15866_v61 = vld [vmem:[%s19675_s4 + $0x18f8] sm:$0xff]  }
 0x33e   :  { %14617 = vmatprep.subr.bf16.mxu1 %v15833_v5  ;;  %v15868_v3 = vld [vmem:[%s19675_s4 + $0x18b8] sm:$0xff]   ;;  %v1244_v4 = vcombine.high %v1236_v0, %v1236_v0  ;;  %v1243_v5 = vrot.slane %v1229_v1, %v16228_v35  ;;  %v1589_v7 = vpack.c.bf16 %v1236_v0, %v1236_v0  ;;  %v15905_v0 = vld [vmem:[%s19675_s4 + $0x1a00] sm:$0xff]  }
 0x340   :  { %14596 = vmatpush3.bf16.msra.mxu0 %v15834_v6  ;;  %v15871_v6 = vld [vmem:[%s19675_s4 + $0x19c0] sm:$0xff]   ;;  %v1590_v9 = vpack.c.bf16 %v1244_v4, %v1244_v4  ;;  %v1591_v12 = vpack.c.bf16 %v1243_v5, %v1243_v5 }
 0x341   :  { %14625 = vmatprep.subr.bf16.mxu0 %v15837_v10  ;;  %14618 = vmatpush3.bf16.msra.mxu1 %v15835_v11  ;;  %v1245_v10 = vcombine.high %v1243_v5, %v1243_v5  ;;  %v15873_v11 = vld [vmem:[%s19675_s4 + $0x1980] sm:$0xff]   ;;  %v15907_v5 = vld [vmem:[%s19675_s4 + $0x1a48] sm:$0xff]  }
 0x342   :  { %14647 = vmatprep.subr.bf16.mxu1 %v15838_v14 }
 0x343   :  { %11693 = vmatmul.mubr.bf16.vlgmr.msra.gmra.mrb[100].mxu0 %v1585_v16  ;;  %v1592_v14 = vpack.c.bf16 %v1245_v10, %v1245_v10  ;;  %v15875_v16 = vld [vmem:[%s19675_s4 + $0x19c8] sm:$0xff]   ;;  %v15911_v10 = vld [vmem:[%s19675_s4 + $0x1a50] sm:$0xff]  }
 0x344   :  { %14626 = vmatpush3.bf16.msra.mxu0 %v15839_v17  ;;  %11733 = vmatmul.mubr.bf16.vlgmr.msra.gmra.mrb[100].mxu1 %v1587_v21  ;;  %v15876_v17 = vld [vmem:[%s19675_s4 + $0x1908] sm:$0xff]   ;;  %v15880_v21 = vld [vmem:[%s19675_s4 + $0x1910] sm:$0xff]  }
 0x345   :  { %14627 = vmatprep.subr.bf16.mxu0 %v15841_v22  ;;  %14648 = vmatpush3.bf16.msra.mxu1 %v15840_v20  ;;  %v15879_v20 = vld [vmem:[%s19675_s4 + $0x19d0] sm:$0xff]  }
 0x346   :  { %14649 = vmatprep.subr.bf16.mxu1 %v15842_v24  ;;  %11772 = vmatprep.mubr.bf16.mxu0 %v1590_v9  ;;  %v15881_v22 = vld [vmem:[%s19675_s4 + $0x1990] sm:$0xff]   ;;  %v15883_v24 = vld [vmem:[%s19675_s4 + $0x19d8] sm:$0xff]   ;;  %v15910_v9 = vld [vmem:[%s19675_s4 + $0x1a88] sm:$0xff]  }
 0x347   :  { %11812 = vmatprep.mubr.bf16.mxu1 %v1592_v14  ;;  %v15915_v14 = vld [vmem:[%s19675_s4 + $0x1a58] sm:$0xff]  }
 0x348   :  { %14628 = vmatpush3.bf16.msra.mxu0 %v15843_v25  ;;  %v15884_v25 = vld [vmem:[%s19675_s4 + $0x1918] sm:$0xff]  }
 0x349   :  { %14629 = vmatprep.subr.bf16.mxu0 %v15845_v27  ;;  %14650 = vmatpush3.bf16.msra.mxu1 %v15844_v26  ;;  %v15885_v26 = vld [vmem:[%s19675_s4 + $0x1998] sm:$0xff]   ;;  %v15886_v27 = vld [vmem:[%s19675_s4 + $0x1960] sm:$0xff]  }
 0x34a   :  { %14651 = vmatprep.subr.bf16.mxu1 %v15846_v28  ;;  %v15887_v28 = vld [vmem:[%s19675_s4 + $0x19e0] sm:$0xff]  }
 0x34c   :  { %14630 = vmatpush3.bf16.msra.mxu0 %v15847_v29  ;;  %v15888_v29 = vld [vmem:[%s19675_s4 + $0x1920] sm:$0xff]  }
 0x34d   :  { %14631 = vmatprep.subr.bf16.mxu0 %v15849_v31  ;;  %14652 = vmatpush3.bf16.msra.mxu1 %v15848_v30  ;;  %v15889_v30 = vld [vmem:[%s19675_s4 + $0x19a0] sm:$0xff]   ;;  %v15890_v31 = vld [vmem:[%s19675_s4 + $0x1968] sm:$0xff]  }
 0x34e   :  { %14653 = vmatprep.subr.bf16.mxu1 %v15850_v32 }
 0x350   :  { %14632 = vmatpush3.bf16.msra.mxu0 %v15851_v33  ;;  %v15891_v33 = vld [vmem:[%s19675_s4 + $0x19e8] sm:$0xff]  }
 0x351   :  { %14633 = vmatprep.subr.bf16.mxu0 %v15853_v36  ;;  %14654 = vmatpush3.bf16.msra.mxu1 %v15852_v34  ;;  %v15892_v36 = vld [vmem:[%s19675_s4 + $0x1928] sm:$0xff]  }
 0x352   :  { %14655 = vmatprep.subr.bf16.mxu1 %v15854_v37 }
 0x354   :  { %14634 = vmatpush3.bf16.msra.mxu0 %v15855_v38 }
 0x355   :  { %14635 = vmatprep.subr.bf16.mxu0 %v15857_v40  ;;  %14656 = vmatpush3.bf16.msra.mxu1 %v15856_v39  ;;  %v15893_v40 = vld [vmem:[%s19675_s4 + $0x19a8] sm:$0xff]  }
 0x356   :  { %v14333_v41 = vpop.f32.mrb[76].mxu0  ;;  %14657 = vmatprep.subr.bf16.mxu1 %v15858_v42 }
 0x357   :  { %v14334_v43 = vpop.f32.mrb[77].mxu0  ;;  %v14355_v45 = vpop.f32.mrb[76].mxu1 }
 0x358   :  { %v14335_v46 = vadd.f32 %v14334_v43, %v14333_v41  ;;  %v14336_v47 = vpop.f32.mrb[78].mxu0  ;;  %v14356_v50 = vpop.f32.mrb[77].mxu1  ;;  %14636 = vmatpush3.bf16.msra.mxu0 %v15859_v44  ;;  %v15894_v41 = vld [vmem:[%s19675_s4 + $0x1970] sm:$0xff]  }
 0x359   :  { %v14337_v51 = vpop.f32.mrb[79].mxu0  ;;  %v14357_v53 = vadd.f32 %v14356_v50, %v14355_v45  ;;  %v14358_v54 = vpop.f32.mrb[78].mxu1  ;;  %14637 = vmatprep.subr.bf16.mxu0 %v15861_v49  ;;  %14658 = vmatpush3.bf16.msra.mxu1 %v15860_v48  ;;  %v15895_v47 = vld [vmem:[%s19675_s4 + $0x19f0] sm:$0xff]  }
 0x35a   :  { %v11215_v52 = vadd.f32 %v14335_v46, %v18817_v2  ;;  %v14359_v56 = vpop.f32.mrb[79].mxu1  ;;  %14659 = vmatprep.subr.bf16.mxu1 %v15862_v55  ;;  %v15870_v2 = vld [vmem:[%s19675_s4 + $0x1940] sm:$0xff]   ;;  %v15896_v49 = vld [vmem:[%s19675_s4 + $0x1930] sm:$0xff]   ;;  %v15900_v54 = vld [vmem:[%s19675_s4 + $0x1938] sm:$0xff]  }
 0x35b   :  { %v15897_v51 = vld [vmem:[%s19675_s4 + $0x19b0] sm:$0xff]   ;;  %v782_v55 = vld [vmem:[%s19676_s3 + $0xc8] sm:$0xff]  ;;  %v15901_v56 = vld [vmem:[%s19675_s4 + $0x19b8] sm:$0xff]  }
 0x35c   :  { %v18921_v58 = vadd.f32 %v14357_v53, %v11215_v52  ;;  %14638 = vmatpush3.bf16.msra.mxu0 %v15863_v57  ;;  %v15898_v52 = vld [vmem:[%s19675_s4 + $0x1978] sm:$0xff]   ;;  %v1253_v57 = vrot.slane %v782_v55, %v16228_v35 }
 0x35d   :  { %14639 = vmatprep.subr.bf16.mxu0 %v15865_v60  ;;  %14660 = vmatpush3.bf16.msra.mxu1 %v15864_v59  ;;  %v15899_v53 = vld [vmem:[%s19675_s4 + $0x19f8] sm:$0xff]   ;;  %v15903_v59 = vld [vmem:[%s19675_s4 + $0x1a40] sm:$0xff]  }
 0x35e   :  { %14661 = vmatprep.subr.bf16.mxu1 %v15866_v61  ;;  %v1261_v60 = vcombine.high %v1253_v57, %v1253_v57  ;;  %v1593_v63 = vpack.c.bf16 %v1253_v57, %v1253_v57 }
 0x360   :  { %14640 = vmatpush3.bf16.msra.mxu0 %v15867_v62  ;;  %v15904_v62 = vld [vmem:[%s19675_s4 + $0x1ac0] sm:$0xff]   ;;  %v1594_v1 = vpack.c.bf16 %v1261_v60, %v1261_v60 }
 0x361   :  { %14669 = vmatprep.subr.bf16.mxu0 %v15870_v2  ;;  %14662 = vmatpush3.bf16.msra.mxu1 %v15868_v3  ;;  %v15906_v3 = vld [vmem:[%s19675_s4 + $0x1a80] sm:$0xff]  }
 0x362   :  { %14691 = vmatprep.subr.bf16.mxu1 %v15871_v6 }
 0x363   :  { %11773 = vmatmul.mubr.bf16.vlgmr.msra.gmra.mrb[104].mxu0 %v1589_v7  ;;  %v15908_v7 = vld [vmem:[%s19675_s4 + $0x1ac8] sm:$0xff]  }
 0x364   :  { %14670 = vmatpush3.bf16.msra.mxu0 %v15872_v8  ;;  %11813 = vmatmul.mubr.bf16.vlgmr.msra.gmra.mrb[104].mxu1 %v1591_v12  ;;  %v15909_v8 = vld [vmem:[%s19675_s4 + $0x1a08] sm:$0xff]   ;;  %v15913_v12 = vld [vmem:[%s19675_s4 + $0x1a10] sm:$0xff]  }
 0x365   :  { %14671 = vmatprep.subr.bf16.mxu0 %v15874_v13  ;;  %14692 = vmatpush3.bf16.msra.mxu1 %v15873_v11  ;;  %v15912_v11 = vld [vmem:[%s19675_s4 + $0x1ad0] sm:$0xff]  }
 0x366   :  { %14693 = vmatprep.subr.bf16.mxu1 %v15875_v16  ;;  %11852 = vmatprep.mubr.bf16.mxu0 %v1594_v1  ;;  %v15914_v13 = vld [vmem:[%s19675_s4 + $0x1a90] sm:$0xff]   ;;  %v15916_v16 = vld [vmem:[%s19675_s4 + $0x1ad8] sm:$0xff]   ;;  %v15943_v1 = vld [vmem:[%s19675_s4 + $0x1b88] sm:$0xff]  }
 0x368   :  { %14672 = vmatpush3.bf16.msra.mxu0 %v15876_v17  ;;  %v15917_v17 = vld [vmem:[%s19675_s4 + $0x1a18] sm:$0xff]  }
 0x369   :  { %14673 = vmatprep.subr.bf16.mxu0 %v15878_v19  ;;  %14694 = vmatpush3.bf16.msra.mxu1 %v15877_v18  ;;  %v15918_v18 = vld [vmem:[%s19675_s4 + $0x1a98] sm:$0xff]   ;;  %v15919_v19 = vld [vmem:[%s19675_s4 + $0x1a60] sm:$0xff]  }
 0x36a   :  { %14695 = vmatprep.subr.bf16.mxu1 %v15879_v20  ;;  %v15920_v20 = vld [vmem:[%s19675_s4 + $0x1ae0] sm:$0xff]  }
 0x36c   :  { %14674 = vmatpush3.bf16.msra.mxu0 %v15880_v21  ;;  %v15921_v21 = vld [vmem:[%s19675_s4 + $0x1a20] sm:$0xff]  }
 0x36d   :  { %14675 = vmatprep.subr.bf16.mxu0 %v15882_v23  ;;  %14696 = vmatpush3.bf16.msra.mxu1 %v15881_v22  ;;  %v15922_v22 = vld [vmem:[%s19675_s4 + $0x1aa0] sm:$0xff]   ;;  %v15923_v23 = vld [vmem:[%s19675_s4 + $0x1a68] sm:$0xff]  }
 0x36e   :  { %14697 = vmatprep.subr.bf16.mxu1 %v15883_v24 }
 0x370   :  { %14676 = vmatpush3.bf16.msra.mxu0 %v15884_v25  ;;  %v15924_v25 = vld [vmem:[%s19675_s4 + $0x1ae8] sm:$0xff]  }
 0x371   :  { %14677 = vmatprep.subr.bf16.mxu0 %v15886_v27  ;;  %14698 = vmatpush3.bf16.msra.mxu1 %v15885_v26  ;;  %v15925_v27 = vld [vmem:[%s19675_s4 + $0x1a28] sm:$0xff]  }
 0x372   :  { %14699 = vmatprep.subr.bf16.mxu1 %v15887_v28 }
 0x374   :  { %14678 = vmatpush3.bf16.msra.mxu0 %v15888_v29 }
 0x375   :  { %14679 = vmatprep.subr.bf16.mxu0 %v15890_v31  ;;  %14700 = vmatpush3.bf16.msra.mxu1 %v15889_v30 }
 0x376   :  { %v14377_v32 = vpop.f32.mrb[80].mxu0  ;;  %14701 = vmatprep.subr.bf16.mxu1 %v15891_v33 }
 0x377   :  { %v14378_v34 = vpop.f32.mrb[81].mxu0  ;;  %v14399_v37 = vpop.f32.mrb[80].mxu1 }
 0x378   :  { %v14379_v38 = vadd.f32 %v14378_v34, %v14377_v32  ;;  %v14380_v39 = vpop.f32.mrb[82].mxu0  ;;  %v14400_v42 = vpop.f32.mrb[81].mxu1  ;;  %14680 = vmatpush3.bf16.msra.mxu0 %v15892_v36  ;;  %v15926_v32 = vld [vmem:[%s19675_s4 + $0x1aa8] sm:$0xff]   ;;  %v15927_v34 = vld [vmem:[%s19675_s4 + $0x1a70] sm:$0xff]  }
 0x379   :  { %v14381_v43 = vpop.f32.mrb[83].mxu0  ;;  %v14401_v45 = vadd.f32 %v14400_v42, %v14399_v37  ;;  %v14402_v46 = vpop.f32.mrb[82].mxu1  ;;  %14681 = vmatprep.subr.bf16.mxu0 %v15894_v41  ;;  %14702 = vmatpush3.bf16.msra.mxu1 %v15893_v40  ;;  %v15928_v39 = vld [vmem:[%s19675_s4 + $0x1af0] sm:$0xff]  }
 0x37a   :  { %v11295_v44 = vadd.f32 %v14379_v38, %v18921_v58  ;;  %v14403_v48 = vpop.f32.mrb[83].mxu1  ;;  %14703 = vmatprep.subr.bf16.mxu1 %v15895_v47  ;;  %v1246_v58 = vcombine.high %v782_v55, %v782_v55  ;;  %v15929_v41 = vld [vmem:[%s19675_s4 + $0x1a30] sm:$0xff]   ;;  %v15931_v43 = vld [vmem:[%s19675_s4 + $0x1a78] sm:$0xff]  }
 0x37b   :  { %v15933_v46 = vld [vmem:[%s19675_s4 + $0x1a38] sm:$0xff]   ;;  %v783_v47 = vld [vmem:[%s19676_s3 + $0xd0] sm:$0xff] }
 0x37c   :  { %v19025_v50 = vadd.f32 %v14401_v45, %v11295_v44  ;;  %14682 = vmatpush3.bf16.msra.mxu0 %v15896_v49  ;;  %v1260_v61 = vrot.slane %v1246_v58, %v16228_v35  ;;  %v15930_v44 = vld [vmem:[%s19675_s4 + $0x1ab0] sm:$0xff]   ;;  %v15932_v45 = vld [vmem:[%s19675_s4 + $0x1af8] sm:$0xff]   ;;  %v1270_v48 = vrot.slane %v783_v47, %v16228_v35  ;;  %v1263_v49 = vcombine.high %v783_v47, %v783_v47 }
 0x37d   :  { %14683 = vmatprep.subr.bf16.mxu0 %v15898_v52  ;;  %14704 = vmatpush3.bf16.msra.mxu1 %v15897_v51  ;;  %v15934_v51 = vld [vmem:[%s19675_s4 + $0x1ab8] sm:$0xff]  }
 0x37e   :  { %14705 = vmatprep.subr.bf16.mxu1 %v15899_v53  ;;  %v1262_v2 = vcombine.high %v1260_v61, %v1260_v61  ;;  %v1595_v4 = vpack.c.bf16 %v1260_v61, %v1260_v61  ;;  %v1278_v52 = vcombine.high %v1270_v48, %v1270_v48  ;;  %v1277_v53 = vrot.slane %v1263_v49, %v16228_v35  ;;  %v15940_v61 = vld [vmem:[%s19675_s4 + $0x1b48] sm:$0xff]  }
 0x37f   :  { %v1597_v55 = vpack.c.bf16 %v1270_v48, %v1270_v48  ;;  %v15971_v48 = vld [vmem:[%s19675_s4 + $0x1c00] sm:$0xff]  }
 0x380   :  { %14684 = vmatpush3.bf16.msra.mxu0 %v15900_v54  ;;  %v1596_v6 = vpack.c.bf16 %v1262_v2, %v1262_v2  ;;  %v15937_v54 = vld [vmem:[%s19675_s4 + $0x1bc0] sm:$0xff]   ;;  %v1598_v57 = vpack.c.bf16 %v1278_v52, %v1278_v52  ;;  %v1279_v58 = vcombine.high %v1277_v53, %v1277_v53  ;;  %v1599_v60 = vpack.c.bf16 %v1277_v53, %v1277_v53  ;;  %v15944_v2 = vld [vmem:[%s19675_s4 + $0x1b50] sm:$0xff]   ;;  %v15973_v53 = vld [vmem:[%s19675_s4 + $0x1c48] sm:$0xff]  }
 0x381   :  { %14713 = vmatprep.subr.bf16.mxu0 %v15903_v59  ;;  %14706 = vmatpush3.bf16.msra.mxu1 %v15901_v56  ;;  %v15938_v56 = vld [vmem:[%s19675_s4 + $0x1b00] sm:$0xff]  }
 0x382   :  { %14735 = vmatprep.subr.bf16.mxu1 %v15904_v62  ;;  %11892 = vmatprep.mubr.bf16.mxu1 %v1596_v6  ;;  %v15939_v59 = vld [vmem:[%s19675_s4 + $0x1b80] sm:$0xff]   ;;  %v1600_v62 = vpack.c.bf16 %v1279_v58, %v1279_v58  ;;  %v15948_v6 = vld [vmem:[%s19675_s4 + $0x1b58] sm:$0xff]   ;;  %v15977_v58 = vld [vmem:[%s19675_s4 + $0x1c50] sm:$0xff]  }
 0x383   :  { %11853 = vmatmul.mubr.bf16.vlgmr.msra.gmra.mrb[108].mxu0 %v1593_v63  ;;  %v15941_v63 = vld [vmem:[%s19675_s4 + $0x1bc8] sm:$0xff]  }
 0x384   :  { %14714 = vmatpush3.bf16.msra.mxu0 %v15905_v0  ;;  %11893 = vmatmul.mubr.bf16.vlgmr.msra.gmra.mrb[108].mxu1 %v1595_v4  ;;  %v15942_v0 = vld [vmem:[%s19675_s4 + $0x1b08] sm:$0xff]   ;;  %v15946_v4 = vld [vmem:[%s19675_s4 + $0x1b10] sm:$0xff]  }
 0x385   :  { %14715 = vmatprep.subr.bf16.mxu0 %v15907_v5  ;;  %14736 = vmatpush3.bf16.msra.mxu1 %v15906_v3  ;;  %v15945_v3 = vld [vmem:[%s19675_s4 + $0x1bd0] sm:$0xff]  }
 0x386   :  { %14737 = vmatprep.subr.bf16.mxu1 %v15908_v7  ;;  %11932 = vmatprep.mubr.bf16.mxu0 %v1598_v57  ;;  %v15947_v5 = vld [vmem:[%s19675_s4 + $0x1b90] sm:$0xff]   ;;  %v15949_v7 = vld [vmem:[%s19675_s4 + $0x1bd8] sm:$0xff]   ;;  %v15976_v57 = vld [vmem:[%s19675_s4 + $0x1c88] sm:$0xff]  }
 0x387   :  { %11972 = vmatprep.mubr.bf16.mxu1 %v1600_v62  ;;  %v15981_v62 = vld [vmem:[%s19675_s4 + $0x1c58] sm:$0xff]  }
 0x388   :  { %14716 = vmatpush3.bf16.msra.mxu0 %v15909_v8  ;;  %v15950_v8 = vld [vmem:[%s19675_s4 + $0x1b18] sm:$0xff]  }
 0x389   :  { %14717 = vmatprep.subr.bf16.mxu0 %v15911_v10  ;;  %14738 = vmatpush3.bf16.msra.mxu1 %v15910_v9  ;;  %v15951_v9 = vld [vmem:[%s19675_s4 + $0x1b98] sm:$0xff]   ;;  %v15952_v10 = vld [vmem:[%s19675_s4 + $0x1b60] sm:$0xff]  }
 0x38a   :  { %14739 = vmatprep.subr.bf16.mxu1 %v15912_v11  ;;  %v15953_v11 = vld [vmem:[%s19675_s4 + $0x1be0] sm:$0xff]  }
 0x38c   :  { %14718 = vmatpush3.bf16.msra.mxu0 %v15913_v12  ;;  %v15954_v12 = vld [vmem:[%s19675_s4 + $0x1b20] sm:$0xff]  }
 0x38d   :  { %14719 = vmatprep.subr.bf16.mxu0 %v15915_v14  ;;  %14740 = vmatpush3.bf16.msra.mxu1 %v15914_v13  ;;  %v15955_v13 = vld [vmem:[%s19675_s4 + $0x1ba0] sm:$0xff]   ;;  %v15956_v14 = vld [vmem:[%s19675_s4 + $0x1b68] sm:$0xff]  }
 0x38e   :  { %14741 = vmatprep.subr.bf16.mxu1 %v15916_v16 }
 0x390   :  { %14720 = vmatpush3.bf16.msra.mxu0 %v15917_v17  ;;  %v15957_v17 = vld [vmem:[%s19675_s4 + $0x1be8] sm:$0xff]  }
 0x391   :  { %14721 = vmatprep.subr.bf16.mxu0 %v15919_v19  ;;  %14742 = vmatpush3.bf16.msra.mxu1 %v15918_v18  ;;  %v15958_v19 = vld [vmem:[%s19675_s4 + $0x1b28] sm:$0xff]  }
 0x392   :  { %14743 = vmatprep.subr.bf16.mxu1 %v15920_v20 }
 0x394   :  { %14722 = vmatpush3.bf16.msra.mxu0 %v15921_v21 }
 0x395   :  { %14723 = vmatprep.subr.bf16.mxu0 %v15923_v23  ;;  %14744 = vmatpush3.bf16.msra.mxu1 %v15922_v22  ;;  %v15959_v23 = vld [vmem:[%s19675_s4 + $0x1ba8] sm:$0xff]  }
 0x396   :  { %v14421_v24 = vpop.f32.mrb[84].mxu0  ;;  %14745 = vmatprep.subr.bf16.mxu1 %v15924_v25 }
 0x397   :  { %v14422_v26 = vpop.f32.mrb[85].mxu0  ;;  %v14443_v28 = vpop.f32.mrb[84].mxu1 }
 0x398   :  { %v14423_v29 = vadd.f32 %v14422_v26, %v14421_v24  ;;  %v14424_v30 = vpop.f32.mrb[86].mxu0  ;;  %v14444_v31 = vpop.f32.mrb[85].mxu1  ;;  %14724 = vmatpush3.bf16.msra.mxu0 %v15925_v27  ;;  %v15960_v24 = vld [vmem:[%s19675_s4 + $0x1b70] sm:$0xff]  }
 0x399   :  { %v14425_v33 = vpop.f32.mrb[87].mxu0  ;;  %v14445_v37 = vadd.f32 %v14444_v31, %v14443_v28  ;;  %v14446_v38 = vpop.f32.mrb[86].mxu1  ;;  %14725 = vmatprep.subr.bf16.mxu0 %v15927_v34  ;;  %14746 = vmatpush3.bf16.msra.mxu1 %v15926_v32  ;;  %v15961_v30 = vld [vmem:[%s19675_s4 + $0x1bf0] sm:$0xff]  }
 0x39a   :  { %v11375_v36 = vadd.f32 %v14423_v29, %v19025_v50  ;;  %v14447_v40 = vpop.f32.mrb[87].mxu1  ;;  %14747 = vmatprep.subr.bf16.mxu1 %v15928_v39  ;;  %v15936_v50 = vld [vmem:[%s19675_s4 + $0x1b40] sm:$0xff]   ;;  %v15962_v32 = vld [vmem:[%s19675_s4 + $0x1b30] sm:$0xff]   ;;  %v15966_v38 = vld [vmem:[%s19675_s4 + $0x1b38] sm:$0xff]  }
 0x39b   :  { %v15963_v34 = vld [vmem:[%s19675_s4 + $0x1bb0] sm:$0xff]   ;;  %v784_v39 = vld [vmem:[%s19676_s3 + $0xd8] sm:$0xff] }
 0x39c   :  { %v19129_v42 = vadd.f32 %v14445_v37, %v11375_v36  ;;  %14726 = vmatpush3.bf16.msra.mxu0 %v15929_v41  ;;  %v15964_v36 = vld [vmem:[%s19675_s4 + $0x1b78] sm:$0xff]   ;;  %v1287_v40 = vrot.slane %v784_v39, %v16228_v35  ;;  %v1280_v41 = vcombine.high %v784_v39, %v784_v39 }
 0x39d   :  { %14727 = vmatprep.subr.bf16.mxu0 %v15931_v43  ;;  %14748 = vmatpush3.bf16.msra.mxu1 %v15930_v44  ;;  %v15965_v37 = vld [vmem:[%s19675_s4 + $0x1bf8] sm:$0xff]  }
 0x39e   :  { %14749 = vmatprep.subr.bf16.mxu1 %v15932_v45  ;;  %v15967_v43 = vld [vmem:[%s19675_s4 + $0x1bb8] sm:$0xff]   ;;  %v1295_v44 = vcombine.high %v1287_v40, %v1287_v40  ;;  %v1294_v45 = vrot.slane %v1280_v41, %v16228_v35  ;;  %v1601_v47 = vpack.c.bf16 %v1287_v40, %v1287_v40  ;;  %v16004_v40 = vld [vmem:[%s19675_s4 + $0x1d00] sm:$0xff]  }
 0x3a0   :  { %14728 = vmatpush3.bf16.msra.mxu0 %v15933_v46  ;;  %v15970_v46 = vld [vmem:[%s19675_s4 + $0x1cc0] sm:$0xff]   ;;  %v1602_v49 = vpack.c.bf16 %v1295_v44, %v1295_v44  ;;  %v1603_v52 = vpack.c.bf16 %v1294_v45, %v1294_v45 }
 0x3a1   :  { %14757 = vmatprep.subr.bf16.mxu0 %v15936_v50  ;;  %14750 = vmatpush3.bf16.msra.mxu1 %v15934_v51  ;;  %v1296_v50 = vcombine.high %v1294_v45, %v1294_v45  ;;  %v15972_v51 = vld [vmem:[%s19675_s4 + $0x1c80] sm:$0xff]   ;;  %v16006_v45 = vld [vmem:[%s19675_s4 + $0x1d48] sm:$0xff]  }
 0x3a2   :  { %14779 = vmatprep.subr.bf16.mxu1 %v15937_v54 }
 0x3a3   :  { %11933 = vmatmul.mubr.bf16.vlgmr.msra.gmra.mrb[112].mxu0 %v1597_v55  ;;  %v1604_v54 = vpack.c.bf16 %v1296_v50, %v1296_v50  ;;  %v15974_v55 = vld [vmem:[%s19675_s4 + $0x1cc8] sm:$0xff]   ;;  %v16010_v50 = vld [vmem:[%s19675_s4 + $0x1d50] sm:$0xff]  }
 0x3a4   :  { %14758 = vmatpush3.bf16.msra.mxu0 %v15938_v56  ;;  %11973 = vmatmul.mubr.bf16.vlgmr.msra.gmra.mrb[112].mxu1 %v1599_v60  ;;  %v15975_v56 = vld [vmem:[%s19675_s4 + $0x1c08] sm:$0xff]   ;;  %v15979_v60 = vld [vmem:[%s19675_s4 + $0x1c10] sm:$0xff]  }
 0x3a5   :  { %14759 = vmatprep.subr.bf16.mxu0 %v15940_v61  ;;  %14780 = vmatpush3.bf16.msra.mxu1 %v15939_v59  ;;  %v15978_v59 = vld [vmem:[%s19675_s4 + $0x1cd0] sm:$0xff]  }
 0x3a6   :  { %14781 = vmatprep.subr.bf16.mxu1 %v15941_v63  ;;  %12012 = vmatprep.mubr.bf16.mxu0 %v1602_v49  ;;  %v15980_v61 = vld [vmem:[%s19675_s4 + $0x1c90] sm:$0xff]   ;;  %v15982_v63 = vld [vmem:[%s19675_s4 + $0x1cd8] sm:$0xff]   ;;  %v16009_v49 = vld [vmem:[%s19675_s4 + $0x1d88] sm:$0xff]  }
 0x3a7   :  { %12052 = vmatprep.mubr.bf16.mxu1 %v1604_v54  ;;  %v16014_v54 = vld [vmem:[%s19675_s4 + $0x1d58] sm:$0xff]  }
 0x3a8   :  { %14760 = vmatpush3.bf16.msra.mxu0 %v15942_v0  ;;  %v15983_v0 = vld [vmem:[%s19675_s4 + $0x1c18] sm:$0xff]  }
 0x3a9   :  { %14761 = vmatprep.subr.bf16.mxu0 %v15944_v2  ;;  %14782 = vmatpush3.bf16.msra.mxu1 %v15943_v1  ;;  %v15984_v1 = vld [vmem:[%s19675_s4 + $0x1c98] sm:$0xff]   ;;  %v15985_v2 = vld [vmem:[%s19675_s4 + $0x1c60] sm:$0xff]  }
 0x3aa   :  { %14783 = vmatprep.subr.bf16.mxu1 %v15945_v3  ;;  %v15986_v3 = vld [vmem:[%s19675_s4 + $0x1ce0] sm:$0xff]  }
 0x3ac   :  { %14762 = vmatpush3.bf16.msra.mxu0 %v15946_v4  ;;  %v15987_v4 = vld [vmem:[%s19675_s4 + $0x1c20] sm:$0xff]  }
 0x3ad   :  { %14763 = vmatprep.subr.bf16.mxu0 %v15948_v6  ;;  %14784 = vmatpush3.bf16.msra.mxu1 %v15947_v5  ;;  %v15988_v5 = vld [vmem:[%s19675_s4 + $0x1ca0] sm:$0xff]   ;;  %v15989_v6 = vld [vmem:[%s19675_s4 + $0x1c68] sm:$0xff]  }
 0x3ae   :  { %14785 = vmatprep.subr.bf16.mxu1 %v15949_v7 }
 0x3b0   :  { %14764 = vmatpush3.bf16.msra.mxu0 %v15950_v8  ;;  %v15990_v8 = vld [vmem:[%s19675_s4 + $0x1ce8] sm:$0xff]  }
 0x3b1   :  { %14765 = vmatprep.subr.bf16.mxu0 %v15952_v10  ;;  %14786 = vmatpush3.bf16.msra.mxu1 %v15951_v9  ;;  %v15991_v10 = vld [vmem:[%s19675_s4 + $0x1c28] sm:$0xff]  }
 0x3b2   :  { %14787 = vmatprep.subr.bf16.mxu1 %v15953_v11 }
 0x3b4   :  { %14766 = vmatpush3.bf16.msra.mxu0 %v15954_v12 }
 0x3b5   :  { %14767 = vmatprep.subr.bf16.mxu0 %v15956_v14  ;;  %14788 = vmatpush3.bf16.msra.mxu1 %v15955_v13  ;;  %v15992_v14 = vld [vmem:[%s19675_s4 + $0x1ca8] sm:$0xff]  }
 0x3b6   :  { %v14465_v16 = vpop.f32.mrb[88].mxu0  ;;  %14789 = vmatprep.subr.bf16.mxu1 %v15957_v17 }
 0x3b7   :  { %v14466_v18 = vpop.f32.mrb[89].mxu0  ;;  %v14487_v20 = vpop.f32.mrb[88].mxu1 }
 0x3b8   :  { %v14467_v21 = vadd.f32 %v14466_v18, %v14465_v16  ;;  %v14468_v22 = vpop.f32.mrb[90].mxu0  ;;  %v14488_v25 = vpop.f32.mrb[89].mxu1  ;;  %14768 = vmatpush3.bf16.msra.mxu0 %v15958_v19  ;;  %v15993_v16 = vld [vmem:[%s19675_s4 + $0x1c70] sm:$0xff]  }
 0x3b9   :  { %v14469_v26 = vpop.f32.mrb[91].mxu0  ;;  %v14489_v28 = vadd.f32 %v14488_v25, %v14487_v20  ;;  %v14490_v29 = vpop.f32.mrb[90].mxu1  ;;  %14769 = vmatprep.subr.bf16.mxu0 %v15960_v24  ;;  %14790 = vmatpush3.bf16.msra.mxu1 %v15959_v23  ;;  %v15994_v22 = vld [vmem:[%s19675_s4 + $0x1cf0] sm:$0xff]  }
 0x3ba   :  { %v11455_v27 = vadd.f32 %v14467_v21, %v19129_v42  ;;  %v14491_v31 = vpop.f32.mrb[91].mxu1  ;;  %14791 = vmatprep.subr.bf16.mxu1 %v15961_v30  ;;  %v15969_v42 = vld [vmem:[%s19675_s4 + $0x1c40] sm:$0xff]   ;;  %v15995_v24 = vld [vmem:[%s19675_s4 + $0x1c30] sm:$0xff]   ;;  %v15999_v29 = vld [vmem:[%s19675_s4 + $0x1c38] sm:$0xff]  }
 0x3bb   :  { %v15996_v26 = vld [vmem:[%s19675_s4 + $0x1cb0] sm:$0xff]   ;;  %v785_v30 = vld [vmem:[%s19676_s3 + $0xe0] sm:$0xff]  ;;  %v16000_v31 = vld [vmem:[%s19675_s4 + $0x1cb8] sm:$0xff]  }
 0x3bc   :  { %v19233_v33 = vadd.f32 %v14489_v28, %v11455_v27  ;;  %14770 = vmatpush3.bf16.msra.mxu0 %v15962_v32  ;;  %v15997_v27 = vld [vmem:[%s19675_s4 + $0x1c78] sm:$0xff]   ;;  %v1304_v32 = vrot.slane %v785_v30, %v16228_v35 }
 0x3bd   :  { %14771 = vmatprep.subr.bf16.mxu0 %v15964_v36  ;;  %14792 = vmatpush3.bf16.msra.mxu1 %v15963_v34  ;;  %v15998_v28 = vld [vmem:[%s19675_s4 + $0x1cf8] sm:$0xff]   ;;  %v16002_v34 = vld [vmem:[%s19675_s4 + $0x1d40] sm:$0xff]  }
 0x3be   :  { %14793 = vmatprep.subr.bf16.mxu1 %v15965_v37  ;;  %v1312_v36 = vcombine.high %v1304_v32, %v1304_v32  ;;  %v1605_v39 = vpack.c.bf16 %v1304_v32, %v1304_v32 }
 0x3c0   :  { %14772 = vmatpush3.bf16.msra.mxu0 %v15966_v38  ;;  %v16003_v38 = vld [vmem:[%s19675_s4 + $0x1dc0] sm:$0xff]   ;;  %v1606_v41 = vpack.c.bf16 %v1312_v36, %v1312_v36 }
 0x3c1   :  { %14801 = vmatprep.subr.bf16.mxu0 %v15969_v42  ;;  %14794 = vmatpush3.bf16.msra.mxu1 %v15967_v43  ;;  %v16005_v43 = vld [vmem:[%s19675_s4 + $0x1d80] sm:$0xff]  }
 0x3c2   :  { %14823 = vmatprep.subr.bf16.mxu1 %v15970_v46 }
 0x3c3   :  { %12013 = vmatmul.mubr.bf16.vlgmr.msra.gmra.mrb[116].mxu0 %v1601_v47  ;;  %v16007_v47 = vld [vmem:[%s19675_s4 + $0x1dc8] sm:$0xff]  }
 0x3c4   :  { %14802 = vmatpush3.bf16.msra.mxu0 %v15971_v48  ;;  %12053 = vmatmul.mubr.bf16.vlgmr.msra.gmra.mrb[116].mxu1 %v1603_v52  ;;  %v16008_v48 = vld [vmem:[%s19675_s4 + $0x1d08] sm:$0xff]   ;;  %v16012_v52 = vld [vmem:[%s19675_s4 + $0x1d10] sm:$0xff]  }
 0x3c5   :  { %14803 = vmatprep.subr.bf16.mxu0 %v15973_v53  ;;  %14824 = vmatpush3.bf16.msra.mxu1 %v15972_v51  ;;  %v16011_v51 = vld [vmem:[%s19675_s4 + $0x1dd0] sm:$0xff]  }
 0x3c6   :  { %14825 = vmatprep.subr.bf16.mxu1 %v15974_v55  ;;  %12092 = vmatprep.mubr.bf16.mxu0 %v1606_v41  ;;  %v16013_v53 = vld [vmem:[%s19675_s4 + $0x1d90] sm:$0xff]   ;;  %v16015_v55 = vld [vmem:[%s19675_s4 + $0x1dd8] sm:$0xff]   ;;  %v16042_v41 = vld [vmem:[%s19675_s4 + $0x1e88] sm:$0xff]  }
 0x3c8   :  { %14804 = vmatpush3.bf16.msra.mxu0 %v15975_v56  ;;  %v16016_v56 = vld [vmem:[%s19675_s4 + $0x1d18] sm:$0xff]  }
 0x3c9   :  { %14805 = vmatprep.subr.bf16.mxu0 %v15977_v58  ;;  %14826 = vmatpush3.bf16.msra.mxu1 %v15976_v57  ;;  %v16017_v57 = vld [vmem:[%s19675_s4 + $0x1d98] sm:$0xff]   ;;  %v16018_v58 = vld [vmem:[%s19675_s4 + $0x1d60] sm:$0xff]  }
 0x3ca   :  { %14827 = vmatprep.subr.bf16.mxu1 %v15978_v59  ;;  %v16019_v59 = vld [vmem:[%s19675_s4 + $0x1de0] sm:$0xff]  }
 0x3cc   :  { %14806 = vmatpush3.bf16.msra.mxu0 %v15979_v60  ;;  %v16020_v60 = vld [vmem:[%s19675_s4 + $0x1d20] sm:$0xff]  }
 0x3cd   :  { %14807 = vmatprep.subr.bf16.mxu0 %v15981_v62  ;;  %14828 = vmatpush3.bf16.msra.mxu1 %v15980_v61  ;;  %v16021_v61 = vld [vmem:[%s19675_s4 + $0x1da0] sm:$0xff]   ;;  %v16022_v62 = vld [vmem:[%s19675_s4 + $0x1d68] sm:$0xff]  }
 0x3ce   :  { %14829 = vmatprep.subr.bf16.mxu1 %v15982_v63 }
 0x3d0   :  { %14808 = vmatpush3.bf16.msra.mxu0 %v15983_v0  ;;  %v16023_v0 = vld [vmem:[%s19675_s4 + $0x1de8] sm:$0xff]  }
 0x3d1   :  { %14809 = vmatprep.subr.bf16.mxu0 %v15985_v2  ;;  %14830 = vmatpush3.bf16.msra.mxu1 %v15984_v1  ;;  %v16024_v2 = vld [vmem:[%s19675_s4 + $0x1d28] sm:$0xff]  }
 0x3d2   :  { %14831 = vmatprep.subr.bf16.mxu1 %v15986_v3 }
 0x3d4   :  { %14810 = vmatpush3.bf16.msra.mxu0 %v15987_v4 }
 0x3d5   :  { %14811 = vmatprep.subr.bf16.mxu0 %v15989_v6  ;;  %14832 = vmatpush3.bf16.msra.mxu1 %v15988_v5 }
 0x3d6   :  { %v14509_v7 = vpop.f32.mrb[92].mxu0  ;;  %14833 = vmatprep.subr.bf16.mxu1 %v15990_v8 }
 0x3d7   :  { %v14510_v9 = vpop.f32.mrb[93].mxu0  ;;  %v14531_v11 = vpop.f32.mrb[92].mxu1 }
 0x3d8   :  { %v14511_v12 = vadd.f32 %v14510_v9, %v14509_v7  ;;  %v14512_v13 = vpop.f32.mrb[94].mxu0  ;;  %v14532_v17 = vpop.f32.mrb[93].mxu1  ;;  %14812 = vmatpush3.bf16.msra.mxu0 %v15991_v10  ;;  %v16025_v7 = vld [vmem:[%s19675_s4 + $0x1da8] sm:$0xff]   ;;  %v16026_v9 = vld [vmem:[%s19675_s4 + $0x1d70] sm:$0xff]  }
 0x3d9   :  { %v14513_v18 = vpop.f32.mrb[95].mxu0  ;;  %v14533_v20 = vadd.f32 %v14532_v17, %v14531_v11  ;;  %v14534_v21 = vpop.f32.mrb[94].mxu1  ;;  %14813 = vmatprep.subr.bf16.mxu0 %v15993_v16  ;;  %14834 = vmatpush3.bf16.msra.mxu1 %v15992_v14  ;;  %v16027_v13 = vld [vmem:[%s19675_s4 + $0x1df0] sm:$0xff]  }
 0x3da   :  { %v11535_v19 = vadd.f32 %v14511_v12, %v19233_v33  ;;  %v14535_v23 = vpop.f32.mrb[95].mxu1  ;;  %14835 = vmatprep.subr.bf16.mxu1 %v15994_v22  ;;  %v1297_v33 = vcombine.high %v785_v30, %v785_v30  ;;  %v16028_v16 = vld [vmem:[%s19675_s4 + $0x1d30] sm:$0xff]   ;;  %v16030_v18 = vld [vmem:[%s19675_s4 + $0x1d78] sm:$0xff]   ;;  %v786_v22 = vld [vmem:[%s19676_s3 + $0xe8] sm:$0xff] }
 0x3db   :  { %v16032_v21 = vld [vmem:[%s19675_s4 + $0x1d38] sm:$0xff]   ;;  %v1321_v23 = vrot.slane %v786_v22, %v16228_v35 }
 0x3dc   :  { %v19337_v25 = vadd.f32 %v14533_v20, %v11535_v19  ;;  %14814 = vmatpush3.bf16.msra.mxu0 %v15995_v24  ;;  %v1311_v37 = vrot.slane %v1297_v33, %v16228_v35  ;;  %v16029_v19 = vld [vmem:[%s19675_s4 + $0x1db0] sm:$0xff]   ;;  %v16031_v20 = vld [vmem:[%s19675_s4 + $0x1df8] sm:$0xff]   ;;  %v1314_v24 = vcombine.high %v786_v22, %v786_v22 }
 0x3dd   :  { %14815 = vmatprep.subr.bf16.mxu0 %v15997_v27  ;;  %14836 = vmatpush3.bf16.msra.mxu1 %v15996_v26  ;;  %v16033_v26 = vld [vmem:[%s19675_s4 + $0x1db8] sm:$0xff]   ;;  %v1329_v27 = vcombine.high %v1321_v23, %v1321_v23  ;;  %v1609_v30 = vpack.c.bf16 %v1321_v23, %v1321_v23 }
 0x3de   :  { %14837 = vmatprep.subr.bf16.mxu1 %v15998_v28  ;;  %v1313_v42 = vcombine.high %v1311_v37, %v1311_v37  ;;  %v1607_v44 = vpack.c.bf16 %v1311_v37, %v1311_v37  ;;  %v1328_v28 = vrot.slane %v1314_v24, %v16228_v35  ;;  %v16039_v37 = vld [vmem:[%s19675_s4 + $0x1e48] sm:$0xff]  }
 0x3df   :  { %v1610_v32 = vpack.c.bf16 %v1329_v27, %v1329_v27  ;;  %v16072_v27 = vld [vmem:[%s19675_s4 + $0x1f48] sm:$0xff]  }
 0x3e0   :  { %14816 = vmatpush3.bf16.msra.mxu0 %v15999_v29  ;;  %v1608_v46 = vpack.c.bf16 %v1313_v42, %v1313_v42  ;;  %v16036_v29 = vld [vmem:[%s19675_s4 + $0x1ec0] sm:$0xff]   ;;  %v1330_v33 = vcombine.high %v1328_v28, %v1328_v28  ;;  %v1611_v36 = vpack.c.bf16 %v1328_v28, %v1328_v28  ;;  %v16043_v42 = vld [vmem:[%s19675_s4 + $0x1e50] sm:$0xff]  }
 0x3e1   :  { %14845 = vmatprep.subr.bf16.mxu0 %v16002_v34  ;;  %14838 = vmatpush3.bf16.msra.mxu1 %v16000_v31  ;;  %v16037_v31 = vld [vmem:[%s19675_s4 + $0x1e00] sm:$0xff]  }
 0x3e2   :  { %14867 = vmatprep.subr.bf16.mxu1 %v16003_v38  ;;  %12132 = vmatprep.mubr.bf16.mxu1 %v1608_v46  ;;  %v16038_v34 = vld [vmem:[%s19675_s4 + $0x1e80] sm:$0xff]   ;;  %v1612_v38 = vpack.c.bf16 %v1330_v33, %v1330_v33  ;;  %v16047_v46 = vld [vmem:[%s19675_s4 + $0x1e58] sm:$0xff]   ;;  %v16075_v33 = vld [vmem:[%s19675_s4 + $0x1f88] sm:$0xff]  }
 0x3e3   :  { %12093 = vmatmul.mubr.bf16.vlgmr.msra.gmra.mrb[120].mxu0 %v1605_v39  ;;  %v16040_v39 = vld [vmem:[%s19675_s4 + $0x1ec8] sm:$0xff]  }
 0x3e4   :  { %14846 = vmatpush3.bf16.msra.mxu0 %v16004_v40  ;;  %12133 = vmatmul.mubr.bf16.vlgmr.msra.gmra.mrb[120].mxu1 %v1607_v44  ;;  %v16041_v40 = vld [vmem:[%s19675_s4 + $0x1e08] sm:$0xff]   ;;  %v16045_v44 = vld [vmem:[%s19675_s4 + $0x1e10] sm:$0xff]  }
 0x3e5   :  { %14847 = vmatprep.subr.bf16.mxu0 %v16006_v45  ;;  %14868 = vmatpush3.bf16.msra.mxu1 %v16005_v43  ;;  %v16044_v43 = vld [vmem:[%s19675_s4 + $0x1ed0] sm:$0xff]  }
 0x3e6   :  { %14869 = vmatprep.subr.bf16.mxu1 %v16007_v47  ;;  %12172 = vmatprep.mubr.bf16.mxu0 %v1610_v32  ;;  %v16046_v45 = vld [vmem:[%s19675_s4 + $0x1e90] sm:$0xff]   ;;  %v16048_v47 = vld [vmem:[%s19675_s4 + $0x1ed8] sm:$0xff]  }
 0x3e7   :  { %12212 = vmatprep.mubr.bf16.mxu1 %v1612_v38  ;;  %v16076_v32 = vld [vmem:[%s19675_s4 + $0x1f50] sm:$0xff]  }
 0x3e8   :  { %14848 = vmatpush3.bf16.msra.mxu0 %v16008_v48  ;;  %v16049_v48 = vld [vmem:[%s19675_s4 + $0x1e18] sm:$0xff]   ;;  %v16079_v38 = vld [vmem:[%s19675_s4 + $0x1f90] sm:$0xff]  }
 0x3e9   :  { %14849 = vmatprep.subr.bf16.mxu0 %v16010_v50  ;;  %14870 = vmatpush3.bf16.msra.mxu1 %v16009_v49  ;;  %v16050_v49 = vld [vmem:[%s19675_s4 + $0x1e98] sm:$0xff]   ;;  %v16051_v50 = vld [vmem:[%s19675_s4 + $0x1e60] sm:$0xff]  }
 0x3ea   :  { %14871 = vmatprep.subr.bf16.mxu1 %v16011_v51  ;;  %v16052_v51 = vld [vmem:[%s19675_s4 + $0x1ee0] sm:$0xff]  }
 0x3ec   :  { %14850 = vmatpush3.bf16.msra.mxu0 %v16012_v52  ;;  %v16053_v52 = vld [vmem:[%s19675_s4 + $0x1e20] sm:$0xff]  }
 0x3ed   :  { %14851 = vmatprep.subr.bf16.mxu0 %v16014_v54  ;;  %14872 = vmatpush3.bf16.msra.mxu1 %v16013_v53  ;;  %v16054_v53 = vld [vmem:[%s19675_s4 + $0x1ea0] sm:$0xff]   ;;  %v16055_v54 = vld [vmem:[%s19675_s4 + $0x1e68] sm:$0xff]  }
 0x3ee   :  { %14873 = vmatprep.subr.bf16.mxu1 %v16015_v55 }
 0x3f0   :  { %14852 = vmatpush3.bf16.msra.mxu0 %v16016_v56  ;;  %v16056_v56 = vld [vmem:[%s19675_s4 + $0x1ee8] sm:$0xff]  }
 0x3f1   :  { %14853 = vmatprep.subr.bf16.mxu0 %v16018_v58  ;;  %14874 = vmatpush3.bf16.msra.mxu1 %v16017_v57  ;;  %v16057_v58 = vld [vmem:[%s19675_s4 + $0x1e28] sm:$0xff]  }
 0x3f2   :  { %14875 = vmatprep.subr.bf16.mxu1 %v16019_v59 }
 0x3f4   :  { %14854 = vmatpush3.bf16.msra.mxu0 %v16020_v60 }
 0x3f5   :  { %14855 = vmatprep.subr.bf16.mxu0 %v16022_v62  ;;  %14876 = vmatpush3.bf16.msra.mxu1 %v16021_v61  ;;  %v16058_v62 = vld [vmem:[%s19675_s4 + $0x1ea8] sm:$0xff]  }
 0x3f6   :  { %v14553_v63 = vpop.f32.mrb[96].mxu0  ;;  %14877 = vmatprep.subr.bf16.mxu1 %v16023_v0 }
 0x3f7   :  { %v14554_v1 = vpop.f32.mrb[97].mxu0  ;;  %v14575_v3 = vpop.f32.mrb[96].mxu1 }
 0x3f8   :  { %v14555_v4 = vadd.f32 %v14554_v1, %v14553_v63  ;;  %v14556_v5 = vpop.f32.mrb[98].mxu0  ;;  %v14576_v6 = vpop.f32.mrb[97].mxu1  ;;  %14856 = vmatpush3.bf16.msra.mxu0 %v16024_v2  ;;  %v16059_v63 = vld [vmem:[%s19675_s4 + $0x1e70] sm:$0xff]  }
 0x3f9   :  { %v14557_v8 = vpop.f32.mrb[99].mxu0  ;;  %v14577_v11 = vadd.f32 %v14576_v6, %v14575_v3  ;;  %v14578_v12 = vpop.f32.mrb[98].mxu1  ;;  %14857 = vmatprep.subr.bf16.mxu0 %v16026_v9  ;;  %14878 = vmatpush3.bf16.msra.mxu1 %v16025_v7  ;;  %v16060_v5 = vld [vmem:[%s19675_s4 + $0x1ef0] sm:$0xff]  }
 0x3fa   :  { %v11615_v10 = vadd.f32 %v14555_v4, %v19337_v25  ;;  %v14579_v14 = vpop.f32.mrb[99].mxu1  ;;  %14879 = vmatprep.subr.bf16.mxu1 %v16027_v13  ;;  %v16035_v25 = vld [vmem:[%s19675_s4 + $0x1e40] sm:$0xff]   ;;  %v16061_v7 = vld [vmem:[%s19675_s4 + $0x1e30] sm:$0xff]   ;;  %v16065_v12 = vld [vmem:[%s19675_s4 + $0x1e38] sm:$0xff]  }
 0x3fb   :  { %v16062_v9 = vld [vmem:[%s19675_s4 + $0x1eb0] sm:$0xff]  }
 0x3fc   :  { %v19441_v17 = vadd.f32 %v14577_v11, %v11615_v10  ;;  %14858 = vmatpush3.bf16.msra.mxu0 %v16028_v16  ;;  %v16063_v10 = vld [vmem:[%s19675_s4 + $0x1e78] sm:$0xff]   ;;  %v787_v13 = vld [vmem:[%s19676_s3 + $0xf0] sm:$0xff] }
 0x3fd   :  { %14859 = vmatprep.subr.bf16.mxu0 %v16030_v18  ;;  %14880 = vmatpush3.bf16.msra.mxu1 %v16029_v19  ;;  %v16064_v11 = vld [vmem:[%s19675_s4 + $0x1ef8] sm:$0xff]   ;;  %v1338_v14 = vrot.slane %v787_v13, %v16228_v35  ;;  %v1331_v16 = vcombine.high %v787_v13, %v787_v13 }
 0x3fe   :  { %14881 = vmatprep.subr.bf16.mxu1 %v16031_v20  ;;  %v16066_v18 = vld [vmem:[%s19675_s4 + $0x1eb8] sm:$0xff]  }
 0x3ff   :  { %v1346_v19 = vcombine.high %v1338_v14, %v1338_v14  ;;  %v1345_v20 = vrot.slane %v1331_v16, %v16228_v35  ;;  %v1613_v22 = vpack.c.bf16 %v1338_v14, %v1338_v14 }
 0x400   :  { %14860 = vmatpush3.bf16.msra.mxu0 %v16032_v21  ;;  %v16069_v21 = vld [vmem:[%s19675_s4 + $0x1fc0] sm:$0xff]  }
 0x401   :  { %14889 = vmatprep.subr.bf16.mxu0 %v16035_v25  ;;  %14882 = vmatpush3.bf16.msra.mxu1 %v16033_v26  ;;  %v1614_v23 = vpack.c.bf16 %v1346_v19, %v1346_v19  ;;  %v1347_v24 = vcombine.high %v1345_v20, %v1345_v20  ;;  %v16070_v25 = vld [vmem:[%s19675_s4 + $0x1f00] sm:$0xff]   ;;  %v1615_v26 = vpack.c.bf16 %v1345_v20, %v1345_v20 }
 0x402   :  { %14911 = vmatprep.subr.bf16.mxu1 %v16036_v29  ;;  %v16071_v29 = vld [vmem:[%s19675_s4 + $0x1f80] sm:$0xff]  }
 0x403   :  { %12173 = vmatmul.mubr.bf16.vlgmr.msra.gmra.mrb[124].mxu0 %v1609_v30  ;;  %v1616_v28 = vpack.c.bf16 %v1347_v24, %v1347_v24  ;;  %v16073_v30 = vld [vmem:[%s19675_s4 + $0x1fc8] sm:$0xff]  }
 0x404   :  { %14890 = vmatpush3.bf16.msra.mxu0 %v16037_v31  ;;  %12213 = vmatmul.mubr.bf16.vlgmr.msra.gmra.mrb[124].mxu1 %v1611_v36  ;;  %v16074_v31 = vld [vmem:[%s19675_s4 + $0x1f08] sm:$0xff]   ;;  %v16078_v36 = vld [vmem:[%s19675_s4 + $0x1f10] sm:$0xff]  }
 0x405   :  { %14891 = vmatprep.subr.bf16.mxu0 %v16039_v37  ;;  %14912 = vmatpush3.bf16.msra.mxu1 %v16038_v34  ;;  %v16077_v34 = vld [vmem:[%s19675_s4 + $0x1fd0] sm:$0xff]   ;;  %v16080_v37 = vld [vmem:[%s19675_s4 + $0x1f58] sm:$0xff]  }
 0x406   :  { %14913 = vmatprep.subr.bf16.mxu1 %v16040_v39  ;;  %12252 = vmatprep.mubr.bf16.mxu0 %v1614_v23  ;;  %v16081_v39 = vld [vmem:[%s19675_s4 + $0x1fd8] sm:$0xff]  }
 0x407   :  { %12292 = vmatprep.mubr.bf16.mxu1 %v1616_v28 }
 0x408   :  { %14892 = vmatpush3.bf16.msra.mxu0 %v16041_v40  ;;  %v16082_v40 = vld [vmem:[%s19675_s4 + $0x1f18] sm:$0xff]  }
 0x409   :  { %14893 = vmatprep.subr.bf16.mxu0 %v16043_v42  ;;  %14914 = vmatpush3.bf16.msra.mxu1 %v16042_v41  ;;  %v16084_v41 = vld [vmem:[%s19675_s4 + $0x1f60] sm:$0xff]   ;;  %v16083_v42 = vld [vmem:[%s19675_s4 + $0x1f98] sm:$0xff]  }
 0x40a   :  { %14915 = vmatprep.subr.bf16.mxu1 %v16044_v43  ;;  %v16085_v43 = vld [vmem:[%s19675_s4 + $0x1fe0] sm:$0xff]  }
 0x40c   :  { %14894 = vmatpush3.bf16.msra.mxu0 %v16045_v44  ;;  %v16086_v44 = vld [vmem:[%s19675_s4 + $0x1f20] sm:$0xff]  }
 0x40d   :  { %14895 = vmatprep.subr.bf16.mxu0 %v16047_v46  ;;  %14916 = vmatpush3.bf16.msra.mxu1 %v16046_v45  ;;  %v16088_v45 = vld [vmem:[%s19675_s4 + $0x1f68] sm:$0xff]   ;;  %v16087_v46 = vld [vmem:[%s19675_s4 + $0x1fa0] sm:$0xff]  }
 0x40e   :  { %14917 = vmatprep.subr.bf16.mxu1 %v16048_v47 }
 0x410   :  { %14896 = vmatpush3.bf16.msra.mxu0 %v16049_v48 }
 0x411   :  { %14897 = vmatprep.subr.bf16.mxu0 %v16051_v50  ;;  %14918 = vmatpush3.bf16.msra.mxu1 %v16050_v49  ;;  %v16089_v49 = vld [vmem:[%s19675_s4 + $0x1fe8] sm:$0xff]  }
 0x412   :  { %14919 = vmatprep.subr.bf16.mxu1 %v16052_v51 }
 0x414   :  { %14898 = vmatpush3.bf16.msra.mxu0 %v16053_v52 }
 0x415   :  { %14899 = vmatprep.subr.bf16.mxu0 %v16055_v54  ;;  %14920 = vmatpush3.bf16.msra.mxu1 %v16054_v53  ;;  %v16090_v53 = vld [vmem:[%s19675_s4 + $0x1f28] sm:$0xff]   ;;  %v16092_v54 = vld [vmem:[%s19675_s4 + $0x1f70] sm:$0xff]  }
 0x416   :  { %v14597_v55 = vpop.f32.mrb[100].mxu0  ;;  %14921 = vmatprep.subr.bf16.mxu1 %v16056_v56 }
 0x417   :  { %v14598_v57 = vpop.f32.mrb[101].mxu0  ;;  %v14619_v59 = vpop.f32.mrb[100].mxu1 }
 0x418   :  { %v14599_v60 = vadd.f32 %v14598_v57, %v14597_v55  ;;  %v14600_v61 = vpop.f32.mrb[102].mxu0  ;;  %v14620_v0 = vpop.f32.mrb[101].mxu1  ;;  %14900 = vmatpush3.bf16.msra.mxu0 %v16057_v58 }
 0x419   :  { %v14601_v1 = vpop.f32.mrb[103].mxu0  ;;  %v14621_v3 = vadd.f32 %v14620_v0, %v14619_v59  ;;  %v14622_v4 = vpop.f32.mrb[102].mxu1  ;;  %14901 = vmatprep.subr.bf16.mxu0 %v16059_v63  ;;  %14922 = vmatpush3.bf16.msra.mxu1 %v16058_v62  ;;  %v16093_v62 = vld [vmem:[%s19675_s4 + $0x1ff0] sm:$0xff]  }
 0x41a   :  { %v11695_v2 = vadd.f32 %v14599_v60, %v19441_v17  ;;  %v14623_v6 = vpop.f32.mrb[103].mxu1  ;;  %14923 = vmatprep.subr.bf16.mxu1 %v16060_v5  ;;  %v16068_v17 = vld [vmem:[%s19675_s4 + $0x1f40] sm:$0xff]   ;;  %v16091_v60 = vld [vmem:[%s19675_s4 + $0x1fa8] sm:$0xff]   ;;  %v16094_v0 = vld [vmem:[%s19675_s4 + $0x1f30] sm:$0xff]  }
 0x41b   :  { %v16096_v1 = vld [vmem:[%s19675_s4 + $0x1f78] sm:$0xff]  }
 0x41c   :  { %v19545_v8 = vadd.f32 %v14621_v3, %v11695_v2  ;;  %14902 = vmatpush3.bf16.msra.mxu0 %v16061_v7  ;;  %v16095_v2 = vld [vmem:[%s19675_s4 + $0x1fb0] sm:$0xff]   ;;  %v16097_v3 = vld [vmem:[%s19675_s4 + $0x1ff8] sm:$0xff]  }
 0x41d   :  { %14903 = vmatprep.subr.bf16.mxu0 %v16063_v10  ;;  %14924 = vmatpush3.bf16.msra.mxu1 %v16062_v9  ;;  %v788_v4 = vld [vmem:[%s19676_s3 + $0xf8] sm:$0xff]  ;;  %s16102_s3 = smov 64  }
 0x41e   :  { %14925 = vmatprep.subr.bf16.mxu1 %v16064_v11  ;;  %v16098_v5 = vld [vmem:[%s19675_s4 + $0x1f38] sm:$0xff]   ;;  %v1355_v6 = vrot.slane %v788_v4, %v16228_v35  ;;  %v1348_v7 = vcombine.high %v788_v4, %v788_v4 }
 0x420   :  { %14904 = vmatpush3.bf16.msra.mxu0 %v16065_v12  ;;  %v1363_v9 = vcombine.high %v1355_v6, %v1355_v6  ;;  %v1362_v10 = vrot.slane %v1348_v7, %v16228_v35  ;;  %v1617_v11 = vpack.c.bf16 %v1355_v6, %v1355_v6 }
 0x421   :  { %14933 = vmatprep.subr.bf16.mxu0 %v16068_v17  ;;  %14926 = vmatpush3.bf16.msra.mxu1 %v16066_v18 }
 0x422   :  { %14955 = vmatprep.subr.bf16.mxu1 %v16069_v21  ;;  %v1618_v12 = vpack.c.bf16 %v1363_v9, %v1363_v9  ;;  %v1364_v13 = vcombine.high %v1362_v10, %v1362_v10  ;;  %v1619_v14 = vpack.c.bf16 %v1362_v10, %v1362_v10 }
 0x423   :  { %12253 = vmatmul.mubr.bf16.vlgmr.msra.gmra.mrb[128].mxu0 %v1613_v22 }
 0x424   :  { %14934 = vmatpush3.bf16.msra.mxu0 %v16070_v25  ;;  %12293 = vmatmul.mubr.bf16.vlgmr.msra.gmra.mrb[128].mxu1 %v1615_v26  ;;  %v1620_v16 = vpack.c.bf16 %v1364_v13, %v1364_v13 }
 0x425   :  { %14935 = vmatprep.subr.bf16.mxu0 %v16072_v27  ;;  %14956 = vmatpush3.bf16.msra.mxu1 %v16071_v29 }
 0x426   :  { %14957 = vmatprep.subr.bf16.mxu1 %v16073_v30  ;;  %12332 = vmatprep.mubr.bf16.mxu0 %v1618_v12 }
 0x427   :  { %12372 = vmatprep.mubr.bf16.mxu1 %v1620_v16 }
 0x428   :  { %14936 = vmatpush3.bf16.msra.mxu0 %v16074_v31 }
 0x429   :  { %14937 = vmatprep.subr.bf16.mxu0 %v16076_v32  ;;  %14958 = vmatpush3.bf16.msra.mxu1 %v16075_v33 }
 0x42a   :  { %14959 = vmatprep.subr.bf16.mxu1 %v16077_v34 }
 0x42c   :  { %14938 = vmatpush3.bf16.msra.mxu0 %v16078_v36 }
 0x42d   :  { %14939 = vmatprep.subr.bf16.mxu0 %v16080_v37  ;;  %14960 = vmatpush3.bf16.msra.mxu1 %v16079_v38 }
 0x42e   :  { %14961 = vmatprep.subr.bf16.mxu1 %v16081_v39 }
 0x430   :  { %14940 = vmatpush3.bf16.msra.mxu0 %v16082_v40 }
 0x431   :  { %14941 = vmatprep.subr.bf16.mxu0 %v16084_v41  ;;  %14962 = vmatpush3.bf16.msra.mxu1 %v16083_v42 }
 0x432   :  { %14963 = vmatprep.subr.bf16.mxu1 %v16085_v43 }
 0x434   :  { %14942 = vmatpush3.bf16.msra.mxu0 %v16086_v44 }
 0x435   :  { %14943 = vmatprep.subr.bf16.mxu0 %v16088_v45  ;;  %14964 = vmatpush3.bf16.msra.mxu1 %v16087_v46 }
 0x436   :  { %v14641_v47 = vpop.f32.mrb[104].mxu0  ;;  %14965 = vmatprep.subr.bf16.mxu1 %v16089_v49 }
 0x437   :  { %v14642_v48 = vpop.f32.mrb[105].mxu0  ;;  %v14663_v50 = vpop.f32.mrb[104].mxu1 }
 0x438   :  { %v14643_v51 = vadd.f32 %v14642_v48, %v14641_v47  ;;  %v14644_v52 = vpop.f32.mrb[106].mxu0  ;;  %v14664_v55 = vpop.f32.mrb[105].mxu1  ;;  %14944 = vmatpush3.bf16.msra.mxu0 %v16090_v53 }
 0x439   :  { %v14645_v56 = vpop.f32.mrb[107].mxu0  ;;  %v14665_v58 = vadd.f32 %v14664_v55, %v14663_v50  ;;  %v14666_v59 = vpop.f32.mrb[106].mxu1  ;;  %14945 = vmatprep.subr.bf16.mxu0 %v16092_v54  ;;  %14966 = vmatpush3.bf16.msra.mxu1 %v16091_v60 }
 0x43a   :  { %v11775_v57 = vadd.f32 %v14643_v51, %v19545_v8  ;;  %v14667_v61 = vpop.f32.mrb[107].mxu1  ;;  %14967 = vmatprep.subr.bf16.mxu1 %v16093_v62  ;;  %v16099_v8 = vld [vmem:[%s19675_s4 + $0x1fb8] sm:$0xff]  }
 0x43c   :  { %v11815_v63 = vadd.f32 %v14665_v58, %v11775_v57  ;;  %14946 = vmatpush3.bf16.msra.mxu0 %v16094_v0 }
 0x43d   :  { %14947 = vmatprep.subr.bf16.mxu0 %v16096_v1  ;;  %14968 = vmatpush3.bf16.msra.mxu1 %v16095_v2 }
 0x43e   :  { %14969 = vmatprep.subr.bf16.mxu1 %v16097_v3 }
 0x440   :  { %14948 = vmatpush3.bf16.msra.mxu0 %v16098_v5 }
 0x441   :  { %14970 = vmatpush3.bf16.msra.mxu1 %v16099_v8 }
 0x443   :  { %12333 = vmatmul.mubr.bf16.vlgmr.msra.gmra.mrb[132].mxu0 %v1617_v11 }
 0x444   :  { %12373 = vmatmul.mubr.bf16.vlgmr.msra.gmra.mrb[132].mxu1 %v1619_v14 }
 0x456   :  { %v14685_v17 = vpop.f32.mrb[108].mxu0 }
 0x457   :  { %v14686_v18 = vpop.f32.mrb[109].mxu0  ;;  %v14707_v19 = vpop.f32.mrb[108].mxu1 }
 0x458   :  { %v14687_v20 = vadd.f32 %v14686_v18, %v14685_v17  ;;  %v14688_v21 = vpop.f32.mrb[110].mxu0  ;;  %v14708_v22 = vpop.f32.mrb[109].mxu1 }
 0x459   :  { %v14689_v23 = vpop.f32.mrb[111].mxu0  ;;  %v14709_v24 = vadd.f32 %v14708_v22, %v14707_v19  ;;  %v14710_v25 = vpop.f32.mrb[110].mxu1 }
 0x45a   :  { %v11855_v35 = vadd.f32 %v14687_v20, %v11815_v63  ;;  %v14711_v26 = vpop.f32.mrb[111].mxu1 }
 0x45c   :  { %v11895_v27 = vadd.f32 %v14709_v24, %v11855_v35 }
 0x476   :  { %v14729_v28 = vpop.f32.mrb[112].mxu0 }
 0x477   :  { %v14730_v29 = vpop.f32.mrb[113].mxu0  ;;  %v14751_v30 = vpop.f32.mrb[112].mxu1 }
 0x478   :  { %v14731_v31 = vadd.f32 %v14730_v29, %v14729_v28  ;;  %v14732_v32 = vpop.f32.mrb[114].mxu0  ;;  %v14752_v33 = vpop.f32.mrb[113].mxu1 }
 0x479   :  { %v14733_v34 = vpop.f32.mrb[115].mxu0  ;;  %v14753_v37 = vadd.f32 %v14752_v33, %v14751_v30  ;;  %v14754_v38 = vpop.f32.mrb[114].mxu1 }
 0x47a   :  { %v11935_v36 = vadd.f32 %v14731_v31, %v11895_v27  ;;  %v14755_v39 = vpop.f32.mrb[115].mxu1 }
 0x47c   :  { %v11975_v40 = vadd.f32 %v14753_v37, %v11935_v36 }
 0x496   :  { %v14773_v41 = vpop.f32.mrb[116].mxu0 }
 0x497   :  { %v14774_v42 = vpop.f32.mrb[117].mxu0  ;;  %v14795_v43 = vpop.f32.mrb[116].mxu1 }
 0x498   :  { %v14775_v44 = vadd.f32 %v14774_v42, %v14773_v41  ;;  %v14776_v45 = vpop.f32.mrb[118].mxu0  ;;  %v14796_v46 = vpop.f32.mrb[117].mxu1 }
 0x499   :  { %v14777_v47 = vpop.f32.mrb[119].mxu0  ;;  %v14797_v49 = vadd.f32 %v14796_v46, %v14795_v43  ;;  %v14798_v50 = vpop.f32.mrb[118].mxu1 }
 0x49a   :  { %v12015_v48 = vadd.f32 %v14775_v44, %v11975_v40  ;;  %v14799_v51 = vpop.f32.mrb[119].mxu1 }
 0x49c   :  { %v12055_v52 = vadd.f32 %v14797_v49, %v12015_v48 }
 0x4b6   :  { %v14817_v53 = vpop.f32.mrb[120].mxu0 }
 0x4b7   :  { %v14818_v54 = vpop.f32.mrb[121].mxu0  ;;  %v14839_v55 = vpop.f32.mrb[120].mxu1 }
 0x4b8   :  { %v14819_v56 = vadd.f32 %v14818_v54, %v14817_v53  ;;  %v14820_v57 = vpop.f32.mrb[122].mxu0  ;;  %v14840_v58 = vpop.f32.mrb[121].mxu1 }
 0x4b9   :  { %v14821_v59 = vpop.f32.mrb[123].mxu0  ;;  %v14841_v61 = vadd.f32 %v14840_v58, %v14839_v55  ;;  %v14842_v62 = vpop.f32.mrb[122].mxu1 }
 0x4ba   :  { %v12095_v60 = vadd.f32 %v14819_v56, %v12055_v52  ;;  %v14843_v63 = vpop.f32.mrb[123].mxu1 }
 0x4bc   :  { %v12135_v0 = vadd.f32 %v14841_v61, %v12095_v60 }
 0x4d6   :  { %v14861_v1 = vpop.f32.mrb[124].mxu0 }
 0x4d7   :  { %v14862_v2 = vpop.f32.mrb[125].mxu0  ;;  %v14883_v3 = vpop.f32.mrb[124].mxu1 }
 0x4d8   :  { %v14863_v4 = vadd.f32 %v14862_v2, %v14861_v1  ;;  %v14864_v5 = vpop.f32.mrb[126].mxu0  ;;  %v14884_v6 = vpop.f32.mrb[125].mxu1 }
 0x4d9   :  { %v14865_v7 = vpop.f32.mrb[127].mxu0  ;;  %v14885_v9 = vadd.f32 %v14884_v6, %v14883_v3  ;;  %v14886_v10 = vpop.f32.mrb[126].mxu1 }
 0x4da   :  { %v12175_v8 = vadd.f32 %v14863_v4, %v12135_v0  ;;  %v14887_v11 = vpop.f32.mrb[127].mxu1 }
 0x4dc   :  { %v12215_v12 = vadd.f32 %v14885_v9, %v12175_v8 }
 0x4f6   :  { %v14905_v13 = vpop.f32.mrb[128].mxu0 }
 0x4f7   :  { %v14906_v14 = vpop.f32.mrb[129].mxu0  ;;  %v14927_v16 = vpop.f32.mrb[128].mxu1 }
 0x4f8   :  { %v14907_v17 = vadd.f32 %v14906_v14, %v14905_v13  ;;  %v14908_v18 = vpop.f32.mrb[130].mxu0  ;;  %v14928_v19 = vpop.f32.mrb[129].mxu1 }
 0x4f9   :  { %v14909_v20 = vpop.f32.mrb[131].mxu0  ;;  %v14929_v22 = vadd.f32 %v14928_v19, %v14927_v16  ;;  %v14930_v23 = vpop.f32.mrb[130].mxu1 }
 0x4fa   :  { %v12255_v21 = vadd.f32 %v14907_v17, %v12215_v12  ;;  %v14931_v35 = vpop.f32.mrb[131].mxu1 }
 0x4fc   :  { %v12295_v24 = vadd.f32 %v14929_v22, %v12255_v21 }
 0x516   :  { %v14949_v25 = vpop.f32.mrb[132].mxu0 }
 0x517   :  { %v14950_v26 = vpop.f32.mrb[133].mxu0  ;;  %v14971_v27 = vpop.f32.mrb[132].mxu1 }
 0x518   :  { %v14951_v28 = vadd.f32 %v14950_v26, %v14949_v25  ;;  %v14952_v29 = vpop.f32.mrb[134].mxu0  ;;  %v14972_v30 = vpop.f32.mrb[133].mxu1 }
 0x519   :  { %v14953_v31 = vpop.f32.mrb[135].mxu0  ;;  %v14973_v33 = vadd.f32 %v14972_v30, %v14971_v27  ;;  %v14974_v34 = vpop.f32.mrb[134].mxu1 }
 0x51a   :  { %v12335_v32 = vadd.f32 %v14951_v28, %v12295_v24  ;;  %v14975_v36 = vpop.f32.mrb[135].mxu1 }
 0x51c   :  { %v12375_v37 = vadd.f32 %v14973_v33, %v12335_v32 }
 0x51e   :  { %12381 = vrot.lane.b32.xlu0 %v12375_v37, %s16102_s3 }
 0x590   :  { %v12382_v38 = vpop.permute.xlu0 %12381 }
 0x591   :  { %v12385_v39 = vsel %vm12384_vm0, %v17050_v15, %v12382_v38 }
 0x592   :  { %12386 = vst [vmem:[%s19679_s6] sm:$0x3] %v12385_v39 }

</bundles_post_ra>
